<compile_context>
chip_gen: v7x
topology: tpu7x:2x2x1
jax: 0.10.0
libtpu: 0.0.40
codegen_flags: <defaults>
</compile_context>

<pallas_src>
import math
import functools

import jax
import jax.numpy as jnp
from jax import lax
from jax.experimental import pallas as pl
from jax.experimental.pallas import tpu as pltpu

# ----------------------------- model constants -----------------------------
NC = 4                     # number of classes
NO = NC + 5                # outputs per anchor (x,y,w,h,obj,cls...)
ANCHORS = [                # plain python floats -> baked into kernels as constants
    [[10.0, 13.0], [16.0, 30.0], [33.0, 23.0]],
    [[30.0, 61.0], [62.0, 45.0], [59.0, 119.0]],
    [[116.0, 90.0], [156.0, 198.0], [373.0, 326.0]],
]
NA = len(ANCHORS[0])       # anchors per level
NL = len(ANCHORS)          # number of detection levels
STRIDES = [2.0, 4.0, 8.0]  # backbone strides of the three feature maps
BACKBONE_CH = [(3, 8), (8, 16), (16, 32)]

# ----------------------------- conv kernel ----------------------------------

def _conv3x3_s2_silu_kernel(p_ref, w_ref, b_ref, o_ref, *, Ho, Wo, C, Cout):
    """One image.  p_ref: (4, Ho+1, Wo+1, C) parity planes of the zero-padded input.
    3x3 / stride-2 conv == 9 accumulating (P,C) @ (C,Cout) matmuls, then bias + SiLU."""
    P = Ho * Wo
    acc = jnp.zeros((P, Cout), jnp.float32)
    for dy in range(3):
        for dx in range(3):
            plane = (dy % 2) * 2 + (dx % 2)              # which parity plane holds the tap
            ro, co = dy // 2, dx // 2                    # offset inside the plane
            tap = p_ref[plane, ro:ro + Ho, co:co + Wo, :]          # (Ho, Wo, C)
            tap = tap.reshape(P, C).astype(jnp.bfloat16)
            w = w_ref[dy, dx].astype(jnp.bfloat16)                 # (C, Cout)
            acc = acc + jnp.dot(tap, w, preferred_element_type=jnp.float32)
    acc = acc + b_ref[...]                                         # (1, Cout) broadcast
    silu = acc * pl.reciprocal(1.0 + jnp.exp(-acc), approx=True)   # SiLU via EUP recip
    o_ref[0] = silu.astype(o_ref.dtype)


def conv3x3_s2_silu(x_nhwc, w_hwio, b):
    """3x3 conv, stride 2, pad 1, bias + SiLU.  Returns (N, Ho*Wo, Cout)."""
    N, H, W, C = x_nhwc.shape
    Cout = w_hwio.shape[-1]
    Ho, Wo = H // 2, W // 2
    xp = jnp.pad(x_nhwc, ((0, 0), (1, 1), (1, 1), (0, 0)))
    # 4 parity planes of the padded input -> every 3x3/stride-2 tap becomes a
    # contiguous static slice inside the kernel (no strided access, no 9x im2col blob).
    planes = jnp.stack([xp[:, py::2, px::2, :] for py in (0, 1) for px in (0, 1)],
                       axis=1)                                  # (N, 4, Ho+1, Wo+1, C)
    planes = planes.reshape(N * 4, Ho + 1, Wo + 1, C)
    b2 = b.reshape(1, Cout).astype(jnp.float32)
    return pl.pallas_call(
        functools.partial(_conv3x3_s2_silu_kernel, Ho=Ho, Wo=Wo, C=C, Cout=Cout),
        out_shape=jax.ShapeDtypeStruct((N, Ho * Wo, Cout), jnp.float32),
        grid=(N,),
        in_specs=[
            pl.BlockSpec((4, Ho + 1, Wo + 1, C), lambda n: (n, 0, 0, 0)),
            pl.BlockSpec((3, 3, C, Cout), lambda n: (0, 0, 0, 0)),
            pl.BlockSpec((1, Cout), lambda n: (0, 0)),
        ],
        out_specs=pl.BlockSpec((1, Ho * Wo, Cout), lambda n: (n, 0, 0)),
        compiler_params=pltpu.CompilerParams(dimension_semantics=("parallel",)),
    )(planes, w_hwio, b2)

# ----------------------------- fused Detect head ----------------------------

def _detect_head_kernel(*refs, hw, strides, anchors):
    """One image.  All levels & anchors: 1x1 conv (matmul) + sigmoid + box decode.
    Writes x[i] (pre-sigmoid logits) in (1, NA, H*W, NO) and z directly in its final
    concatenated (1, NA*sum(HW), NO) layout."""
    f_refs = refs[0:NL]
    w_refs = refs[NL:2 * NL]
    b_refs = refs[2 * NL:3 * NL]
    t_refs = refs[3 * NL:4 * NL]
    z_ref = refs[4 * NL]
    off = 0
    for l in range(NL):
        H, W = hw[l]
        P = H * W
        stride = strides[l]
        f = f_refs[l][0].astype(jnp.bfloat16)                         # (P, C)
        col = lax.broadcasted_iota(jnp.int32, (P, NO), 1)
        pix = lax.broadcasted_iota(jnp.int32, (P, NO), 0)             # row = y*W + x
        gx = jnp.bitwise_and(pix, W - 1).astype(jnp.float32)          # pix %  W
        gy = jnp.right_shift(pix, int(math.log2(W))).astype(jnp.float32)  # pix // W
        g = jnp.where(col == 0, gx, jnp.where(col == 1, gy, 0.0))
        for a in range(NA):
            w = w_refs[l][a].astype(jnp.bfloat16)                     # (C, NO)
            t = jnp.dot(f, w, preferred_element_type=jnp.float32) + b_refs[l][a]
            y = pl.reciprocal(1.0 + jnp.exp(-t), approx=True)         # sigmoid
            aw, ah = anchors[l][a]                                    # static floats
            amul = jnp.where(col == 2, aw, jnp.where(col == 3, ah, 1.0))
            y2 = y * 2.0
            xy = (y2 - 0.5 + g) * stride
            wh = y2 * y2 * amul
            dec = jnp.where(col < 2, xy, jnp.where(col < 4, wh, y))
            t_refs[l][0, a] = t
            z_ref[0, off + a * P: off + (a + 1) * P] = dec
        off += NA * P


def detect_head(feats, det_w, det_b, hw):
    """feats: list of (N, H*W, C) feature maps.  Returns (z, [t per level])."""
    N = feats[0].shape[0]
    assert all((w & (w - 1)) == 0 for _, w in hw), "W must be a power of two"
    inputs, in_specs = [], []
    for f in feats:                                            # features
        HW, C = f.shape[1], f.shape[2]
        inputs.append(f)
        in_specs.append(pl.BlockSpec((1, HW, C), lambda n: (n, 0, 0)))
    for f, w in zip(feats, det_w):                             # 1x1-conv weights
        C = f.shape[2]
        inputs.append(w.reshape(C, NA, NO).transpose(1, 0, 2))    # (NA, C, NO)
        in_specs.append(pl.BlockSpec((NA, C, NO), lambda n: (0, 0, 0)))
    for b in det_b:                                            # biases
        inputs.append(b.reshape(NA, 1, NO).astype(jnp.float32))
        in_specs.append(pl.BlockSpec((NA, 1, NO), lambda n: (0, 0, 0)))

    p_total = NA * sum(h * w for h, w in hw)
    out_shape = tuple([jax.ShapeDtypeStruct((N, NA, h * w, NO), jnp.float32)
                       for h, w in hw]
                      + [jax.ShapeDtypeStruct((N, p_total, NO), jnp.float32)])
    out_specs = tuple([pl.BlockSpec((1, NA, h * w, NO), lambda n: (n, 0, 0, 0))
                       for h, w in hw]
                      + [pl.BlockSpec((1, p_total, NO), lambda n: (n, 0, 0))])
    outs = pl.pallas_call(
        functools.partial(
            _detect_head_kernel, hw=tuple(hw), strides=tuple(STRIDES),
            anchors=tuple(tuple(tuple(a) for a in lvl) for lvl in ANCHORS)),
        out_shape=out_shape,
        grid=(N,),
        in_specs=in_specs,
        out_specs=out_specs,
        compiler_params=pltpu.CompilerParams(dimension_semantics=("parallel",)),
    )(*inputs)
    return outs[NL], list(outs[:NL])

# ----------------------------- model forward --------------------------------

def model_forward(params, x_nchw):
    """Model.forward(x) in eval mode -> (cat(z, 1), [x_i in (N, na, ny, nx, no)])."""
    x = jnp.transpose(x_nchw, (0, 2, 3, 1))                    # NCHW -> NHWC
    N = x.shape[0]
    feats, hw = [], []
    h = x
    for i in range(len(BACKBONE_CH)):
        Ho, Wo = h.shape[1] // 2, h.shape[2] // 2
        f = conv3x3_s2_silu(h, params[f"bw{i}"], params[f"bb{i}"])   # (N, Ho*Wo, Cout)
        feats.append(f)
        hw.append((Ho, Wo))
        h = f.reshape(N, Ho, Wo, -1)
    z, t_levels = detect_head(feats,
                              [params[f"dw{i}"] for i in range(NL)],
                              [params[f"db{i}"] for i in range(NL)], hw)
    x_out = [t.reshape(N, NA, hh, ww, NO) for t, (hh, ww) in zip(t_levels, hw)]
    return z, x_out

# ----------------------------- params ----------------------------------------

def init_params(key):
    params = {}
    keys = jax.random.split(key, 2 * len(BACKBONE_CH) + 2 * NL)
    k = 0
    for i, (cin, cout) in enumerate(BACKBONE_CH):
        params[f"bw{i}"] = 0.1 * jax.random.normal(keys[k], (3, 3, cin, cout), jnp.float32); k += 1
        params[f"bb{i}"] = 0.01 * jax.random.normal(keys[k], (cout,), jnp.float32); k += 1
    det_ch = [c for _, c in BACKBONE_CH]
    for i, cin in enumerate(det_ch):
        params[f"dw{i}"] = 0.1 * jax.random.normal(keys[k], (cin, NA * NO), jnp.float32); k += 1
        params[f"db{i}"] = 0.01 * jax.random.normal(keys[k], (NA * NO,), jnp.float32); k += 1
    return params

# ----------------------------- pure-JAX reference ----------------------------

def ref_forward(params, x_nchw):
    x = jnp.transpose(x_nchw, (0, 2, 3, 1))
    feats = []
    h = x
    for i in range(len(BACKBONE_CH)):
        y = lax.conv_general_dilated(
            h, params[f"bw{i}"], window_strides=(2, 2), padding=((1, 1), (1, 1)),
            dimension_numbers=("NHWC", "HWIO", "NHWC"),
            precision=lax.Precision.HIGHEST) + params[f"bb{i}"]
        h = y * jax.nn.sigmoid(y)
        feats.append(h)
    z_list, x_out = [], []
    for i, f in enumerate(feats):
        N, H, W, C = f.shape
        t = jnp.dot(f.reshape(-1, C), params[f"dw{i}"],
                    precision=lax.Precision.HIGHEST) + params[f"db{i}"]
        t5 = t.reshape(N, H, W, NA, NO).transpose(0, 3, 1, 2, 4)     # (N,na,H,W,no)
        y = jax.nn.sigmoid(t5)
        yv, xv = jnp.meshgrid(jnp.arange(H), jnp.arange(W), indexing="ij")
        grid = jnp.stack([xv, yv], -1).astype(jnp.float32)           # (H,W,2), [...,0]=x
        anch = jnp.array(ANCHORS[i], jnp.float32).reshape(1, NA, 1, 1, 2)
        xy = (y[..., 0:2] * 2.0 - 0.5 + grid[None, None]) * STRIDES[i]
        wh = (y[..., 2:4] * 2.0) ** 2 * anch
        yd = jnp.concatenate([xy, wh, y[..., 4:]], -1)
        x_out.append(t5)
        z_list.append(yd.reshape(N, -1, NO))
    return jnp.concatenate(z_list, axis=1), x_out

# ----------------------------- main -------------------------------------------

if __name__ == "__main__":
    key = jax.random.PRNGKey(0)
    pkey, xkey = jax.random.split(key)
    params = init_params(pkey)
    x = jax.random.normal(xkey, (2, 3, 32, 32), jnp.float32)   # NCHW like PyTorch

    fwd = jax.jit(model_forward)
    z, x_levels = fwd(params, x)
    jax.block_until_ready(z)
    for xl in x_levels:
        jax.block_until_ready(xl)

    # sanity check against a pure-JAX reference
    z_ref, x_ref = ref_forward(params, x)
    assert z.shape == (2, NA * (16 * 16 + 8 * 8 + 4 * 4), NO), z.shape
    assert jnp.allclose(z, z_ref, rtol=5e-2, atol=5e-2), float(jnp.max(jnp.abs(z - z_ref)))
    for a, b in zip(x_levels, x_ref):
        assert a.shape == b.shape
        assert jnp.allclose(a, b, rtol=5e-2, atol=5e-2)

    print("KERNEL_OK")
</pallas_src>

<mosaic_0001>
module attributes {stable_mosaic.version = 11 : i64} {
  func.func @_conv3x3_s2_silu_kernel(%arg0: i32, %arg1: memref<4x17x17x3xf32, #tpu.memory_space<vmem>>, %arg2: memref<3x3x3x8xf32, #tpu.memory_space<vmem>>, %arg3: memref<1x8xf32, #tpu.memory_space<vmem>>, %arg4: memref<1x256x8xf32, #tpu.memory_space<vmem>>) attributes {dimension_semantics = [#tpu.dimension_semantics<parallel>], iteration_bounds = array<i64: 2>, scalar_prefetch = 0 : i64, scratch_operands = 0 : i64, tpu.core_type = #tpu.core_type<tc>, window_params = [{transform_indices = @transform_0, window_bounds = array<i64: 4, 17, 17, 3>}, {pipeline_mode = #tpu.pipeline_mode<synchronous>, transform_indices = @transform_1, window_bounds = array<i64: 3, 3, 3, 8>}, {pipeline_mode = #tpu.pipeline_mode<synchronous>, transform_indices = @transform_2, window_bounds = array<i64: 1, 8>}, {transform_indices = @transform_3, window_bounds = array<i64: 1, 256, 8>}]} {
    %cst = arith.constant 0.000000e+00 : f32
    %0 = vector.broadcast %cst : f32 to vector<256x8xf32>
    %c0 = arith.constant 0 : index
    %c0_0 = arith.constant 0 : index
    %c0_1 = arith.constant 0 : index
    %c0_2 = arith.constant 0 : index
    %1 = vector.load %arg1[%c0, %c0_0, %c0_1, %c0_2] : memref<4x17x17x3xf32, #tpu.memory_space<vmem>>, vector<1x16x16x3xf32>
    %2 = vector.shape_cast %1 : vector<1x16x16x3xf32> to vector<16x16x3xf32>
    %3 = vector.shape_cast %2 : vector<16x16x3xf32> to vector<256x3xf32>
    %4 = arith.truncf %3 : vector<256x3xf32> to vector<256x3xbf16>
    %c0_3 = arith.constant 0 : index
    %c0_4 = arith.constant 0 : index
    %c0_5 = arith.constant 0 : index
    %c0_6 = arith.constant 0 : index
    %5 = vector.load %arg2[%c0_3, %c0_4, %c0_5, %c0_6] : memref<3x3x3x8xf32, #tpu.memory_space<vmem>>, vector<1x1x3x8xf32>
    %6 = vector.shape_cast %5 : vector<1x1x3x8xf32> to vector<3x8xf32>
    %7 = arith.truncf %6 : vector<3x8xf32> to vector<3x8xbf16>
    %cst_7 = arith.constant dense<0.000000e+00> : vector<256x8xf32>
    %8 = tpu.matmul %4, %7, %cst_7 {dimension_numbers = #tpu.dot_dimension_numbers<[1], [0], [0], [1], [0, 0, 1, 1], [], []>} : vector<256x3xbf16>, vector<3x8xbf16>, vector<256x8xf32> -> vector<256x8xf32>
    %9 = arith.addf %0, %8 : vector<256x8xf32>
    %c1 = arith.constant 1 : index
    %c0_8 = arith.constant 0 : index
    %c0_9 = arith.constant 0 : index
    %c0_10 = arith.constant 0 : index
    %10 = vector.load %arg1[%c1, %c0_8, %c0_9, %c0_10] : memref<4x17x17x3xf32, #tpu.memory_space<vmem>>, vector<1x16x16x3xf32>
    %11 = vector.shape_cast %10 : vector<1x16x16x3xf32> to vector<16x16x3xf32>
    %12 = vector.shape_cast %11 : vector<16x16x3xf32> to vector<256x3xf32>
    %13 = arith.truncf %12 : vector<256x3xf32> to vector<256x3xbf16>
    %c0_11 = arith.constant 0 : index
    %c1_12 = arith.constant 1 : index
    %c0_13 = arith.constant 0 : index
    %c0_14 = arith.constant 0 : index
    %14 = vector.load %arg2[%c0_11, %c1_12, %c0_13, %c0_14] : memref<3x3x3x8xf32, #tpu.memory_space<vmem>>, vector<1x1x3x8xf32>
    %15 = vector.shape_cast %14 : vector<1x1x3x8xf32> to vector<3x8xf32>
    %16 = arith.truncf %15 : vector<3x8xf32> to vector<3x8xbf16>
    %cst_15 = arith.constant dense<0.000000e+00> : vector<256x8xf32>
    %17 = tpu.matmul %13, %16, %cst_15 {dimension_numbers = #tpu.dot_dimension_numbers<[1], [0], [0], [1], [0, 0, 1, 1], [], []>} : vector<256x3xbf16>, vector<3x8xbf16>, vector<256x8xf32> -> vector<256x8xf32>
    %18 = arith.addf %9, %17 : vector<256x8xf32>
    %c0_16 = arith.constant 0 : index
    %c0_17 = arith.constant 0 : index
    %c1_18 = arith.constant 1 : index
    %c0_19 = arith.constant 0 : index
    %19 = vector.load %arg1[%c0_16, %c0_17, %c1_18, %c0_19] : memref<4x17x17x3xf32, #tpu.memory_space<vmem>>, vector<1x16x16x3xf32>
    %20 = vector.shape_cast %19 : vector<1x16x16x3xf32> to vector<16x16x3xf32>
    %21 = vector.shape_cast %20 : vector<16x16x3xf32> to vector<256x3xf32>
    %22 = arith.truncf %21 : vector<256x3xf32> to vector<256x3xbf16>
    %c0_20 = arith.constant 0 : index
    %c2 = arith.constant 2 : index
    %c0_21 = arith.constant 0 : index
    %c0_22 = arith.constant 0 : index
    %23 = vector.load %arg2[%c0_20, %c2, %c0_21, %c0_22] : memref<3x3x3x8xf32, #tpu.memory_space<vmem>>, vector<1x1x3x8xf32>
    %24 = vector.shape_cast %23 : vector<1x1x3x8xf32> to vector<3x8xf32>
    %25 = arith.truncf %24 : vector<3x8xf32> to vector<3x8xbf16>
    %cst_23 = arith.constant dense<0.000000e+00> : vector<256x8xf32>
    %26 = tpu.matmul %22, %25, %cst_23 {dimension_numbers = #tpu.dot_dimension_numbers<[1], [0], [0], [1], [0, 0, 1, 1], [], []>} : vector<256x3xbf16>, vector<3x8xbf16>, vector<256x8xf32> -> vector<256x8xf32>
    %27 = arith.addf %18, %26 : vector<256x8xf32>
    %c2_24 = arith.constant 2 : index
    %c0_25 = arith.constant 0 : index
    %c0_26 = arith.constant 0 : index
    %c0_27 = arith.constant 0 : index
    %28 = vector.load %arg1[%c2_24, %c0_25, %c0_26, %c0_27] : memref<4x17x17x3xf32, #tpu.memory_space<vmem>>, vector<1x16x16x3xf32>
    %29 = vector.shape_cast %28 : vector<1x16x16x3xf32> to vector<16x16x3xf32>
    %30 = vector.shape_cast %29 : vector<16x16x3xf32> to vector<256x3xf32>
    %31 = arith.truncf %30 : vector<256x3xf32> to vector<256x3xbf16>
    %c1_28 = arith.constant 1 : index
    %c0_29 = arith.constant 0 : index
    %c0_30 = arith.constant 0 : index
    %c0_31 = arith.constant 0 : index
    %32 = vector.load %arg2[%c1_28, %c0_29, %c0_30, %c0_31] : memref<3x3x3x8xf32, #tpu.memory_space<vmem>>, vector<1x1x3x8xf32>
    %33 = vector.shape_cast %32 : vector<1x1x3x8xf32> to vector<3x8xf32>
    %34 = arith.truncf %33 : vector<3x8xf32> to vector<3x8xbf16>
    %cst_32 = arith.constant dense<0.000000e+00> : vector<256x8xf32>
    %35 = tpu.matmul %31, %34, %cst_32 {dimension_numbers = #tpu.dot_dimension_numbers<[1], [0], [0], [1], [0, 0, 1, 1], [], []>} : vector<256x3xbf16>, vector<3x8xbf16>, vector<256x8xf32> -> vector<256x8xf32>
    %36 = arith.addf %27, %35 : vector<256x8xf32>
    %c3 = arith.constant 3 : index
    %c0_33 = arith.constant 0 : index
    %c0_34 = arith.constant 0 : index
    %c0_35 = arith.constant 0 : index
    %37 = vector.load %arg1[%c3, %c0_33, %c0_34, %c0_35] : memref<4x17x17x3xf32, #tpu.memory_space<vmem>>, vector<1x16x16x3xf32>
    %38 = vector.shape_cast %37 : vector<1x16x16x3xf32> to vector<16x16x3xf32>
    %39 = vector.shape_cast %38 : vector<16x16x3xf32> to vector<256x3xf32>
    %40 = arith.truncf %39 : vector<256x3xf32> to vector<256x3xbf16>
    %c1_36 = arith.constant 1 : index
    %c1_37 = arith.constant 1 : index
    %c0_38 = arith.constant 0 : index
    %c0_39 = arith.constant 0 : index
    %41 = vector.load %arg2[%c1_36, %c1_37, %c0_38, %c0_39] : memref<3x3x3x8xf32, #tpu.memory_space<vmem>>, vector<1x1x3x8xf32>
    %42 = vector.shape_cast %41 : vector<1x1x3x8xf32> to vector<3x8xf32>
    %43 = arith.truncf %42 : vector<3x8xf32> to vector<3x8xbf16>
    %cst_40 = arith.constant dense<0.000000e+00> : vector<256x8xf32>
    %44 = tpu.matmul %40, %43, %cst_40 {dimension_numbers = #tpu.dot_dimension_numbers<[1], [0], [0], [1], [0, 0, 1, 1], [], []>} : vector<256x3xbf16>, vector<3x8xbf16>, vector<256x8xf32> -> vector<256x8xf32>
    %45 = arith.addf %36, %44 : vector<256x8xf32>
    %c2_41 = arith.constant 2 : index
    %c0_42 = arith.constant 0 : index
    %c1_43 = arith.constant 1 : index
    %c0_44 = arith.constant 0 : index
    %46 = vector.load %arg1[%c2_41, %c0_42, %c1_43, %c0_44] : memref<4x17x17x3xf32, #tpu.memory_space<vmem>>, vector<1x16x16x3xf32>
    %47 = vector.shape_cast %46 : vector<1x16x16x3xf32> to vector<16x16x3xf32>
    %48 = vector.shape_cast %47 : vector<16x16x3xf32> to vector<256x3xf32>
    %49 = arith.truncf %48 : vector<256x3xf32> to vector<256x3xbf16>
    %c1_45 = arith.constant 1 : index
    %c2_46 = arith.constant 2 : index
    %c0_47 = arith.constant 0 : index
    %c0_48 = arith.constant 0 : index
    %50 = vector.load %arg2[%c1_45, %c2_46, %c0_47, %c0_48] : memref<3x3x3x8xf32, #tpu.memory_space<vmem>>, vector<1x1x3x8xf32>
    %51 = vector.shape_cast %50 : vector<1x1x3x8xf32> to vector<3x8xf32>
    %52 = arith.truncf %51 : vector<3x8xf32> to vector<3x8xbf16>
    %cst_49 = arith.constant dense<0.000000e+00> : vector<256x8xf32>
    %53 = tpu.matmul %49, %52, %cst_49 {dimension_numbers = #tpu.dot_dimension_numbers<[1], [0], [0], [1], [0, 0, 1, 1], [], []>} : vector<256x3xbf16>, vector<3x8xbf16>, vector<256x8xf32> -> vector<256x8xf32>
    %54 = arith.addf %45, %53 : vector<256x8xf32>
    %c0_50 = arith.constant 0 : index
    %c1_51 = arith.constant 1 : index
    %c0_52 = arith.constant 0 : index
    %c0_53 = arith.constant 0 : index
    %55 = vector.load %arg1[%c0_50, %c1_51, %c0_52, %c0_53] : memref<4x17x17x3xf32, #tpu.memory_space<vmem>>, vector<1x16x16x3xf32>
    %56 = vector.shape_cast %55 : vector<1x16x16x3xf32> to vector<16x16x3xf32>
    %57 = vector.shape_cast %56 : vector<16x16x3xf32> to vector<256x3xf32>
    %58 = arith.truncf %57 : vector<256x3xf32> to vector<256x3xbf16>
    %c2_54 = arith.constant 2 : index
    %c0_55 = arith.constant 0 : index
    %c0_56 = arith.constant 0 : index
    %c0_57 = arith.constant 0 : index
    %59 = vector.load %arg2[%c2_54, %c0_55, %c0_56, %c0_57] : memref<3x3x3x8xf32, #tpu.memory_space<vmem>>, vector<1x1x3x8xf32>
    %60 = vector.shape_cast %59 : vector<1x1x3x8xf32> to vector<3x8xf32>
    %61 = arith.truncf %60 : vector<3x8xf32> to vector<3x8xbf16>
    %cst_58 = arith.constant dense<0.000000e+00> : vector<256x8xf32>
    %62 = tpu.matmul %58, %61, %cst_58 {dimension_numbers = #tpu.dot_dimension_numbers<[1], [0], [0], [1], [0, 0, 1, 1], [], []>} : vector<256x3xbf16>, vector<3x8xbf16>, vector<256x8xf32> -> vector<256x8xf32>
    %63 = arith.addf %54, %62 : vector<256x8xf32>
    %c1_59 = arith.constant 1 : index
    %c1_60 = arith.constant 1 : index
    %c0_61 = arith.constant 0 : index
    %c0_62 = arith.constant 0 : index
    %64 = vector.load %arg1[%c1_59, %c1_60, %c0_61, %c0_62] : memref<4x17x17x3xf32, #tpu.memory_space<vmem>>, vector<1x16x16x3xf32>
    %65 = vector.shape_cast %64 : vector<1x16x16x3xf32> to vector<16x16x3xf32>
    %66 = vector.shape_cast %65 : vector<16x16x3xf32> to vector<256x3xf32>
    %67 = arith.truncf %66 : vector<256x3xf32> to vector<256x3xbf16>
    %c2_63 = arith.constant 2 : index
    %c1_64 = arith.constant 1 : index
    %c0_65 = arith.constant 0 : index
    %c0_66 = arith.constant 0 : index
    %68 = vector.load %arg2[%c2_63, %c1_64, %c0_65, %c0_66] : memref<3x3x3x8xf32, #tpu.memory_space<vmem>>, vector<1x1x3x8xf32>
    %69 = vector.shape_cast %68 : vector<1x1x3x8xf32> to vector<3x8xf32>
    %70 = arith.truncf %69 : vector<3x8xf32> to vector<3x8xbf16>
    %cst_67 = arith.constant dense<0.000000e+00> : vector<256x8xf32>
    %71 = tpu.matmul %67, %70, %cst_67 {dimension_numbers = #tpu.dot_dimension_numbers<[1], [0], [0], [1], [0, 0, 1, 1], [], []>} : vector<256x3xbf16>, vector<3x8xbf16>, vector<256x8xf32> -> vector<256x8xf32>
    %72 = arith.addf %63, %71 : vector<256x8xf32>
    %c0_68 = arith.constant 0 : index
    %c1_69 = arith.constant 1 : index
    %c1_70 = arith.constant 1 : index
    %c0_71 = arith.constant 0 : index
    %73 = vector.load %arg1[%c0_68, %c1_69, %c1_70, %c0_71] : memref<4x17x17x3xf32, #tpu.memory_space<vmem>>, vector<1x16x16x3xf32>
    %74 = vector.shape_cast %73 : vector<1x16x16x3xf32> to vector<16x16x3xf32>
    %75 = vector.shape_cast %74 : vector<16x16x3xf32> to vector<256x3xf32>
    %76 = arith.truncf %75 : vector<256x3xf32> to vector<256x3xbf16>
    %c2_72 = arith.constant 2 : index
    %c2_73 = arith.constant 2 : index
    %c0_74 = arith.constant 0 : index
    %c0_75 = arith.constant 0 : index
    %77 = vector.load %arg2[%c2_72, %c2_73, %c0_74, %c0_75] : memref<3x3x3x8xf32, #tpu.memory_space<vmem>>, vector<1x1x3x8xf32>
    %78 = vector.shape_cast %77 : vector<1x1x3x8xf32> to vector<3x8xf32>
    %79 = arith.truncf %78 : vector<3x8xf32> to vector<3x8xbf16>
    %cst_76 = arith.constant dense<0.000000e+00> : vector<256x8xf32>
    %80 = tpu.matmul %76, %79, %cst_76 {dimension_numbers = #tpu.dot_dimension_numbers<[1], [0], [0], [1], [0, 0, 1, 1], [], []>} : vector<256x3xbf16>, vector<3x8xbf16>, vector<256x8xf32> -> vector<256x8xf32>
    %81 = arith.addf %72, %80 : vector<256x8xf32>
    %c0_77 = arith.constant 0 : index
    %c0_78 = arith.constant 0 : index
    %82 = vector.load %arg3[%c0_77, %c0_78] : memref<1x8xf32, #tpu.memory_space<vmem>>, vector<1x8xf32>
    %83 = vector.broadcast %82 : vector<1x8xf32> to vector<256x8xf32>
    %84 = arith.addf %81, %83 : vector<256x8xf32>
    %cst_79 = arith.constant 0.000000e+00 : f32
    %85 = vector.broadcast %cst_79 : f32 to vector<256x8xf32>
    %86 = arith.subf %85, %84 : vector<256x8xf32>
    %87 = math.exp %86 : vector<256x8xf32>
    %cst_80 = arith.constant 1.000000e+00 : f32
    %88 = vector.broadcast %cst_80 : f32 to vector<256x8xf32>
    %89 = arith.addf %88, %87 : vector<256x8xf32>
    %90 = tpu.reciprocal %89 {approx = true} : vector<256x8xf32> -> vector<256x8xf32>
    %91 = arith.mulf %84, %90 : vector<256x8xf32>
    %c0_81 = arith.constant 0 : index
    %c0_82 = arith.constant 0 : index
    %c0_83 = arith.constant 0 : index
    %92 = vector.load %arg4[%c0_81, %c0_82, %c0_83] : memref<1x256x8xf32, #tpu.memory_space<vmem>>, vector<1x256x8xf32>
    %93 = vector.shape_cast %92 : vector<1x256x8xf32> to vector<256x8xf32>
    %94 = vector.shape_cast %91 : vector<256x8xf32> to vector<1x256x8xf32>
    tpu.vector_store %arg4[%c0_81, %c0_82, %c0_83], %94 {strides = array<i32>} : memref<1x256x8xf32, #tpu.memory_space<vmem>>, vector<1x256x8xf32>,
    return
  }
  func.func @transform_0(%arg0: i32) -> (i32, i32, i32, i32) {
    %c0_i32 = arith.constant 0 : i32
    %c0_i32_0 = arith.constant 0 : i32
    %c0_i32_1 = arith.constant 0 : i32
    %c0_i32_2 = arith.constant 0 : i32
    return %arg0, %c0_i32, %c0_i32_0, %c0_i32_1 : i32, i32, i32, i32
  }
  func.func @transform_1(%arg0: i32) -> (i32, i32, i32, i32) {
    %c0_i32 = arith.constant 0 : i32
    %c0_i32_0 = arith.constant 0 : i32
    %c0_i32_1 = arith.constant 0 : i32
    %c0_i32_2 = arith.constant 0 : i32
    %c0_i32_3 = arith.constant 0 : i32
    return %c0_i32, %c0_i32_0, %c0_i32_1, %c0_i32_2 : i32, i32, i32, i32
  }
  func.func @transform_2(%arg0: i32) -> (i32, i32) {
    %c0_i32 = arith.constant 0 : i32
    %c0_i32_0 = arith.constant 0 : i32
    %c0_i32_1 = arith.constant 0 : i32
    return %c0_i32, %c0_i32_0 : i32, i32
  }
  func.func @transform_3(%arg0: i32) -> (i32, i32, i32) {
    %c0_i32 = arith.constant 0 : i32
    %c0_i32_0 = arith.constant 0 : i32
    %c0_i32_1 = arith.constant 0 : i32
    return %arg0, %c0_i32, %c0_i32_0 : i32, i32, i32
  }
}

module attributes {stable_mosaic.version = 11 : i64} {
  func.func @_conv3x3_s2_silu_kernel(%arg0: i32, %arg1: memref<4x9x9x8xf32, #tpu.memory_space<vmem>>, %arg2: memref<3x3x8x16xf32, #tpu.memory_space<vmem>>, %arg3: memref<1x16xf32, #tpu.memory_space<vmem>>, %arg4: memref<1x64x16xf32, #tpu.memory_space<vmem>>) attributes {dimension_semantics = [#tpu.dimension_semantics<parallel>], iteration_bounds = array<i64: 2>, scalar_prefetch = 0 : i64, scratch_operands = 0 : i64, tpu.core_type = #tpu.core_type<tc>, window_params = [{transform_indices = @transform_0, window_bounds = array<i64: 4, 9, 9, 8>}, {pipeline_mode = #tpu.pipeline_mode<synchronous>, transform_indices = @transform_1, window_bounds = array<i64: 3, 3, 8, 16>}, {pipeline_mode = #tpu.pipeline_mode<synchronous>, transform_indices = @transform_2, window_bounds = array<i64: 1, 16>}, {transform_indices = @transform_3, window_bounds = array<i64: 1, 64, 16>}]} {
    %cst = arith.constant 0.000000e+00 : f32
    %0 = vector.broadcast %cst : f32 to vector<64x16xf32>
    %c0 = arith.constant 0 : index
    %c0_0 = arith.constant 0 : index
    %c0_1 = arith.constant 0 : index
    %c0_2 = arith.constant 0 : index
    %1 = vector.load %arg1[%c0, %c0_0, %c0_1, %c0_2] : memref<4x9x9x8xf32, #tpu.memory_space<vmem>>, vector<1x8x8x8xf32>
    %2 = vector.shape_cast %1 : vector<1x8x8x8xf32> to vector<8x8x8xf32>
    %3 = vector.shape_cast %2 : vector<8x8x8xf32> to vector<64x8xf32>
    %4 = arith.truncf %3 : vector<64x8xf32> to vector<64x8xbf16>
    %c0_3 = arith.constant 0 : index
    %c0_4 = arith.constant 0 : index
    %c0_5 = arith.constant 0 : index
    %c0_6 = arith.constant 0 : index
    %5 = vector.load %arg2[%c0_3, %c0_4, %c0_5, %c0_6] : memref<3x3x8x16xf32, #tpu.memory_space<vmem>>, vector<1x1x8x16xf32>
    %6 = vector.shape_cast %5 : vector<1x1x8x16xf32> to vector<8x16xf32>
    %7 = arith.truncf %6 : vector<8x16xf32> to vector<8x16xbf16>
    %cst_7 = arith.constant dense<0.000000e+00> : vector<64x16xf32>
    %8 = tpu.matmul %4, %7, %cst_7 {dimension_numbers = #tpu.dot_dimension_numbers<[1], [0], [0], [1], [0, 0, 1, 1], [], []>} : vector<64x8xbf16>, vector<8x16xbf16>, vector<64x16xf32> -> vector<64x16xf32>
    %9 = arith.addf %0, %8 : vector<64x16xf32>
    %c1 = arith.constant 1 : index
    %c0_8 = arith.constant 0 : index
    %c0_9 = arith.constant 0 : index
    %c0_10 = arith.constant 0 : index
    %10 = vector.load %arg1[%c1, %c0_8, %c0_9, %c0_10] : memref<4x9x9x8xf32, #tpu.memory_space<vmem>>, vector<1x8x8x8xf32>
    %11 = vector.shape_cast %10 : vector<1x8x8x8xf32> to vector<8x8x8xf32>
    %12 = vector.shape_cast %11 : vector<8x8x8xf32> to vector<64x8xf32>
    %13 = arith.truncf %12 : vector<64x8xf32> to vector<64x8xbf16>
    %c0_11 = arith.constant 0 : index
    %c1_12 = arith.constant 1 : index
    %c0_13 = arith.constant 0 : index
    %c0_14 = arith.constant 0 : index
    %14 = vector.load %arg2[%c0_11, %c1_12, %c0_13, %c0_14] : memref<3x3x8x16xf32, #tpu.memory_space<vmem>>, vector<1x1x8x16xf32>
    %15 = vector.shape_cast %14 : vector<1x1x8x16xf32> to vector<8x16xf32>
    %16 = arith.truncf %15 : vector<8x16xf32> to vector<8x16xbf16>
    %cst_15 = arith.constant dense<0.000000e+00> : vector<64x16xf32>
    %17 = tpu.matmul %13, %16, %cst_15 {dimension_numbers = #tpu.dot_dimension_numbers<[1], [0], [0], [1], [0, 0, 1, 1], [], []>} : vector<64x8xbf16>, vector<8x16xbf16>, vector<64x16xf32> -> vector<64x16xf32>
    %18 = arith.addf %9, %17 : vector<64x16xf32>
    %c0_16 = arith.constant 0 : index
    %c0_17 = arith.constant 0 : index
    %c1_18 = arith.constant 1 : index
    %c0_19 = arith.constant 0 : index
    %19 = vector.load %arg1[%c0_16, %c0_17, %c1_18, %c0_19] : memref<4x9x9x8xf32, #tpu.memory_space<vmem>>, vector<1x8x8x8xf32>
    %20 = vector.shape_cast %19 : vector<1x8x8x8xf32> to vector<8x8x8xf32>
    %21 = vector.shape_cast %20 : vector<8x8x8xf32> to vector<64x8xf32>
    %22 = arith.truncf %21 : vector<64x8xf32> to vector<64x8xbf16>
    %c0_20 = arith.constant 0 : index
    %c2 = arith.constant 2 : index
    %c0_21 = arith.constant 0 : index
    %c0_22 = arith.constant 0 : index
    %23 = vector.load %arg2[%c0_20, %c2, %c0_21, %c0_22] : memref<3x3x8x16xf32, #tpu.memory_space<vmem>>, vector<1x1x8x16xf32>
    %24 = vector.shape_cast %23 : vector<1x1x8x16xf32> to vector<8x16xf32>
    %25 = arith.truncf %24 : vector<8x16xf32> to vector<8x16xbf16>
    %cst_23 = arith.constant dense<0.000000e+00> : vector<64x16xf32>
    %26 = tpu.matmul %22, %25, %cst_23 {dimension_numbers = #tpu.dot_dimension_numbers<[1], [0], [0], [1], [0, 0, 1, 1], [], []>} : vector<64x8xbf16>, vector<8x16xbf16>, vector<64x16xf32> -> vector<64x16xf32>
    %27 = arith.addf %18, %26 : vector<64x16xf32>
    %c2_24 = arith.constant 2 : index
    %c0_25 = arith.constant 0 : index
    %c0_26 = arith.constant 0 : index
    %c0_27 = arith.constant 0 : index
    %28 = vector.load %arg1[%c2_24, %c0_25, %c0_26, %c0_27] : memref<4x9x9x8xf32, #tpu.memory_space<vmem>>, vector<1x8x8x8xf32>
    %29 = vector.shape_cast %28 : vector<1x8x8x8xf32> to vector<8x8x8xf32>
    %30 = vector.shape_cast %29 : vector<8x8x8xf32> to vector<64x8xf32>
    %31 = arith.truncf %30 : vector<64x8xf32> to vector<64x8xbf16>
    %c1_28 = arith.constant 1 : index
    %c0_29 = arith.constant 0 : index
    %c0_30 = arith.constant 0 : index
    %c0_31 = arith.constant 0 : index
    %32 = vector.load %arg2[%c1_28, %c0_29, %c0_30, %c0_31] : memref<3x3x8x16xf32, #tpu.memory_space<vmem>>, vector<1x1x8x16xf32>
    %33 = vector.shape_cast %32 : vector<1x1x8x16xf32> to vector<8x16xf32>
    %34 = arith.truncf %33 : vector<8x16xf32> to vector<8x16xbf16>
    %cst_32 = arith.constant dense<0.000000e+00> : vector<64x16xf32>
    %35 = tpu.matmul %31, %34, %cst_32 {dimension_numbers = #tpu.dot_dimension_numbers<[1], [0], [0], [1], [0, 0, 1, 1], [], []>} : vector<64x8xbf16>, vector<8x16xbf16>, vector<64x16xf32> -> vector<64x16xf32>
    %36 = arith.addf %27, %35 : vector<64x16xf32>
    %c3 = arith.constant 3 : index
    %c0_33 = arith.constant 0 : index
    %c0_34 = arith.constant 0 : index
    %c0_35 = arith.constant 0 : index
    %37 = vector.load %arg1[%c3, %c0_33, %c0_34, %c0_35] : memref<4x9x9x8xf32, #tpu.memory_space<vmem>>, vector<1x8x8x8xf32>
    %38 = vector.shape_cast %37 : vector<1x8x8x8xf32> to vector<8x8x8xf32>
    %39 = vector.shape_cast %38 : vector<8x8x8xf32> to vector<64x8xf32>
    %40 = arith.truncf %39 : vector<64x8xf32> to vector<64x8xbf16>
    %c1_36 = arith.constant 1 : index
    %c1_37 = arith.constant 1 : index
    %c0_38 = arith.constant 0 : index
    %c0_39 = arith.constant 0 : index
    %41 = vector.load %arg2[%c1_36, %c1_37, %c0_38, %c0_39] : memref<3x3x8x16xf32, #tpu.memory_space<vmem>>, vector<1x1x8x16xf32>
    %42 = vector.shape_cast %41 : vector<1x1x8x16xf32> to vector<8x16xf32>
    %43 = arith.truncf %42 : vector<8x16xf32> to vector<8x16xbf16>
    %cst_40 = arith.constant dense<0.000000e+00> : vector<64x16xf32>
    %44 = tpu.matmul %40, %43, %cst_40 {dimension_numbers = #tpu.dot_dimension_numbers<[1], [0], [0], [1], [0, 0, 1, 1], [], []>} : vector<64x8xbf16>, vector<8x16xbf16>, vector<64x16xf32> -> vector<64x16xf32>
    %45 = arith.addf %36, %44 : vector<64x16xf32>
    %c2_41 = arith.constant 2 : index
    %c0_42 = arith.constant 0 : index
    %c1_43 = arith.constant 1 : index
    %c0_44 = arith.constant 0 : index
    %46 = vector.load %arg1[%c2_41, %c0_42, %c1_43, %c0_44] : memref<4x9x9x8xf32, #tpu.memory_space<vmem>>, vector<1x8x8x8xf32>
    %47 = vector.shape_cast %46 : vector<1x8x8x8xf32> to vector<8x8x8xf32>
    %48 = vector.shape_cast %47 : vector<8x8x8xf32> to vector<64x8xf32>
    %49 = arith.truncf %48 : vector<64x8xf32> to vector<64x8xbf16>
    %c1_45 = arith.constant 1 : index
    %c2_46 = arith.constant 2 : index
    %c0_47 = arith.constant 0 : index
    %c0_48 = arith.constant 0 : index
    %50 = vector.load %arg2[%c1_45, %c2_46, %c0_47, %c0_48] : memref<3x3x8x16xf32, #tpu.memory_space<vmem>>, vector<1x1x8x16xf32>
    %51 = vector.shape_cast %50 : vector<1x1x8x16xf32> to vector<8x16xf32>
    %52 = arith.truncf %51 : vector<8x16xf32> to vector<8x16xbf16>
    %cst_49 = arith.constant dense<0.000000e+00> : vector<64x16xf32>
    %53 = tpu.matmul %49, %52, %cst_49 {dimension_numbers = #tpu.dot_dimension_numbers<[1], [0], [0], [1], [0, 0, 1, 1], [], []>} : vector<64x8xbf16>, vector<8x16xbf16>, vector<64x16xf32> -> vector<64x16xf32>
    %54 = arith.addf %45, %53 : vector<64x16xf32>
    %c0_50 = arith.constant 0 : index
    %c1_51 = arith.constant 1 : index
    %c0_52 = arith.constant 0 : index
    %c0_53 = arith.constant 0 : index
    %55 = vector.load %arg1[%c0_50, %c1_51, %c0_52, %c0_53] : memref<4x9x9x8xf32, #tpu.memory_space<vmem>>, vector<1x8x8x8xf32>
    %56 = vector.shape_cast %55 : vector<1x8x8x8xf32> to vector<8x8x8xf32>
    %57 = vector.shape_cast %56 : vector<8x8x8xf32> to vector<64x8xf32>
    %58 = arith.truncf %57 : vector<64x8xf32> to vector<64x8xbf16>
    %c2_54 = arith.constant 2 : index
    %c0_55 = arith.constant 0 : index
    %c0_56 = arith.constant 0 : index
    %c0_57 = arith.constant 0 : index
    %59 = vector.load %arg2[%c2_54, %c0_55, %c0_56, %c0_57] : memref<3x3x8x16xf32, #tpu.memory_space<vmem>>, vector<1x1x8x16xf32>
    %60 = vector.shape_cast %59 : vector<1x1x8x16xf32> to vector<8x16xf32>
    %61 = arith.truncf %60 : vector<8x16xf32> to vector<8x16xbf16>
    %cst_58 = arith.constant dense<0.000000e+00> : vector<64x16xf32>
    %62 = tpu.matmul %58, %61, %cst_58 {dimension_numbers = #tpu.dot_dimension_numbers<[1], [0], [0], [1], [0, 0, 1, 1], [], []>} : vector<64x8xbf16>, vector<8x16xbf16>, vector<64x16xf32> -> vector<64x16xf32>
    %63 = arith.addf %54, %62 : vector<64x16xf32>
    %c1_59 = arith.constant 1 : index
    %c1_60 = arith.constant 1 : index
    %c0_61 = arith.constant 0 : index
    %c0_62 = arith.constant 0 : index
    %64 = vector.load %arg1[%c1_59, %c1_60, %c0_61, %c0_62] : memref<4x9x9x8xf32, #tpu.memory_space<vmem>>, vector<1x8x8x8xf32>
    %65 = vector.shape_cast %64 : vector<1x8x8x8xf32> to vector<8x8x8xf32>
    %66 = vector.shape_cast %65 : vector<8x8x8xf32> to vector<64x8xf32>
    %67 = arith.truncf %66 : vector<64x8xf32> to vector<64x8xbf16>
    %c2_63 = arith.constant 2 : index
    %c1_64 = arith.constant 1 : index
    %c0_65 = arith.constant 0 : index
    %c0_66 = arith.constant 0 : index
    %68 = vector.load %arg2[%c2_63, %c1_64, %c0_65, %c0_66] : memref<3x3x8x16xf32, #tpu.memory_space<vmem>>, vector<1x1x8x16xf32>
    %69 = vector.shape_cast %68 : vector<1x1x8x16xf32> to vector<8x16xf32>
    %70 = arith.truncf %69 : vector<8x16xf32> to vector<8x16xbf16>
    %cst_67 = arith.constant dense<0.000000e+00> : vector<64x16xf32>
    %71 = tpu.matmul %67, %70, %cst_67 {dimension_numbers = #tpu.dot_dimension_numbers<[1], [0], [0], [1], [0, 0, 1, 1], [], []>} : vector<64x8xbf16>, vector<8x16xbf16>, vector<64x16xf32> -> vector<64x16xf32>
    %72 = arith.addf %63, %71 : vector<64x16xf32>
    %c0_68 = arith.constant 0 : index
    %c1_69 = arith.constant 1 : index
    %c1_70 = arith.constant 1 : index
    %c0_71 = arith.constant 0 : index
    %73 = vector.load %arg1[%c0_68, %c1_69, %c1_70, %c0_71] : memref<4x9x9x8xf32, #tpu.memory_space<vmem>>, vector<1x8x8x8xf32>
    %74 = vector.shape_cast %73 : vector<1x8x8x8xf32> to vector<8x8x8xf32>
    %75 = vector.shape_cast %74 : vector<8x8x8xf32> to vector<64x8xf32>
    %76 = arith.truncf %75 : vector<64x8xf32> to vector<64x8xbf16>
    %c2_72 = arith.constant 2 : index
    %c2_73 = arith.constant 2 : index
    %c0_74 = arith.constant 0 : index
    %c0_75 = arith.constant 0 : index
    %77 = vector.load %arg2[%c2_72, %c2_73, %c0_74, %c0_75] : memref<3x3x8x16xf32, #tpu.memory_space<vmem>>, vector<1x1x8x16xf32>
    %78 = vector.shape_cast %77 : vector<1x1x8x16xf32> to vector<8x16xf32>
    %79 = arith.truncf %78 : vector<8x16xf32> to vector<8x16xbf16>
    %cst_76 = arith.constant dense<0.000000e+00> : vector<64x16xf32>
    %80 = tpu.matmul %76, %79, %cst_76 {dimension_numbers = #tpu.dot_dimension_numbers<[1], [0], [0], [1], [0, 0, 1, 1], [], []>} : vector<64x8xbf16>, vector<8x16xbf16>, vector<64x16xf32> -> vector<64x16xf32>
    %81 = arith.addf %72, %80 : vector<64x16xf32>
    %c0_77 = arith.constant 0 : index
    %c0_78 = arith.constant 0 : index
    %82 = vector.load %arg3[%c0_77, %c0_78] : memref<1x16xf32, #tpu.memory_space<vmem>>, vector<1x16xf32>
    %83 = vector.broadcast %82 : vector<1x16xf32> to vector<64x16xf32>
    %84 = arith.addf %81, %83 : vector<64x16xf32>
    %cst_79 = arith.constant 0.000000e+00 : f32
    %85 = vector.broadcast %cst_79 : f32 to vector<64x16xf32>
    %86 = arith.subf %85, %84 : vector<64x16xf32>
    %87 = math.exp %86 : vector<64x16xf32>
    %cst_80 = arith.constant 1.000000e+00 : f32
    %88 = vector.broadcast %cst_80 : f32 to vector<64x16xf32>
    %89 = arith.addf %88, %87 : vector<64x16xf32>
    %90 = tpu.reciprocal %89 {approx = true} : vector<64x16xf32> -> vector<64x16xf32>
    %91 = arith.mulf %84, %90 : vector<64x16xf32>
    %c0_81 = arith.constant 0 : index
    %c0_82 = arith.constant 0 : index
    %c0_83 = arith.constant 0 : index
    %92 = vector.load %arg4[%c0_81, %c0_82, %c0_83] : memref<1x64x16xf32, #tpu.memory_space<vmem>>, vector<1x64x16xf32>
    %93 = vector.shape_cast %92 : vector<1x64x16xf32> to vector<64x16xf32>
    %94 = vector.shape_cast %91 : vector<64x16xf32> to vector<1x64x16xf32>
    tpu.vector_store %arg4[%c0_81, %c0_82, %c0_83], %94 {strides = array<i32>} : memref<1x64x16xf32, #tpu.memory_space<vmem>>, vector<1x64x16xf32>,
    return
  }
  func.func @transform_0(%arg0: i32) -> (i32, i32, i32, i32) {
    %c0_i32 = arith.constant 0 : i32
    %c0_i32_0 = arith.constant 0 : i32
    %c0_i32_1 = arith.constant 0 : i32
    %c0_i32_2 = arith.constant 0 : i32
    return %arg0, %c0_i32, %c0_i32_0, %c0_i32_1 : i32, i32, i32, i32
  }
  func.func @transform_1(%arg0: i32) -> (i32, i32, i32, i32) {
    %c0_i32 = arith.constant 0 : i32
    %c0_i32_0 = arith.constant 0 : i32
    %c0_i32_1 = arith.constant 0 : i32
    %c0_i32_2 = arith.constant 0 : i32
    %c0_i32_3 = arith.constant 0 : i32
    return %c0_i32, %c0_i32_0, %c0_i32_1, %c0_i32_2 : i32, i32, i32, i32
  }
  func.func @transform_2(%arg0: i32) -> (i32, i32) {
    %c0_i32 = arith.constant 0 : i32
    %c0_i32_0 = arith.constant 0 : i32
    %c0_i32_1 = arith.constant 0 : i32
    return %c0_i32, %c0_i32_0 : i32, i32
  }
  func.func @transform_3(%arg0: i32) -> (i32, i32, i32) {
    %c0_i32 = arith.constant 0 : i32
    %c0_i32_0 = arith.constant 0 : i32
    %c0_i32_1 = arith.constant 0 : i32
    return %arg0, %c0_i32, %c0_i32_0 : i32, i32, i32
  }
}

module attributes {stable_mosaic.version = 11 : i64} {
  func.func @_conv3x3_s2_silu_kernel(%arg0: i32, %arg1: memref<4x5x5x16xf32, #tpu.memory_space<vmem>>, %arg2: memref<3x3x16x32xf32, #tpu.memory_space<vmem>>, %arg3: memref<1x32xf32, #tpu.memory_space<vmem>>, %arg4: memref<1x16x32xf32, #tpu.memory_space<vmem>>) attributes {dimension_semantics = [#tpu.dimension_semantics<parallel>], iteration_bounds = array<i64: 2>, scalar_prefetch = 0 : i64, scratch_operands = 0 : i64, tpu.core_type = #tpu.core_type<tc>, window_params = [{transform_indices = @transform_0, window_bounds = array<i64: 4, 5, 5, 16>}, {pipeline_mode = #tpu.pipeline_mode<synchronous>, transform_indices = @transform_1, window_bounds = array<i64: 3, 3, 16, 32>}, {pipeline_mode = #tpu.pipeline_mode<synchronous>, transform_indices = @transform_2, window_bounds = array<i64: 1, 32>}, {transform_indices = @transform_3, window_bounds = array<i64: 1, 16, 32>}]} {
    %cst = arith.constant 0.000000e+00 : f32
    %0 = vector.broadcast %cst : f32 to vector<16x32xf32>
    %c0 = arith.constant 0 : index
    %c0_0 = arith.constant 0 : index
    %c0_1 = arith.constant 0 : index
    %c0_2 = arith.constant 0 : index
    %1 = vector.load %arg1[%c0, %c0_0, %c0_1, %c0_2] : memref<4x5x5x16xf32, #tpu.memory_space<vmem>>, vector<1x4x4x16xf32>
    %2 = vector.shape_cast %1 : vector<1x4x4x16xf32> to vector<4x4x16xf32>
    %3 = vector.shape_cast %2 : vector<4x4x16xf32> to vector<16x16xf32>
    %4 = arith.truncf %3 : vector<16x16xf32> to vector<16x16xbf16>
    %c0_3 = arith.constant 0 : index
    %c0_4 = arith.constant 0 : index
    %c0_5 = arith.constant 0 : index
    %c0_6 = arith.constant 0 : index
    %5 = vector.load %arg2[%c0_3, %c0_4, %c0_5, %c0_6] : memref<3x3x16x32xf32, #tpu.memory_space<vmem>>, vector<1x1x16x32xf32>
    %6 = vector.shape_cast %5 : vector<1x1x16x32xf32> to vector<16x32xf32>
    %7 = arith.truncf %6 : vector<16x32xf32> to vector<16x32xbf16>
    %cst_7 = arith.constant dense<0.000000e+00> : vector<16x32xf32>
    %8 = tpu.matmul %4, %7, %cst_7 {dimension_numbers = #tpu.dot_dimension_numbers<[1], [0], [0], [1], [0, 0, 1, 1], [], []>} : vector<16x16xbf16>, vector<16x32xbf16>, vector<16x32xf32> -> vector<16x32xf32>
    %9 = arith.addf %0, %8 : vector<16x32xf32>
    %c1 = arith.constant 1 : index
    %c0_8 = arith.constant 0 : index
    %c0_9 = arith.constant 0 : index
    %c0_10 = arith.constant 0 : index
    %10 = vector.load %arg1[%c1, %c0_8, %c0_9, %c0_10] : memref<4x5x5x16xf32, #tpu.memory_space<vmem>>, vector<1x4x4x16xf32>
    %11 = vector.shape_cast %10 : vector<1x4x4x16xf32> to vector<4x4x16xf32>
    %12 = vector.shape_cast %11 : vector<4x4x16xf32> to vector<16x16xf32>
    %13 = arith.truncf %12 : vector<16x16xf32> to vector<16x16xbf16>
    %c0_11 = arith.constant 0 : index
    %c1_12 = arith.constant 1 : index
    %c0_13 = arith.constant 0 : index
    %c0_14 = arith.constant 0 : index
    %14 = vector.load %arg2[%c0_11, %c1_12, %c0_13, %c0_14] : memref<3x3x16x32xf32, #tpu.memory_space<vmem>>, vector<1x1x16x32xf32>
    %15 = vector.shape_cast %14 : vector<1x1x16x32xf32> to vector<16x32xf32>
    %16 = arith.truncf %15 : vector<16x32xf32> to vector<16x32xbf16>
    %cst_15 = arith.constant dense<0.000000e+00> : vector<16x32xf32>
    %17 = tpu.matmul %13, %16, %cst_15 {dimension_numbers = #tpu.dot_dimension_numbers<[1], [0], [0], [1], [0, 0, 1, 1], [], []>} : vector<16x16xbf16>, vector<16x32xbf16>, vector<16x32xf32> -> vector<16x32xf32>
    %18 = arith.addf %9, %17 : vector<16x32xf32>
    %c0_16 = arith.constant 0 : index
    %c0_17 = arith.constant 0 : index
    %c1_18 = arith.constant 1 : index
    %c0_19 = arith.constant 0 : index
    %19 = vector.load %arg1[%c0_16, %c0_17, %c1_18, %c0_19] : memref<4x5x5x16xf32, #tpu.memory_space<vmem>>, vector<1x4x4x16xf32>
    %20 = vector.shape_cast %19 : vector<1x4x4x16xf32> to vector<4x4x16xf32>
    %21 = vector.shape_cast %20 : vector<4x4x16xf32> to vector<16x16xf32>
    %22 = arith.truncf %21 : vector<16x16xf32> to vector<16x16xbf16>
    %c0_20 = arith.constant 0 : index
    %c2 = arith.constant 2 : index
    %c0_21 = arith.constant 0 : index
    %c0_22 = arith.constant 0 : index
    %23 = vector.load %arg2[%c0_20, %c2, %c0_21, %c0_22] : memref<3x3x16x32xf32, #tpu.memory_space<vmem>>, vector<1x1x16x32xf32>
    %24 = vector.shape_cast %23 : vector<1x1x16x32xf32> to vector<16x32xf32>
    %25 = arith.truncf %24 : vector<16x32xf32> to vector<16x32xbf16>
    %cst_23 = arith.constant dense<0.000000e+00> : vector<16x32xf32>
    %26 = tpu.matmul %22, %25, %cst_23 {dimension_numbers = #tpu.dot_dimension_numbers<[1], [0], [0], [1], [0, 0, 1, 1], [], []>} : vector<16x16xbf16>, vector<16x32xbf16>, vector<16x32xf32> -> vector<16x32xf32>
    %27 = arith.addf %18, %26 : vector<16x32xf32>
    %c2_24 = arith.constant 2 : index
    %c0_25 = arith.constant 0 : index
    %c0_26 = arith.constant 0 : index
    %c0_27 = arith.constant 0 : index
    %28 = vector.load %arg1[%c2_24, %c0_25, %c0_26, %c0_27] : memref<4x5x5x16xf32, #tpu.memory_space<vmem>>, vector<1x4x4x16xf32>
    %29 = vector.shape_cast %28 : vector<1x4x4x16xf32> to vector<4x4x16xf32>
    %30 = vector.shape_cast %29 : vector<4x4x16xf32> to vector<16x16xf32>
    %31 = arith.truncf %30 : vector<16x16xf32> to vector<16x16xbf16>
    %c1_28 = arith.constant 1 : index
    %c0_29 = arith.constant 0 : index
    %c0_30 = arith.constant 0 : index
    %c0_31 = arith.constant 0 : index
    %32 = vector.load %arg2[%c1_28, %c0_29, %c0_30, %c0_31] : memref<3x3x16x32xf32, #tpu.memory_space<vmem>>, vector<1x1x16x32xf32>
    %33 = vector.shape_cast %32 : vector<1x1x16x32xf32> to vector<16x32xf32>
    %34 = arith.truncf %33 : vector<16x32xf32> to vector<16x32xbf16>
    %cst_32 = arith.constant dense<0.000000e+00> : vector<16x32xf32>
    %35 = tpu.matmul %31, %34, %cst_32 {dimension_numbers = #tpu.dot_dimension_numbers<[1], [0], [0], [1], [0, 0, 1, 1], [], []>} : vector<16x16xbf16>, vector<16x32xbf16>, vector<16x32xf32> -> vector<16x32xf32>
    %36 = arith.addf %27, %35 : vector<16x32xf32>
    %c3 = arith.constant 3 : index
    %c0_33 = arith.constant 0 : index
    %c0_34 = arith.constant 0 : index
    %c0_35 = arith.constant 0 : index
    %37 = vector.load %arg1[%c3, %c0_33, %c0_34, %c0_35] : memref<4x5x5x16xf32, #tpu.memory_space<vmem>>, vector<1x4x4x16xf32>
    %38 = vector.shape_cast %37 : vector<1x4x4x16xf32> to vector<4x4x16xf32>
    %39 = vector.shape_cast %38 : vector<4x4x16xf32> to vector<16x16xf32>
    %40 = arith.truncf %39 : vector<16x16xf32> to vector<16x16xbf16>
    %c1_36 = arith.constant 1 : index
    %c1_37 = arith.constant 1 : index
    %c0_38 = arith.constant 0 : index
    %c0_39 = arith.constant 0 : index
    %41 = vector.load %arg2[%c1_36, %c1_37, %c0_38, %c0_39] : memref<3x3x16x32xf32, #tpu.memory_space<vmem>>, vector<1x1x16x32xf32>
    %42 = vector.shape_cast %41 : vector<1x1x16x32xf32> to vector<16x32xf32>
    %43 = arith.truncf %42 : vector<16x32xf32> to vector<16x32xbf16>
    %cst_40 = arith.constant dense<0.000000e+00> : vector<16x32xf32>
    %44 = tpu.matmul %40, %43, %cst_40 {dimension_numbers = #tpu.dot_dimension_numbers<[1], [0], [0], [1], [0, 0, 1, 1], [], []>} : vector<16x16xbf16>, vector<16x32xbf16>, vector<16x32xf32> -> vector<16x32xf32>
    %45 = arith.addf %36, %44 : vector<16x32xf32>
    %c2_41 = arith.constant 2 : index
    %c0_42 = arith.constant 0 : index
    %c1_43 = arith.constant 1 : index
    %c0_44 = arith.constant 0 : index
    %46 = vector.load %arg1[%c2_41, %c0_42, %c1_43, %c0_44] : memref<4x5x5x16xf32, #tpu.memory_space<vmem>>, vector<1x4x4x16xf32>
    %47 = vector.shape_cast %46 : vector<1x4x4x16xf32> to vector<4x4x16xf32>
    %48 = vector.shape_cast %47 : vector<4x4x16xf32> to vector<16x16xf32>
    %49 = arith.truncf %48 : vector<16x16xf32> to vector<16x16xbf16>
    %c1_45 = arith.constant 1 : index
    %c2_46 = arith.constant 2 : index
    %c0_47 = arith.constant 0 : index
    %c0_48 = arith.constant 0 : index
    %50 = vector.load %arg2[%c1_45, %c2_46, %c0_47, %c0_48] : memref<3x3x16x32xf32, #tpu.memory_space<vmem>>, vector<1x1x16x32xf32>
    %51 = vector.shape_cast %50 : vector<1x1x16x32xf32> to vector<16x32xf32>
    %52 = arith.truncf %51 : vector<16x32xf32> to vector<16x32xbf16>
    %cst_49 = arith.constant dense<0.000000e+00> : vector<16x32xf32>
    %53 = tpu.matmul %49, %52, %cst_49 {dimension_numbers = #tpu.dot_dimension_numbers<[1], [0], [0], [1], [0, 0, 1, 1], [], []>} : vector<16x16xbf16>, vector<16x32xbf16>, vector<16x32xf32> -> vector<16x32xf32>
    %54 = arith.addf %45, %53 : vector<16x32xf32>
    %c0_50 = arith.constant 0 : index
    %c1_51 = arith.constant 1 : index
    %c0_52 = arith.constant 0 : index
    %c0_53 = arith.constant 0 : index
    %55 = vector.load %arg1[%c0_50, %c1_51, %c0_52, %c0_53] : memref<4x5x5x16xf32, #tpu.memory_space<vmem>>, vector<1x4x4x16xf32>
    %56 = vector.shape_cast %55 : vector<1x4x4x16xf32> to vector<4x4x16xf32>
    %57 = vector.shape_cast %56 : vector<4x4x16xf32> to vector<16x16xf32>
    %58 = arith.truncf %57 : vector<16x16xf32> to vector<16x16xbf16>
    %c2_54 = arith.constant 2 : index
    %c0_55 = arith.constant 0 : index
    %c0_56 = arith.constant 0 : index
    %c0_57 = arith.constant 0 : index
    %59 = vector.load %arg2[%c2_54, %c0_55, %c0_56, %c0_57] : memref<3x3x16x32xf32, #tpu.memory_space<vmem>>, vector<1x1x16x32xf32>
    %60 = vector.shape_cast %59 : vector<1x1x16x32xf32> to vector<16x32xf32>
    %61 = arith.truncf %60 : vector<16x32xf32> to vector<16x32xbf16>
    %cst_58 = arith.constant dense<0.000000e+00> : vector<16x32xf32>
    %62 = tpu.matmul %58, %61, %cst_58 {dimension_numbers = #tpu.dot_dimension_numbers<[1], [0], [0], [1], [0, 0, 1, 1], [], []>} : vector<16x16xbf16>, vector<16x32xbf16>, vector<16x32xf32> -> vector<16x32xf32>
    %63 = arith.addf %54, %62 : vector<16x32xf32>
    %c1_59 = arith.constant 1 : index
    %c1_60 = arith.constant 1 : index
    %c0_61 = arith.constant 0 : index
    %c0_62 = arith.constant 0 : index
    %64 = vector.load %arg1[%c1_59, %c1_60, %c0_61, %c0_62] : memref<4x5x5x16xf32, #tpu.memory_space<vmem>>, vector<1x4x4x16xf32>
    %65 = vector.shape_cast %64 : vector<1x4x4x16xf32> to vector<4x4x16xf32>
    %66 = vector.shape_cast %65 : vector<4x4x16xf32> to vector<16x16xf32>
    %67 = arith.truncf %66 : vector<16x16xf32> to vector<16x16xbf16>
    %c2_63 = arith.constant 2 : index
    %c1_64 = arith.constant 1 : index
    %c0_65 = arith.constant 0 : index
    %c0_66 = arith.constant 0 : index
    %68 = vector.load %arg2[%c2_63, %c1_64, %c0_65, %c0_66] : memref<3x3x16x32xf32, #tpu.memory_space<vmem>>, vector<1x1x16x32xf32>
    %69 = vector.shape_cast %68 : vector<1x1x16x32xf32> to vector<16x32xf32>
    %70 = arith.truncf %69 : vector<16x32xf32> to vector<16x32xbf16>
    %cst_67 = arith.constant dense<0.000000e+00> : vector<16x32xf32>
    %71 = tpu.matmul %67, %70, %cst_67 {dimension_numbers = #tpu.dot_dimension_numbers<[1], [0], [0], [1], [0, 0, 1, 1], [], []>} : vector<16x16xbf16>, vector<16x32xbf16>, vector<16x32xf32> -> vector<16x32xf32>
    %72 = arith.addf %63, %71 : vector<16x32xf32>
    %c0_68 = arith.constant 0 : index
    %c1_69 = arith.constant 1 : index
    %c1_70 = arith.constant 1 : index
    %c0_71 = arith.constant 0 : index
    %73 = vector.load %arg1[%c0_68, %c1_69, %c1_70, %c0_71] : memref<4x5x5x16xf32, #tpu.memory_space<vmem>>, vector<1x4x4x16xf32>
    %74 = vector.shape_cast %73 : vector<1x4x4x16xf32> to vector<4x4x16xf32>
    %75 = vector.shape_cast %74 : vector<4x4x16xf32> to vector<16x16xf32>
    %76 = arith.truncf %75 : vector<16x16xf32> to vector<16x16xbf16>
    %c2_72 = arith.constant 2 : index
    %c2_73 = arith.constant 2 : index
    %c0_74 = arith.constant 0 : index
    %c0_75 = arith.constant 0 : index
    %77 = vector.load %arg2[%c2_72, %c2_73, %c0_74, %c0_75] : memref<3x3x16x32xf32, #tpu.memory_space<vmem>>, vector<1x1x16x32xf32>
    %78 = vector.shape_cast %77 : vector<1x1x16x32xf32> to vector<16x32xf32>
    %79 = arith.truncf %78 : vector<16x32xf32> to vector<16x32xbf16>
    %cst_76 = arith.constant dense<0.000000e+00> : vector<16x32xf32>
    %80 = tpu.matmul %76, %79, %cst_76 {dimension_numbers = #tpu.dot_dimension_numbers<[1], [0], [0], [1], [0, 0, 1, 1], [], []>} : vector<16x16xbf16>, vector<16x32xbf16>, vector<16x32xf32> -> vector<16x32xf32>
    %81 = arith.addf %72, %80 : vector<16x32xf32>
    %c0_77 = arith.constant 0 : index
    %c0_78 = arith.constant 0 : index
    %82 = vector.load %arg3[%c0_77, %c0_78] : memref<1x32xf32, #tpu.memory_space<vmem>>, vector<1x32xf32>
    %83 = vector.broadcast %82 : vector<1x32xf32> to vector<16x32xf32>
    %84 = arith.addf %81, %83 : vector<16x32xf32>
    %cst_79 = arith.constant 0.000000e+00 : f32
    %85 = vector.broadcast %cst_79 : f32 to vector<16x32xf32>
    %86 = arith.subf %85, %84 : vector<16x32xf32>
    %87 = math.exp %86 : vector<16x32xf32>
    %cst_80 = arith.constant 1.000000e+00 : f32
    %88 = vector.broadcast %cst_80 : f32 to vector<16x32xf32>
    %89 = arith.addf %88, %87 : vector<16x32xf32>
    %90 = tpu.reciprocal %89 {approx = true} : vector<16x32xf32> -> vector<16x32xf32>
    %91 = arith.mulf %84, %90 : vector<16x32xf32>
    %c0_81 = arith.constant 0 : index
    %c0_82 = arith.constant 0 : index
    %c0_83 = arith.constant 0 : index
    %92 = vector.load %arg4[%c0_81, %c0_82, %c0_83] : memref<1x16x32xf32, #tpu.memory_space<vmem>>, vector<1x16x32xf32>
    %93 = vector.shape_cast %92 : vector<1x16x32xf32> to vector<16x32xf32>
    %94 = vector.shape_cast %91 : vector<16x32xf32> to vector<1x16x32xf32>
    tpu.vector_store %arg4[%c0_81, %c0_82, %c0_83], %94 {strides = array<i32>} : memref<1x16x32xf32, #tpu.memory_space<vmem>>, vector<1x16x32xf32>,
    return
  }
  func.func @transform_0(%arg0: i32) -> (i32, i32, i32, i32) {
    %c0_i32 = arith.constant 0 : i32
    %c0_i32_0 = arith.constant 0 : i32
    %c0_i32_1 = arith.constant 0 : i32
    %c0_i32_2 = arith.constant 0 : i32
    return %arg0, %c0_i32, %c0_i32_0, %c0_i32_1 : i32, i32, i32, i32
  }
  func.func @transform_1(%arg0: i32) -> (i32, i32, i32, i32) {
    %c0_i32 = arith.constant 0 : i32
    %c0_i32_0 = arith.constant 0 : i32
    %c0_i32_1 = arith.constant 0 : i32
    %c0_i32_2 = arith.constant 0 : i32
    %c0_i32_3 = arith.constant 0 : i32
    return %c0_i32, %c0_i32_0, %c0_i32_1, %c0_i32_2 : i32, i32, i32, i32
  }
  func.func @transform_2(%arg0: i32) -> (i32, i32) {
    %c0_i32 = arith.constant 0 : i32
    %c0_i32_0 = arith.constant 0 : i32
    %c0_i32_1 = arith.constant 0 : i32
    return %c0_i32, %c0_i32_0 : i32, i32
  }
  func.func @transform_3(%arg0: i32) -> (i32, i32, i32) {
    %c0_i32 = arith.constant 0 : i32
    %c0_i32_0 = arith.constant 0 : i32
    %c0_i32_1 = arith.constant 0 : i32
    return %arg0, %c0_i32, %c0_i32_0 : i32, i32, i32
  }
}

module attributes {stable_mosaic.version = 11 : i64} {
  func.func @_detect_head_kernel(%arg0: i32, %arg1: memref<1x256x8xf32, #tpu.memory_space<vmem>>, %arg2: memref<1x64x16xf32, #tpu.memory_space<vmem>>, %arg3: memref<1x16x32xf32, #tpu.memory_space<vmem>>, %arg4: memref<3x8x9xf32, #tpu.memory_space<vmem>>, %arg5: memref<3x16x9xf32, #tpu.memory_space<vmem>>, %arg6: memref<3x32x9xf32, #tpu.memory_space<vmem>>, %arg7: memref<3x1x9xf32, #tpu.memory_space<vmem>>, %arg8: memref<3x1x9xf32, #tpu.memory_space<vmem>>, %arg9: memref<3x1x9xf32, #tpu.memory_space<vmem>>, %arg10: memref<1x3x256x9xf32, #tpu.memory_space<vmem>>, %arg11: memref<1x3x64x9xf32, #tpu.memory_space<vmem>>, %arg12: memref<1x3x16x9xf32, #tpu.memory_space<vmem>>, %arg13: memref<1x1008x9xf32, #tpu.memory_space<vmem>>) attributes {dimension_semantics = [#tpu.dimension_semantics<parallel>], iteration_bounds = array<i64: 2>, scalar_prefetch = 0 : i64, scratch_operands = 0 : i64, tpu.core_type = #tpu.core_type<tc>, window_params = [{transform_indices = @transform_0, window_bounds = array<i64: 1, 256, 8>}, {transform_indices = @transform_1, window_bounds = array<i64: 1, 64, 16>}, {transform_indices = @transform_2, window_bounds = array<i64: 1, 16, 32>}, {pipeline_mode = #tpu.pipeline_mode<synchronous>, transform_indices = @transform_3, window_bounds = array<i64: 3, 8, 9>}, {pipeline_mode = #tpu.pipeline_mode<synchronous>, transform_indices = @transform_4, window_bounds = array<i64: 3, 16, 9>}, {pipeline_mode = #tpu.pipeline_mode<synchronous>, transform_indices = @transform_5, window_bounds = array<i64: 3, 32, 9>}, {pipeline_mode = #tpu.pipeline_mode<synchronous>, transform_indices = @transform_6, window_bounds = array<i64: 3, 1, 9>}, {pipeline_mode = #tpu.pipeline_mode<synchronous>, transform_indices = @transform_7, window_bounds = array<i64: 3, 1, 9>}, {pipeline_mode = #tpu.pipeline_mode<synchronous>, transform_indices = @transform_8, window_bounds = array<i64: 3, 1, 9>}, {transform_indices = @transform_9, window_bounds = array<i64: 1, 3, 256, 9>}, {transform_indices = @transform_10, window_bounds = array<i64: 1, 3, 64, 9>}, {transform_indices = @transform_11, window_bounds = array<i64: 1, 3, 16, 9>}, {transform_indices = @transform_12, window_bounds = array<i64: 1, 1008, 9>}]} {
    %c0 = arith.constant 0 : index
    %c0_0 = arith.constant 0 : index
    %c0_1 = arith.constant 0 : index
    %0 = vector.load %arg1[%c0, %c0_0, %c0_1] : memref<1x256x8xf32, #tpu.memory_space<vmem>>, vector<1x256x8xf32>
    %1 = vector.shape_cast %0 : vector<1x256x8xf32> to vector<256x8xf32>
    %2 = arith.truncf %1 : vector<256x8xf32> to vector<256x8xbf16>
    %3 = tpu.iota {dimensions = array<i32: 1>} : vector<256x9xi32>
    %4 = tpu.iota {dimensions = array<i32: 0>} : vector<256x9xi32>
    %c15_i32 = arith.constant 15 : i32
    %5 = vector.broadcast %c15_i32 : i32 to vector<256x9xi32>
    %6 = arith.andi %4, %5 : vector<256x9xi32>
    %7 = arith.sitofp %6 : vector<256x9xi32> to vector<256x9xf32>
    %c4_i32 = arith.constant 4 : i32
    %8 = vector.broadcast %c4_i32 : i32 to vector<256x9xi32>
    %9 = arith.shrsi %4, %8 : vector<256x9xi32>
    %10 = arith.sitofp %9 : vector<256x9xi32> to vector<256x9xf32>
    %c0_i32 = arith.constant 0 : i32
    %11 = vector.broadcast %c0_i32 : i32 to vector<256x9xi32>
    %12 = arith.cmpi eq, %3, %11 : vector<256x9xi32>
    %c1_i32 = arith.constant 1 : i32
    %13 = vector.broadcast %c1_i32 : i32 to vector<256x9xi32>
    %14 = arith.cmpi eq, %3, %13 : vector<256x9xi32>
    %cst = arith.constant 0.000000e+00 : f32
    %15 = vector.broadcast %cst : f32 to vector<256x9xf32>
    %16 = arith.select %14, %10, %15 : vector<256x9xi1>, vector<256x9xf32>
    %17 = arith.select %12, %7, %16 : vector<256x9xi1>, vector<256x9xf32>
    %c0_2 = arith.constant 0 : index
    %c0_3 = arith.constant 0 : index
    %c0_4 = arith.constant 0 : index
    %18 = vector.load %arg4[%c0_2, %c0_3, %c0_4] : memref<3x8x9xf32, #tpu.memory_space<vmem>>, vector<1x8x9xf32>
    %19 = vector.shape_cast %18 : vector<1x8x9xf32> to vector<8x9xf32>
    %20 = arith.truncf %19 : vector<8x9xf32> to vector<8x9xbf16>
    %cst_5 = arith.constant dense<0.000000e+00> : vector<256x9xf32>
    %21 = tpu.matmul %2, %20, %cst_5 {dimension_numbers = #tpu.dot_dimension_numbers<[1], [0], [0], [1], [0, 0, 1, 1], [], []>} : vector<256x8xbf16>, vector<8x9xbf16>, vector<256x9xf32> -> vector<256x9xf32>
    %c0_6 = arith.constant 0 : index
    %c0_7 = arith.constant 0 : index
    %c0_8 = arith.constant 0 : index
    %22 = vector.load %arg7[%c0_6, %c0_7, %c0_8] : memref<3x1x9xf32, #tpu.memory_space<vmem>>, vector<1x1x9xf32>
    %23 = vector.shape_cast %22 : vector<1x1x9xf32> to vector<1x9xf32>
    %24 = vector.broadcast %23 : vector<1x9xf32> to vector<256x9xf32>
    %25 = arith.addf %21, %24 : vector<256x9xf32>
    %cst_9 = arith.constant 0.000000e+00 : f32
    %26 = vector.broadcast %cst_9 : f32 to vector<256x9xf32>
    %27 = arith.subf %26, %25 : vector<256x9xf32>
    %28 = math.exp %27 : vector<256x9xf32>
    %cst_10 = arith.constant 1.000000e+00 : f32
    %29 = vector.broadcast %cst_10 : f32 to vector<256x9xf32>
    %30 = arith.addf %29, %28 : vector<256x9xf32>
    %31 = tpu.reciprocal %30 {approx = true} : vector<256x9xf32> -> vector<256x9xf32>
    %c2_i32 = arith.constant 2 : i32
    %32 = vector.broadcast %c2_i32 : i32 to vector<256x9xi32>
    %33 = arith.cmpi eq, %3, %32 : vector<256x9xi32>
    %c3_i32 = arith.constant 3 : i32
    %34 = vector.broadcast %c3_i32 : i32 to vector<256x9xi32>
    %35 = arith.cmpi eq, %3, %34 : vector<256x9xi32>
    %cst_11 = arith.constant 1.300000e+01 : f32
    %cst_12 = arith.constant 1.000000e+00 : f32
    %36 = vector.broadcast %cst_11 : f32 to vector<256x9xf32>
    %37 = vector.broadcast %cst_12 : f32 to vector<256x9xf32>
    %38 = arith.select %35, %36, %37 : vector<256x9xi1>, vector<256x9xf32>
    %cst_13 = arith.constant 1.000000e+01 : f32
    %39 = vector.broadcast %cst_13 : f32 to vector<256x9xf32>
    %40 = arith.select %33, %39, %38 : vector<256x9xi1>, vector<256x9xf32>
    %cst_14 = arith.constant 2.000000e+00 : f32
    %41 = vector.broadcast %cst_14 : f32 to vector<256x9xf32>
    %42 = arith.mulf %31, %41 : vector<256x9xf32>
    %cst_15 = arith.constant 5.000000e-01 : f32
    %43 = vector.broadcast %cst_15 : f32 to vector<256x9xf32>
    %44 = arith.subf %42, %43 : vector<256x9xf32>
    %45 = arith.addf %44, %17 : vector<256x9xf32>
    %cst_16 = arith.constant 2.000000e+00 : f32
    %46 = vector.broadcast %cst_16 : f32 to vector<256x9xf32>
    %47 = arith.mulf %45, %46 : vector<256x9xf32>
    %48 = arith.mulf %42, %42 : vector<256x9xf32>
    %49 = arith.mulf %48, %40 : vector<256x9xf32>
    %c2_i32_17 = arith.constant 2 : i32
    %50 = vector.broadcast %c2_i32_17 : i32 to vector<256x9xi32>
    %51 = arith.cmpi slt, %3, %50 : vector<256x9xi32>
    %c4_i32_18 = arith.constant 4 : i32
    %52 = vector.broadcast %c4_i32_18 : i32 to vector<256x9xi32>
    %53 = arith.cmpi slt, %3, %52 : vector<256x9xi32>
    %54 = arith.select %53, %49, %31 : vector<256x9xi1>, vector<256x9xf32>
    %55 = arith.select %51, %47, %54 : vector<256x9xi1>, vector<256x9xf32>
    %c0_19 = arith.constant 0 : index
    %c0_20 = arith.constant 0 : index
    %c0_21 = arith.constant 0 : index
    %c0_22 = arith.constant 0 : index
    %56 = vector.load %arg10[%c0_19, %c0_20, %c0_21, %c0_22] : memref<1x3x256x9xf32, #tpu.memory_space<vmem>>, vector<1x1x256x9xf32>
    %57 = vector.shape_cast %56 : vector<1x1x256x9xf32> to vector<256x9xf32>
    %58 = vector.shape_cast %25 : vector<256x9xf32> to vector<1x1x256x9xf32>
    tpu.vector_store %arg10[%c0_19, %c0_20, %c0_21, %c0_22], %58 {strides = array<i32>} : memref<1x3x256x9xf32, #tpu.memory_space<vmem>>, vector<1x1x256x9xf32>,
    %c0_23 = arith.constant 0 : index
    %c0_24 = arith.constant 0 : index
    %c0_25 = arith.constant 0 : index
    %59 = vector.load %arg13[%c0_23, %c0_24, %c0_25] : memref<1x1008x9xf32, #tpu.memory_space<vmem>>, vector<1x256x9xf32>
    %60 = vector.shape_cast %59 : vector<1x256x9xf32> to vector<256x9xf32>
    %61 = vector.shape_cast %55 : vector<256x9xf32> to vector<1x256x9xf32>
    tpu.vector_store %arg13[%c0_23, %c0_24, %c0_25], %61 {strides = array<i32>} : memref<1x1008x9xf32, #tpu.memory_space<vmem>>, vector<1x256x9xf32>,
    %c1 = arith.constant 1 : index
    %c0_26 = arith.constant 0 : index
    %c0_27 = arith.constant 0 : index
    %62 = vector.load %arg4[%c1, %c0_26, %c0_27] : memref<3x8x9xf32, #tpu.memory_space<vmem>>, vector<1x8x9xf32>
    %63 = vector.shape_cast %62 : vector<1x8x9xf32> to vector<8x9xf32>
    %64 = arith.truncf %63 : vector<8x9xf32> to vector<8x9xbf16>
    %cst_28 = arith.constant dense<0.000000e+00> : vector<256x9xf32>
    %65 = tpu.matmul %2, %64, %cst_28 {dimension_numbers = #tpu.dot_dimension_numbers<[1], [0], [0], [1], [0, 0, 1, 1], [], []>} : vector<256x8xbf16>, vector<8x9xbf16>, vector<256x9xf32> -> vector<256x9xf32>
    %c1_29 = arith.constant 1 : index
    %c0_30 = arith.constant 0 : index
    %c0_31 = arith.constant 0 : index
    %66 = vector.load %arg7[%c1_29, %c0_30, %c0_31] : memref<3x1x9xf32, #tpu.memory_space<vmem>>, vector<1x1x9xf32>
    %67 = vector.shape_cast %66 : vector<1x1x9xf32> to vector<1x9xf32>
    %68 = vector.broadcast %67 : vector<1x9xf32> to vector<256x9xf32>
    %69 = arith.addf %65, %68 : vector<256x9xf32>
    %cst_32 = arith.constant 0.000000e+00 : f32
    %70 = vector.broadcast %cst_32 : f32 to vector<256x9xf32>
    %71 = arith.subf %70, %69 : vector<256x9xf32>
    %72 = math.exp %71 : vector<256x9xf32>
    %cst_33 = arith.constant 1.000000e+00 : f32
    %73 = vector.broadcast %cst_33 : f32 to vector<256x9xf32>
    %74 = arith.addf %73, %72 : vector<256x9xf32>
    %75 = tpu.reciprocal %74 {approx = true} : vector<256x9xf32> -> vector<256x9xf32>
    %c2_i32_34 = arith.constant 2 : i32
    %76 = vector.broadcast %c2_i32_34 : i32 to vector<256x9xi32>
    %77 = arith.cmpi eq, %3, %76 : vector<256x9xi32>
    %c3_i32_35 = arith.constant 3 : i32
    %78 = vector.broadcast %c3_i32_35 : i32 to vector<256x9xi32>
    %79 = arith.cmpi eq, %3, %78 : vector<256x9xi32>
    %cst_36 = arith.constant 3.000000e+01 : f32
    %cst_37 = arith.constant 1.000000e+00 : f32
    %80 = vector.broadcast %cst_36 : f32 to vector<256x9xf32>
    %81 = vector.broadcast %cst_37 : f32 to vector<256x9xf32>
    %82 = arith.select %79, %80, %81 : vector<256x9xi1>, vector<256x9xf32>
    %cst_38 = arith.constant 1.600000e+01 : f32
    %83 = vector.broadcast %cst_38 : f32 to vector<256x9xf32>
    %84 = arith.select %77, %83, %82 : vector<256x9xi1>, vector<256x9xf32>
    %cst_39 = arith.constant 2.000000e+00 : f32
    %85 = vector.broadcast %cst_39 : f32 to vector<256x9xf32>
    %86 = arith.mulf %75, %85 : vector<256x9xf32>
    %cst_40 = arith.constant 5.000000e-01 : f32
    %87 = vector.broadcast %cst_40 : f32 to vector<256x9xf32>
    %88 = arith.subf %86, %87 : vector<256x9xf32>
    %89 = arith.addf %88, %17 : vector<256x9xf32>
    %cst_41 = arith.constant 2.000000e+00 : f32
    %90 = vector.broadcast %cst_41 : f32 to vector<256x9xf32>
    %91 = arith.mulf %89, %90 : vector<256x9xf32>
    %92 = arith.mulf %86, %86 : vector<256x9xf32>
    %93 = arith.mulf %92, %84 : vector<256x9xf32>
    %c2_i32_42 = arith.constant 2 : i32
    %94 = vector.broadcast %c2_i32_42 : i32 to vector<256x9xi32>
    %95 = arith.cmpi slt, %3, %94 : vector<256x9xi32>
    %c4_i32_43 = arith.constant 4 : i32
    %96 = vector.broadcast %c4_i32_43 : i32 to vector<256x9xi32>
    %97 = arith.cmpi slt, %3, %96 : vector<256x9xi32>
    %98 = arith.select %97, %93, %75 : vector<256x9xi1>, vector<256x9xf32>
    %99 = arith.select %95, %91, %98 : vector<256x9xi1>, vector<256x9xf32>
    %c0_44 = arith.constant 0 : index
    %c1_45 = arith.constant 1 : index
    %c0_46 = arith.constant 0 : index
    %c0_47 = arith.constant 0 : index
    %100 = vector.load %arg10[%c0_44, %c1_45, %c0_46, %c0_47] : memref<1x3x256x9xf32, #tpu.memory_space<vmem>>, vector<1x1x256x9xf32>
    %101 = vector.shape_cast %100 : vector<1x1x256x9xf32> to vector<256x9xf32>
    %102 = vector.shape_cast %69 : vector<256x9xf32> to vector<1x1x256x9xf32>
    tpu.vector_store %arg10[%c0_44, %c1_45, %c0_46, %c0_47], %102 {strides = array<i32>} : memref<1x3x256x9xf32, #tpu.memory_space<vmem>>, vector<1x1x256x9xf32>,
    %c0_48 = arith.constant 0 : index
    %c256 = arith.constant 256 : index
    %c0_49 = arith.constant 0 : index
    %103 = vector.load %arg13[%c0_48, %c256, %c0_49] : memref<1x1008x9xf32, #tpu.memory_space<vmem>>, vector<1x256x9xf32>
    %104 = vector.shape_cast %103 : vector<1x256x9xf32> to vector<256x9xf32>
    %105 = vector.shape_cast %99 : vector<256x9xf32> to vector<1x256x9xf32>
    tpu.vector_store %arg13[%c0_48, %c256, %c0_49], %105 {strides = array<i32>} : memref<1x1008x9xf32, #tpu.memory_space<vmem>>, vector<1x256x9xf32>,
    %c2 = arith.constant 2 : index
    %c0_50 = arith.constant 0 : index
    %c0_51 = arith.constant 0 : index
    %106 = vector.load %arg4[%c2, %c0_50, %c0_51] : memref<3x8x9xf32, #tpu.memory_space<vmem>>, vector<1x8x9xf32>
    %107 = vector.shape_cast %106 : vector<1x8x9xf32> to vector<8x9xf32>
    %108 = arith.truncf %107 : vector<8x9xf32> to vector<8x9xbf16>
    %cst_52 = arith.constant dense<0.000000e+00> : vector<256x9xf32>
    %109 = tpu.matmul %2, %108, %cst_52 {dimension_numbers = #tpu.dot_dimension_numbers<[1], [0], [0], [1], [0, 0, 1, 1], [], []>} : vector<256x8xbf16>, vector<8x9xbf16>, vector<256x9xf32> -> vector<256x9xf32>
    %c2_53 = arith.constant 2 : index
    %c0_54 = arith.constant 0 : index
    %c0_55 = arith.constant 0 : index
    %110 = vector.load %arg7[%c2_53, %c0_54, %c0_55] : memref<3x1x9xf32, #tpu.memory_space<vmem>>, vector<1x1x9xf32>
    %111 = vector.shape_cast %110 : vector<1x1x9xf32> to vector<1x9xf32>
    %112 = vector.broadcast %111 : vector<1x9xf32> to vector<256x9xf32>
    %113 = arith.addf %109, %112 : vector<256x9xf32>
    %cst_56 = arith.constant 0.000000e+00 : f32
    %114 = vector.broadcast %cst_56 : f32 to vector<256x9xf32>
    %115 = arith.subf %114, %113 : vector<256x9xf32>
    %116 = math.exp %115 : vector<256x9xf32>
    %cst_57 = arith.constant 1.000000e+00 : f32
    %117 = vector.broadcast %cst_57 : f32 to vector<256x9xf32>
    %118 = arith.addf %117, %116 : vector<256x9xf32>
    %119 = tpu.reciprocal %118 {approx = true} : vector<256x9xf32> -> vector<256x9xf32>
    %c2_i32_58 = arith.constant 2 : i32
    %120 = vector.broadcast %c2_i32_58 : i32 to vector<256x9xi32>
    %121 = arith.cmpi eq, %3, %120 : vector<256x9xi32>
    %c3_i32_59 = arith.constant 3 : i32
    %122 = vector.broadcast %c3_i32_59 : i32 to vector<256x9xi32>
    %123 = arith.cmpi eq, %3, %122 : vector<256x9xi32>
    %cst_60 = arith.constant 2.300000e+01 : f32
    %cst_61 = arith.constant 1.000000e+00 : f32
    %124 = vector.broadcast %cst_60 : f32 to vector<256x9xf32>
    %125 = vector.broadcast %cst_61 : f32 to vector<256x9xf32>
    %126 = arith.select %123, %124, %125 : vector<256x9xi1>, vector<256x9xf32>
    %cst_62 = arith.constant 3.300000e+01 : f32
    %127 = vector.broadcast %cst_62 : f32 to vector<256x9xf32>
    %128 = arith.select %121, %127, %126 : vector<256x9xi1>, vector<256x9xf32>
    %cst_63 = arith.constant 2.000000e+00 : f32
    %129 = vector.broadcast %cst_63 : f32 to vector<256x9xf32>
    %130 = arith.mulf %119, %129 : vector<256x9xf32>
    %cst_64 = arith.constant 5.000000e-01 : f32
    %131 = vector.broadcast %cst_64 : f32 to vector<256x9xf32>
    %132 = arith.subf %130, %131 : vector<256x9xf32>
    %133 = arith.addf %132, %17 : vector<256x9xf32>
    %cst_65 = arith.constant 2.000000e+00 : f32
    %134 = vector.broadcast %cst_65 : f32 to vector<256x9xf32>
    %135 = arith.mulf %133, %134 : vector<256x9xf32>
    %136 = arith.mulf %130, %130 : vector<256x9xf32>
    %137 = arith.mulf %136, %128 : vector<256x9xf32>
    %c2_i32_66 = arith.constant 2 : i32
    %138 = vector.broadcast %c2_i32_66 : i32 to vector<256x9xi32>
    %139 = arith.cmpi slt, %3, %138 : vector<256x9xi32>
    %c4_i32_67 = arith.constant 4 : i32
    %140 = vector.broadcast %c4_i32_67 : i32 to vector<256x9xi32>
    %141 = arith.cmpi slt, %3, %140 : vector<256x9xi32>
    %142 = arith.select %141, %137, %119 : vector<256x9xi1>, vector<256x9xf32>
    %143 = arith.select %139, %135, %142 : vector<256x9xi1>, vector<256x9xf32>
    %c0_68 = arith.constant 0 : index
    %c2_69 = arith.constant 2 : index
    %c0_70 = arith.constant 0 : index
    %c0_71 = arith.constant 0 : index
    %144 = vector.load %arg10[%c0_68, %c2_69, %c0_70, %c0_71] : memref<1x3x256x9xf32, #tpu.memory_space<vmem>>, vector<1x1x256x9xf32>
    %145 = vector.shape_cast %144 : vector<1x1x256x9xf32> to vector<256x9xf32>
    %146 = vector.shape_cast %113 : vector<256x9xf32> to vector<1x1x256x9xf32>
    tpu.vector_store %arg10[%c0_68, %c2_69, %c0_70, %c0_71], %146 {strides = array<i32>} : memref<1x3x256x9xf32, #tpu.memory_space<vmem>>, vector<1x1x256x9xf32>,
    %c0_72 = arith.constant 0 : index
    %c512 = arith.constant 512 : index
    %c0_73 = arith.constant 0 : index
    %147 = vector.load %arg13[%c0_72, %c512, %c0_73] : memref<1x1008x9xf32, #tpu.memory_space<vmem>>, vector<1x256x9xf32>
    %148 = vector.shape_cast %147 : vector<1x256x9xf32> to vector<256x9xf32>
    %149 = vector.shape_cast %143 : vector<256x9xf32> to vector<1x256x9xf32>
    tpu.vector_store %arg13[%c0_72, %c512, %c0_73], %149 {strides = array<i32>} : memref<1x1008x9xf32, #tpu.memory_space<vmem>>, vector<1x256x9xf32>,
    %c0_74 = arith.constant 0 : index
    %c0_75 = arith.constant 0 : index
    %c0_76 = arith.constant 0 : index
    %150 = vector.load %arg2[%c0_74, %c0_75, %c0_76] : memref<1x64x16xf32, #tpu.memory_space<vmem>>, vector<1x64x16xf32>
    %151 = vector.shape_cast %150 : vector<1x64x16xf32> to vector<64x16xf32>
    %152 = arith.truncf %151 : vector<64x16xf32> to vector<64x16xbf16>
    %153 = tpu.iota {dimensions = array<i32: 1>} : vector<64x9xi32>
    %154 = tpu.iota {dimensions = array<i32: 0>} : vector<64x9xi32>
    %c7_i32 = arith.constant 7 : i32
    %155 = vector.broadcast %c7_i32 : i32 to vector<64x9xi32>
    %156 = arith.andi %154, %155 : vector<64x9xi32>
    %157 = arith.sitofp %156 : vector<64x9xi32> to vector<64x9xf32>
    %c3_i32_77 = arith.constant 3 : i32
    %158 = vector.broadcast %c3_i32_77 : i32 to vector<64x9xi32>
    %159 = arith.shrsi %154, %158 : vector<64x9xi32>
    %160 = arith.sitofp %159 : vector<64x9xi32> to vector<64x9xf32>
    %c0_i32_78 = arith.constant 0 : i32
    %161 = vector.broadcast %c0_i32_78 : i32 to vector<64x9xi32>
    %162 = arith.cmpi eq, %153, %161 : vector<64x9xi32>
    %c1_i32_79 = arith.constant 1 : i32
    %163 = vector.broadcast %c1_i32_79 : i32 to vector<64x9xi32>
    %164 = arith.cmpi eq, %153, %163 : vector<64x9xi32>
    %cst_80 = arith.constant 0.000000e+00 : f32
    %165 = vector.broadcast %cst_80 : f32 to vector<64x9xf32>
    %166 = arith.select %164, %160, %165 : vector<64x9xi1>, vector<64x9xf32>
    %167 = arith.select %162, %157, %166 : vector<64x9xi1>, vector<64x9xf32>
    %c0_81 = arith.constant 0 : index
    %c0_82 = arith.constant 0 : index
    %c0_83 = arith.constant 0 : index
    %168 = vector.load %arg5[%c0_81, %c0_82, %c0_83] : memref<3x16x9xf32, #tpu.memory_space<vmem>>, vector<1x16x9xf32>
    %169 = vector.shape_cast %168 : vector<1x16x9xf32> to vector<16x9xf32>
    %170 = arith.truncf %169 : vector<16x9xf32> to vector<16x9xbf16>
    %cst_84 = arith.constant dense<0.000000e+00> : vector<64x9xf32>
    %171 = tpu.matmul %152, %170, %cst_84 {dimension_numbers = #tpu.dot_dimension_numbers<[1], [0], [0], [1], [0, 0, 1, 1], [], []>} : vector<64x16xbf16>, vector<16x9xbf16>, vector<64x9xf32> -> vector<64x9xf32>
    %c0_85 = arith.constant 0 : index
    %c0_86 = arith.constant 0 : index
    %c0_87 = arith.constant 0 : index
    %172 = vector.load %arg8[%c0_85, %c0_86, %c0_87] : memref<3x1x9xf32, #tpu.memory_space<vmem>>, vector<1x1x9xf32>
    %173 = vector.shape_cast %172 : vector<1x1x9xf32> to vector<1x9xf32>
    %174 = vector.broadcast %173 : vector<1x9xf32> to vector<64x9xf32>
    %175 = arith.addf %171, %174 : vector<64x9xf32>
    %cst_88 = arith.constant 0.000000e+00 : f32
    %176 = vector.broadcast %cst_88 : f32 to vector<64x9xf32>
    %177 = arith.subf %176, %175 : vector<64x9xf32>
    %178 = math.exp %177 : vector<64x9xf32>
    %cst_89 = arith.constant 1.000000e+00 : f32
    %179 = vector.broadcast %cst_89 : f32 to vector<64x9xf32>
    %180 = arith.addf %179, %178 : vector<64x9xf32>
    %181 = tpu.reciprocal %180 {approx = true} : vector<64x9xf32> -> vector<64x9xf32>
    %c2_i32_90 = arith.constant 2 : i32
    %182 = vector.broadcast %c2_i32_90 : i32 to vector<64x9xi32>
    %183 = arith.cmpi eq, %153, %182 : vector<64x9xi32>
    %c3_i32_91 = arith.constant 3 : i32
    %184 = vector.broadcast %c3_i32_91 : i32 to vector<64x9xi32>
    %185 = arith.cmpi eq, %153, %184 : vector<64x9xi32>
    %cst_92 = arith.constant 6.100000e+01 : f32
    %cst_93 = arith.constant 1.000000e+00 : f32
    %186 = vector.broadcast %cst_92 : f32 to vector<64x9xf32>
    %187 = vector.broadcast %cst_93 : f32 to vector<64x9xf32>
    %188 = arith.select %185, %186, %187 : vector<64x9xi1>, vector<64x9xf32>
    %cst_94 = arith.constant 3.000000e+01 : f32
    %189 = vector.broadcast %cst_94 : f32 to vector<64x9xf32>
    %190 = arith.select %183, %189, %188 : vector<64x9xi1>, vector<64x9xf32>
    %cst_95 = arith.constant 2.000000e+00 : f32
    %191 = vector.broadcast %cst_95 : f32 to vector<64x9xf32>
    %192 = arith.mulf %181, %191 : vector<64x9xf32>
    %cst_96 = arith.constant 5.000000e-01 : f32
    %193 = vector.broadcast %cst_96 : f32 to vector<64x9xf32>
    %194 = arith.subf %192, %193 : vector<64x9xf32>
    %195 = arith.addf %194, %167 : vector<64x9xf32>
    %cst_97 = arith.constant 4.000000e+00 : f32
    %196 = vector.broadcast %cst_97 : f32 to vector<64x9xf32>
    %197 = arith.mulf %195, %196 : vector<64x9xf32>
    %198 = arith.mulf %192, %192 : vector<64x9xf32>
    %199 = arith.mulf %198, %190 : vector<64x9xf32>
    %c2_i32_98 = arith.constant 2 : i32
    %200 = vector.broadcast %c2_i32_98 : i32 to vector<64x9xi32>
    %201 = arith.cmpi slt, %153, %200 : vector<64x9xi32>
    %c4_i32_99 = arith.constant 4 : i32
    %202 = vector.broadcast %c4_i32_99 : i32 to vector<64x9xi32>
    %203 = arith.cmpi slt, %153, %202 : vector<64x9xi32>
    %204 = arith.select %203, %199, %181 : vector<64x9xi1>, vector<64x9xf32>
    %205 = arith.select %201, %197, %204 : vector<64x9xi1>, vector<64x9xf32>
    %c0_100 = arith.constant 0 : index
    %c0_101 = arith.constant 0 : index
    %c0_102 = arith.constant 0 : index
    %c0_103 = arith.constant 0 : index
    %206 = vector.load %arg11[%c0_100, %c0_101, %c0_102, %c0_103] : memref<1x3x64x9xf32, #tpu.memory_space<vmem>>, vector<1x1x64x9xf32>
    %207 = vector.shape_cast %206 : vector<1x1x64x9xf32> to vector<64x9xf32>
    %208 = vector.shape_cast %175 : vector<64x9xf32> to vector<1x1x64x9xf32>
    tpu.vector_store %arg11[%c0_100, %c0_101, %c0_102, %c0_103], %208 {strides = array<i32>} : memref<1x3x64x9xf32, #tpu.memory_space<vmem>>, vector<1x1x64x9xf32>,
    %c0_104 = arith.constant 0 : index
    %c768 = arith.constant 768 : index
    %c0_105 = arith.constant 0 : index
    %209 = vector.load %arg13[%c0_104, %c768, %c0_105] : memref<1x1008x9xf32, #tpu.memory_space<vmem>>, vector<1x64x9xf32>
    %210 = vector.shape_cast %209 : vector<1x64x9xf32> to vector<64x9xf32>
    %211 = vector.shape_cast %205 : vector<64x9xf32> to vector<1x64x9xf32>
    tpu.vector_store %arg13[%c0_104, %c768, %c0_105], %211 {strides = array<i32>} : memref<1x1008x9xf32, #tpu.memory_space<vmem>>, vector<1x64x9xf32>,
    %c1_106 = arith.constant 1 : index
    %c0_107 = arith.constant 0 : index
    %c0_108 = arith.constant 0 : index
    %212 = vector.load %arg5[%c1_106, %c0_107, %c0_108] : memref<3x16x9xf32, #tpu.memory_space<vmem>>, vector<1x16x9xf32>
    %213 = vector.shape_cast %212 : vector<1x16x9xf32> to vector<16x9xf32>
    %214 = arith.truncf %213 : vector<16x9xf32> to vector<16x9xbf16>
    %cst_109 = arith.constant dense<0.000000e+00> : vector<64x9xf32>
    %215 = tpu.matmul %152, %214, %cst_109 {dimension_numbers = #tpu.dot_dimension_numbers<[1], [0], [0], [1], [0, 0, 1, 1], [], []>} : vector<64x16xbf16>, vector<16x9xbf16>, vector<64x9xf32> -> vector<64x9xf32>
    %c1_110 = arith.constant 1 : index
    %c0_111 = arith.constant 0 : index
    %c0_112 = arith.constant 0 : index
    %216 = vector.load %arg8[%c1_110, %c0_111, %c0_112] : memref<3x1x9xf32, #tpu.memory_space<vmem>>, vector<1x1x9xf32>
    %217 = vector.shape_cast %216 : vector<1x1x9xf32> to vector<1x9xf32>
    %218 = vector.broadcast %217 : vector<1x9xf32> to vector<64x9xf32>
    %219 = arith.addf %215, %218 : vector<64x9xf32>
    %cst_113 = arith.constant 0.000000e+00 : f32
    %220 = vector.broadcast %cst_113 : f32 to vector<64x9xf32>
    %221 = arith.subf %220, %219 : vector<64x9xf32>
    %222 = math.exp %221 : vector<64x9xf32>
    %cst_114 = arith.constant 1.000000e+00 : f32
    %223 = vector.broadcast %cst_114 : f32 to vector<64x9xf32>
    %224 = arith.addf %223, %222 : vector<64x9xf32>
    %225 = tpu.reciprocal %224 {approx = true} : vector<64x9xf32> -> vector<64x9xf32>
    %c2_i32_115 = arith.constant 2 : i32
    %226 = vector.broadcast %c2_i32_115 : i32 to vector<64x9xi32>
    %227 = arith.cmpi eq, %153, %226 : vector<64x9xi32>
    %c3_i32_116 = arith.constant 3 : i32
    %228 = vector.broadcast %c3_i32_116 : i32 to vector<64x9xi32>
    %229 = arith.cmpi eq, %153, %228 : vector<64x9xi32>
    %cst_117 = arith.constant 4.500000e+01 : f32
    %cst_118 = arith.constant 1.000000e+00 : f32
    %230 = vector.broadcast %cst_117 : f32 to vector<64x9xf32>
    %231 = vector.broadcast %cst_118 : f32 to vector<64x9xf32>
    %232 = arith.select %229, %230, %231 : vector<64x9xi1>, vector<64x9xf32>
    %cst_119 = arith.constant 6.200000e+01 : f32
    %233 = vector.broadcast %cst_119 : f32 to vector<64x9xf32>
    %234 = arith.select %227, %233, %232 : vector<64x9xi1>, vector<64x9xf32>
    %cst_120 = arith.constant 2.000000e+00 : f32
    %235 = vector.broadcast %cst_120 : f32 to vector<64x9xf32>
    %236 = arith.mulf %225, %235 : vector<64x9xf32>
    %cst_121 = arith.constant 5.000000e-01 : f32
    %237 = vector.broadcast %cst_121 : f32 to vector<64x9xf32>
    %238 = arith.subf %236, %237 : vector<64x9xf32>
    %239 = arith.addf %238, %167 : vector<64x9xf32>
    %cst_122 = arith.constant 4.000000e+00 : f32
    %240 = vector.broadcast %cst_122 : f32 to vector<64x9xf32>
    %241 = arith.mulf %239, %240 : vector<64x9xf32>
    %242 = arith.mulf %236, %236 : vector<64x9xf32>
    %243 = arith.mulf %242, %234 : vector<64x9xf32>
    %c2_i32_123 = arith.constant 2 : i32
    %244 = vector.broadcast %c2_i32_123 : i32 to vector<64x9xi32>
    %245 = arith.cmpi slt, %153, %244 : vector<64x9xi32>
    %c4_i32_124 = arith.constant 4 : i32
    %246 = vector.broadcast %c4_i32_124 : i32 to vector<64x9xi32>
    %247 = arith.cmpi slt, %153, %246 : vector<64x9xi32>
    %248 = arith.select %247, %243, %225 : vector<64x9xi1>, vector<64x9xf32>
    %249 = arith.select %245, %241, %248 : vector<64x9xi1>, vector<64x9xf32>
    %c0_125 = arith.constant 0 : index
    %c1_126 = arith.constant 1 : index
    %c0_127 = arith.constant 0 : index
    %c0_128 = arith.constant 0 : index
    %250 = vector.load %arg11[%c0_125, %c1_126, %c0_127, %c0_128] : memref<1x3x64x9xf32, #tpu.memory_space<vmem>>, vector<1x1x64x9xf32>
    %251 = vector.shape_cast %250 : vector<1x1x64x9xf32> to vector<64x9xf32>
    %252 = vector.shape_cast %219 : vector<64x9xf32> to vector<1x1x64x9xf32>
    tpu.vector_store %arg11[%c0_125, %c1_126, %c0_127, %c0_128], %252 {strides = array<i32>} : memref<1x3x64x9xf32, #tpu.memory_space<vmem>>, vector<1x1x64x9xf32>,
    %c0_129 = arith.constant 0 : index
    %c832 = arith.constant 832 : index
    %c0_130 = arith.constant 0 : index
    %253 = vector.load %arg13[%c0_129, %c832, %c0_130] : memref<1x1008x9xf32, #tpu.memory_space<vmem>>, vector<1x64x9xf32>
    %254 = vector.shape_cast %253 : vector<1x64x9xf32> to vector<64x9xf32>
    %255 = vector.shape_cast %249 : vector<64x9xf32> to vector<1x64x9xf32>
    tpu.vector_store %arg13[%c0_129, %c832, %c0_130], %255 {strides = array<i32>} : memref<1x1008x9xf32, #tpu.memory_space<vmem>>, vector<1x64x9xf32>,
    %c2_131 = arith.constant 2 : index
    %c0_132 = arith.constant 0 : index
    %c0_133 = arith.constant 0 : index
    %256 = vector.load %arg5[%c2_131, %c0_132, %c0_133] : memref<3x16x9xf32, #tpu.memory_space<vmem>>, vector<1x16x9xf32>
    %257 = vector.shape_cast %256 : vector<1x16x9xf32> to vector<16x9xf32>
    %258 = arith.truncf %257 : vector<16x9xf32> to vector<16x9xbf16>
    %cst_134 = arith.constant dense<0.000000e+00> : vector<64x9xf32>
    %259 = tpu.matmul %152, %258, %cst_134 {dimension_numbers = #tpu.dot_dimension_numbers<[1], [0], [0], [1], [0, 0, 1, 1], [], []>} : vector<64x16xbf16>, vector<16x9xbf16>, vector<64x9xf32> -> vector<64x9xf32>
    %c2_135 = arith.constant 2 : index
    %c0_136 = arith.constant 0 : index
    %c0_137 = arith.constant 0 : index
    %260 = vector.load %arg8[%c2_135, %c0_136, %c0_137] : memref<3x1x9xf32, #tpu.memory_space<vmem>>, vector<1x1x9xf32>
    %261 = vector.shape_cast %260 : vector<1x1x9xf32> to vector<1x9xf32>
    %262 = vector.broadcast %261 : vector<1x9xf32> to vector<64x9xf32>
    %263 = arith.addf %259, %262 : vector<64x9xf32>
    %cst_138 = arith.constant 0.000000e+00 : f32
    %264 = vector.broadcast %cst_138 : f32 to vector<64x9xf32>
    %265 = arith.subf %264, %263 : vector<64x9xf32>
    %266 = math.exp %265 : vector<64x9xf32>
    %cst_139 = arith.constant 1.000000e+00 : f32
    %267 = vector.broadcast %cst_139 : f32 to vector<64x9xf32>
    %268 = arith.addf %267, %266 : vector<64x9xf32>
    %269 = tpu.reciprocal %268 {approx = true} : vector<64x9xf32> -> vector<64x9xf32>
    %c2_i32_140 = arith.constant 2 : i32
    %270 = vector.broadcast %c2_i32_140 : i32 to vector<64x9xi32>
    %271 = arith.cmpi eq, %153, %270 : vector<64x9xi32>
    %c3_i32_141 = arith.constant 3 : i32
    %272 = vector.broadcast %c3_i32_141 : i32 to vector<64x9xi32>
    %273 = arith.cmpi eq, %153, %272 : vector<64x9xi32>
    %cst_142 = arith.constant 1.190000e+02 : f32
    %cst_143 = arith.constant 1.000000e+00 : f32
    %274 = vector.broadcast %cst_142 : f32 to vector<64x9xf32>
    %275 = vector.broadcast %cst_143 : f32 to vector<64x9xf32>
    %276 = arith.select %273, %274, %275 : vector<64x9xi1>, vector<64x9xf32>
    %cst_144 = arith.constant 5.900000e+01 : f32
    %277 = vector.broadcast %cst_144 : f32 to vector<64x9xf32>
    %278 = arith.select %271, %277, %276 : vector<64x9xi1>, vector<64x9xf32>
    %cst_145 = arith.constant 2.000000e+00 : f32
    %279 = vector.broadcast %cst_145 : f32 to vector<64x9xf32>
    %280 = arith.mulf %269, %279 : vector<64x9xf32>
    %cst_146 = arith.constant 5.000000e-01 : f32
    %281 = vector.broadcast %cst_146 : f32 to vector<64x9xf32>
    %282 = arith.subf %280, %281 : vector<64x9xf32>
    %283 = arith.addf %282, %167 : vector<64x9xf32>
    %cst_147 = arith.constant 4.000000e+00 : f32
    %284 = vector.broadcast %cst_147 : f32 to vector<64x9xf32>
    %285 = arith.mulf %283, %284 : vector<64x9xf32>
    %286 = arith.mulf %280, %280 : vector<64x9xf32>
    %287 = arith.mulf %286, %278 : vector<64x9xf32>
    %c2_i32_148 = arith.constant 2 : i32
    %288 = vector.broadcast %c2_i32_148 : i32 to vector<64x9xi32>
    %289 = arith.cmpi slt, %153, %288 : vector<64x9xi32>
    %c4_i32_149 = arith.constant 4 : i32
    %290 = vector.broadcast %c4_i32_149 : i32 to vector<64x9xi32>
    %291 = arith.cmpi slt, %153, %290 : vector<64x9xi32>
    %292 = arith.select %291, %287, %269 : vector<64x9xi1>, vector<64x9xf32>
    %293 = arith.select %289, %285, %292 : vector<64x9xi1>, vector<64x9xf32>
    %c0_150 = arith.constant 0 : index
    %c2_151 = arith.constant 2 : index
    %c0_152 = arith.constant 0 : index
    %c0_153 = arith.constant 0 : index
    %294 = vector.load %arg11[%c0_150, %c2_151, %c0_152, %c0_153] : memref<1x3x64x9xf32, #tpu.memory_space<vmem>>, vector<1x1x64x9xf32>
    %295 = vector.shape_cast %294 : vector<1x1x64x9xf32> to vector<64x9xf32>
    %296 = vector.shape_cast %263 : vector<64x9xf32> to vector<1x1x64x9xf32>
    tpu.vector_store %arg11[%c0_150, %c2_151, %c0_152, %c0_153], %296 {strides = array<i32>} : memref<1x3x64x9xf32, #tpu.memory_space<vmem>>, vector<1x1x64x9xf32>,
    %c0_154 = arith.constant 0 : index
    %c896 = arith.constant 896 : index
    %c0_155 = arith.constant 0 : index
    %297 = vector.load %arg13[%c0_154, %c896, %c0_155] : memref<1x1008x9xf32, #tpu.memory_space<vmem>>, vector<1x64x9xf32>
    %298 = vector.shape_cast %297 : vector<1x64x9xf32> to vector<64x9xf32>
    %299 = vector.shape_cast %293 : vector<64x9xf32> to vector<1x64x9xf32>
    tpu.vector_store %arg13[%c0_154, %c896, %c0_155], %299 {strides = array<i32>} : memref<1x1008x9xf32, #tpu.memory_space<vmem>>, vector<1x64x9xf32>,
    %c0_156 = arith.constant 0 : index
    %c0_157 = arith.constant 0 : index
    %c0_158 = arith.constant 0 : index
    %300 = vector.load %arg3[%c0_156, %c0_157, %c0_158] : memref<1x16x32xf32, #tpu.memory_space<vmem>>, vector<1x16x32xf32>
    %301 = vector.shape_cast %300 : vector<1x16x32xf32> to vector<16x32xf32>
    %302 = arith.truncf %301 : vector<16x32xf32> to vector<16x32xbf16>
    %303 = tpu.iota {dimensions = array<i32: 1>} : vector<16x9xi32>
    %304 = tpu.iota {dimensions = array<i32: 0>} : vector<16x9xi32>
    %c3_i32_159 = arith.constant 3 : i32
    %305 = vector.broadcast %c3_i32_159 : i32 to vector<16x9xi32>
    %306 = arith.andi %304, %305 : vector<16x9xi32>
    %307 = arith.sitofp %306 : vector<16x9xi32> to vector<16x9xf32>
    %c2_i32_160 = arith.constant 2 : i32
    %308 = vector.broadcast %c2_i32_160 : i32 to vector<16x9xi32>
    %309 = arith.shrsi %304, %308 : vector<16x9xi32>
    %310 = arith.sitofp %309 : vector<16x9xi32> to vector<16x9xf32>
    %c0_i32_161 = arith.constant 0 : i32
    %311 = vector.broadcast %c0_i32_161 : i32 to vector<16x9xi32>
    %312 = arith.cmpi eq, %303, %311 : vector<16x9xi32>
    %c1_i32_162 = arith.constant 1 : i32
    %313 = vector.broadcast %c1_i32_162 : i32 to vector<16x9xi32>
    %314 = arith.cmpi eq, %303, %313 : vector<16x9xi32>
    %cst_163 = arith.constant 0.000000e+00 : f32
    %315 = vector.broadcast %cst_163 : f32 to vector<16x9xf32>
    %316 = arith.select %314, %310, %315 : vector<16x9xi1>, vector<16x9xf32>
    %317 = arith.select %312, %307, %316 : vector<16x9xi1>, vector<16x9xf32>
    %c0_164 = arith.constant 0 : index
    %c0_165 = arith.constant 0 : index
    %c0_166 = arith.constant 0 : index
    %318 = vector.load %arg6[%c0_164, %c0_165, %c0_166] : memref<3x32x9xf32, #tpu.memory_space<vmem>>, vector<1x32x9xf32>
    %319 = vector.shape_cast %318 : vector<1x32x9xf32> to vector<32x9xf32>
    %320 = arith.truncf %319 : vector<32x9xf32> to vector<32x9xbf16>
    %cst_167 = arith.constant dense<0.000000e+00> : vector<16x9xf32>
    %321 = tpu.matmul %302, %320, %cst_167 {dimension_numbers = #tpu.dot_dimension_numbers<[1], [0], [0], [1], [0, 0, 1, 1], [], []>} : vector<16x32xbf16>, vector<32x9xbf16>, vector<16x9xf32> -> vector<16x9xf32>
    %c0_168 = arith.constant 0 : index
    %c0_169 = arith.constant 0 : index
    %c0_170 = arith.constant 0 : index
    %322 = vector.load %arg9[%c0_168, %c0_169, %c0_170] : memref<3x1x9xf32, #tpu.memory_space<vmem>>, vector<1x1x9xf32>
    %323 = vector.shape_cast %322 : vector<1x1x9xf32> to vector<1x9xf32>
    %324 = vector.broadcast %323 : vector<1x9xf32> to vector<16x9xf32>
    %325 = arith.addf %321, %324 : vector<16x9xf32>
    %cst_171 = arith.constant 0.000000e+00 : f32
    %326 = vector.broadcast %cst_171 : f32 to vector<16x9xf32>
    %327 = arith.subf %326, %325 : vector<16x9xf32>
    %328 = math.exp %327 : vector<16x9xf32>
    %cst_172 = arith.constant 1.000000e+00 : f32
    %329 = vector.broadcast %cst_172 : f32 to vector<16x9xf32>
    %330 = arith.addf %329, %328 : vector<16x9xf32>
    %331 = tpu.reciprocal %330 {approx = true} : vector<16x9xf32> -> vector<16x9xf32>
    %c2_i32_173 = arith.constant 2 : i32
    %332 = vector.broadcast %c2_i32_173 : i32 to vector<16x9xi32>
    %333 = arith.cmpi eq, %303, %332 : vector<16x9xi32>
    %c3_i32_174 = arith.constant 3 : i32
    %334 = vector.broadcast %c3_i32_174 : i32 to vector<16x9xi32>
    %335 = arith.cmpi eq, %303, %334 : vector<16x9xi32>
    %cst_175 = arith.constant 9.000000e+01 : f32
    %cst_176 = arith.constant 1.000000e+00 : f32
    %336 = vector.broadcast %cst_175 : f32 to vector<16x9xf32>
    %337 = vector.broadcast %cst_176 : f32 to vector<16x9xf32>
    %338 = arith.select %335, %336, %337 : vector<16x9xi1>, vector<16x9xf32>
    %cst_177 = arith.constant 1.160000e+02 : f32
    %339 = vector.broadcast %cst_177 : f32 to vector<16x9xf32>
    %340 = arith.select %333, %339, %338 : vector<16x9xi1>, vector<16x9xf32>
    %cst_178 = arith.constant 2.000000e+00 : f32
    %341 = vector.broadcast %cst_178 : f32 to vector<16x9xf32>
    %342 = arith.mulf %331, %341 : vector<16x9xf32>
    %cst_179 = arith.constant 5.000000e-01 : f32
    %343 = vector.broadcast %cst_179 : f32 to vector<16x9xf32>
    %344 = arith.subf %342, %343 : vector<16x9xf32>
    %345 = arith.addf %344, %317 : vector<16x9xf32>
    %cst_180 = arith.constant 8.000000e+00 : f32
    %346 = vector.broadcast %cst_180 : f32 to vector<16x9xf32>
    %347 = arith.mulf %345, %346 : vector<16x9xf32>
    %348 = arith.mulf %342, %342 : vector<16x9xf32>
    %349 = arith.mulf %348, %340 : vector<16x9xf32>
    %c2_i32_181 = arith.constant 2 : i32
    %350 = vector.broadcast %c2_i32_181 : i32 to vector<16x9xi32>
    %351 = arith.cmpi slt, %303, %350 : vector<16x9xi32>
    %c4_i32_182 = arith.constant 4 : i32
    %352 = vector.broadcast %c4_i32_182 : i32 to vector<16x9xi32>
    %353 = arith.cmpi slt, %303, %352 : vector<16x9xi32>
    %354 = arith.select %353, %349, %331 : vector<16x9xi1>, vector<16x9xf32>
    %355 = arith.select %351, %347, %354 : vector<16x9xi1>, vector<16x9xf32>
    %c0_183 = arith.constant 0 : index
    %c0_184 = arith.constant 0 : index
    %c0_185 = arith.constant 0 : index
    %c0_186 = arith.constant 0 : index
    %356 = vector.load %arg12[%c0_183, %c0_184, %c0_185, %c0_186] : memref<1x3x16x9xf32, #tpu.memory_space<vmem>>, vector<1x1x16x9xf32>
    %357 = vector.shape_cast %356 : vector<1x1x16x9xf32> to vector<16x9xf32>
    %358 = vector.shape_cast %325 : vector<16x9xf32> to vector<1x1x16x9xf32>
    tpu.vector_store %arg12[%c0_183, %c0_184, %c0_185, %c0_186], %358 {strides = array<i32>} : memref<1x3x16x9xf32, #tpu.memory_space<vmem>>, vector<1x1x16x9xf32>,
    %c0_187 = arith.constant 0 : index
    %c960 = arith.constant 960 : index
    %c0_188 = arith.constant 0 : index
    %359 = vector.load %arg13[%c0_187, %c960, %c0_188] : memref<1x1008x9xf32, #tpu.memory_space<vmem>>, vector<1x16x9xf32>
    %360 = vector.shape_cast %359 : vector<1x16x9xf32> to vector<16x9xf32>
    %361 = vector.shape_cast %355 : vector<16x9xf32> to vector<1x16x9xf32>
    tpu.vector_store %arg13[%c0_187, %c960, %c0_188], %361 {strides = array<i32>} : memref<1x1008x9xf32, #tpu.memory_space<vmem>>, vector<1x16x9xf32>,
    %c1_189 = arith.constant 1 : index
    %c0_190 = arith.constant 0 : index
    %c0_191 = arith.constant 0 : index
    %362 = vector.load %arg6[%c1_189, %c0_190, %c0_191] : memref<3x32x9xf32, #tpu.memory_space<vmem>>, vector<1x32x9xf32>
    %363 = vector.shape_cast %362 : vector<1x32x9xf32> to vector<32x9xf32>
    %364 = arith.truncf %363 : vector<32x9xf32> to vector<32x9xbf16>
    %cst_192 = arith.constant dense<0.000000e+00> : vector<16x9xf32>
    %365 = tpu.matmul %302, %364, %cst_192 {dimension_numbers = #tpu.dot_dimension_numbers<[1], [0], [0], [1], [0, 0, 1, 1], [], []>} : vector<16x32xbf16>, vector<32x9xbf16>, vector<16x9xf32> -> vector<16x9xf32>
    %c1_193 = arith.constant 1 : index
    %c0_194 = arith.constant 0 : index
    %c0_195 = arith.constant 0 : index
    %366 = vector.load %arg9[%c1_193, %c0_194, %c0_195] : memref<3x1x9xf32, #tpu.memory_space<vmem>>, vector<1x1x9xf32>
    %367 = vector.shape_cast %366 : vector<1x1x9xf32> to vector<1x9xf32>
    %368 = vector.broadcast %367 : vector<1x9xf32> to vector<16x9xf32>
    %369 = arith.addf %365, %368 : vector<16x9xf32>
    %cst_196 = arith.constant 0.000000e+00 : f32
    %370 = vector.broadcast %cst_196 : f32 to vector<16x9xf32>
    %371 = arith.subf %370, %369 : vector<16x9xf32>
    %372 = math.exp %371 : vector<16x9xf32>
    %cst_197 = arith.constant 1.000000e+00 : f32
    %373 = vector.broadcast %cst_197 : f32 to vector<16x9xf32>
    %374 = arith.addf %373, %372 : vector<16x9xf32>
    %375 = tpu.reciprocal %374 {approx = true} : vector<16x9xf32> -> vector<16x9xf32>
    %c2_i32_198 = arith.constant 2 : i32
    %376 = vector.broadcast %c2_i32_198 : i32 to vector<16x9xi32>
    %377 = arith.cmpi eq, %303, %376 : vector<16x9xi32>
    %c3_i32_199 = arith.constant 3 : i32
    %378 = vector.broadcast %c3_i32_199 : i32 to vector<16x9xi32>
    %379 = arith.cmpi eq, %303, %378 : vector<16x9xi32>
    %cst_200 = arith.constant 1.980000e+02 : f32
    %cst_201 = arith.constant 1.000000e+00 : f32
    %380 = vector.broadcast %cst_200 : f32 to vector<16x9xf32>
    %381 = vector.broadcast %cst_201 : f32 to vector<16x9xf32>
    %382 = arith.select %379, %380, %381 : vector<16x9xi1>, vector<16x9xf32>
    %cst_202 = arith.constant 1.560000e+02 : f32
    %383 = vector.broadcast %cst_202 : f32 to vector<16x9xf32>
    %384 = arith.select %377, %383, %382 : vector<16x9xi1>, vector<16x9xf32>
    %cst_203 = arith.constant 2.000000e+00 : f32
    %385 = vector.broadcast %cst_203 : f32 to vector<16x9xf32>
    %386 = arith.mulf %375, %385 : vector<16x9xf32>
    %cst_204 = arith.constant 5.000000e-01 : f32
    %387 = vector.broadcast %cst_204 : f32 to vector<16x9xf32>
    %388 = arith.subf %386, %387 : vector<16x9xf32>
    %389 = arith.addf %388, %317 : vector<16x9xf32>
    %cst_205 = arith.constant 8.000000e+00 : f32
    %390 = vector.broadcast %cst_205 : f32 to vector<16x9xf32>
    %391 = arith.mulf %389, %390 : vector<16x9xf32>
    %392 = arith.mulf %386, %386 : vector<16x9xf32>
    %393 = arith.mulf %392, %384 : vector<16x9xf32>
    %c2_i32_206 = arith.constant 2 : i32
    %394 = vector.broadcast %c2_i32_206 : i32 to vector<16x9xi32>
    %395 = arith.cmpi slt, %303, %394 : vector<16x9xi32>
    %c4_i32_207 = arith.constant 4 : i32
    %396 = vector.broadcast %c4_i32_207 : i32 to vector<16x9xi32>
    %397 = arith.cmpi slt, %303, %396 : vector<16x9xi32>
    %398 = arith.select %397, %393, %375 : vector<16x9xi1>, vector<16x9xf32>
    %399 = arith.select %395, %391, %398 : vector<16x9xi1>, vector<16x9xf32>
    %c0_208 = arith.constant 0 : index
    %c1_209 = arith.constant 1 : index
    %c0_210 = arith.constant 0 : index
    %c0_211 = arith.constant 0 : index
    %400 = vector.load %arg12[%c0_208, %c1_209, %c0_210, %c0_211] : memref<1x3x16x9xf32, #tpu.memory_space<vmem>>, vector<1x1x16x9xf32>
    %401 = vector.shape_cast %400 : vector<1x1x16x9xf32> to vector<16x9xf32>
    %402 = vector.shape_cast %369 : vector<16x9xf32> to vector<1x1x16x9xf32>
    tpu.vector_store %arg12[%c0_208, %c1_209, %c0_210, %c0_211], %402 {strides = array<i32>} : memref<1x3x16x9xf32, #tpu.memory_space<vmem>>, vector<1x1x16x9xf32>,
    %c0_212 = arith.constant 0 : index
    %c976 = arith.constant 976 : index
    %c0_213 = arith.constant 0 : index
    %403 = vector.load %arg13[%c0_212, %c976, %c0_213] : memref<1x1008x9xf32, #tpu.memory_space<vmem>>, vector<1x16x9xf32>
    %404 = vector.shape_cast %403 : vector<1x16x9xf32> to vector<16x9xf32>
    %405 = vector.shape_cast %399 : vector<16x9xf32> to vector<1x16x9xf32>
    tpu.vector_store %arg13[%c0_212, %c976, %c0_213], %405 {strides = array<i32>} : memref<1x1008x9xf32, #tpu.memory_space<vmem>>, vector<1x16x9xf32>,
    %c2_214 = arith.constant 2 : index
    %c0_215 = arith.constant 0 : index
    %c0_216 = arith.constant 0 : index
    %406 = vector.load %arg6[%c2_214, %c0_215, %c0_216] : memref<3x32x9xf32, #tpu.memory_space<vmem>>, vector<1x32x9xf32>
    %407 = vector.shape_cast %406 : vector<1x32x9xf32> to vector<32x9xf32>
    %408 = arith.truncf %407 : vector<32x9xf32> to vector<32x9xbf16>
    %cst_217 = arith.constant dense<0.000000e+00> : vector<16x9xf32>
    %409 = tpu.matmul %302, %408, %cst_217 {dimension_numbers = #tpu.dot_dimension_numbers<[1], [0], [0], [1], [0, 0, 1, 1], [], []>} : vector<16x32xbf16>, vector<32x9xbf16>, vector<16x9xf32> -> vector<16x9xf32>
    %c2_218 = arith.constant 2 : index
    %c0_219 = arith.constant 0 : index
    %c0_220 = arith.constant 0 : index
    %410 = vector.load %arg9[%c2_218, %c0_219, %c0_220] : memref<3x1x9xf32, #tpu.memory_space<vmem>>, vector<1x1x9xf32>
    %411 = vector.shape_cast %410 : vector<1x1x9xf32> to vector<1x9xf32>
    %412 = vector.broadcast %411 : vector<1x9xf32> to vector<16x9xf32>
    %413 = arith.addf %409, %412 : vector<16x9xf32>
    %cst_221 = arith.constant 0.000000e+00 : f32
    %414 = vector.broadcast %cst_221 : f32 to vector<16x9xf32>
    %415 = arith.subf %414, %413 : vector<16x9xf32>
    %416 = math.exp %415 : vector<16x9xf32>
    %cst_222 = arith.constant 1.000000e+00 : f32
    %417 = vector.broadcast %cst_222 : f32 to vector<16x9xf32>
    %418 = arith.addf %417, %416 : vector<16x9xf32>
    %419 = tpu.reciprocal %418 {approx = true} : vector<16x9xf32> -> vector<16x9xf32>
    %c2_i32_223 = arith.constant 2 : i32
    %420 = vector.broadcast %c2_i32_223 : i32 to vector<16x9xi32>
    %421 = arith.cmpi eq, %303, %420 : vector<16x9xi32>
    %c3_i32_224 = arith.constant 3 : i32
    %422 = vector.broadcast %c3_i32_224 : i32 to vector<16x9xi32>
    %423 = arith.cmpi eq, %303, %422 : vector<16x9xi32>
    %cst_225 = arith.constant 3.260000e+02 : f32
    %cst_226 = arith.constant 1.000000e+00 : f32
    %424 = vector.broadcast %cst_225 : f32 to vector<16x9xf32>
    %425 = vector.broadcast %cst_226 : f32 to vector<16x9xf32>
    %426 = arith.select %423, %424, %425 : vector<16x9xi1>, vector<16x9xf32>
    %cst_227 = arith.constant 3.730000e+02 : f32
    %427 = vector.broadcast %cst_227 : f32 to vector<16x9xf32>
    %428 = arith.select %421, %427, %426 : vector<16x9xi1>, vector<16x9xf32>
    %cst_228 = arith.constant 2.000000e+00 : f32
    %429 = vector.broadcast %cst_228 : f32 to vector<16x9xf32>
    %430 = arith.mulf %419, %429 : vector<16x9xf32>
    %cst_229 = arith.constant 5.000000e-01 : f32
    %431 = vector.broadcast %cst_229 : f32 to vector<16x9xf32>
    %432 = arith.subf %430, %431 : vector<16x9xf32>
    %433 = arith.addf %432, %317 : vector<16x9xf32>
    %cst_230 = arith.constant 8.000000e+00 : f32
    %434 = vector.broadcast %cst_230 : f32 to vector<16x9xf32>
    %435 = arith.mulf %433, %434 : vector<16x9xf32>
    %436 = arith.mulf %430, %430 : vector<16x9xf32>
    %437 = arith.mulf %436, %428 : vector<16x9xf32>
    %c2_i32_231 = arith.constant 2 : i32
    %438 = vector.broadcast %c2_i32_231 : i32 to vector<16x9xi32>
    %439 = arith.cmpi slt, %303, %438 : vector<16x9xi32>
    %c4_i32_232 = arith.constant 4 : i32
    %440 = vector.broadcast %c4_i32_232 : i32 to vector<16x9xi32>
    %441 = arith.cmpi slt, %303, %440 : vector<16x9xi32>
    %442 = arith.select %441, %437, %419 : vector<16x9xi1>, vector<16x9xf32>
    %443 = arith.select %439, %435, %442 : vector<16x9xi1>, vector<16x9xf32>
    %c0_233 = arith.constant 0 : index
    %c2_234 = arith.constant 2 : index
    %c0_235 = arith.constant 0 : index
    %c0_236 = arith.constant 0 : index
    %444 = vector.load %arg12[%c0_233, %c2_234, %c0_235, %c0_236] : memref<1x3x16x9xf32, #tpu.memory_space<vmem>>, vector<1x1x16x9xf32>
    %445 = vector.shape_cast %444 : vector<1x1x16x9xf32> to vector<16x9xf32>
    %446 = vector.shape_cast %413 : vector<16x9xf32> to vector<1x1x16x9xf32>
    tpu.vector_store %arg12[%c0_233, %c2_234, %c0_235, %c0_236], %446 {strides = array<i32>} : memref<1x3x16x9xf32, #tpu.memory_space<vmem>>, vector<1x1x16x9xf32>,
    %c0_237 = arith.constant 0 : index
    %c992 = arith.constant 992 : index
    %c0_238 = arith.constant 0 : index
    %447 = vector.load %arg13[%c0_237, %c992, %c0_238] : memref<1x1008x9xf32, #tpu.memory_space<vmem>>, vector<1x16x9xf32>
    %448 = vector.shape_cast %447 : vector<1x16x9xf32> to vector<16x9xf32>
    %449 = vector.shape_cast %443 : vector<16x9xf32> to vector<1x16x9xf32>
    tpu.vector_store %arg13[%c0_237, %c992, %c0_238], %449 {strides = array<i32>} : memref<1x1008x9xf32, #tpu.memory_space<vmem>>, vector<1x16x9xf32>,
    return
  }
  func.func @transform_0(%arg0: i32) -> (i32, i32, i32) {
    %c0_i32 = arith.constant 0 : i32
    %c0_i32_0 = arith.constant 0 : i32
    %c0_i32_1 = arith.constant 0 : i32
    return %arg0, %c0_i32, %c0_i32_0 : i32, i32, i32
  }
  func.func @transform_1(%arg0: i32) -> (i32, i32, i32) {
    %c0_i32 = arith.constant 0 : i32
    %c0_i32_0 = arith.constant 0 : i32
    %c0_i32_1 = arith.constant 0 : i32
    return %arg0, %c0_i32, %c0_i32_0 : i32, i32, i32
  }
  func.func @transform_2(%arg0: i32) -> (i32, i32, i32) {
    %c0_i32 = arith.constant 0 : i32
    %c0_i32_0 = arith.constant 0 : i32
    %c0_i32_1 = arith.constant 0 : i32
    return %arg0, %c0_i32, %c0_i32_0 : i32, i32, i32
  }
  func.func @transform_3(%arg0: i32) -> (i32, i32, i32) {
    %c0_i32 = arith.constant 0 : i32
    %c0_i32_0 = arith.constant 0 : i32
    %c0_i32_1 = arith.constant 0 : i32
    %c0_i32_2 = arith.constant 0 : i32
    return %c0_i32, %c0_i32_0, %c0_i32_1 : i32, i32, i32
  }
  func.func @transform_4(%arg0: i32) -> (i32, i32, i32) {
    %c0_i32 = arith.constant 0 : i32
    %c0_i32_0 = arith.constant 0 : i32
    %c0_i32_1 = arith.constant 0 : i32
    %c0_i32_2 = arith.constant 0 : i32
    return %c0_i32, %c0_i32_0, %c0_i32_1 : i32, i32, i32
  }
  func.func @transform_5(%arg0: i32) -> (i32, i32, i32) {
    %c0_i32 = arith.constant 0 : i32
    %c0_i32_0 = arith.constant 0 : i32
    %c0_i32_1 = arith.constant 0 : i32
    %c0_i32_2 = arith.constant 0 : i32
    return %c0_i32, %c0_i32_0, %c0_i32_1 : i32, i32, i32
  }
  func.func @transform_6(%arg0: i32) -> (i32, i32, i32) {
    %c0_i32 = arith.constant 0 : i32
    %c0_i32_0 = arith.constant 0 : i32
    %c0_i32_1 = arith.constant 0 : i32
    %c0_i32_2 = arith.constant 0 : i32
    return %c0_i32, %c0_i32_0, %c0_i32_1 : i32, i32, i32
  }
  func.func @transform_7(%arg0: i32) -> (i32, i32, i32) {
    %c0_i32 = arith.constant 0 : i32
    %c0_i32_0 = arith.constant 0 : i32
    %c0_i32_1 = arith.constant 0 : i32
    %c0_i32_2 = arith.constant 0 : i32
    return %c0_i32, %c0_i32_0, %c0_i32_1 : i32, i32, i32
  }
  func.func @transform_8(%arg0: i32) -> (i32, i32, i32) {
    %c0_i32 = arith.constant 0 : i32
    %c0_i32_0 = arith.constant 0 : i32
    %c0_i32_1 = arith.constant 0 : i32
    %c0_i32_2 = arith.constant 0 : i32
    return %c0_i32, %c0_i32_0, %c0_i32_1 : i32, i32, i32
  }
  func.func @transform_9(%arg0: i32) -> (i32, i32, i32, i32) {
    %c0_i32 = arith.constant 0 : i32
    %c0_i32_0 = arith.constant 0 : i32
    %c0_i32_1 = arith.constant 0 : i32
    %c0_i32_2 = arith.constant 0 : i32
    return %arg0, %c0_i32, %c0_i32_0, %c0_i32_1 : i32, i32, i32, i32
  }
  func.func @transform_10(%arg0: i32) -> (i32, i32, i32, i32) {
    %c0_i32 = arith.constant 0 : i32
    %c0_i32_0 = arith.constant 0 : i32
    %c0_i32_1 = arith.constant 0 : i32
    %c0_i32_2 = arith.constant 0 : i32
    return %arg0, %c0_i32, %c0_i32_0, %c0_i32_1 : i32, i32, i32, i32
  }
  func.func @transform_11(%arg0: i32) -> (i32, i32, i32, i32) {
    %c0_i32 = arith.constant 0 : i32
    %c0_i32_0 = arith.constant 0 : i32
    %c0_i32_1 = arith.constant 0 : i32
    %c0_i32_2 = arith.constant 0 : i32
    return %arg0, %c0_i32, %c0_i32_0, %c0_i32_1 : i32, i32, i32, i32
  }
  func.func @transform_12(%arg0: i32) -> (i32, i32, i32) {
    %c0_i32 = arith.constant 0 : i32
    %c0_i32_0 = arith.constant 0 : i32
    %c0_i32_1 = arith.constant 0 : i32
    return %arg0, %c0_i32, %c0_i32_0 : i32, i32, i32
  }
}

</mosaic_0001>

<bundles_post_ra>
// kernel: model_forward.5
= control target key start
LH: loop header
LB: loop body
LE: loop exit
PB: predicated region body
PF: predicated region fallthrough
CT: control target
= control target key end

     0   :  { %s1614_s12 = smov 0   ;;  %s1843_s0 = inlined_call_operand.vmem [shape: f32[8,9,9,8], index: 0, kind: input, shape index: {}]   ;;  %s1844_s1 = inlined_call_operand.vmem [shape: f32[3,3,8,16], index: 1, kind: input, shape index: {}]   ;;  %s1845_s2 = inlined_call_operand.vmem [shape: f32[1,16], index: 2, kind: input, shape index: {}]   ;;  %s1846_s3 = inlined_call_operand.vmem [shape: f32[2,64,16], index: 3, kind: output, shape index: {}]  }
   0x1 LB: > { %s1620_s13 = sadd.s32 4294967295, %s1592_s12   ;;  %p1225_p0 = scmp.ge.s32.totalorder %s1592_s12, 1  ;;  %s1592_s12 = sphi %s1614_s12, %s13_s12  }
   0x2   : > { %p139_p1 = scmp.lt.s32.totalorder %s1592_s12, 3 }
   0x4   : > { %p140_p2 = pnand %p1225_p0, %p139_p1 }
   0x5   : > { %v1238_v0 = vld [vmem:[%s1844_s1 + $0x8] sm:$0xff] (!%p140_p2)  ;;  %vm220_vm0 = vcmask (!%p140_p2), 1043456   ;;  %v1273_v1 = vld [vmem:[%s1844_s1 + $0x20] sm:$0xff] (!%p140_p2)  ;;  %s1226_s18 = sshll.u32 (!%p140_p2), %s1620_s13, 2  ;;  %v1299_v10 = vld [vmem:[%s1844_s1 + $0x30] sm:$0xff] (!%p140_p2)  ;;  %vm207_vm1 = vcmask (!%p140_p2), 64512  }
   0x6   : > { %143 = sbr.rel (%p140_p2) target bundleno = 341 (0x155), region = 32  ;;  %v189_v2 = vld [vmem:[%s1844_s1] sm:$0xff] (!%p140_p2)  ;;  %v206_v3 = vpack.c.bf16 (!%p140_p2), %v1238_v0, %v1238_v0  ;;  %v1634_v4 = vpack.c.bf16 (!%p140_p2), %v1273_v1, %v1273_v1  ;;  %p165_p3 = scmp.lt.s32.totalorder (!%p140_p2), %s1226_s18, 7  ;;  %v1286_v6 = vld [vmem:[%s1844_s1 + $0x28] sm:$0xff] (!%p140_p2)  ;;  %v1247_v11 = vld [vmem:[%s1844_s1 + $0x10] sm:$0xff] (!%p140_p2)  ;;  %v798_v28 = vpack.c.bf16 (!%p140_p2), %v1299_v10, %v1299_v10  ;;  %vm1157_vm2 = vcmask (!%p140_p2), 130048  }
   0x7   : > { %v190_v5 = vpack.c.bf16 (!%p140_p2), %v189_v2, %v189_v2  ;;  %v694_v7 = vpack.c.bf16 (!%p140_p2), %v1286_v6, %v1286_v6  ;;  %v383_v32 = vpack.c.bf16 (!%p140_p2), %v1247_v11, %v1247_v11  ;;  %v1312_v44 = vld [vmem:[%s1844_s1 + $0x38] sm:$0xff] (!%p140_p2)  ;;  %p171_p4 = scmp.lt.s32.totalorder (!%p140_p2), %s1620_s13, 1 }
   0x8   : > { %1535 = vmatprep.subr.msk.bf16.mxu1 (!%p140_p2), %vm220_vm0, %v206_v3  ;;  %1539 = vmatprep.subr.msk.bf16.mxu0 (!%p140_p2), %vm220_vm0, %v1634_v4  ;;  %v222_v8 = vsel (!%p140_p2), %vm220_vm0, %v206_v3, 0  ;;  %v1645_v9 = vsel (!%p140_p2), %vm220_vm0, %v1634_v4, 0  ;;  %v812_v51 = vsel (!%p140_p2), %vm220_vm0, %v798_v28, 0  ;;  %v902_v52 = vpack.c.bf16 (!%p140_p2), %v1312_v44, %v1312_v44  ;;  %v1260_v53 = vld [vmem:[%s1844_s1 + $0x18] sm:$0xff] (!%p140_p2) }
   0x9   : > { %1380 = vmatpush3.bf16.msra.mxu1 (!%p140_p2), %v222_v8  ;;  %1420 = vmatpush3.bf16.msra.mxu0 (!%p140_p2), %v1645_v9  ;;  %v302_v21 = vsel (!%p140_p2), %vm220_vm0, %v190_v5, 0  ;;  %v708_v26 = vsel (!%p140_p2), %vm220_vm0, %v694_v7, 0  ;;  %v397_v56 = vsel (!%p140_p2), %vm220_vm0, %v383_v32, 0  ;;  %v487_v59 = vpack.c.bf16 (!%p140_p2), %v1260_v53, %v1260_v53 }
   0xa   : > { %1536 = vmatprep.subr.msk.bf16.mxu1 (!%p140_p2), %vm220_vm0, %v190_v5  ;;  %1541 = vmatprep.subr.msk.bf16.mxu0 (!%p140_p2), %vm220_vm0, %v694_v7  ;;  %v1325_v5 = vld [vmem:[%s1844_s1 + $0x40] sm:$0xff] (!%p140_p2) }
   0xd   : > { %s1848_s18 = smov (!%p165_p3, %s1226_s18), 7  ;;  %s1850_s13 = smov (!%p171_p4, %s1620_s13), 1 }
   0xe   : > { %s1545_s23 = smul.u32 144, %s1848_s18  ;;  %s1333_s14 = sshll.u32 %s1850_s13, 6 }
   0xf   : > { %s175_s17 = scalar_lea.vmem %s1846_s3, %s1333_s14 }
  0x10   : > { %s1653_s26 = scalar_lea.vmem %s1843_s0, %s1545_s23 }
  0x11   : > { %v1230_v12 = vld [vmem:[%s1653_s26 + $0x90] sm:$0xff]  ;;  %v1663_v13 = vld [vmem:[%s1653_s26 + $0xa0] sm:$0xff] }
  0x12   : > { %v1265_v14 = vld [vmem:[%s1653_s26 + $0x1b0] sm:$0xff]  ;;  %v200_v15 = vpack.c.bf16 %v1663_v13, %v1230_v12  ;;  %v1266_v16 = vld [vmem:[%s1653_s26 + $0x1c0] sm:$0xff] }
  0x13   : > { %v1669_v17 = vld [vmem:[%s1653_s26 + $0xb0] sm:$0xff]  ;;  %v1672_v18 = vld [vmem:[%s1653_s26 + $0xc0] sm:$0xff]  ;;  %v585_v19 = vpack.c.bf16 %v1266_v16, %v1265_v14  ;;  %v916_v14 = vsel %vm220_vm0, %v902_v52, 0 }
  0x14   : > { %v201_v20 = vpack.c.bf16 %v1672_v18, %v1669_v17  ;;  %v1267_v22 = vld [vmem:[%s1653_s26 + $0x1d0] sm:$0xff]  ;;  %v1268_v23 = vld [vmem:[%s1653_s26 + $0x1e0] sm:$0xff]  ;;  %1381 = vmatprep.mubr.msk.bf16.mxu1 %vm207_vm1, %v200_v15  ;;  %v1005_v15 = vpack.c.bf16 %v1325_v5, %v1325_v5 }
  0x15   : > { %v1680_v24 = vld [vmem:[%s1653_s26 + $0xd0] sm:$0xff]  ;;  %v586_v25 = vpack.c.bf16 %v1268_v23, %v1267_v22  ;;  %v1685_v27 = vld [vmem:[%s1653_s26 + $0xe0] sm:$0xff]  ;;  %1421 = vmatprep.mubr.msk.bf16.mxu0 %vm207_vm1, %v585_v19 }
  0x16   : > { %1382 = vmatmul.mubr.msk.bf16.vlgmr.msra.gmra.mrb[0].mxu1 %vm207_vm1, %v201_v20  ;;  %v202_v29 = vpack.c.bf16 %v1685_v27, %v1680_v24  ;;  %v1278_v30 = vld [vmem:[%s1653_s26 + $0x121] sm:$0xff]  ;;  %v1279_v31 = vld [vmem:[%s1653_s26 + $0x131] sm:$0xff]  ;;  %v501_v20 = vsel %vm220_vm0, %v487_v59, 0 }
  0x17   : > { %1390 = vmatpush3.bf16.msra.mxu1 %v302_v21  ;;  %1422 = vmatmul.mubr.msk.bf16.vlgmr.msra.gmra.mrb[0].mxu0 %vm207_vm1, %v586_v25  ;;  %v1695_v33 = vld [vmem:[%s1653_s26 + $0xf0] sm:$0xff]  ;;  %v1698_v34 = vld [vmem:[%s1653_s26 + $0x100] sm:$0xff]  ;;  %v688_v35 = vpack.c.bf16 %v1279_v31, %v1278_v30 }
  0x18   : > { %1430 = vmatpush3.bf16.msra.mxu0 %v708_v26  ;;  %1385 = vmatprep.mubr.msk.bf16.mxu1 %vm207_vm1, %v202_v29  ;;  %v177_v36 = vld [vmem:[%s1653_s26] sm:$0xff]  ;;  %v178_v37 = vld [vmem:[%s1653_s26 + $0x10] sm:$0xff]  ;;  %v203_v38 = vpack.c.bf16 %v1698_v34, %v1695_v33  ;;  %v896_v26 = vpack.c.bf16 %v1669_v17, %v1663_v13 }
  0x19   : > { %1431 = vmatprep.mubr.msk.bf16.mxu0 %vm207_vm1, %v688_v35  ;;  %1542 = vmatprep.subr.msk.bf16.mxu0 %vm220_vm0, %v798_v28  ;;  %v185_v39 = vpack.c.bf16 %v178_v37, %v177_v36  ;;  %v1280_v40 = vld [vmem:[%s1653_s26 + $0x141] sm:$0xff]  ;;  %v1281_v41 = vld [vmem:[%s1653_s26 + $0x151] sm:$0xff] }
  0x1a   : > { %1537 = vmatprep.subr.msk.bf16.mxu1 %vm220_vm0, %v383_v32  ;;  %v1282_v42 = vld [vmem:[%s1653_s26 + $0x161] sm:$0xff]  ;;  %v1283_v43 = vld [vmem:[%s1653_s26 + $0x171] sm:$0xff]  ;;  %v689_v45 = vpack.c.bf16 %v1281_v41, %v1280_v40  ;;  %v897_v32 = vpack.c.bf16 %v1680_v24, %v1672_v18 }
  0x1b   : > { %v179_v46 = vld [vmem:[%s1653_s26 + $0x20] sm:$0xff]  ;;  %v180_v47 = vld [vmem:[%s1653_s26 + $0x30] sm:$0xff]  ;;  %v690_v48 = vpack.c.bf16 %v1283_v43, %v1282_v42 }
  0x1c   : > { %v181_v49 = vld [vmem:[%s1653_s26 + $0x40] sm:$0xff]  ;;  %v182_v50 = vld [vmem:[%s1653_s26 + $0x50] sm:$0xff]  ;;  %v186_v54 = vpack.c.bf16 %v180_v47, %v179_v46  ;;  %v792_v63 = vpack.c.bf16 %v179_v46, %v178_v37  ;;  %v1019_v37 = vsel %vm220_vm0, %v1005_v15, 0 }
  0x1d   : > { %v187_v55 = vpack.c.bf16 %v182_v50, %v181_v49  ;;  %v1284_v57 = vld [vmem:[%s1653_s26 + $0x181] sm:$0xff]  ;;  %v1285_v58 = vld [vmem:[%s1653_s26 + $0x191] sm:$0xff]  ;;  %v793_v6 = vpack.c.bf16 %v181_v49, %v180_v47 }
  0x1e   : > { %1386 = vmatmul.mubr.msk.bf16.gmra.mrb[4].mxu1 %vm207_vm1, %v203_v38  ;;  %v691_v60 = vpack.c.bf16 %v1285_v58, %v1284_v57  ;;  %v183_v61 = vld [vmem:[%s1653_s26 + $0x60] sm:$0xff]  ;;  %v184_v62 = vld [vmem:[%s1653_s26 + $0x70] sm:$0xff] }
  0x1f   : > { %1391 = vmatprep.mubr.msk.bf16.mxu1 %vm207_vm1, %v185_v39  ;;  %v369_v0 = vld [vmem:[%s1653_s26 + $0x1] sm:$0xff]  ;;  %v1737_v1 = vld [vmem:[%s1653_s26 + $0x11] sm:$0xff]  ;;  %v188_v2 = vpack.c.bf16 %v184_v62, %v183_v61  ;;  %v794_v10 = vpack.c.bf16 %v183_v61, %v182_v50 }
  0x20   : > { %v377_v3 = vpack.c.bf16 %v1737_v1, %v369_v0  ;;  %v371_v7 = vld [vmem:[%s1653_s26 + $0x21] sm:$0xff]  ;;  %v372_v8 = vld [vmem:[%s1653_s26 + $0x31] sm:$0xff] }
  0x21   : > { %v373_v11 = vld [vmem:[%s1653_s26 + $0x41] sm:$0xff]  ;;  %v374_v12 = vld [vmem:[%s1653_s26 + $0x51] sm:$0xff]  ;;  %v378_v16 = vpack.c.bf16 %v372_v8, %v371_v7  ;;  %v999_v40 = vpack.c.bf16 %v371_v7, %v1737_v1 }
  0x22   : > { %v379_v19 = vpack.c.bf16 %v374_v12, %v373_v11  ;;  %v1298_v21 = vld [vmem:[%s1653_s26 + $0x80] sm:$0xff]  ;;  %v376_v25 = vld [vmem:[%s1653_s26 + $0x71] sm:$0xff] }
  0x23   : > { %1432 = vmatmul.mubr.msk.bf16.vlgmr.msra.gmra.mrb[0].mxu0 %vm207_vm1, %v689_v45  ;;  %v795_v22 = vpack.c.bf16 %v1298_v21, %v184_v62  ;;  %v375_v23 = vld [vmem:[%s1653_s26 + $0x61] sm:$0xff]  ;;  %v1253_v29 = vld [vmem:[%s1653_s26 + $0x130] sm:$0xff] }
  0x24   : > { %1440 = vmatpush3.bf16.msra.mxu0 %v812_v51  ;;  %1435 = vmatprep.mubr.msk.bf16.mxu0 %vm207_vm1, %v690_v48  ;;  %v1252_v28 = vld [vmem:[%s1653_s26 + $0x120] sm:$0xff]  ;;  %v380_v30 = vpack.c.bf16 %v376_v25, %v375_v23  ;;  %v1255_v17 = vld [vmem:[%s1653_s26 + $0x150] sm:$0xff] }
  0x25   : > { %1543 = vmatprep.subr.msk.bf16.mxu0 %vm220_vm0, %v902_v52  ;;  %v481_v31 = vpack.c.bf16 %v1253_v29, %v1252_v28  ;;  %v1254_v13 = vld [vmem:[%s1653_s26 + $0x140] sm:$0xff]  ;;  %v1257_v36 = vld [vmem:[%s1653_s26 + $0x170] sm:$0xff] }
  0x26   : > { %1392 = vmatmul.mubr.msk.bf16.vlgmr.msra.gmra.mrb[0].mxu1 %vm207_vm1, %v186_v54  ;;  %v1256_v35 = vld [vmem:[%s1653_s26 + $0x160] sm:$0xff]  ;;  %v482_v38 = vpack.c.bf16 %v1255_v17, %v1254_v13  ;;  %v1311_v18 = vld [vmem:[%s1653_s26 + $0x110] sm:$0xff] }
  0x27   : > { %1400 = vmatpush3.bf16.msra.mxu1 %v397_v56  ;;  %1395 = vmatprep.mubr.msk.bf16.mxu1 %vm207_vm1, %v187_v55  ;;  %v483_v39 = vpack.c.bf16 %v1257_v36, %v1256_v35  ;;  %v899_v24 = vpack.c.bf16 %v1311_v18, %v1698_v34  ;;  %v1269_v41 = vld [vmem:[%s1653_s26 + $0x1f0] sm:$0xff]  ;;  %v1270_v42 = vld [vmem:[%s1653_s26 + $0x200] sm:$0xff]  ;;  %v1001_v34 = vpack.c.bf16 %v375_v23, %v374_v12 }
  0x28   : > { %1538 = vmatprep.subr.msk.bf16.mxu1 %vm220_vm0, %v487_v59  ;;  %v587_v44 = vpack.c.bf16 %v1270_v42, %v1269_v41  ;;  %v1271_v45 = vld [vmem:[%s1653_s26 + $0x210] sm:$0xff]  ;;  %v1272_v46 = vld [vmem:[%s1653_s26 + $0x220] sm:$0xff] }
  0x29   : > { %v1324_v47 = vld [vmem:[%s1653_s26 + $0x81] sm:$0xff]  ;;  %v588_v48 = vpack.c.bf16 %v1272_v46, %v1271_v45  ;;  %v1330_v55 = vld [vmem:[%s1845_s2] ss:$0 sm:$0xff] }
  0x2a   : > { %v1002_v49 = vpack.c.bf16 %v1324_v47, %v376_v25 }
  0x2b   : > { %1436 = vmatmul.mubr.msk.bf16.gmra.mrb[4].mxu0 %vm207_vm1, %v691_v60 }
  0x2c   : > { %1441 = vmatprep.mubr.msk.bf16.mxu0 %vm207_vm1, %v792_v63 }
  0x2e   : > { %1396 = vmatmul.mubr.msk.bf16.gmra.mrb[4].mxu1 %vm207_vm1, %v188_v2 }
  0x2f   : > { %1401 = vmatprep.mubr.msk.bf16.mxu1 %vm207_vm1, %v377_v3 }
  0x33   : > { %1442 = vmatmul.mubr.msk.bf16.vlgmr.msra.gmra.mrb[0].mxu0 %vm207_vm1, %v793_v6 }
  0x34   : > { %1450 = vmatpush3.bf16.msra.mxu0 %v916_v14  ;;  %1445 = vmatprep.mubr.msk.bf16.mxu0 %vm207_vm1, %v794_v10 }
  0x35   : > { %1544 = vmatprep.subr.msk.bf16.mxu0 %vm220_vm0, %v1005_v15 }
  0x36   : > { %1402 = vmatmul.mubr.msk.bf16.vlgmr.msra.gmra.mrb[0].mxu1 %vm207_vm1, %v378_v16 }
  0x37   : > { %1410 = vmatpush3.bf16.msra.mxu1 %v501_v20  ;;  %1405 = vmatprep.mubr.msk.bf16.mxu1 %vm207_vm1, %v379_v19 }
  0x38   : > { %1540 = vmatprep.subr.msk.bf16.mxu1 %vm220_vm0, %v1634_v4  ;;  %v898_v4 = vpack.c.bf16 %v1695_v33, %v1685_v27  ;;  %v1258_v27 = vld [vmem:[%s1653_s26 + $0x180] sm:$0xff]  ;;  %v1259_v33 = vld [vmem:[%s1653_s26 + $0x190] sm:$0xff] }
  0x39   : > { %v484_v43 = vpack.c.bf16 %v1259_v33, %v1258_v27 }
  0x3b   : > { %1446 = vmatmul.mubr.msk.bf16.gmra.mrb[4].mxu0 %vm207_vm1, %v795_v22 }
  0x3c   : > { %1451 = vmatprep.mubr.msk.bf16.mxu0 %vm207_vm1, %v896_v26 }
  0x3e   : > { %1406 = vmatmul.mubr.msk.bf16.gmra.mrb[4].mxu1 %vm207_vm1, %v380_v30 }
  0x3f   : > { %1411 = vmatprep.mubr.msk.bf16.mxu1 %vm207_vm1, %v481_v31 }
  0x43   : > { %1452 = vmatmul.mubr.msk.bf16.vlgmr.msra.gmra.mrb[0].mxu0 %vm207_vm1, %v897_v32 }
  0x44   : > { %1460 = vmatpush3.bf16.msra.mxu0 %v1019_v37  ;;  %1455 = vmatprep.mubr.msk.bf16.mxu0 %vm207_vm1, %v898_v4 }
  0x46   : > { %1412 = vmatmul.mubr.msk.bf16.vlgmr.msra.gmra.mrb[0].mxu1 %vm207_vm1, %v482_v38 }
  0x47   : > { %1470 = vmatpush3.bf16.msra.mxu1 %v1645_v9  ;;  %1415 = vmatprep.mubr.msk.bf16.mxu1 %vm207_vm1, %v483_v39  ;;  %v1000_v9 = vpack.c.bf16 %v373_v11, %v372_v8 }
  0x4b   : > { %1456 = vmatmul.mubr.msk.bf16.gmra.mrb[4].mxu0 %vm207_vm1, %v899_v24 }
  0x4c   : > { %1461 = vmatprep.mubr.msk.bf16.mxu0 %vm207_vm1, %v999_v40 }
  0x4e   : > { %1416 = vmatmul.mubr.msk.bf16.gmra.mrb[4].mxu1 %vm207_vm1, %v484_v43 }
  0x4f   : > { %1425 = vmatprep.mubr.msk.bf16.mxu1 %vm207_vm1, %v587_v44 }
  0x53   : > { %1462 = vmatmul.mubr.msk.bf16.vlgmr.msra.gmra.mrb[0].mxu0 %vm207_vm1, %v1000_v9 }
  0x54   : > { %1465 = vmatprep.mubr.msk.bf16.mxu0 %vm207_vm1, %v1001_v34 }
  0x5a   : > { %1426 = vmatmul.mubr.msk.bf16.vlgmr.msra.gmra.mrb[4].mxu1 %vm207_vm1, %v588_v48 }
  0x5b   : > { %1466 = vmatmul.mubr.msk.bf16.gmra.mrb[4].mxu0 %vm207_vm1, %v1002_v49 }
 0x119   : > { %v1413_v50 = vpop.f32.mrb[0].mxu1 }
 0x11a   : > { %v537_v51 = vpop.f32.mrb[1].mxu1 }
 0x11b   : > { %v1414_v52 = vpop.f32.mrb[2].mxu1 }
 0x11c   : > { %v540_v53 = vpop.f32.mrb[3].mxu1 }
 0x126   : > { %v1463_v54 = vpop.f32.mrb[0].mxu0 }
 0x127   : > { %v1471_v56 = vadd.f32 %v1463_v54, %v1413_v50  ;;  %v1055_v57 = vpop.f32.mrb[1].mxu0 }
 0x128   : > { %v1472_v58 = vadd.f32 %v1055_v57, %v537_v51  ;;  %v1464_v59 = vpop.f32.mrb[2].mxu0 }
 0x129   : > { %v1807_v60 = vadd.f32 %v1471_v56, %v1330_v55  ;;  %v1473_v61 = vadd.f32 %v1464_v59, %v1414_v52  ;;  %v1058_v62 = vpop.f32.mrb[3].mxu0 }
 0x12a   : > { %v1809_v63 = vadd.f32 %v1472_v58, %v1330_v55  ;;  %v1474_v0 = vadd.f32 %v1058_v62, %v540_v53 }
 0x12b   : > { %v1111_v1 = vsub.f32 0.0, %v1807_v60  ;;  %v1812_v2 = vadd.f32 %v1473_v61, %v1330_v55 }
 0x12c   : > { %v1109_v3 = vsub.f32 0.0, %v1809_v63  ;;  %v1815_v5 = vadd.f32 %v1474_v0, %v1330_v55 }
 0x12d   : > { %v1121_v6 = vmul.f32 1.442695, %v1111_v1  ;;  %v1112_v7 = vsub.f32 0.0, %v1812_v2  ;;  %v1427_v8 = vpop.f32.mrb[4].mxu1 }
 0x12e   : > { %v1117_v10 = vmul.f32 1.442695, %v1109_v3  ;;  %v1110_v11 = vsub.f32 0.0, %v1815_v5  ;;  %v1467_v12 = vpop.f32.mrb[4].mxu0  ;;  %v657_v14 = vpop.f32.mrb[5].mxu1 }
 0x12f   : > { %1554 = vpow2.f32 %v1121_v6  ;;  %v1123_v15 = vmul.f32 1.442695, %v1112_v7  ;;  %v1475_v16 = vadd.f32 %v1467_v12, %v1427_v8  ;;  %v1071_v19 = vpop.f32.mrb[5].mxu0  ;;  %v1428_v20 = vpop.f32.mrb[6].mxu1 }
 0x130   : > { %1556 = vpow2.f32 %v1117_v10  ;;  %v1119_v21 = vmul.f32 1.442695, %v1110_v11  ;;  %v1476_v22 = vadd.f32 %v1071_v19, %v657_v14  ;;  %v1468_v23 = vpop.f32.mrb[6].mxu0  ;;  %v660_v25 = vpop.f32.mrb[7].mxu1 }
 0x131   : > { %1558 = vpow2.f32 %v1123_v15  ;;  %v1819_v26 = vadd.f32 %v1475_v16, %v1330_v55  ;;  %v1477_v28 = vadd.f32 %v1468_v23, %v1428_v20  ;;  %v1074_v29 = vpop.f32.mrb[7].mxu0 }
 0x132   : > { %1560 = vpow2.f32 %v1119_v21  ;;  %v1105_v30 = vadd.f32 %v1476_v22, %v1330_v55  ;;  %v1478_v31 = vadd.f32 %v1074_v29, %v660_v25 }
 0x133   : > { %v1115_v32 = vsub.f32 0.0, %v1819_v26  ;;  %v1108_v13 = vadd.f32 %v1477_v28, %v1330_v55 }
 0x134   : > { %v1113_v17 = vsub.f32 0.0, %v1105_v30  ;;  %v1106_v4 = vadd.f32 %v1478_v31, %v1330_v55 }
 0x135   : > { %v1129_v35 = vmul.f32 1.442695, %v1115_v32  ;;  %v1116_v36 = vsub.f32 0.0, %v1108_v13 }
 0x136   : > { %v1125_v37 = vmul.f32 1.442695, %v1113_v17  ;;  %v1114_v38 = vsub.f32 0.0, %v1106_v4 }
 0x137   : > { %1562 = vpow2.f32 %v1129_v35  ;;  %v1131_v39 = vmul.f32 1.442695, %v1116_v36 }
 0x138   : > { %1564 = vpow2.f32 %v1125_v37  ;;  %v1127_v18 = vmul.f32 1.442695, %v1114_v38 }
 0x139   : > { %v1555_v24 = vpop.eup %1554  ;;  %1566 = vpow2.f32 %v1131_v39 }
 0x13a   : > { %v1557_v27 = vpop.eup %1556  ;;  %v1135_v33 = vadd.f32 1.0, %v1555_v24  ;;  %1568 = vpow2.f32 %v1127_v18 }
 0x13b   : > { %v1559_v40 = vpop.eup %1558  ;;  %v1133_v41 = vadd.f32 1.0, %v1557_v27 }
 0x13c   : > { %v1561_v42 = vpop.eup %1560  ;;  %1570 = vrcp.f32 %v1135_v33  ;;  %v1136_v43 = vadd.f32 1.0, %v1559_v40 }
 0x13d   : > { %1572 = vrcp.f32 %v1133_v41  ;;  %v1134_v44 = vadd.f32 1.0, %v1561_v42 }
 0x13e   : > { %1574 = vrcp.f32 %v1136_v43 }
 0x13f   : > { %1576 = vrcp.f32 %v1134_v44 }
 0x141   : > { %v1563_v9 = vpop.eup %1562 }
 0x142   : > { %v1565_v34 = vpop.eup %1564  ;;  %v1139_v45 = vadd.f32 1.0, %v1563_v9 }
 0x143   : > { %v1567_v46 = vpop.eup %1566  ;;  %v1137_v47 = vadd.f32 1.0, %v1565_v34 }
 0x144   : > { %v1569_v48 = vpop.eup %1568  ;;  %1578 = vrcp.f32 %v1139_v45  ;;  %v1140_v49 = vadd.f32 1.0, %v1567_v46 }
 0x145   : > { %1580 = vrcp.f32 %v1137_v47  ;;  %v1138_v50 = vadd.f32 1.0, %v1569_v48 }
 0x146   : > { %v1571_v51 = vpop.eup %1570  ;;  %1582 = vrcp.f32 %v1140_v49 }
 0x147   : > { %v1573_v52 = vpop.eup %1572  ;;  %v1151_v53 = vmul.f32 %v1571_v51, %v1807_v60  ;;  %1584 = vrcp.f32 %v1138_v50 }
 0x148   : > { %v1575_v54 = vpop.eup %1574  ;;  %v1149_v55 = vmul.f32 %v1573_v52, %v1809_v63 }
 0x149   : > { %v1577_v56 = vpop.eup %1576  ;;  %1160 = vst.msk [vmem:[%s175_s17 + $0x10] sm:$0xff] %vm1157_vm2, %v1151_v53  ;;  %v1152_v57 = vmul.f32 %v1575_v54, %v1812_v2 }
 0x14a   : > { %1158 = vst.msk [vmem:[%s175_s17] sm:$0xff] %vm1157_vm2, %v1149_v55  ;;  %v1150_v58 = vmul.f32 %v1577_v56, %v1815_v5 }
 0x14b   : > { %1161 = vst.msk [vmem:[%s175_s17 + $0x18] sm:$0xff] %vm1157_vm2, %v1152_v57 }
 0x14c   : > { %1159 = vst.msk [vmem:[%s175_s17 + $0x8] sm:$0xff] %vm1157_vm2, %v1150_v58 }
 0x14e   : > { %v1579_v59 = vpop.eup %1578 }
 0x14f   : > { %v1581_v61 = vpop.eup %1580  ;;  %v1155_v60 = vmul.f32 %v1579_v59, %v1819_v26 }
 0x150   : > { %v1583_v62 = vpop.eup %1582  ;;  %v1153_v0 = vmul.f32 %v1581_v61, %v1105_v30 }
 0x151   : > { %v1585_v63 = vpop.eup %1584  ;;  %1164 = vst.msk [vmem:[%s175_s17 + $0x30] sm:$0xff] %vm1157_vm2, %v1155_v60  ;;  %v1156_v1 = vmul.f32 %v1583_v62, %v1108_v13 }
 0x152   : > { %1162 = vst.msk [vmem:[%s175_s17 + $0x20] sm:$0xff] %vm1157_vm2, %v1153_v0  ;;  %v1154_v2 = vmul.f32 %v1585_v63, %v1106_v4 }
 0x153   : > { %1165 = vst.msk [vmem:[%s175_s17 + $0x38] sm:$0xff] %vm1157_vm2, %v1156_v1 }
 0x154   : > { %1163 = vst.msk [vmem:[%s175_s17 + $0x28] sm:$0xff] %vm1157_vm2, %v1154_v2 }
 0x155 PF: > { %s13_s12 = sadd.s32 1, %s1592_s12  }
 0x156   : > { %p10_p5 = scmp.ge.s32.totalorder %s13_s12, 4  }
 0x158   :  { %12 = sbr.rel (!%p10_p5) target bundleno = 1 (0x1), region = 75 }

// kernel: model_forward.4
= control target key start
LH: loop header
LB: loop body
LE: loop exit
PB: predicated region body
PF: predicated region fallthrough
CT: control target
= control target key end

     0   :  { %s4369_s12 = smov 0   ;;  %s5174_s0 = inlined_call_operand.vmem [shape: f32[8,17,17,3], index: 0, kind: input, shape index: {}]   ;;  %s5175_s1 = inlined_call_operand.vmem [shape: f32[3,3,3,8], index: 1, kind: input, shape index: {}]   ;;  %s5176_s2 = inlined_call_operand.vmem [shape: f32[1,8], index: 2, kind: input, shape index: {}]   ;;  %s5177_s3 = inlined_call_operand.vmem [shape: f32[2,256,8], index: 3, kind: output, shape index: {}]  }
   0x1 LB: > { %s4375_s13 = sadd.s32 4294967295, %s4346_s12   ;;  %p3100_p0 = scmp.ge.s32.totalorder %s4346_s12, 1  ;;  %s4346_s12 = sphi %s4369_s12, %s13_s12  }
   0x2   : > { %p139_p1 = scmp.lt.s32.totalorder %s4346_s12, 3 }
   0x4   : > { %p140_p2 = pnand %p3100_p0, %p139_p1 }
   0x5   : > { %v3137_v0 = vld [vmem:[%s5175_s1 + $0x4] sm:$0x7] (!%p140_p2)  ;;  %vm328_vm0 = vcmask (!%p140_p2), 1040384   ;;  %vm329_vm1 = vcmask (!%p140_p2), 1041408   ;;  %s3101_s16 = sshll.u32 (!%p140_p2), %s4375_s13, 2  ;;  %v4348_v2 = vmov (!%p140_p2), 65535  }
   0x6   : > { %143 = sbr.rel (%p140_p2) target bundleno = 558 (0x22e), region = 32  ;;  %v278_v1 = vpack.c.bf16 (!%p140_p2), %v3137_v0, %v3137_v0  ;;  %v330_v3 = vsel (!%p140_p2), %vm328_vm0, 4294967295, %v4348_v2  ;;  %v3268_v4 = vld [vmem:[%s5175_s1 + $0x10] sm:$0x7] (!%p140_p2)  ;;  %p165_p3 = scmp.lt.s32.totalorder (!%p140_p2), %s3101_s16, 7  ;;  %vm279_vm2 = vcmask (!%p140_p2), 23552  }
   0x7   : > { %v4386_v5 = vsel (!%p140_p2), %vm329_vm1, %v330_v3, 0  ;;  %v1350_v6 = vpack.c.bf16 (!%p140_p2), %v3268_v4, %v3268_v4  ;;  %v225_v7 = vld [vmem:[%s5175_s1] sm:$0x7] (!%p140_p2)  ;;  %v3317_v8 = vld [vmem:[%s5175_s1 + $0x14] sm:$0x7] (!%p140_p2)  ;;  %p171_p4 = scmp.lt.s32.totalorder (!%p140_p2), %s4375_s13, 1 }
   0x8   : > { %v333_v9 = vand.u32 (!%p140_p2), %v4386_v5, %v278_v1  ;;  %v226_v10 = vpack.c.bf16 (!%p140_p2), %v225_v7, %v225_v7  ;;  %v1645_v11 = vpack.c.bf16 (!%p140_p2), %v3317_v8, %v3317_v8  ;;  %v3366_v13 = vld [vmem:[%s5175_s1 + $0x18] sm:$0x7] (!%p140_p2)  ;;  %v3170_v16 = vld [vmem:[%s5175_s1 + $0x8] sm:$0x7] (!%p140_p2)  ;;  %vm3008_vm3 = vcmask (!%p140_p2), 64512  }
   0x9   : > { %v4396_v12 = vand.u32 (!%p140_p2), %v1350_v6, %v4386_v5  ;;  %v1941_v17 = vpack.c.bf16 (!%p140_p2), %v3366_v13, %v3366_v13  ;;  %v758_v21 = vpack.c.bf16 (!%p140_p2), %v3170_v16, %v3170_v16  ;;  %v3415_v13 = vld [vmem:[%s5175_s1 + $0x1c] sm:$0x7] (!%p140_p2) }
   0xa   : > { %3638 = vmatprep.subr.bf16.mxu1 (!%p140_p2), %v333_v9  ;;  %v545_v14 = vand.u32 (!%p140_p2), %v4386_v5, %v226_v10  ;;  %v1695_v15 = vand.u32 (!%p140_p2), %v1645_v11, %v4386_v5 }
   0xb   : > { %3774 = vmatprep.subr.bf16.mxu0 (!%p140_p2), %v4396_v12  ;;  %3639 = vmatpush3.bf16.msra.mxu1 (!%p140_p2), %v333_v9  ;;  %v4429_v35 = vand.u32 (!%p140_p2), %v1941_v17, %v4386_v5  ;;  %v4437_v38 = vand.u32 (!%p140_p2), %v758_v21, %v4386_v5 }
   0xc   : > { %3775 = vmatpush3.bf16.msra.mxu0 (!%p140_p2), %v4396_v12  ;;  %3672 = vmatprep.subr.bf16.mxu1 (!%p140_p2), %v545_v14 }
   0xd   : > { %s5179_s16 = smov (!%p165_p3, %s3101_s16), 7  ;;  %3808 = vmatprep.subr.bf16.mxu0 %v1695_v15  ;;  %s5181_s13 = smov (!%p171_p4, %s4375_s13), 1 }
   0xe   : > { %s4202_s25 = smul.u32 408, %s5179_s16  ;;  %s3484_s14 = sshll.u32 %s5181_s13, 8 }
   0xf   : > { %s5008_s16 = scalar_lea.vmem %s5177_s3, %s3484_s14 }
  0x10   : > { %s4411_s30 = scalar_lea.vmem %s5174_s0, %s4202_s25 }
  0x11   : > { %v3105_v18 = vld [vmem:[%s4411_s30 + $0x198] sm:$0xff]  ;;  %v3106_v19 = vld [vmem:[%s4411_s30 + $0x1a0] sm:$0xff]  ;;  %v3236_v20 = vld [vmem:[%s4411_s30 + $0x4c8] sm:$0xff] }
  0x12   : > { %v260_v22 = vpack.c.bf16 %v3106_v19, %v3105_v18  ;;  %v3237_v23 = vld [vmem:[%s4411_s30 + $0x4d0] sm:$0xff]  ;;  %v3108_v25 = vld [vmem:[%s4411_s30 + $0x1b8] sm:$0xff]  ;;  %v3238_v28 = vld [vmem:[%s4411_s30 + $0x4e0] sm:$0xff] }
  0x13   : > { %v3107_v24 = vld [vmem:[%s4411_s30 + $0x1b0] sm:$0xff]  ;;  %v1332_v26 = vpack.c.bf16 %v3237_v23, %v3236_v20  ;;  %v3239_v29 = vld [vmem:[%s4411_s30 + $0x4e8] sm:$0xff]  ;;  %v3240_v33 = vld [vmem:[%s4411_s30 + $0x4f8] sm:$0xff] }
  0x14   : > { %v4419_v27 = vpack.c.bf16 %v3108_v25, %v3107_v24  ;;  %v3109_v30 = vld [vmem:[%s4411_s30 + $0x1c8] sm:$0xff]  ;;  %3640 = vmatprep.mubr.msk.bf16.mxu1 %vm279_vm2, %v260_v22  ;;  %v1333_v31 = vpack.c.bf16 %v3239_v29, %v3238_v28  ;;  %v3110_v32 = vld [vmem:[%s4411_s30 + $0x1d0] sm:$0xff]  ;;  %v3241_v34 = vld [vmem:[%s4411_s30 + $0x500] sm:$0xff]  ;;  %v2237_v22 = vpack.c.bf16 %v3415_v13, %v3415_v13 }
  0x15   : > { %3776 = vmatprep.mubr.msk.bf16.mxu0 %vm279_vm2, %v1332_v26  ;;  %v4434_v36 = vpack.c.bf16 %v3110_v32, %v3109_v30  ;;  %v1334_v37 = vpack.c.bf16 %v3241_v34, %v3240_v33  ;;  %v3111_v39 = vld [vmem:[%s4411_s30 + $0x1e0] sm:$0xff]  ;;  %v3112_v40 = vld [vmem:[%s4411_s30 + $0x1e8] sm:$0xff]  ;;  %v3242_v41 = vld [vmem:[%s4411_s30 + $0x510] sm:$0xff] }
  0x16   : > { %3641 = vmatmul.mubr.msk.bf16.vlgmr.msra.gmra.mrb[0].mxu1 %vm279_vm2, %v4419_v27  ;;  %3777 = vmatmul.mubr.msk.bf16.vlgmr.msra.gmra.mrb[0].mxu0 %vm279_vm2, %v1333_v31  ;;  %v3243_v42 = vld [vmem:[%s4411_s30 + $0x518] sm:$0xff]  ;;  %v3114_v44 = vld [vmem:[%s4411_s30 + $0x200] sm:$0xff]  ;;  %v3244_v45 = vld [vmem:[%s4411_s30 + $0x528] sm:$0xff]  ;;  %v4452_v47 = vpack.c.bf16 %v3112_v40, %v3111_v39  ;;  %v4515_v28 = vand.u32 %v2237_v22, %v4386_v5 }
  0x17   : > { %3673 = vmatpush3.bf16.msra.mxu1 %v545_v14  ;;  %3809 = vmatpush3.bf16.msra.mxu0 %v1695_v15  ;;  %v3113_v43 = vld [vmem:[%s4411_s30 + $0x1f8] sm:$0xff]  ;;  %v3245_v46 = vld [vmem:[%s4411_s30 + $0x530] sm:$0xff]  ;;  %v1335_v48 = vpack.c.bf16 %v3243_v42, %v3242_v41  ;;  %v3246_v53 = vld [vmem:[%s4411_s30 + $0x540] sm:$0xff] }
  0x18   : > { %3644 = vmatprep.mubr.msk.bf16.mxu1 %vm279_vm2, %v4434_v36  ;;  %3780 = vmatprep.mubr.msk.bf16.mxu0 %vm279_vm2, %v1334_v37  ;;  %v4455_v49 = vpack.c.bf16 %v3114_v44, %v3113_v43  ;;  %v1336_v50 = vpack.c.bf16 %v3245_v46, %v3244_v45  ;;  %v3115_v51 = vld [vmem:[%s4411_s30 + $0x210] sm:$0xff]  ;;  %v3116_v52 = vld [vmem:[%s4411_s30 + $0x218] sm:$0xff]  ;;  %v3247_v54 = vld [vmem:[%s4411_s30 + $0x548] sm:$0xff] }
  0x19   : > { %3842 = vmatprep.subr.bf16.mxu0 %v4429_v35  ;;  %3706 = vmatprep.subr.bf16.mxu1 %v4437_v38  ;;  %v3117_v55 = vld [vmem:[%s4411_s30 + $0x228] sm:$0xff]  ;;  %v3118_v56 = vld [vmem:[%s4411_s30 + $0x230] sm:$0xff]  ;;  %v3248_v57 = vld [vmem:[%s4411_s30 + $0x558] sm:$0xff]  ;;  %v4471_v59 = vpack.c.bf16 %v3116_v52, %v3115_v51  ;;  %v1337_v60 = vpack.c.bf16 %v3247_v54, %v3246_v53 }
  0x1a   : > { %v3249_v58 = vld [vmem:[%s4411_s30 + $0x560] sm:$0xff]  ;;  %v4473_v61 = vpack.c.bf16 %v3118_v56, %v3117_v55  ;;  %v3120_v0 = vld [vmem:[%s4411_s30 + $0x248] sm:$0xff]  ;;  %v3250_v1 = vld [vmem:[%s4411_s30 + $0x570] sm:$0xff] }
  0x1b   : > { %v1338_v62 = vpack.c.bf16 %v3249_v58, %v3248_v57  ;;  %v3119_v63 = vld [vmem:[%s4411_s30 + $0x240] sm:$0xff]  ;;  %v3251_v2 = vld [vmem:[%s4411_s30 + $0x578] sm:$0xff]  ;;  %v3123_v14 = vld [vmem:[%s4411_s30 + $0x270] sm:$0xff] }
  0x1c   : > { %v3121_v3 = vld [vmem:[%s4411_s30 + $0x258] sm:$0xff]  ;;  %v3122_v4 = vld [vmem:[%s4411_s30 + $0x260] sm:$0xff]  ;;  %v4489_v8 = vpack.c.bf16 %v3120_v0, %v3119_v63  ;;  %v1339_v9 = vpack.c.bf16 %v3251_v2, %v3250_v1  ;;  %v3287_v16 = vld [vmem:[%s4411_s30 + $0x349] sm:$0xff] }
  0x1d   : > { %v3285_v6 = vld [vmem:[%s4411_s30 + $0x331] sm:$0xff]  ;;  %v3286_v7 = vld [vmem:[%s4411_s30 + $0x339] sm:$0xff]  ;;  %v4491_v10 = vpack.c.bf16 %v3122_v4, %v3121_v3  ;;  %v3125_v18 = vld [vmem:[%s4411_s30 + $0x288] sm:$0xff] }
  0x1e   : > { %3645 = vmatmul.mubr.msk.bf16.gmra.mrb[4].mxu1 %vm279_vm2, %v4452_v47  ;;  %3781 = vmatmul.mubr.msk.bf16.gmra.mrb[4].mxu0 %vm279_vm2, %v1335_v48  ;;  %v1627_v11 = vpack.c.bf16 %v3286_v7, %v3285_v6  ;;  %v3124_v15 = vld [vmem:[%s4411_s30 + $0x278] sm:$0xff]  ;;  %v3126_v19 = vld [vmem:[%s4411_s30 + $0x290] sm:$0xff]  ;;  %v3289_v20 = vld [vmem:[%s4411_s30 + $0x361] sm:$0xff] }
  0x1f   : > { %3648 = vmatprep.mubr.msk.bf16.mxu1 %vm279_vm2, %v4455_v49  ;;  %3784 = vmatprep.mubr.msk.bf16.mxu0 %vm279_vm2, %v1336_v50  ;;  %v3288_v17 = vld [vmem:[%s4411_s30 + $0x351] sm:$0xff]  ;;  %v3290_v21 = vld [vmem:[%s4411_s30 + $0x369] sm:$0xff]  ;;  %v4510_v23 = vpack.c.bf16 %v3124_v15, %v3123_v14  ;;  %v4512_v25 = vpack.c.bf16 %v3126_v19, %v3125_v18  ;;  %v3127_v29 = vld [vmem:[%s4411_s30 + $0x2a0] sm:$0xff] }
  0x20   : > { %v1628_v24 = vpack.c.bf16 %v3288_v17, %v3287_v16  ;;  %v1629_v26 = vpack.c.bf16 %v3290_v21, %v3289_v20  ;;  %v3128_v30 = vld [vmem:[%s4411_s30 + $0x2a8] sm:$0xff]  ;;  %v3291_v31 = vld [vmem:[%s4411_s30 + $0x379] sm:$0xff]  ;;  %v3293_v37 = vld [vmem:[%s4411_s30 + $0x391] sm:$0xff] }
  0x21   : > { %v3292_v32 = vld [vmem:[%s4411_s30 + $0x381] sm:$0xff]  ;;  %v3129_v33 = vld [vmem:[%s4411_s30 + $0x2b8] sm:$0xff]  ;;  %v4533_v40 = vpack.c.bf16 %v3128_v30, %v3127_v29  ;;  %v3131_v43 = vld [vmem:[%s4411_s30 + $0x2d0] sm:$0xff] }
  0x22   : > { %v3130_v34 = vld [vmem:[%s4411_s30 + $0x2c0] sm:$0xff]  ;;  %v1630_v41 = vpack.c.bf16 %v3292_v32, %v3291_v31  ;;  %v3132_v44 = vld [vmem:[%s4411_s30 + $0x2d8] sm:$0xff]  ;;  %v3295_v45 = vld [vmem:[%s4411_s30 + $0x3a9] sm:$0xff] }
  0x23   : > { %v3294_v39 = vld [vmem:[%s4411_s30 + $0x399] sm:$0xff]  ;;  %v3296_v46 = vld [vmem:[%s4411_s30 + $0x3b1] sm:$0xff]  ;;  %v3133_v48 = vld [vmem:[%s4411_s30 + $0x2e8] sm:$0xff]  ;;  %v4551_v53 = vpack.c.bf16 %v3132_v44, %v3131_v43 }
  0x24   : > { %v1631_v42 = vpack.c.bf16 %v3294_v39, %v3293_v37  ;;  %v3134_v50 = vld [vmem:[%s4411_s30 + $0x2f0] sm:$0xff]  ;;  %v3297_v51 = vld [vmem:[%s4411_s30 + $0x3c1] sm:$0xff]  ;;  %v1632_v54 = vpack.c.bf16 %v3296_v46, %v3295_v45  ;;  %v3302_v2 = vld [vmem:[%s4411_s30 + $0x3f9] sm:$0xff] }
  0x25   : > { %v3298_v52 = vld [vmem:[%s4411_s30 + $0x3c9] sm:$0xff]  ;;  %v4553_v55 = vpack.c.bf16 %v3134_v50, %v3133_v48  ;;  %v3135_v57 = vld [vmem:[%s4411_s30 + $0x300] sm:$0xff]  ;;  %v3301_v1 = vld [vmem:[%s4411_s30 + $0x3f1] sm:$0xff] }
  0x26   : > { %3649 = vmatmul.mubr.msk.bf16.gmra.mrb[8].mxu1 %vm279_vm2, %v4471_v59  ;;  %3785 = vmatmul.mubr.msk.bf16.gmra.mrb[8].mxu0 %vm279_vm2, %v1337_v60  ;;  %v1633_v56 = vpack.c.bf16 %v3298_v52, %v3297_v51  ;;  %v3136_v58 = vld [vmem:[%s4411_s30 + $0x308] sm:$0xff]  ;;  %v3299_v60 = vld [vmem:[%s4411_s30 + $0x3d9] sm:$0xff]  ;;  %v1635_v7 = vpack.c.bf16 %v3302_v2, %v3301_v1  ;;  %v3304_v15 = vld [vmem:[%s4411_s30 + $0x411] sm:$0xff] }
  0x27   : > { %3652 = vmatprep.mubr.msk.bf16.mxu1 %vm279_vm2, %v4473_v61  ;;  %3788 = vmatprep.mubr.msk.bf16.mxu0 %vm279_vm2, %v1338_v62  ;;  %v3300_v62 = vld [vmem:[%s4411_s30 + $0x3e1] sm:$0xff]  ;;  %v4569_v3 = vpack.c.bf16 %v3136_v58, %v3135_v57  ;;  %v3303_v14 = vld [vmem:[%s4411_s30 + $0x409] sm:$0xff]  ;;  %v182_v17 = vld [vmem:[%s4411_s30 + $0x38] sm:$0xff] }
  0x28   : > { %v177_v63 = vld [vmem:[%s4411_s30] sm:$0xff]  ;;  %v178_v0 = vld [vmem:[%s4411_s30 + $0x8] sm:$0xff]  ;;  %v1634_v4 = vpack.c.bf16 %v3300_v62, %v3299_v60  ;;  %v181_v16 = vld [vmem:[%s4411_s30 + $0x30] sm:$0xff]  ;;  %v1636_v22 = vpack.c.bf16 %v3304_v15, %v3303_v14 }
  0x29   : > { %v209_v6 = vpack.c.bf16 %v178_v0, %v177_v63  ;;  %v180_v13 = vld [vmem:[%s4411_s30 + $0x20] sm:$0xff]  ;;  %v3306_v19 = vld [vmem:[%s4411_s30 + $0x429] sm:$0xff]  ;;  %v3309_v39 = vld [vmem:[%s4411_s30 + $0x451] sm:$0xff] }
  0x2a   : > { %v3305_v18 = vld [vmem:[%s4411_s30 + $0x421] sm:$0xff]  ;;  %v184_v31 = vld [vmem:[%s4411_s30 + $0x50] sm:$0xff]  ;;  %v3307_v32 = vld [vmem:[%s4411_s30 + $0x439] sm:$0xff] }
  0x2b   : > { %v183_v30 = vld [vmem:[%s4411_s30 + $0x48] sm:$0xff]  ;;  %v187_v45 = vld [vmem:[%s4411_s30 + $0x78] sm:$0xff]  ;;  %v188_v46 = vld [vmem:[%s4411_s30 + $0x80] sm:$0xff] }
  0x2c   : > { %v186_v37 = vld [vmem:[%s4411_s30 + $0x68] sm:$0xff]  ;;  %v3312_v50 = vld [vmem:[%s4411_s30 + $0x471] sm:$0xff]  ;;  %v214_v57 = vpack.c.bf16 %v188_v46, %v187_v45  ;;  %v3315_v1 = vld [vmem:[%s4411_s30 + $0x499] sm:$0xff] }
  0x2d   : > { %v3311_v48 = vld [vmem:[%s4411_s30 + $0x469] sm:$0xff]  ;;  %v190_v52 = vld [vmem:[%s4411_s30 + $0x98] sm:$0xff]  ;;  %v3316_v2 = vld [vmem:[%s4411_s30 + $0x4a1] sm:$0xff] }
  0x2e   : > { %3653 = vmatmul.mubr.msk.bf16.gmra.mrb[12].mxu1 %vm279_vm2, %v4489_v8  ;;  %3789 = vmatmul.mubr.msk.bf16.gmra.mrb[12].mxu0 %vm279_vm2, %v1339_v9  ;;  %v3219_v9 = vld [vmem:[%s5175_s1 + $0xc] sm:$0x7]  ;;  %v189_v51 = vld [vmem:[%s4411_s30 + $0x90] sm:$0xff]  ;;  %v1640_v58 = vpack.c.bf16 %v3312_v50, %v3311_v48  ;;  %v195_v14 = vld [vmem:[%s4411_s30 + $0xd8] sm:$0xff] }
  0x2f   : > { %3656 = vmatprep.mubr.msk.bf16.mxu1 %vm279_vm2, %v4491_v10  ;;  %3810 = vmatprep.mubr.msk.bf16.mxu0 %vm279_vm2, %v1627_v11  ;;  %v179_v11 = vld [vmem:[%s4411_s30 + $0x18] sm:$0xff]  ;;  %v1054_v20 = vpack.c.bf16 %v3219_v9, %v3219_v9  ;;  %v215_v60 = vpack.c.bf16 %v190_v52, %v189_v51  ;;  %v191_v63 = vld [vmem:[%s4411_s30 + $0xa8] sm:$0xff]  ;;  %v192_v0 = vld [vmem:[%s4411_s30 + $0xb0] sm:$0xff]  ;;  %v1642_v9 = vpack.c.bf16 %v3316_v2, %v3315_v1 }
  0x30   : > { %v210_v21 = vpack.c.bf16 %v180_v13, %v179_v11  ;;  %v3464_v13 = vld [vmem:[%s5175_s1 + $0x20] sm:$0x7]  ;;  %v712_v50 = vld [vmem:[%s4411_s30 + $0x31] sm:$0xff] }
  0x31   : > { %v4590_v29 = vand.u32 %v1054_v20, %v4386_v5  ;;  %v196_v15 = vld [vmem:[%s4411_s30 + $0xe0] sm:$0xff]  ;;  %v720_v1 = vld [vmem:[%s4411_s30 + $0x91] sm:$0xff] }
  0x32   : > { %v710_v46 = vld [vmem:[%s4411_s30 + $0x19] sm:$0xff]  ;;  %v711_v48 = vld [vmem:[%s4411_s30 + $0x21] sm:$0xff] }
  0x33   : > { %v713_v51 = vld [vmem:[%s4411_s30 + $0x39] sm:$0xff]  ;;  %v4678_v52 = vpack.c.bf16 %v711_v48, %v710_v46 }
  0x34   : > { %v721_v2 = vld [vmem:[%s4411_s30 + $0x99] sm:$0xff] }
  0x36   : > { %3657 = vmatmul.mubr.msk.bf16.gmra.mrb[16].mxu1 %vm279_vm2, %v4510_v23  ;;  %3811 = vmatmul.mubr.msk.bf16.vlgmr.msra.gmra.mrb[0].mxu0 %vm279_vm2, %v1628_v24  ;;  %v4587_v24 = vpack.c.bf16 %v182_v17, %v181_v16  ;;  %v197_v16 = vld [vmem:[%s4411_s30 + $0xf0] sm:$0xff]  ;;  %v198_v17 = vld [vmem:[%s4411_s30 + $0xf8] sm:$0xff] }
  0x37   : > { %3660 = vmatprep.mubr.msk.bf16.mxu1 %vm279_vm2, %v4512_v25  ;;  %3843 = vmatpush3.bf16.msra.mxu0 %v4429_v35  ;;  %v4535_v35 = vpack.c.bf16 %v3130_v34, %v3129_v33  ;;  %v3308_v33 = vld [vmem:[%s4411_s30 + $0x441] sm:$0xff]  ;;  %v219_v20 = vpack.c.bf16 %v198_v17, %v197_v16 }
  0x38   : > { %3814 = vmatprep.mubr.msk.bf16.mxu0 %vm279_vm2, %v1629_v26  ;;  %3876 = vmatprep.subr.bf16.mxu0 %v4515_v28  ;;  %v1637_v26 = vpack.c.bf16 %v3306_v19, %v3305_v18  ;;  %v185_v34 = vld [vmem:[%s4411_s30 + $0x60] sm:$0xff]  ;;  %v2532_v18 = vpack.c.bf16 %v3464_v13, %v3464_v13  ;;  %v218_v19 = vpack.c.bf16 %v196_v15, %v195_v14  ;;  %v3365_v13 = vld [vmem:[%s4411_s30 + $0x188] sm:$0xff] }
  0x39   : > { %v213_v43 = vpack.c.bf16 %v186_v37, %v185_v34  ;;  %v206_v34 = vld [vmem:[%s4411_s30 + $0x158] sm:$0xff]  ;;  %v724_v14 = vld [vmem:[%s4411_s30 + $0xc1] sm:$0xff]  ;;  %v725_v15 = vld [vmem:[%s4411_s30 + $0xc9] sm:$0xff] }
  0x3e   : > { %3661 = vmatmul.mubr.msk.bf16.gmra.mrb[20].mxu1 %vm279_vm2, %v4533_v40  ;;  %3815 = vmatmul.mubr.msk.bf16.gmra.mrb[4].mxu0 %vm279_vm2, %v1630_v41  ;;  %v212_v41 = vpack.c.bf16 %v184_v31, %v183_v30  ;;  %v201_v30 = vld [vmem:[%s4411_s30 + $0x120] sm:$0xff] }
  0x3f   : > { %3664 = vmatprep.mubr.msk.bf16.mxu1 %vm279_vm2, %v4535_v35  ;;  %3818 = vmatprep.mubr.msk.bf16.mxu0 %vm279_vm2, %v1631_v42  ;;  %v1638_v42 = vpack.c.bf16 %v3308_v33, %v3307_v32  ;;  %v205_v33 = vld [vmem:[%s4411_s30 + $0x150] sm:$0xff] }
  0x46   : > { %3665 = vmatmul.mubr.msk.bf16.gmra.mrb[24].mxu1 %vm279_vm2, %v4551_v53  ;;  %3819 = vmatmul.mubr.msk.bf16.gmra.mrb[8].mxu0 %vm279_vm2, %v1632_v54  ;;  %v3313_v54 = vld [vmem:[%s4411_s30 + $0x481] sm:$0xff] }
  0x47   : > { %3668 = vmatprep.mubr.msk.bf16.mxu1 %vm279_vm2, %v4553_v55  ;;  %3822 = vmatprep.mubr.msk.bf16.mxu0 %vm279_vm2, %v1633_v56  ;;  %v3314_v56 = vld [vmem:[%s4411_s30 + $0x489] sm:$0xff] }
  0x48   : > { %v1641_v62 = vpack.c.bf16 %v3314_v56, %v3313_v54  ;;  %v4680_v54 = vpack.c.bf16 %v713_v51, %v712_v50  ;;  %v714_v56 = vld [vmem:[%s4411_s30 + $0x49] sm:$0xff]  ;;  %v3194_v50 = vld [vmem:[%s4411_s30 + $0x380] sm:$0xff]  ;;  %v3196_v51 = vld [vmem:[%s4411_s30 + $0x398] sm:$0xff] }
  0x4e   : > { %3669 = vmatmul.mubr.msk.bf16.gmra.mrb[28].mxu1 %vm279_vm2, %v4569_v3  ;;  %3823 = vmatmul.mubr.msk.bf16.gmra.mrb[12].mxu0 %vm279_vm2, %v1634_v4  ;;  %v193_v4 = vld [vmem:[%s4411_s30 + $0xc0] sm:$0xff] }
  0x4f   : > { %3674 = vmatprep.mubr.msk.bf16.mxu1 %vm279_vm2, %v209_v6  ;;  %3826 = vmatprep.mubr.msk.bf16.mxu0 %vm279_vm2, %v1635_v7  ;;  %v194_v6 = vld [vmem:[%s4411_s30 + $0xc8] sm:$0xff]  ;;  %v216_v7 = vpack.c.bf16 %v192_v0, %v191_v63  ;;  %v718_v63 = vld [vmem:[%s4411_s30 + $0x79] sm:$0xff] }
  0x50   : > { %v217_v11 = vpack.c.bf16 %v194_v6, %v193_v4  ;;  %v719_v0 = vld [vmem:[%s4411_s30 + $0x81] sm:$0xff]  ;;  %v4710_v6 = vpack.c.bf16 %v721_v2, %v720_v1  ;;  %v3413_v1 = vld [vmem:[%s4411_s30 + $0x318] sm:$0xff]  ;;  %v3203_v2 = vld [vmem:[%s4411_s30 + $0x3f0] sm:$0xff] }
  0x51   : > { %v4708_v4 = vpack.c.bf16 %v719_v0, %v718_v63  ;;  %v3202_v0 = vld [vmem:[%s4411_s30 + $0x3e0] sm:$0xff] }
  0x56   : > { %3675 = vmatmul.mubr.msk.bf16.vlgmr.msra.gmra.mrb[0].mxu1 %vm279_vm2, %v210_v21  ;;  %3827 = vmatmul.mubr.msk.bf16.gmra.mrb[16].mxu0 %vm279_vm2, %v1636_v22  ;;  %v4641_v22 = vand.u32 %v2532_v18, %v4386_v5  ;;  %v202_v5 = vld [vmem:[%s4411_s30 + $0x128] sm:$0xff]  ;;  %v4726_v18 = vpack.c.bf16 %v725_v15, %v724_v14  ;;  %v3206_v14 = vld [vmem:[%s4411_s30 + $0x410] sm:$0xff] }
  0x57   : > { %3707 = vmatpush3.bf16.msra.mxu1 %v4437_v38  ;;  %3678 = vmatprep.mubr.msk.bf16.mxu1 %vm279_vm2, %v4587_v24  ;;  %v3310_v38 = vld [vmem:[%s4411_s30 + $0x459] sm:$0xff]  ;;  %v221_v32 = vpack.c.bf16 %v202_v5, %v201_v30  ;;  %v3208_v15 = vld [vmem:[%s4411_s30 + $0x428] sm:$0xff] }
  0x58   : > { %3830 = vmatprep.mubr.msk.bf16.mxu0 %vm279_vm2, %v1637_v26  ;;  %3740 = vmatprep.subr.bf16.mxu1 %v4590_v29  ;;  %v1639_v44 = vpack.c.bf16 %v3310_v38, %v3309_v39  ;;  %v199_v26 = vld [vmem:[%s4411_s30 + $0x108] sm:$0xff]  ;;  %v223_v39 = vpack.c.bf16 %v206_v34, %v205_v33  ;;  %v737_v34 = vld [vmem:[%s4411_s30 + $0x159] sm:$0xff] }
  0x59   : > { %v207_v38 = vld [vmem:[%s4411_s30 + $0x168] sm:$0xff] }
  0x5e   : > { %3679 = vmatmul.mubr.msk.bf16.gmra.mrb[4].mxu1 %vm279_vm2, %v212_v41  ;;  %3831 = vmatmul.mubr.msk.bf16.gmra.mrb[20].mxu0 %vm279_vm2, %v1638_v42  ;;  %v708_v42 = vld [vmem:[%s4411_s30 + $0x1] sm:$0xff] }
  0x5f   : > { %3682 = vmatprep.mubr.msk.bf16.mxu1 %vm279_vm2, %v213_v43  ;;  %3834 = vmatprep.mubr.msk.bf16.mxu0 %vm279_vm2, %v1639_v44 }
  0x66   : > { %3683 = vmatmul.mubr.msk.bf16.gmra.mrb[8].mxu1 %vm279_vm2, %v214_v57  ;;  %3835 = vmatmul.mubr.msk.bf16.gmra.mrb[24].mxu0 %vm279_vm2, %v1640_v58  ;;  %v716_v58 = vld [vmem:[%s4411_s30 + $0x61] sm:$0xff] }
  0x67   : > { %3686 = vmatprep.mubr.msk.bf16.mxu1 %vm279_vm2, %v215_v60  ;;  %3838 = vmatprep.mubr.msk.bf16.mxu0 %vm279_vm2, %v1641_v62 }
  0x6e   : > { %3687 = vmatmul.mubr.msk.bf16.gmra.mrb[12].mxu1 %vm279_vm2, %v216_v7  ;;  %3839 = vmatmul.mubr.msk.bf16.gmra.mrb[28].mxu0 %vm279_vm2, %v1642_v9  ;;  %v723_v9 = vld [vmem:[%s4411_s30 + $0xb1] sm:$0xff] }
  0x6f   : > { %3690 = vmatprep.mubr.msk.bf16.mxu1 %vm279_vm2, %v217_v11  ;;  %3844 = vmatprep.mubr.msk.bf16.mxu0 %vm279_vm2, %v210_v21  ;;  %v200_v21 = vld [vmem:[%s4411_s30 + $0x110] sm:$0xff] }
  0x70   : > { %v220_v31 = vpack.c.bf16 %v200_v21, %v199_v26  ;;  %v728_v26 = vld [vmem:[%s4411_s30 + $0xf1] sm:$0xff]  ;;  %v729_v21 = vld [vmem:[%s4411_s30 + $0xf9] sm:$0xff] }
  0x71   : > { %v4741_v5 = vpack.c.bf16 %v729_v21, %v728_v26  ;;  %v3210_v26 = vld [vmem:[%s4411_s30 + $0x440] sm:$0xff]  ;;  %v3212_v21 = vld [vmem:[%s4411_s30 + $0x458] sm:$0xff] }
  0x76   : > { %3691 = vmatmul.mubr.msk.bf16.gmra.mrb[16].mxu1 %vm279_vm2, %v218_v19  ;;  %3845 = vmatmul.mubr.msk.bf16.vlgmr.msra.gmra.mrb[0].mxu0 %vm279_vm2, %v4587_v24  ;;  %v203_v24 = vld [vmem:[%s4411_s30 + $0x138] sm:$0xff] }
  0x77   : > { %3694 = vmatprep.mubr.msk.bf16.mxu1 %vm279_vm2, %v219_v20  ;;  %3877 = vmatpush3.bf16.msra.mxu0 %v4515_v28  ;;  %v204_v28 = vld [vmem:[%s4411_s30 + $0x140] sm:$0xff] }
  0x78   : > { %3848 = vmatprep.mubr.msk.bf16.mxu0 %vm279_vm2, %v212_v41  ;;  %3910 = vmatprep.subr.bf16.mxu0 %v4641_v22  ;;  %v222_v37 = vpack.c.bf16 %v204_v28, %v203_v24  ;;  %v208_v41 = vld [vmem:[%s4411_s30 + $0x170] sm:$0xff] }
  0x79   : > { %v224_v44 = vpack.c.bf16 %v208_v41, %v207_v38  ;;  %v733_v24 = vld [vmem:[%s4411_s30 + $0x129] sm:$0xff]  ;;  %v3188_v41 = vld [vmem:[%s4411_s30 + $0x338] sm:$0xff] }
  0x7a   : > { %v3187_v38 = vld [vmem:[%s4411_s30 + $0x330] sm:$0xff] }
  0x7e   : > { %3695 = vmatmul.mubr.msk.bf16.gmra.mrb[20].mxu1 %vm279_vm2, %v220_v31  ;;  %3849 = vmatmul.mubr.msk.bf16.gmra.mrb[4].mxu0 %vm279_vm2, %v213_v43  ;;  %v709_v43 = vld [vmem:[%s4411_s30 + $0x9] sm:$0xff] }
  0x7f   : > { %3698 = vmatprep.mubr.msk.bf16.mxu1 %vm279_vm2, %v221_v32  ;;  %3852 = vmatprep.mubr.msk.bf16.mxu0 %vm279_vm2, %v214_v57  ;;  %v740_v45 = vpack.c.bf16 %v709_v43, %v708_v42  ;;  %v715_v57 = vld [vmem:[%s4411_s30 + $0x51] sm:$0xff]  ;;  %v1036_v43 = vpack.c.bf16 %v3188_v41, %v3187_v38  ;;  %v3255_v38 = vld [vmem:[%s4411_s30 + $0x5a8] sm:$0xff]  ;;  %v3257_v41 = vld [vmem:[%s4411_s30 + $0x5c0] sm:$0xff] }
  0x80   : > { %v4694_v62 = vpack.c.bf16 %v715_v57, %v714_v56 }
  0x86   : > { %3699 = vmatmul.mubr.msk.bf16.gmra.mrb[24].mxu1 %vm279_vm2, %v222_v37  ;;  %3853 = vmatmul.mubr.msk.bf16.gmra.mrb[8].mxu0 %vm279_vm2, %v215_v60  ;;  %v717_v60 = vld [vmem:[%s4411_s30 + $0x69] sm:$0xff] }
  0x87   : > { %3702 = vmatprep.mubr.msk.bf16.mxu1 %vm279_vm2, %v223_v39  ;;  %3856 = vmatprep.mubr.msk.bf16.mxu0 %vm279_vm2, %v216_v7  ;;  %v722_v7 = vld [vmem:[%s4411_s30 + $0xa9] sm:$0xff] }
  0x88   : > { %v4724_v16 = vpack.c.bf16 %v723_v9, %v722_v7  ;;  %v3204_v7 = vld [vmem:[%s4411_s30 + $0x3f8] sm:$0xff] }
  0x8e   : > { %3703 = vmatmul.mubr.msk.bf16.gmra.mrb[28].mxu1 %vm279_vm2, %v224_v44  ;;  %3857 = vmatmul.mubr.msk.bf16.gmra.mrb[12].mxu0 %vm279_vm2, %v217_v11  ;;  %v3364_v11 = vld [vmem:[%s4411_s30 + $0x180] sm:$0xff] }
  0x8f   : > { %3708 = vmatprep.mubr.msk.bf16.mxu1 %vm279_vm2, %v740_v45  ;;  %3860 = vmatprep.mubr.msk.bf16.mxu0 %vm279_vm2, %v218_v19  ;;  %v1938_v17 = vpack.c.bf16 %v3365_v13, %v3364_v11  ;;  %v726_v19 = vld [vmem:[%s4411_s30 + $0xd9] sm:$0xff]  ;;  %v3192_v45 = vld [vmem:[%s4411_s30 + $0x368] sm:$0xff]  ;;  %v1044_v13 = vpack.c.bf16 %v3204_v7, %v3203_v2 }
  0x96   : > { %3709 = vmatmul.mubr.msk.bf16.vlgmr.msra.gmra.mrb[0].mxu1 %vm279_vm2, %v4678_v52  ;;  %3861 = vmatmul.mubr.msk.bf16.gmra.mrb[16].mxu0 %vm279_vm2, %v219_v20  ;;  %v727_v20 = vld [vmem:[%s4411_s30 + $0xe1] sm:$0xff] }
  0x97   : > { %3741 = vmatpush3.bf16.msra.mxu1 %v4590_v29  ;;  %3712 = vmatprep.mubr.msk.bf16.mxu1 %vm279_vm2, %v4680_v54  ;;  %v4696_v29 = vpack.c.bf16 %v717_v60, %v716_v58  ;;  %v4739_v30 = vpack.c.bf16 %v727_v20, %v726_v19  ;;  %v3200_v58 = vld [vmem:[%s4411_s30 + $0x3c8] sm:$0xff]  ;;  %v3209_v20 = vld [vmem:[%s4411_s30 + $0x438] sm:$0xff] }
  0x98   : > { %3864 = vmatprep.mubr.msk.bf16.mxu0 %vm279_vm2, %v220_v31  ;;  %3944 = vmatprep.subr.bf16.mxu1 %v4396_v12  ;;  %v731_v31 = vld [vmem:[%s4411_s30 + $0x111] sm:$0xff] }
  0x9e   : > { %3713 = vmatmul.mubr.msk.bf16.gmra.mrb[4].mxu1 %vm279_vm2, %v4694_v62  ;;  %3865 = vmatmul.mubr.msk.bf16.gmra.mrb[20].mxu0 %vm279_vm2, %v221_v32  ;;  %v732_v32 = vld [vmem:[%s4411_s30 + $0x121] sm:$0xff] }
  0x9f   : > { %3716 = vmatprep.mubr.msk.bf16.mxu1 %vm279_vm2, %v4696_v29  ;;  %3868 = vmatprep.mubr.msk.bf16.mxu0 %vm279_vm2, %v222_v37  ;;  %v4758_v33 = vpack.c.bf16 %v733_v24, %v732_v32  ;;  %v3214_v32 = vld [vmem:[%s4411_s30 + $0x470] sm:$0xff]  ;;  %v3216_v24 = vld [vmem:[%s4411_s30 + $0x488] sm:$0xff] }
  0xa6   : > { %3717 = vmatmul.mubr.msk.bf16.gmra.mrb[8].mxu1 %vm279_vm2, %v4708_v4  ;;  %3869 = vmatmul.mubr.msk.bf16.gmra.mrb[24].mxu0 %vm279_vm2, %v223_v39 }
  0xa7   : > { %3720 = vmatprep.mubr.msk.bf16.mxu1 %vm279_vm2, %v4710_v6  ;;  %3872 = vmatprep.mubr.msk.bf16.mxu0 %vm279_vm2, %v224_v44  ;;  %v3190_v44 = vld [vmem:[%s4411_s30 + $0x350] sm:$0xff] }
  0xae   : > { %3721 = vmatmul.mubr.msk.bf16.gmra.mrb[12].mxu1 %vm279_vm2, %v4724_v16  ;;  %3873 = vmatmul.mubr.msk.bf16.gmra.mrb[28].mxu0 %vm279_vm2, %v1938_v17 }
  0xaf   : > { %3724 = vmatprep.mubr.msk.bf16.mxu1 %vm279_vm2, %v4726_v18  ;;  %3878 = vmatprep.mubr.msk.bf16.mxu0 %vm279_vm2, %v4419_v27  ;;  %v730_v27 = vld [vmem:[%s4411_s30 + $0x109] sm:$0xff] }
  0xb0   : > { %v4756_v28 = vpack.c.bf16 %v731_v31, %v730_v27  ;;  %v1047_v27 = vpack.c.bf16 %v3210_v26, %v3209_v20 }
  0xb6   : > { %3725 = vmatmul.mubr.msk.bf16.gmra.mrb[16].mxu1 %vm279_vm2, %v4739_v30  ;;  %3879 = vmatmul.mubr.msk.bf16.vlgmr.msra.gmra.mrb[0].mxu0 %vm279_vm2, %v4434_v36  ;;  %v734_v36 = vld [vmem:[%s4411_s30 + $0x139] sm:$0xff] }
  0xb7   : > { %3728 = vmatprep.mubr.msk.bf16.mxu1 %vm279_vm2, %v4741_v5  ;;  %3911 = vmatpush3.bf16.msra.mxu0 %v4641_v22  ;;  %v736_v22 = vld [vmem:[%s4411_s30 + $0x151] sm:$0xff] }
  0xb8   : > { %3882 = vmatprep.mubr.msk.bf16.mxu0 %vm279_vm2, %v4452_v47  ;;  %v735_v47 = vld [vmem:[%s4411_s30 + $0x141] sm:$0xff]  ;;  %v4774_v39 = vpack.c.bf16 %v737_v34, %v736_v22  ;;  %v3253_v34 = vld [vmem:[%s4411_s30 + $0x590] sm:$0xff] }
  0xb9   : > { %v4772_v37 = vpack.c.bf16 %v735_v47, %v734_v36  ;;  %v3218_v22 = vld [vmem:[%s4411_s30 + $0x4a0] sm:$0xff] }
  0xbe   : > { %3729 = vmatmul.mubr.msk.bf16.gmra.mrb[20].mxu1 %vm279_vm2, %v4756_v28  ;;  %3883 = vmatmul.mubr.msk.bf16.gmra.mrb[4].mxu0 %vm279_vm2, %v4455_v49  ;;  %v738_v49 = vld [vmem:[%s4411_s30 + $0x169] sm:$0xff] }
  0xbf   : > { %3732 = vmatprep.mubr.msk.bf16.mxu1 %vm279_vm2, %v4758_v33  ;;  %3886 = vmatprep.mubr.msk.bf16.mxu0 %vm279_vm2, %v4471_v59  ;;  %v739_v59 = vld [vmem:[%s4411_s30 + $0x171] sm:$0xff] }
  0xc0   : > { %v4788_v42 = vpack.c.bf16 %v739_v59, %v738_v49 }
  0xc6   : > { %3733 = vmatmul.mubr.msk.bf16.gmra.mrb[24].mxu1 %vm279_vm2, %v4772_v37  ;;  %3887 = vmatmul.mubr.msk.bf16.gmra.mrb[8].mxu0 %vm279_vm2, %v4473_v61  ;;  %v3189_v61 = vld [vmem:[%s4411_s30 + $0x348] sm:$0xff] }
  0xc7   : > { %3736 = vmatprep.mubr.msk.bf16.mxu1 %vm279_vm2, %v4774_v39  ;;  %3890 = vmatprep.mubr.msk.bf16.mxu0 %vm279_vm2, %v4489_v8  ;;  %v3191_v8 = vld [vmem:[%s4411_s30 + $0x360] sm:$0xff]  ;;  %v1037_v46 = vpack.c.bf16 %v3190_v44, %v3189_v61  ;;  %v3259_v44 = vld [vmem:[%s4411_s30 + $0x5d8] sm:$0xff] }
  0xc8   : > { %v1038_v48 = vpack.c.bf16 %v3192_v45, %v3191_v8  ;;  %v3261_v8 = vld [vmem:[%s4411_s30 + $0x5f0] sm:$0xff] }
  0xce   : > { %3737 = vmatmul.mubr.msk.bf16.gmra.mrb[28].mxu1 %vm279_vm2, %v4788_v42  ;;  %3891 = vmatmul.mubr.msk.bf16.gmra.mrb[12].mxu0 %vm279_vm2, %v4491_v10  ;;  %v3193_v10 = vld [vmem:[%s4411_s30 + $0x378] sm:$0xff] }
  0xcf   : > { %3742 = vmatprep.mubr.msk.bf16.mxu1 %vm279_vm2, %v1036_v43  ;;  %3894 = vmatprep.mubr.msk.bf16.mxu0 %vm279_vm2, %v4510_v23  ;;  %v3195_v23 = vld [vmem:[%s4411_s30 + $0x390] sm:$0xff]  ;;  %v1039_v56 = vpack.c.bf16 %v3194_v50, %v3193_v10  ;;  %v3265_v10 = vld [vmem:[%s4411_s30 + $0x620] sm:$0xff] }
  0xd0   : > { %v1040_v57 = vpack.c.bf16 %v3196_v51, %v3195_v23  ;;  %v3267_v51 = vld [vmem:[%s4411_s30 + $0x638] sm:$0xff] }
  0xd6   : > { %3743 = vmatmul.mubr.msk.bf16.vlgmr.msra.gmra.mrb[0].mxu1 %vm279_vm2, %v1037_v46  ;;  %3895 = vmatmul.mubr.msk.bf16.gmra.mrb[16].mxu0 %vm279_vm2, %v4512_v25  ;;  %v3198_v25 = vld [vmem:[%s4411_s30 + $0x3b0] sm:$0xff] }
  0xd7   : > { %3945 = vmatpush3.bf16.msra.mxu1 %v4396_v12  ;;  %3746 = vmatprep.mubr.msk.bf16.mxu1 %vm279_vm2, %v1038_v48  ;;  %v3197_v12 = vld [vmem:[%s4411_s30 + $0x3a8] sm:$0xff] }
  0xd8   : > { %3898 = vmatprep.mubr.msk.bf16.mxu0 %vm279_vm2, %v4533_v40  ;;  %v3199_v40 = vld [vmem:[%s4411_s30 + $0x3c0] sm:$0xff]  ;;  %v1041_v60 = vpack.c.bf16 %v3198_v25, %v3197_v12  ;;  %v3263_v48 = vld [vmem:[%s4411_s30 + $0x608] sm:$0xff] }
  0xd9   : > { %v1042_v63 = vpack.c.bf16 %v3200_v58, %v3199_v40 }
  0xde   : > { %3747 = vmatmul.mubr.msk.bf16.gmra.mrb[4].mxu1 %vm279_vm2, %v1039_v56  ;;  %3899 = vmatmul.mubr.msk.bf16.gmra.mrb[20].mxu0 %vm279_vm2, %v4535_v35  ;;  %v3201_v35 = vld [vmem:[%s4411_s30 + $0x3d8] sm:$0xff]  ;;  %v3462_v56 = vld [vmem:[%s4411_s30 + $0x181] sm:$0xff] }
  0xdf   : > { %3750 = vmatprep.mubr.msk.bf16.mxu1 %vm279_vm2, %v1040_v57  ;;  %3902 = vmatprep.mubr.msk.bf16.mxu0 %vm279_vm2, %v4551_v53  ;;  %v3414_v53 = vld [vmem:[%s4411_s30 + $0x320] sm:$0xff]  ;;  %v1043_v9 = vpack.c.bf16 %v3202_v0, %v3201_v35  ;;  %v3463_v57 = vld [vmem:[%s4411_s30 + $0x189] sm:$0xff] }
  0xe0   : > { %v2234_v11 = vpack.c.bf16 %v3414_v53, %v3413_v1 }
  0xe6   : > { %3751 = vmatmul.mubr.msk.bf16.gmra.mrb[8].mxu1 %vm279_vm2, %v1041_v60  ;;  %3903 = vmatmul.mubr.msk.bf16.gmra.mrb[24].mxu0 %vm279_vm2, %v4553_v55  ;;  %v3205_v55 = vld [vmem:[%s4411_s30 + $0x408] sm:$0xff] }
  0xe7   : > { %3754 = vmatprep.mubr.msk.bf16.mxu1 %vm279_vm2, %v1042_v63  ;;  %3906 = vmatprep.mubr.msk.bf16.mxu0 %vm279_vm2, %v4569_v3  ;;  %v3207_v3 = vld [vmem:[%s4411_s30 + $0x420] sm:$0xff]  ;;  %v1045_v17 = vpack.c.bf16 %v3206_v14, %v3205_v55 }
  0xe8   : > { %v1046_v19 = vpack.c.bf16 %v3208_v15, %v3207_v3  ;;  %v4928_v14 = vld [vmem:[%s5176_s2] ss:$0 sm:$0xff] }
  0xee   : > { %3755 = vmatmul.mubr.msk.bf16.gmra.mrb[12].mxu1 %vm279_vm2, %v1043_v9  ;;  %3907 = vmatmul.mubr.msk.bf16.gmra.mrb[28].mxu0 %vm279_vm2, %v2234_v11 }
  0xef   : > { %3758 = vmatprep.mubr.msk.bf16.mxu1 %vm279_vm2, %v1044_v13  ;;  %3912 = vmatprep.mubr.msk.bf16.mxu0 %vm279_vm2, %v4678_v52  ;;  %v3211_v52 = vld [vmem:[%s4411_s30 + $0x450] sm:$0xff] }
  0xf0   : > { %v1048_v31 = vpack.c.bf16 %v3212_v21, %v3211_v52 }
  0xf6   : > { %3759 = vmatmul.mubr.msk.bf16.gmra.mrb[16].mxu1 %vm279_vm2, %v1045_v17  ;;  %3913 = vmatmul.mubr.msk.bf16.vlgmr.msra.gmra.mrb[0].mxu0 %vm279_vm2, %v4680_v54  ;;  %v3213_v54 = vld [vmem:[%s4411_s30 + $0x468] sm:$0xff] }
  0xf7   : > { %3762 = vmatprep.mubr.msk.bf16.mxu1 %vm279_vm2, %v1046_v19  ;;  %3916 = vmatprep.mubr.msk.bf16.mxu0 %vm279_vm2, %v4694_v62  ;;  %v3215_v62 = vld [vmem:[%s4411_s30 + $0x480] sm:$0xff]  ;;  %v1049_v36 = vpack.c.bf16 %v3214_v32, %v3213_v54 }
  0xf8   : > { %v1050_v47 = vpack.c.bf16 %v3216_v24, %v3215_v62 }
  0xfe   : > { %3763 = vmatmul.mubr.msk.bf16.gmra.mrb[20].mxu1 %vm279_vm2, %v1047_v27  ;;  %3917 = vmatmul.mubr.msk.bf16.gmra.mrb[4].mxu0 %vm279_vm2, %v4696_v29  ;;  %v3217_v29 = vld [vmem:[%s4411_s30 + $0x498] sm:$0xff] }
  0xff   : > { %3766 = vmatprep.mubr.msk.bf16.mxu1 %vm279_vm2, %v1048_v31  ;;  %3920 = vmatprep.mubr.msk.bf16.mxu0 %vm279_vm2, %v4708_v4  ;;  %v3252_v4 = vld [vmem:[%s4411_s30 + $0x588] sm:$0xff]  ;;  %v1051_v49 = vpack.c.bf16 %v3218_v22, %v3217_v29 }
 0x100   : > { %v1340_v59 = vpack.c.bf16 %v3253_v34, %v3252_v4 }
 0x106   : > { %3767 = vmatmul.mubr.msk.bf16.gmra.mrb[24].mxu1 %vm279_vm2, %v1049_v36  ;;  %3921 = vmatmul.mubr.msk.bf16.gmra.mrb[8].mxu0 %vm279_vm2, %v4710_v6  ;;  %v3254_v6 = vld [vmem:[%s4411_s30 + $0x5a0] sm:$0xff] }
 0x107   : > { %3770 = vmatprep.mubr.msk.bf16.mxu1 %vm279_vm2, %v1050_v47  ;;  %3924 = vmatprep.mubr.msk.bf16.mxu0 %vm279_vm2, %v4724_v16  ;;  %v3256_v16 = vld [vmem:[%s4411_s30 + $0x5b8] sm:$0xff]  ;;  %v1341_v43 = vpack.c.bf16 %v3255_v38, %v3254_v6 }
 0x108   : > { %v1342_v61 = vpack.c.bf16 %v3257_v41, %v3256_v16 }
 0x10e   : > { %3771 = vmatmul.mubr.msk.bf16.gmra.mrb[28].mxu1 %vm279_vm2, %v1051_v49  ;;  %3925 = vmatmul.mubr.msk.bf16.gmra.mrb[12].mxu0 %vm279_vm2, %v4726_v18  ;;  %v3258_v18 = vld [vmem:[%s4411_s30 + $0x5d0] sm:$0xff] }
 0x10f   : > { %3792 = vmatprep.mubr.msk.bf16.mxu1 %vm279_vm2, %v1340_v59  ;;  %3928 = vmatprep.mubr.msk.bf16.mxu0 %vm279_vm2, %v4739_v30  ;;  %v3260_v30 = vld [vmem:[%s4411_s30 + $0x5e8] sm:$0xff]  ;;  %v1343_v45 = vpack.c.bf16 %v3259_v44, %v3258_v18 }
 0x110   : > { %v1344_v46 = vpack.c.bf16 %v3261_v8, %v3260_v30 }
 0x116   : > { %3793 = vmatmul.mubr.msk.bf16.vlgmr.msra.gmra.mrb[16].mxu1 %vm279_vm2, %v1341_v43  ;;  %3929 = vmatmul.mubr.msk.bf16.gmra.mrb[16].mxu0 %vm279_vm2, %v4741_v5  ;;  %v3262_v5 = vld [vmem:[%s4411_s30 + $0x600] sm:$0xff] }
 0x117   : > { %3796 = vmatprep.mubr.msk.bf16.mxu1 %vm279_vm2, %v1342_v61  ;;  %3932 = vmatprep.mubr.msk.bf16.mxu0 %vm279_vm2, %v4756_v28  ;;  %v3264_v28 = vld [vmem:[%s4411_s30 + $0x618] sm:$0xff]  ;;  %v1345_v50 = vpack.c.bf16 %v3263_v48, %v3262_v5 }
 0x118   : > { %v1346_v23 = vpack.c.bf16 %v3265_v10, %v3264_v28 }
 0x11e   : > { %3797 = vmatmul.mubr.msk.bf16.gmra.mrb[20].mxu1 %vm279_vm2, %v1343_v45  ;;  %3933 = vmatmul.mubr.msk.bf16.gmra.mrb[20].mxu0 %vm279_vm2, %v4758_v33  ;;  %v3266_v33 = vld [vmem:[%s4411_s30 + $0x630] sm:$0xff] }
 0x11f   : > { %3800 = vmatprep.mubr.msk.bf16.mxu1 %vm279_vm2, %v1344_v46  ;;  %3936 = vmatprep.mubr.msk.bf16.mxu0 %vm279_vm2, %v4772_v37  ;;  %v1347_v12 = vpack.c.bf16 %v3267_v51, %v3266_v33  ;;  %v2529_v37 = vpack.c.bf16 %v3463_v57, %v3462_v56 }
 0x126   : > { %3801 = vmatmul.mubr.msk.bf16.gmra.mrb[24].mxu1 %vm279_vm2, %v1345_v50  ;;  %3937 = vmatmul.mubr.msk.bf16.gmra.mrb[24].mxu0 %vm279_vm2, %v4774_v39 }
 0x127   : > { %3804 = vmatprep.mubr.msk.bf16.mxu1 %vm279_vm2, %v1346_v23  ;;  %3940 = vmatprep.mubr.msk.bf16.mxu0 %vm279_vm2, %v4788_v42 }
 0x12e   : > { %3805 = vmatmul.mubr.msk.bf16.gmra.mrb[28].mxu1 %vm279_vm2, %v1347_v12  ;;  %3941 = vmatmul.mubr.msk.bf16.gmra.mrb[28].mxu0 %vm279_vm2, %v2529_v37 }
 0x1a9   : > { %v3744_v25 = vpop.f32.mrb[0].mxu1 }
 0x1aa   : > { %v1140_v40 = vpop.f32.mrb[1].mxu1 }
 0x1ab   : > { %v3745_v58 = vpop.f32.mrb[2].mxu1 }
 0x1ac   : > { %v1143_v60 = vpop.f32.mrb[3].mxu1 }
 0x1b1   : > { %v3748_v39 = vpop.f32.mrb[4].mxu1 }
 0x1b2   : > { %v1156_v63 = vpop.f32.mrb[5].mxu1 }
 0x1b3   : > { %v3749_v35 = vpop.f32.mrb[6].mxu1 }
 0x1b4   : > { %v1159_v0 = vpop.f32.mrb[7].mxu1 }
 0x1b9   : > { %v3752_v1 = vpop.f32.mrb[8].mxu1 }
 0x1ba   : > { %v1172_v53 = vpop.f32.mrb[9].mxu1 }
 0x1bb   : > { %v3753_v2 = vpop.f32.mrb[10].mxu1 }
 0x1bc   : > { %v4915_v42 = vpop.f32.mrb[11].mxu1 }
 0x1c1   : > { %v4917_v7 = vpop.f32.mrb[12].mxu1 }
 0x1c2   : > { %v4919_v9 = vpop.f32.mrb[13].mxu1 }
 0x1c3   : > { %v4921_v11 = vpop.f32.mrb[14].mxu1 }
 0x1c4   : > { %v4923_v13 = vpop.f32.mrb[15].mxu1 }
 0x1c9   : > { %v3914_v55 = vpop.f32.mrb[0].mxu0 }
 0x1ca   : > { %v3946_v3 = vadd.f32 %v3914_v55, %v3744_v25  ;;  %v2618_v15 = vpop.f32.mrb[1].mxu0 }
 0x1cb   : > { %v3947_v17 = vadd.f32 %v2618_v15, %v1140_v40  ;;  %v3915_v19 = vpop.f32.mrb[2].mxu0 }
 0x1cc   : > { %v4931_v20 = vadd.f32 %v3946_v3, %v4928_v14  ;;  %v3948_v26 = vadd.f32 %v3915_v19, %v3745_v58  ;;  %v2621_v52 = vpop.f32.mrb[3].mxu0 }
 0x1cd   : > { %v4934_v21 = vadd.f32 %v3947_v17, %v4928_v14  ;;  %v3949_v27 = vadd.f32 %v2621_v52, %v1143_v60 }
 0x1ce   : > { %v2818_v31 = vsub.f32 0.0, %v4931_v20  ;;  %v4938_v54 = vadd.f32 %v3948_v26, %v4928_v14 }
 0x1cf   : > { %v2816_v32 = vsub.f32 0.0, %v4934_v21  ;;  %v4942_v62 = vadd.f32 %v3949_v27, %v4928_v14 }
 0x1d0   : > { %v2852_v24 = vmul.f32 1.442695, %v2818_v31  ;;  %v2819_v36 = vsub.f32 0.0, %v4938_v54 }
 0x1d1   : > { %v2848_v47 = vmul.f32 1.442695, %v2816_v32  ;;  %v2817_v29 = vsub.f32 0.0, %v4942_v62  ;;  %v3918_v22 = vpop.f32.mrb[4].mxu0 }
 0x1d2   : > { %4212 = vpow2.f32 %v2852_v24  ;;  %v2854_v4 = vmul.f32 1.442695, %v2819_v36  ;;  %v3950_v34 = vadd.f32 %v3918_v22, %v3748_v39  ;;  %v2634_v49 = vpop.f32.mrb[5].mxu0 }
 0x1d3   : > { %4214 = vpow2.f32 %v2848_v47  ;;  %v2850_v59 = vmul.f32 1.442695, %v2817_v29  ;;  %v3951_v6 = vadd.f32 %v2634_v49, %v1156_v63  ;;  %v3919_v38 = vpop.f32.mrb[6].mxu0 }
 0x1d4   : > { %4216 = vpow2.f32 %v2854_v4  ;;  %v4947_v16 = vadd.f32 %v3950_v34, %v4928_v14  ;;  %v3952_v41 = vadd.f32 %v3919_v38, %v3749_v35  ;;  %v2637_v43 = vpop.f32.mrb[7].mxu0 }
 0x1d5   : > { %4218 = vpow2.f32 %v2850_v59  ;;  %v4950_v61 = vadd.f32 %v3951_v6, %v4928_v14  ;;  %v3953_v18 = vadd.f32 %v2637_v43, %v1159_v0 }
 0x1d6   : > { %v2822_v44 = vsub.f32 0.0, %v4947_v16  ;;  %v4954_v30 = vadd.f32 %v3952_v41, %v4928_v14 }
 0x1d7   : > { %v2820_v8 = vsub.f32 0.0, %v4950_v61  ;;  %v4958_v45 = vadd.f32 %v3953_v18, %v4928_v14 }
 0x1d8   : > { %v2860_v46 = vmul.f32 1.442695, %v2822_v44  ;;  %v2823_v5 = vsub.f32 0.0, %v4954_v30 }
 0x1d9   : > { %v2856_v48 = vmul.f32 1.442695, %v2820_v8  ;;  %v2821_v28 = vsub.f32 0.0, %v4958_v45  ;;  %v3922_v10 = vpop.f32.mrb[8].mxu0 }
 0x1da   : > { %4220 = vpow2.f32 %v2860_v46  ;;  %v2862_v50 = vmul.f32 1.442695, %v2823_v5  ;;  %v3954_v23 = vadd.f32 %v3922_v10, %v3752_v1  ;;  %v2650_v33 = vpop.f32.mrb[9].mxu0 }
 0x1db   : > { %4222 = vpow2.f32 %v2856_v48  ;;  %v2858_v51 = vmul.f32 1.442695, %v2821_v28  ;;  %v3955_v56 = vadd.f32 %v2650_v33, %v1172_v53  ;;  %v3923_v57 = vpop.f32.mrb[10].mxu0 }
 0x1dc   : > { %v4213_v12 = vpop.eup %4212  ;;  %4224 = vpow2.f32 %v2862_v50  ;;  %v4963_v37 = vadd.f32 %v3954_v23, %v4928_v14  ;;  %v3956_v25 = vadd.f32 %v3923_v57, %v3753_v2  ;;  %v2653_v40 = vpop.f32.mrb[11].mxu0 }
 0x1dd   : > { %v4215_v58 = vpop.eup %4214  ;;  %v2914_v60 = vadd.f32 1.0, %v4213_v12  ;;  %4226 = vpow2.f32 %v2858_v51  ;;  %v4966_v39 = vadd.f32 %v3955_v56, %v4928_v14  ;;  %v3957_v63 = vadd.f32 %v2653_v40, %v4915_v42 }
 0x1de   : > { %v4217_v35 = vpop.eup %4216  ;;  %v2912_v0 = vadd.f32 1.0, %v4215_v58  ;;  %v2826_v1 = vsub.f32 0.0, %v4963_v37  ;;  %v4972_v53 = vadd.f32 %v3956_v25, %v4928_v14 }
 0x1df   : > { %v4219_v2 = vpop.eup %4218  ;;  %4228 = vrcp.f32 %v2914_v60  ;;  %v2915_v55 = vadd.f32 1.0, %v4217_v35  ;;  %v2824_v3 = vsub.f32 0.0, %v4966_v39  ;;  %v4976_v15 = vadd.f32 %v3957_v63, %v4928_v14 }
 0x1e0   : > { %4230 = vrcp.f32 %v2912_v0  ;;  %v2913_v42 = vadd.f32 1.0, %v4219_v2  ;;  %v2868_v17 = vmul.f32 1.442695, %v2826_v1  ;;  %v2827_v19 = vsub.f32 0.0, %v4972_v53 }
 0x1e1   : > { %4232 = vrcp.f32 %v2915_v55  ;;  %v2864_v26 = vmul.f32 1.442695, %v2824_v3  ;;  %v2825_v52 = vsub.f32 0.0, %v4976_v15  ;;  %v3926_v27 = vpop.f32.mrb[12].mxu0 }
 0x1e2   : > { %4234 = vrcp.f32 %v2913_v42  ;;  %v2870_v31 = vmul.f32 1.442695, %v2827_v19  ;;  %v3958_v32 = vadd.f32 %v3926_v27, %v4917_v7  ;;  %v2666_v24 = vpop.f32.mrb[13].mxu0 }
 0x1e3   : > { %4236 = vpow2.f32 %v2868_v17  ;;  %v2866_v36 = vmul.f32 1.442695, %v2825_v52  ;;  %v3959_v47 = vadd.f32 %v2666_v24, %v4919_v9  ;;  %v3927_v29 = vpop.f32.mrb[14].mxu0 }
 0x1e4   : > { %v4221_v22 = vpop.eup %4220  ;;  %4238 = vpow2.f32 %v2864_v26  ;;  %v4988_v4 = vadd.f32 %v3958_v32, %v4928_v14  ;;  %v3960_v34 = vadd.f32 %v3927_v29, %v4921_v11  ;;  %v2669_v49 = vpop.f32.mrb[15].mxu0 }
 0x1e5   : > { %v4223_v59 = vpop.eup %4222  ;;  %v2918_v6 = vadd.f32 1.0, %v4221_v22  ;;  %4240 = vpow2.f32 %v2870_v31  ;;  %v4992_v7 = vadd.f32 %v3959_v47, %v4928_v14  ;;  %v3961_v38 = vadd.f32 %v2669_v49, %v4923_v13 }
 0x1e6   : > { %v4225_v41 = vpop.eup %4224  ;;  %v2916_v9 = vadd.f32 1.0, %v4223_v59  ;;  %4242 = vpow2.f32 %v2866_v36  ;;  %v2830_v43 = vsub.f32 0.0, %v4988_v4  ;;  %v4998_v18 = vadd.f32 %v3960_v34, %v4928_v14 }
 0x1e7   : > { %v4227_v44 = vpop.eup %4226  ;;  %4244 = vrcp.f32 %v2918_v6  ;;  %v2919_v11 = vadd.f32 1.0, %v4225_v41  ;;  %v2828_v8 = vsub.f32 0.0, %v4992_v7  ;;  %v5002_v46 = vadd.f32 %v3961_v38, %v4928_v14 }
 0x1e8   : > { %4246 = vrcp.f32 %v2916_v9  ;;  %v2917_v5 = vadd.f32 1.0, %v4227_v44  ;;  %v2876_v13 = vmul.f32 1.442695, %v2830_v43  ;;  %v2831_v48 = vsub.f32 0.0, %v4998_v18 }
 0x1e9   : > { %v3794_v28 = vpop.f32.mrb[16].mxu1  ;;  %v4229_v10 = vpop.eup %4228  ;;  %4248 = vrcp.f32 %v2919_v11  ;;  %v2872_v50 = vmul.f32 1.442695, %v2828_v8  ;;  %v2829_v23 = vsub.f32 0.0, %v5002_v46 }
 0x1ea   : > { %v3930_v33 = vpop.f32.mrb[16].mxu0  ;;  %v1500_v51 = vpop.f32.mrb[17].mxu1  ;;  %v2978_v57 = vmul.f32 %v4229_v10, %v4931_v20  ;;  %4250 = vrcp.f32 %v2917_v5  ;;  %v2878_v12 = vmul.f32 1.442695, %v2831_v48 }
 0x1eb   : > { %v4231_v56 = vpop.eup %4230  ;;  %v3962_v25 = vadd.f32 %v3930_v33, %v3794_v28  ;;  %v2682_v40 = vpop.f32.mrb[17].mxu0  ;;  %4252 = vpow2.f32 %v2876_v13  ;;  %v2874_v35 = vmul.f32 1.442695, %v2829_v23 }
 0x1ec   : > { %v3795_v58 = vpop.f32.mrb[18].mxu1  ;;  %v4233_v60 = vpop.eup %4232  ;;  %v2976_v63 = vmul.f32 %v4231_v56, %v4934_v21  ;;  %v3963_v0 = vadd.f32 %v2682_v40, %v1500_v51  ;;  %3011 = vst.msk [vmem:[%s5008_s16 + $0x10] sm:$0xff] %vm3008_vm3, %v2978_v57  ;;  %4254 = vpow2.f32 %v2872_v50 }
 0x1ed   : > { %v3931_v1 = vpop.f32.mrb[18].mxu0  ;;  %v1503_v2 = vpop.f32.mrb[19].mxu1  ;;  %v2979_v20 = vmul.f32 %v4233_v60, %v4938_v54  ;;  %v5017_v3 = vadd.f32 %v3962_v25, %v4928_v14  ;;  %4256 = vpow2.f32 %v2878_v12 }
 0x1ee   : > { %v4235_v55 = vpop.eup %4234  ;;  %v3964_v42 = vadd.f32 %v3931_v1, %v3795_v58  ;;  %v2685_v17 = vpop.f32.mrb[19].mxu0  ;;  %3009 = vst.msk [vmem:[%s5008_s16] sm:$0xff] %vm3008_vm3, %v2976_v63  ;;  %v5023_v26 = vadd.f32 %v3963_v0, %v4928_v14  ;;  %4258 = vpow2.f32 %v2874_v35 }
 0x1ef   : > { %v4237_v19 = vpop.eup %4236  ;;  %v2977_v21 = vmul.f32 %v4235_v55, %v4942_v62  ;;  %v3965_v52 = vadd.f32 %v2685_v17, %v1503_v2  ;;  %3012 = vst.msk [vmem:[%s5008_s16 + $0x18] sm:$0xff] %vm3008_vm3, %v2979_v20  ;;  %v2834_v31 = vsub.f32 0.0, %v5017_v3 }
 0x1f0   : > { %v4239_v27 = vpop.eup %4238  ;;  %v2922_v54 = vadd.f32 1.0, %v4237_v19  ;;  %v5029_v32 = vadd.f32 %v3964_v42, %v4928_v14  ;;  %v2832_v62 = vsub.f32 0.0, %v5023_v26 }
 0x1f1   : > { %v4241_v24 = vpop.eup %4240  ;;  %3010 = vst.msk [vmem:[%s5008_s16 + $0x8] sm:$0xff] %vm3008_vm3, %v2977_v21  ;;  %v2920_v36 = vadd.f32 1.0, %v4239_v27  ;;  %v5035_v47 = vadd.f32 %v3965_v52, %v4928_v14  ;;  %v2884_v34 = vmul.f32 1.442695, %v2834_v31  ;;  %v3798_v59 = vpop.f32.mrb[20].mxu1 }
 0x1f2   : > { %v4243_v29 = vpop.eup %4242  ;;  %4260 = vrcp.f32 %v2922_v54  ;;  %v2923_v22 = vadd.f32 1.0, %v4241_v24  ;;  %v2835_v49 = vsub.f32 0.0, %v5029_v32  ;;  %v2880_v41 = vmul.f32 1.442695, %v2832_v62  ;;  %v3934_v43 = vpop.f32.mrb[20].mxu0 }
 0x1f3   : > { %v4245_v6 = vpop.eup %4244  ;;  %4262 = vrcp.f32 %v2920_v36  ;;  %v2921_v38 = vadd.f32 1.0, %v4243_v29  ;;  %v2833_v9 = vsub.f32 0.0, %v5035_v47  ;;  %v1516_v44 = vpop.f32.mrb[21].mxu1  ;;  %v3966_v13 = vadd.f32 %v3934_v43, %v3798_v59 }
 0x1f4   : > { %v4247_v11 = vpop.eup %4246  ;;  %v2982_v8 = vmul.f32 %v4245_v6, %v4947_v16  ;;  %4264 = vrcp.f32 %v2923_v22  ;;  %v2886_v5 = vmul.f32 1.442695, %v2835_v49  ;;  %v2698_v48 = vpop.f32.mrb[21].mxu0 }
 0x1f5   : > { %v3799_v28 = vpop.f32.mrb[22].mxu1  ;;  %v4249_v10 = vpop.eup %4248  ;;  %v2980_v50 = vmul.f32 %v4247_v11, %v4950_v61  ;;  %4266 = vrcp.f32 %v2921_v38  ;;  %v2882_v23 = vmul.f32 1.442695, %v2833_v9  ;;  %v3967_v33 = vadd.f32 %v2698_v48, %v1516_v44 }
 0x1f6   : > { %v3935_v51 = vpop.f32.mrb[22].mxu0  ;;  %v1519_v56 = vpop.f32.mrb[23].mxu1  ;;  %3015 = vst.msk [vmem:[%s5008_s16 + $0x30] sm:$0xff] %vm3008_vm3, %v2982_v8  ;;  %v2983_v16 = vmul.f32 %v4249_v10, %v4954_v30  ;;  %4268 = vpow2.f32 %v2884_v34  ;;  %v5045_v12 = vadd.f32 %v3966_v13, %v4928_v14 }
 0x1f7   : > { %v4251_v57 = vpop.eup %4250  ;;  %v3968_v25 = vadd.f32 %v3935_v51, %v3799_v28  ;;  %v2701_v40 = vpop.f32.mrb[23].mxu0  ;;  %3013 = vst.msk [vmem:[%s5008_s16 + $0x20] sm:$0xff] %vm3008_vm3, %v2980_v50  ;;  %4270 = vpow2.f32 %v2880_v41  ;;  %v5051_v60 = vadd.f32 %v3967_v33, %v4928_v14 }
 0x1f8   : > { %v4253_v58 = vpop.eup %4252  ;;  %v2981_v61 = vmul.f32 %v4251_v57, %v4958_v45  ;;  %v3969_v63 = vadd.f32 %v2701_v40, %v1519_v56  ;;  %3016 = vst.msk [vmem:[%s5008_s16 + $0x38] sm:$0xff] %vm3008_vm3, %v2983_v16  ;;  %4272 = vpow2.f32 %v2886_v5  ;;  %v2838_v0 = vsub.f32 0.0, %v5045_v12 }
 0x1f9   : > { %v4255_v35 = vpop.eup %4254  ;;  %v2926_v30 = vadd.f32 1.0, %v4253_v58  ;;  %v5057_v1 = vadd.f32 %v3968_v25, %v4928_v14  ;;  %4274 = vpow2.f32 %v2882_v23  ;;  %v2836_v45 = vsub.f32 0.0, %v5051_v60  ;;  %v3802_v52 = vpop.f32.mrb[24].mxu1 }
 0x1fa   : > { %v4257_v2 = vpop.eup %4256  ;;  %3014 = vst.msk [vmem:[%s5008_s16 + $0x28] sm:$0xff] %vm3008_vm3, %v2981_v61  ;;  %v2924_v55 = vadd.f32 1.0, %v4255_v35  ;;  %v5063_v20 = vadd.f32 %v3969_v63, %v4928_v14  ;;  %v2892_v19 = vmul.f32 1.442695, %v2838_v0  ;;  %v3938_v24 = vpop.f32.mrb[24].mxu0 }
 0x1fb   : > { %v4259_v42 = vpop.eup %4258  ;;  %4276 = vrcp.f32 %v2926_v30  ;;  %v2927_v17 = vadd.f32 1.0, %v4257_v2  ;;  %v2839_v21 = vsub.f32 0.0, %v5057_v1  ;;  %v2888_v54 = vmul.f32 1.442695, %v2836_v45  ;;  %v1532_v36 = vpop.f32.mrb[25].mxu1 }
 0x1fc   : > { %4278 = vrcp.f32 %v2924_v55  ;;  %v2925_v27 = vadd.f32 1.0, %v4259_v42  ;;  %v2837_v31 = vsub.f32 0.0, %v5063_v20  ;;  %v4261_v62 = vpop.eup %4260  ;;  %v3970_v22 = vadd.f32 %v3938_v24, %v3802_v52  ;;  %v2714_v34 = vpop.f32.mrb[25].mxu0 }
 0x1fd   : > { %4280 = vrcp.f32 %v2927_v17  ;;  %v2894_v29 = vmul.f32 1.442695, %v2839_v21  ;;  %v3803_v49 = vpop.f32.mrb[26].mxu1  ;;  %v4263_v59 = vpop.eup %4262  ;;  %v2986_v6 = vmul.f32 %v4261_v62, %v4963_v37  ;;  %v3971_v41 = vadd.f32 %v2714_v34, %v1532_v36 }
 0x1fe   : > { %4282 = vrcp.f32 %v2925_v27  ;;  %v2890_v38 = vmul.f32 1.442695, %v2837_v31  ;;  %v3939_v9 = vpop.f32.mrb[26].mxu0  ;;  %v1535_v43 = vpop.f32.mrb[27].mxu1  ;;  %v2984_v11 = vmul.f32 %v4263_v59, %v4966_v39  ;;  %v5070_v8 = vadd.f32 %v3970_v22, %v4928_v14 }
 0x1ff   : > { %v4265_v44 = vpop.eup %4264  ;;  %4284 = vpow2.f32 %v2892_v19  ;;  %v3972_v5 = vadd.f32 %v3939_v9, %v3803_v49  ;;  %v2717_v13 = vpop.f32.mrb[27].mxu0  ;;  %3019 = vst.msk [vmem:[%s5008_s16 + $0x50] sm:$0xff] %vm3008_vm3, %v2986_v6  ;;  %v5076_v28 = vadd.f32 %v3971_v41, %v4928_v14 }
 0x200   : > { %v4267_v48 = vpop.eup %4266  ;;  %v2987_v37 = vmul.f32 %v4265_v44, %v4972_v53  ;;  %4286 = vpow2.f32 %v2888_v54  ;;  %v3973_v10 = vadd.f32 %v2717_v13, %v1535_v43  ;;  %3017 = vst.msk [vmem:[%s5008_s16 + $0x40] sm:$0xff] %vm3008_vm3, %v2984_v11  ;;  %v2842_v23 = vsub.f32 0.0, %v5070_v8 }
 0x201   : > { %v4269_v50 = vpop.eup %4268  ;;  %v2985_v39 = vmul.f32 %v4267_v48, %v4976_v15  ;;  %4288 = vpow2.f32 %v2894_v29  ;;  %v5083_v33 = vadd.f32 %v3972_v5, %v4928_v14  ;;  %v2840_v56 = vsub.f32 0.0, %v5076_v28  ;;  %v3806_v58 = vpop.f32.mrb[28].mxu1 }
 0x202   : > { %v4271_v51 = vpop.eup %4270  ;;  %3020 = vst.msk [vmem:[%s5008_s16 + $0x58] sm:$0xff] %vm3008_vm3, %v2987_v37  ;;  %v2930_v53 = vadd.f32 1.0, %v4269_v50  ;;  %4290 = vpow2.f32 %v2890_v38  ;;  %v5089_v57 = vadd.f32 %v3973_v10, %v4928_v14  ;;  %v2900_v25 = vmul.f32 1.442695, %v2842_v23  ;;  %v3942_v0 = vpop.f32.mrb[28].mxu0 }
 0x203   : > { %v4273_v16 = vpop.eup %4272  ;;  %3018 = vst.msk [vmem:[%s5008_s16 + $0x48] sm:$0xff] %vm3008_vm3, %v2985_v39  ;;  %v2928_v15 = vadd.f32 1.0, %v4271_v51  ;;  %v2843_v40 = vsub.f32 0.0, %v5083_v33  ;;  %v2896_v35 = vmul.f32 1.442695, %v2840_v56  ;;  %v1548_v2 = vpop.f32.mrb[29].mxu1  ;;  %v3974_v17 = vadd.f32 %v3942_v0, %v3806_v58 }
 0x204   : > { %v4275_v61 = vpop.eup %4274  ;;  %4292 = vrcp.f32 %v2930_v53  ;;  %v2931_v63 = vadd.f32 1.0, %v4273_v16  ;;  %v2841_v30 = vsub.f32 0.0, %v5089_v57  ;;  %v2730_v19 = vpop.f32.mrb[29].mxu0 }
 0x205   : > { %v4277_v55 = vpop.eup %4276  ;;  %4294 = vrcp.f32 %v2928_v15  ;;  %v2929_v45 = vadd.f32 1.0, %v4275_v61  ;;  %v2902_v42 = vmul.f32 1.442695, %v2843_v40  ;;  %v3807_v21 = vpop.f32.mrb[30].mxu1  ;;  %v3975_v31 = vadd.f32 %v2730_v19, %v1548_v2 }
 0x206   : > { %v4279_v52 = vpop.eup %4278  ;;  %v2990_v27 = vmul.f32 %v4277_v55, %v4988_v4  ;;  %4296 = vrcp.f32 %v2931_v63  ;;  %v2898_v54 = vmul.f32 1.442695, %v2841_v30  ;;  %v3943_v24 = vpop.f32.mrb[30].mxu0  ;;  %v5098_v22 = vadd.f32 %v3974_v17, %v4928_v14 }
 0x207   : > { %v1551_v36 = vpop.f32.mrb[31].mxu1  ;;  %v4281_v62 = vpop.eup %4280  ;;  %v2988_v29 = vmul.f32 %v4279_v52, %v4992_v7  ;;  %4298 = vrcp.f32 %v2929_v45  ;;  %v3976_v34 = vadd.f32 %v3943_v24, %v3807_v21  ;;  %v5104_v6 = vadd.f32 %v3975_v31, %v4928_v14 }
 0x208   : > { %v2733_v49 = vpop.f32.mrb[31].mxu0  ;;  %v4283_v59 = vpop.eup %4282  ;;  %3023 = vst.msk [vmem:[%s5008_s16 + $0x70] sm:$0xff] %vm3008_vm3, %v2990_v27  ;;  %v2991_v4 = vmul.f32 %v4281_v62, %v4998_v18  ;;  %4300 = vpow2.f32 %v2900_v25  ;;  %v2846_v9 = vsub.f32 0.0, %v5098_v22 }
 0x209   : > { %v3977_v38 = vadd.f32 %v2733_v49, %v1551_v36  ;;  %v4285_v41 = vpop.eup %4284  ;;  %3021 = vst.msk [vmem:[%s5008_s16 + $0x60] sm:$0xff] %vm3008_vm3, %v2988_v29  ;;  %v2989_v7 = vmul.f32 %v4283_v59, %v5002_v46  ;;  %4302 = vpow2.f32 %v2896_v35  ;;  %v5111_v43 = vadd.f32 %v3976_v34, %v4928_v14 }
 0x20a   : > { %v4287_v44 = vpop.eup %4286  ;;  %3024 = vst.msk [vmem:[%s5008_s16 + $0x78] sm:$0xff] %vm3008_vm3, %v2991_v4  ;;  %v2934_v18 = vadd.f32 1.0, %v4285_v41  ;;  %4304 = vpow2.f32 %v2902_v42  ;;  %v2844_v11 = vsub.f32 0.0, %v5104_v6  ;;  %v2908_v50 = vmul.f32 1.442695, %v2846_v9 }
 0x20b   : > { %v5117_v5 = vadd.f32 %v3977_v38, %v4928_v14  ;;  %v4289_v13 = vpop.eup %4288  ;;  %3022 = vst.msk [vmem:[%s5008_s16 + $0x68] sm:$0xff] %vm3008_vm3, %v2989_v7  ;;  %v2932_v46 = vadd.f32 1.0, %v4287_v44  ;;  %4306 = vpow2.f32 %v2898_v54  ;;  %v2847_v48 = vsub.f32 0.0, %v5111_v43 }
 0x20c   : > { %v4291_v37 = vpop.eup %4290  ;;  %4308 = vrcp.f32 %v2934_v18  ;;  %v2935_v10 = vadd.f32 1.0, %v4289_v13  ;;  %v2904_v51 = vmul.f32 1.442695, %v2844_v11 }
 0x20d   : > { %v2845_v39 = vsub.f32 0.0, %v5117_v5  ;;  %4310 = vrcp.f32 %v2932_v46  ;;  %v2933_v23 = vadd.f32 1.0, %v4291_v37  ;;  %v2910_v53 = vmul.f32 1.442695, %v2847_v48 }
 0x20e   : > { %v4293_v14 = vpop.eup %4292  ;;  %4312 = vrcp.f32 %v2935_v10 }
 0x20f   : > { %v4295_v56 = vpop.eup %4294  ;;  %v2994_v16 = vmul.f32 %v4293_v14, %v5017_v3  ;;  %4314 = vrcp.f32 %v2933_v23  ;;  %v2906_v15 = vmul.f32 1.442695, %v2845_v39 }
 0x210   : > { %v4297_v25 = vpop.eup %4296  ;;  %v2992_v40 = vmul.f32 %v4295_v56, %v5023_v26  ;;  %4316 = vpow2.f32 %v2908_v50 }
 0x211   : > { %v4299_v58 = vpop.eup %4298  ;;  %3027 = vst.msk [vmem:[%s5008_s16 + $0x90] sm:$0xff] %vm3008_vm3, %v2994_v16  ;;  %v2995_v61 = vmul.f32 %v4297_v25, %v5029_v32  ;;  %4318 = vpow2.f32 %v2904_v51 }
 0x212   : > { %v4301_v63 = vpop.eup %4300  ;;  %3025 = vst.msk [vmem:[%s5008_s16 + $0x80] sm:$0xff] %vm3008_vm3, %v2992_v40  ;;  %v2993_v35 = vmul.f32 %v4299_v58, %v5035_v47  ;;  %4320 = vpow2.f32 %v2910_v53 }
 0x213   : > { %v4303_v3 = vpop.eup %4302  ;;  %3028 = vst.msk [vmem:[%s5008_s16 + $0x98] sm:$0xff] %vm3008_vm3, %v2995_v61  ;;  %v2938_v30 = vadd.f32 1.0, %v4301_v63  ;;  %4322 = vpow2.f32 %v2906_v15 }
 0x214   : > { %v4305_v0 = vpop.eup %4304  ;;  %3026 = vst.msk [vmem:[%s5008_s16 + $0x88] sm:$0xff] %vm3008_vm3, %v2993_v35  ;;  %v2936_v26 = vadd.f32 1.0, %v4303_v3 }
 0x215   : > { %v4307_v2 = vpop.eup %4306  ;;  %4324 = vrcp.f32 %v2938_v30  ;;  %v2939_v32 = vadd.f32 1.0, %v4305_v0 }
 0x216   : > { %v4309_v55 = vpop.eup %4308  ;;  %4326 = vrcp.f32 %v2936_v26  ;;  %v2937_v45 = vadd.f32 1.0, %v4307_v2 }
 0x217   : > { %v4311_v47 = vpop.eup %4310  ;;  %v2998_v42 = vmul.f32 %v4309_v55, %v5045_v12  ;;  %4328 = vrcp.f32 %v2939_v32 }
 0x218   : > { %v4313_v17 = vpop.eup %4312  ;;  %v2996_v19 = vmul.f32 %v4311_v47, %v5051_v60  ;;  %4330 = vrcp.f32 %v2937_v45 }
 0x219   : > { %v4315_v21 = vpop.eup %4314  ;;  %3031 = vst.msk [vmem:[%s5008_s16 + $0xb0] sm:$0xff] %vm3008_vm3, %v2998_v42  ;;  %v2999_v52 = vmul.f32 %v4313_v17, %v5057_v1 }
 0x21a   : > { %v4317_v27 = vpop.eup %4316  ;;  %3029 = vst.msk [vmem:[%s5008_s16 + $0xa0] sm:$0xff] %vm3008_vm3, %v2996_v19  ;;  %v2997_v54 = vmul.f32 %v4315_v21, %v5063_v20 }
 0x21b   : > { %v4319_v31 = vpop.eup %4318  ;;  %3032 = vst.msk [vmem:[%s5008_s16 + $0xb8] sm:$0xff] %vm3008_vm3, %v2999_v52  ;;  %v2942_v24 = vadd.f32 1.0, %v4317_v27 }
 0x21c   : > { %v4321_v12 = vpop.eup %4320  ;;  %3030 = vst.msk [vmem:[%s5008_s16 + $0xa8] sm:$0xff] %vm3008_vm3, %v2997_v54  ;;  %v2940_v60 = vadd.f32 1.0, %v4319_v31 }
 0x21d   : > { %v4323_v36 = vpop.eup %4322  ;;  %4332 = vrcp.f32 %v2942_v24  ;;  %v2943_v62 = vadd.f32 1.0, %v4321_v12 }
 0x21e   : > { %4334 = vrcp.f32 %v2940_v60  ;;  %v2941_v1 = vadd.f32 1.0, %v4323_v36 }
 0x21f   : > { %v4325_v29 = vpop.eup %4324  ;;  %4336 = vrcp.f32 %v2943_v62 }
 0x220   : > { %v4327_v20 = vpop.eup %4326  ;;  %v3002_v34 = vmul.f32 %v4325_v29, %v5070_v8  ;;  %4338 = vrcp.f32 %v2941_v1 }
 0x221   : > { %v4329_v49 = vpop.eup %4328  ;;  %v3000_v59 = vmul.f32 %v4327_v20, %v5076_v28 }
 0x222   : > { %v4331_v4 = vpop.eup %4330  ;;  %3035 = vst.msk [vmem:[%s5008_s16 + $0xd0] sm:$0xff] %vm3008_vm3, %v3002_v34  ;;  %v3003_v38 = vmul.f32 %v4329_v49, %v5083_v33 }
 0x223   : > { %3033 = vst.msk [vmem:[%s5008_s16 + $0xc0] sm:$0xff] %vm3008_vm3, %v3000_v59  ;;  %v3001_v41 = vmul.f32 %v4331_v4, %v5089_v57 }
 0x224   : > { %3036 = vst.msk [vmem:[%s5008_s16 + $0xd8] sm:$0xff] %vm3008_vm3, %v3003_v38 }
 0x225   : > { %3034 = vst.msk [vmem:[%s5008_s16 + $0xc8] sm:$0xff] %vm3008_vm3, %v3001_v41 }
 0x227   : > { %v4333_v8 = vpop.eup %4332 }
 0x228   : > { %v4335_v7 = vpop.eup %4334  ;;  %v3006_v28 = vmul.f32 %v4333_v8, %v5098_v22 }
 0x229   : > { %v4337_v9 = vpop.eup %4336  ;;  %v3004_v44 = vmul.f32 %v4335_v7, %v5104_v6 }
 0x22a   : > { %v4339_v18 = vpop.eup %4338  ;;  %3039 = vst.msk [vmem:[%s5008_s16 + $0xf0] sm:$0xff] %vm3008_vm3, %v3006_v28  ;;  %v3007_v33 = vmul.f32 %v4337_v9, %v5111_v43 }
 0x22b   : > { %3037 = vst.msk [vmem:[%s5008_s16 + $0xe0] sm:$0xff] %vm3008_vm3, %v3004_v44  ;;  %v3005_v57 = vmul.f32 %v4339_v18, %v5117_v5 }
 0x22c   : > { %3040 = vst.msk [vmem:[%s5008_s16 + $0xf8] sm:$0xff] %vm3008_vm3, %v3007_v33 }
 0x22d   : > { %3038 = vst.msk [vmem:[%s5008_s16 + $0xe8] sm:$0xff] %vm3008_vm3, %v3005_v57 }
 0x22e PF: > { %s13_s12 = sadd.s32 1, %s4346_s12  }
 0x22f   : > { %p10_p5 = scmp.ge.s32.totalorder %s13_s12, 4  }
 0x231   :  { %12 = sbr.rel (!%p10_p5) target bundleno = 1 (0x1), region = 75 }

// kernel: model_forward.6
= control target key start
LH: loop header
LB: loop body
LE: loop exit
PB: predicated region body
PF: predicated region fallthrough
CT: control target
= control target key end

     0   :  { %s1029_s12 = smov 0   ;;  %s1164_s0 = inlined_call_operand.vmem [shape: f32[8,5,5,16], index: 0, kind: input, shape index: {}]   ;;  %s1165_s1 = inlined_call_operand.vmem [shape: f32[3,3,16,32], index: 1, kind: input, shape index: {}]   ;;  %s1166_s2 = inlined_call_operand.vmem [shape: f32[1,32], index: 2, kind: input, shape index: {}]   ;;  %s1167_s3 = inlined_call_operand.vmem [shape: f32[2,16,32], index: 3, kind: output, shape index: {}]  }
   0x1 LB: > { %s1035_s13 = sadd.s32 4294967295, %s1005_s12   ;;  %p828_p0 = scmp.ge.s32.totalorder %s1005_s12, 1  ;;  %s1005_s12 = sphi %s1029_s12, %s13_s12  }
   0x2   : > { %p139_p1 = scmp.lt.s32.totalorder %s1005_s12, 3 }
   0x4   : > { %p140_p2 = pnand %p828_p0, %p139_p1 }
   0x5   : > { %v837_v0 = vld [vmem:[%s1165_s1 + $0x10] sm:$0xff] (!%p140_p2)  ;;  %v838_v1 = vld [vmem:[%s1165_s1 + $0x18] sm:$0xff] (!%p140_p2)  ;;  %v190_v2 = vld [vmem:[%s1165_s1] sm:$0xff] (!%p140_p2)  ;;  %s829_s20 = sshll.u32 (!%p140_p2), %s1035_s13, 2  ;;  %v1007_v3 = vmov (!%p140_p2), 0.0   ;;  %vm1008_vm0 = vmmov (!%p140_p2), 0  }
   0x6   : > { %143 = sbr.rel (%p140_p2) target bundleno = 301 (0x12d), region = 32  ;;  %908 = vmatprep.subr.bf16.mxu0 (!%p140_p2), %v1007_v3  ;;  %v210_v4 = vpack.c.bf16 (!%p140_p2), %v838_v1, %v837_v0  ;;  %914 = vmatprep.subr.bf16.mxu1 (!%p140_p2), %v1007_v3  ;;  %v191_v5 = vld [vmem:[%s1165_s1 + $0x8] sm:$0xff] (!%p140_p2)  ;;  %p165_p3 = scmp.lt.s32.totalorder (!%p140_p2), %s829_s20, 7  ;;  %v841_v7 = vld [vmem:[%s1165_s1 + $0x20] sm:$0xff] (!%p140_p2)  ;;  %vm211_vm1 = vcmask (!%p140_p2), 130048   ;;  %v848_v9 = vld [vmem:[%s1165_s1 + $0x30] sm:$0xff] (!%p140_p2) }
   0x7   : > { %v192_v6 = vpack.c.bf16 (!%p140_p2), %v191_v5, %v190_v2  ;;  %910 = vmatprep.mubr.msk.bf16.mxu0 (!%p140_p2), %vm1008_vm0, %v1007_v3  ;;  %916 = vmatprep.mubr.msk.bf16.mxu1 (!%p140_p2), %vm1008_vm0, %v1007_v3  ;;  %v842_v8 = vld [vmem:[%s1165_s1 + $0x28] sm:$0xff] (!%p140_p2)  ;;  %v849_v10 = vld [vmem:[%s1165_s1 + $0x38] sm:$0xff] (!%p140_p2)  ;;  %v855_v21 = vld [vmem:[%s1165_s1 + $0x40] sm:$0xff] (!%p140_p2)  ;;  %p171_p4 = scmp.lt.s32.totalorder (!%p140_p2), %s1035_s13, 1  ;;  %vm766_vm2 = vcmask (!%p140_p2), 261120  }
   0x8   : > { %909 = vmatpush3.bf16.msra.mxu0 (!%p140_p2), %v210_v4  ;;  %v316_v13 = vpack.c.bf16 (!%p140_p2), %v842_v8, %v841_v7  ;;  %v380_v17 = vpack.c.bf16 (!%p140_p2), %v849_v10, %v848_v9  ;;  %v856_v22 = vld [vmem:[%s1165_s1 + $0x48] sm:$0xff] (!%p140_p2)  ;;  %v862_v26 = vld [vmem:[%s1165_s1 + $0x50] sm:$0xff] (!%p140_p2)  ;;  %v863_v27 = vld [vmem:[%s1165_s1 + $0x58] sm:$0xff] (!%p140_p2) }
   0x9   : > { %915 = vmatpush3.bf16.msra.mxu1 (!%p140_p2), %v192_v6  ;;  %920 = vmatprep.subr.bf16.mxu0 (!%p140_p2), %v1007_v3  ;;  %v444_v28 = vpack.c.bf16 (!%p140_p2), %v856_v22, %v855_v21  ;;  %v507_v30 = vpack.c.bf16 (!%p140_p2), %v863_v27, %v862_v26  ;;  %v869_v33 = vld [vmem:[%s1165_s1 + $0x60] sm:$0xff] (!%p140_p2)  ;;  %v870_v34 = vld [vmem:[%s1165_s1 + $0x68] sm:$0xff] (!%p140_p2)  ;;  %v876_v38 = vld [vmem:[%s1165_s1 + $0x70] sm:$0xff] (!%p140_p2) }
   0xa   : > { %926 = vmatprep.subr.bf16.mxu1 (!%p140_p2), %v1007_v3  ;;  %v877_v39 = vld [vmem:[%s1165_s1 + $0x78] sm:$0xff] (!%p140_p2)  ;;  %v571_v40 = vpack.c.bf16 (!%p140_p2), %v870_v34, %v869_v33  ;;  %v883_v45 = vld [vmem:[%s1165_s1 + $0x80] sm:$0xff] (!%p140_p2)  ;;  %v884_v46 = vld [vmem:[%s1165_s1 + $0x88] sm:$0xff] (!%p140_p2) }
   0xb   : > { %v635_v42 = vpack.c.bf16 (!%p140_p2), %v877_v39, %v876_v38  ;;  %v698_v50 = vpack.c.bf16 (!%p140_p2), %v884_v46, %v883_v45  ;;  %v886_v38 = vld [vmem:[%s1166_s2] ss:$0 sm:$0xff] (!%p140_p2) }
   0xd   : > { %s1169_s20 = smov (!%p165_p3, %s829_s20), 7  ;;  %s1171_s13 = smov (!%p171_p4, %s1035_s13), 1 }
   0xe   : > { %s962_s23 = smul.u32 40, %s1169_s20  ;;  %s889_s5 = sshll.u32 %s1171_s13, 4 }
   0xf   : > { %s175_s8 = scalar_lea.vmem %s1167_s3, %s889_s5 }
  0x10   : > { %s1066_s28 = scalar_lea.vmem %s1164_s0, %s962_s23 }
  0x11   : > { %v973_v11 = vld [vmem:[%s1066_s28 + $0x28] ss:$8 sps:$4 sm:$0xff]   ;;  %v974_v12 = vld [vmem:[%s1066_s28 + $0x38] ss:$8 sps:$4 sm:$0xff]  }
  0x12   : > { %v206_v14 = vpack.c.bf16 %v974_v12, %v973_v11  ;;  %v975_v15 = vld [vmem:[%s1066_s28] ss:$8 sps:$4 sm:$0xff]   ;;  %v976_v16 = vld [vmem:[%s1066_s28 + $0x10] ss:$8 sps:$4 sm:$0xff]  }
  0x13   : > { %v189_v18 = vpack.c.bf16 %v976_v16, %v975_v15  ;;  %v977_v19 = vld [vmem:[%s1066_s28 + $0x1] ss:$8 sps:$4 sm:$0xff]   ;;  %v978_v20 = vld [vmem:[%s1066_s28 + $0x11] ss:$8 sps:$4 sm:$0xff]  }
  0x14   : > { %911 = vmatmul.mubr.msk.bf16.vlgmr.msra.gmra.mrb[0].mxu0 %vm211_vm1, %v206_v14  ;;  %v979_v23 = vld [vmem:[%s1066_s28 + $0x50] ss:$8 sps:$4 sm:$0xff]   ;;  %v980_v24 = vld [vmem:[%s1066_s28 + $0x60] ss:$8 sps:$4 sm:$0xff]   ;;  %v312_v25 = vpack.c.bf16 %v978_v20, %v977_v19 }
  0x15   : > { %921 = vmatpush3.bf16.msra.mxu0 %v316_v13  ;;  %922 = vmatprep.mubr.msk.bf16.mxu0 %vm1008_vm0, %v1007_v3  ;;  %v376_v29 = vpack.c.bf16 %v980_v24, %v979_v23  ;;  %v981_v31 = vld [vmem:[%s1066_s28 + $0x78] ss:$8 sps:$4 sm:$0xff]   ;;  %v982_v32 = vld [vmem:[%s1066_s28 + $0x88] ss:$8 sps:$4 sm:$0xff]  }
  0x16   : > { %917 = vmatmul.mubr.msk.bf16.vlgmr.msra.gmra.mrb[0].mxu1 %vm211_vm1, %v189_v18  ;;  %932 = vmatprep.subr.bf16.mxu0 %v1007_v3  ;;  %v983_v35 = vld [vmem:[%s1066_s28 + $0x51] ss:$8 sps:$4 sm:$0xff]   ;;  %v984_v36 = vld [vmem:[%s1066_s28 + $0x61] ss:$8 sps:$4 sm:$0xff]   ;;  %v440_v37 = vpack.c.bf16 %v982_v32, %v981_v31 }
  0x17   : > { %927 = vmatpush3.bf16.msra.mxu1 %v380_v17  ;;  %928 = vmatprep.mubr.msk.bf16.mxu1 %vm1008_vm0, %v1007_v3  ;;  %v503_v41 = vpack.c.bf16 %v984_v36, %v983_v35  ;;  %v985_v43 = vld [vmem:[%s1066_s28 + $0x8] ss:$8 sps:$4 sm:$0xff]   ;;  %v986_v44 = vld [vmem:[%s1066_s28 + $0x18] ss:$8 sps:$4 sm:$0xff]  }
  0x18   : > { %938 = vmatprep.subr.bf16.mxu1 %v1007_v3  ;;  %v987_v47 = vld [vmem:[%s1066_s28 + $0x30] ss:$8 sps:$4 sm:$0xff]   ;;  %v988_v48 = vld [vmem:[%s1066_s28 + $0x40] ss:$8 sps:$4 sm:$0xff]   ;;  %v567_v49 = vpack.c.bf16 %v986_v44, %v985_v43 }
  0x19   : > { %v631_v51 = vpack.c.bf16 %v988_v48, %v987_v47  ;;  %v989_v52 = vld [vmem:[%s1066_s28 + $0x9] ss:$8 sps:$4 sm:$0xff]   ;;  %v990_v53 = vld [vmem:[%s1066_s28 + $0x19] ss:$8 sps:$4 sm:$0xff]  }
  0x1a   : > { %v694_v54 = vpack.c.bf16 %v990_v53, %v989_v52 }
  0x1c   : > { %923 = vmatmul.mubr.msk.bf16.vlgmr.msra.gmra.mrb[4].mxu0 %vm211_vm1, %v312_v25 }
  0x1d   : > { %933 = vmatpush3.bf16.msra.mxu0 %v444_v28  ;;  %934 = vmatprep.mubr.msk.bf16.mxu0 %vm1008_vm0, %v1007_v3 }
  0x1e   : > { %929 = vmatmul.mubr.msk.bf16.vlgmr.msra.gmra.mrb[4].mxu1 %vm211_vm1, %v376_v29  ;;  %944 = vmatprep.subr.bf16.mxu0 %v1007_v3 }
  0x1f   : > { %939 = vmatpush3.bf16.msra.mxu1 %v507_v30  ;;  %940 = vmatprep.mubr.msk.bf16.mxu1 %vm1008_vm0, %v1007_v3 }
  0x20   : > { %950 = vmatprep.subr.bf16.mxu1 %v1007_v3 }
  0x24   : > { %935 = vmatmul.mubr.msk.bf16.vlgmr.msra.gmra.mrb[8].mxu0 %vm211_vm1, %v440_v37 }
  0x25   : > { %945 = vmatpush3.bf16.msra.mxu0 %v571_v40  ;;  %946 = vmatprep.mubr.msk.bf16.mxu0 %vm1008_vm0, %v1007_v3 }
  0x26   : > { %941 = vmatmul.mubr.msk.bf16.vlgmr.msra.gmra.mrb[8].mxu1 %vm211_vm1, %v503_v41  ;;  %956 = vmatprep.subr.bf16.mxu0 %v1007_v3 }
  0x27   : > { %951 = vmatpush3.bf16.msra.mxu1 %v635_v42  ;;  %952 = vmatprep.mubr.msk.bf16.mxu1 %vm1008_vm0, %v1007_v3 }
  0x2c   : > { %947 = vmatmul.mubr.msk.bf16.vlgmr.msra.gmra.mrb[12].mxu0 %vm211_vm1, %v567_v49 }
  0x2d   : > { %957 = vmatpush3.bf16.msra.mxu0 %v698_v50  ;;  %958 = vmatprep.mubr.msk.bf16.mxu0 %vm1008_vm0, %v1007_v3 }
  0x2e   : > { %953 = vmatmul.mubr.msk.bf16.vlgmr.msra.gmra.mrb[12].mxu1 %vm211_vm1, %v631_v51 }
  0x34   : > { %959 = vmatmul.mubr.msk.bf16.vlgmr.msra.gmra.mrb[16].mxu0 %vm211_vm1, %v694_v54 }
  0xe7   : > { %v249_v55 = vpop.f32.mrb[0].mxu0 }
  0xe8   : > { %v912_v56 = vpop.f32.mrb[1].mxu0 }
  0xe9   : > { %v293_v57 = vpop.f32.mrb[0].mxu1  ;;  %v252_v58 = vpop.f32.mrb[2].mxu0 }
  0xea   : > { %v294_v59 = vadd.f32 %v293_v57, %v249_v55  ;;  %v918_v60 = vpop.f32.mrb[1].mxu1  ;;  %v913_v61 = vpop.f32.mrb[3].mxu0 }
  0xeb   : > { %v296_v62 = vpop.f32.mrb[2].mxu1 }
  0xec   : > { %v297_v63 = vadd.f32 %v296_v62, %v252_v58  ;;  %v919_v0 = vpop.f32.mrb[3].mxu1 }
  0xef   : > { %v354_v1 = vpop.f32.mrb[4].mxu0 }
  0xf0   : > { %v361_v2 = vadd.f32 %v354_v1, %v294_v59  ;;  %v924_v4 = vpop.f32.mrb[5].mxu0 }
  0xf1   : > { %v357_v5 = vpop.f32.mrb[6].mxu0  ;;  %v418_v3 = vpop.f32.mrb[4].mxu1 }
  0xf2   : > { %v362_v6 = vadd.f32 %v357_v5, %v297_v63  ;;  %v425_v7 = vadd.f32 %v418_v3, %v361_v2  ;;  %v925_v8 = vpop.f32.mrb[7].mxu0  ;;  %v930_v9 = vpop.f32.mrb[5].mxu1 }
  0xf3   : > { %v421_v10 = vpop.f32.mrb[6].mxu1 }
  0xf4   : > { %v426_v11 = vadd.f32 %v421_v10, %v362_v6  ;;  %v931_v12 = vpop.f32.mrb[7].mxu1 }
  0xf7   : > { %v482_v13 = vpop.f32.mrb[8].mxu0 }
  0xf8   : > { %v489_v14 = vadd.f32 %v482_v13, %v425_v7  ;;  %v936_v15 = vpop.f32.mrb[9].mxu0 }
  0xf9   : > { %v485_v16 = vpop.f32.mrb[10].mxu0  ;;  %v545_v17 = vpop.f32.mrb[8].mxu1 }
  0xfa   : > { %v490_v18 = vadd.f32 %v485_v16, %v426_v11  ;;  %v552_v19 = vadd.f32 %v545_v17, %v489_v14  ;;  %v937_v20 = vpop.f32.mrb[11].mxu0  ;;  %v942_v21 = vpop.f32.mrb[9].mxu1 }
  0xfb   : > { %v548_v22 = vpop.f32.mrb[10].mxu1 }
  0xfc   : > { %v553_v23 = vadd.f32 %v548_v22, %v490_v18  ;;  %v943_v24 = vpop.f32.mrb[11].mxu1 }
  0xff   : > { %v609_v25 = vpop.f32.mrb[12].mxu0 }
 0x100   : > { %v616_v26 = vadd.f32 %v609_v25, %v552_v19  ;;  %v948_v27 = vpop.f32.mrb[13].mxu0 }
 0x101   : > { %v612_v28 = vpop.f32.mrb[14].mxu0  ;;  %v673_v29 = vpop.f32.mrb[12].mxu1 }
 0x102   : > { %v617_v30 = vadd.f32 %v612_v28, %v553_v23  ;;  %v680_v31 = vadd.f32 %v673_v29, %v616_v26  ;;  %v949_v32 = vpop.f32.mrb[15].mxu0  ;;  %v954_v33 = vpop.f32.mrb[13].mxu1 }
 0x103   : > { %v676_v34 = vpop.f32.mrb[14].mxu1 }
 0x104   : > { %v681_v35 = vadd.f32 %v676_v34, %v617_v30  ;;  %v955_v36 = vpop.f32.mrb[15].mxu1 }
 0x107   : > { %v736_v37 = vpop.f32.mrb[16].mxu0 }
 0x108   : > { %v743_v39 = vadd.f32 %v736_v37, %v680_v31  ;;  %v960_v40 = vpop.f32.mrb[17].mxu0 }
 0x109   : > { %v739_v41 = vpop.f32.mrb[18].mxu0 }
 0x10a   : > { %v752_v42 = vadd.f32 %v886_v38, %v743_v39  ;;  %v744_v43 = vadd.f32 %v739_v41, %v681_v35  ;;  %v961_v44 = vpop.f32.mrb[19].mxu0 }
 0x10c   : > { %v754_v45 = vsub.f32 0.0, %v752_v42  ;;  %v753_v46 = vadd.f32 %v886_v38, %v744_v43 }
 0x10e   : > { %v756_v47 = vmul.f32 1.442695, %v754_v45  ;;  %v755_v48 = vsub.f32 0.0, %v753_v46 }
 0x110   : > { %991 = vpow2.f32 %v756_v47  ;;  %v758_v49 = vmul.f32 1.442695, %v755_v48 }
 0x112   : > { %993 = vpow2.f32 %v758_v49 }
 0x11a   : > { %v992_v50 = vpop.eup %991 }
 0x11b   : > { %v760_v51 = vadd.f32 1.0, %v992_v50 }
 0x11c   : > { %v994_v52 = vpop.eup %993 }
 0x11d   : > { %995 = vrcp.f32 %v760_v51  ;;  %v761_v53 = vadd.f32 1.0, %v994_v52 }
 0x11f   : > { %997 = vrcp.f32 %v761_v53 }
 0x127   : > { %v996_v54 = vpop.eup %995 }
 0x128   : > { %v764_v55 = vmul.f32 %v996_v54, %v752_v42 }
 0x129   : > { %v998_v56 = vpop.eup %997 }
 0x12a   : > { %767 = vst.msk [vmem:[%s175_s8] sm:$0xff] %vm766_vm2, %v764_v55  ;;  %v765_v57 = vmul.f32 %v998_v56, %v753_v46 }
 0x12c   : > { %768 = vst.msk [vmem:[%s175_s8 + $0x8] sm:$0xff] %vm766_vm2, %v765_v57 }
 0x12d PF: > { %s13_s12 = sadd.s32 1, %s1005_s12  }
 0x12e   : > { %p10_p5 = scmp.ge.s32.totalorder %s13_s12, 4  }
 0x130   :  { %12 = sbr.rel (!%p10_p5) target bundleno = 1 (0x1), region = 75 }

// kernel: model_forward.7
= control target key start
LH: loop header
LB: loop body
LE: loop exit
PB: predicated region body
PF: predicated region fallthrough
CT: control target
= control target key end

     0   :  { %s8311_s0 = inlined_call_operand.vmem [shape: f32[2,256,8], index: 0, kind: input, shape index: {}]   ;;  %s8312_s1 = inlined_call_operand.vmem [shape: f32[2,64,16], index: 1, kind: input, shape index: {}]   ;;  %s8313_s2 = inlined_call_operand.vmem [shape: f32[2,16,32], index: 2, kind: input, shape index: {}]   ;;  %s8314_s3 = inlined_call_operand.vmem [shape: f32[3,8,9], index: 3, kind: input, shape index: {}]   ;;  %s8315_s4 = inlined_call_operand.vmem [shape: f32[3,16,9], index: 4, kind: input, shape index: {}]   ;;  %s8316_s5 = inlined_call_operand.vmem [shape: f32[3,32,9], index: 5, kind: input, shape index: {}]   ;;  %s8317_s6 = inlined_call_operand.vmem [shape: f32[3,1,9], index: 6, kind: input, shape index: {}]   ;;  %s8318_s7 = inlined_call_operand.vmem [shape: f32[3,1,9], index: 7, kind: input, shape index: {}]   ;;  %s8319_s8 = inlined_call_operand.vmem [shape: f32[3,1,9], index: 8, kind: input, shape index: {}]   ;;  %s8320_s9 = inlined_call_operand.vmem [shape: f32[2,3,256,9], index: 9, kind: output, shape index: {0}]   ;;  %s8321_s10 = inlined_call_operand.hbm [shape: f32[2,3,64,9], index: 10, kind: output, shape index: {1}]   ;;  %s8322_s11 = inlined_call_operand.hbm [shape: f32[2,3,16,9], index: 11, kind: output, shape index: {2}]   ;;  %s8323_s12 = inlined_call_operand.vmem [shape: f32[2,1008,9], index: 12, kind: output, shape index: {3}]  }
   0x1   :  { %8382 = sst [smem:[#allocation58_spill]] %s8311_s0 }
   0x2   :  { %8383 = sst [smem:[#allocation59_spill]] %s8312_s1 }
   0x3   :  { %8384 = sst [smem:[#allocation60_spill]] %s8313_s2 }
   0x4   :  { %8385 = sst [smem:[#allocation61_spill]] %s8314_s3 }
   0x5   :  { %18 = vsyncpa [#allocation3], 0 }
   0x6   :  { %20 = vsyncpa [#allocation3 + $0x1], 0 }
   0x7   :  { %21 = vsyncpa [#allocation5], 0 }
   0x8   :  { %23 = vsyncpa [#allocation5 + $0x1], 0  ;;  %s5251_s21 = smov 0   ;;  %s5253_s22 = smov 0  }
   0x9   :  { %s5255_s23 = smov 0   ;;  %s5257_s24 = smov 0  }
   0xa LB: > { %s5272_s25 = sadd.s32 4294967295, %s5177_s24   ;;  %s3963_s26 = sadd.s32 4294967294, %s5177_s24   ;;  %s5177_s24 = sphi %s5257_s24, %s8560_s24   ;;  %s5173_s23 = sphi %s5255_s23, %s8559_s23   ;;  %s5169_s22 = sphi %s5253_s22, %s8558_s22   ;;  %s5165_s21 = sphi %s5251_s21, %s8557_s21  }
   0xb   : > { %s5276_s27 = sadd.s32 1, %s5177_s24   ;;  %s266_s28 = sadd.s32 1, %s5173_s23 }
   0xc   : > { %s263_s29 = ssub.s32 %s5177_s24, %s5276_s27  ;;  %p276_p0 = scmp.ne.s32.totalorder %s5173_s23, %s5169_s22 }
   0xd   : > { %p264_p1 = scmp.eq.s32.totalorder %s263_s29, 0  ;;  %p277_p2 = scmp.eq.s32.totalorder %s5272_s25, 1 }
   0xe   : > { %p282_p3 = scmp.ne.s32.totalorder %s5169_s22, %s5165_s21  ;;  %p283_p4 = scmp.eq.s32.totalorder %s3963_s26, 1 }
   0xf   : > { %s5287_s30 = scalar_select %p264_p1, %s5173_s23, %s266_s28  }
  0x10   : > { %p5289_p5 = por %p277_p2, %p276_p0  ;;  %p5293_p6 = por %p283_p4, %p282_p3 }
  0x11   : > { %p3966_p7 = scmp.ge.s32.totalorder %s5177_s24, 1  ;;  %p395_p8 = scmp.lt.s32.totalorder %s5177_s24, 3 }
  0x13   : > { %p396_p9 = pnand %p3966_p7, %p395_p8 }
  0x15   : > { %399 = sbr.rel (%p396_p9) target bundleno = 812 (0x32c), region = 56 }
  0x1c   : > { %s8388_s3 = sld [smem:[#allocation61_spill]]  ;;  %vm823_vm0 = vcmask 1043456   ;;  %p462_p10 = scmp.lt.s32.totalorder %s5272_s25, 1  ;;  %v2851_v6 = vld [vmem:[%s8315_s4] sm:$0xff]  ;;  %v2852_v7 = vld [vmem:[%s8315_s4 + $0x8] sm:$0xff]  ;;  %v4203_v11 = vld [vmem:[%s8315_s4 + $0x10] sm:$0xff] }
  0x1d   : > { %v2853_v8 = vpack.c.bf16 %v2852_v7, %v2851_v6  ;;  %s8389_s0 = sld [smem:[#allocation58_spill]]  ;;  %v4204_v12 = vld [vmem:[%s8315_s4 + $0x18] sm:$0xff]  ;;  %vm774_vm1 = vcmask 64512   ;;  %v5179_v28 = vmov 0.0   ;;  %s8390_s1 = sld [smem:[#allocation59_spill]]  ;;  %vm2861_vm2 = vcmask 130048  }
  0x1e   : > { %s5316_s16 = scalar_select %p462_p10, %s5272_s25, 1  ;;  %v5352_v23 = vpack.c.bf16 %v4204_v12, %v4203_v11  ;;  %v4267_v6 = vld [vmem:[%s8316_s5 + $0x48] sm:$0xff]  ;;  %vm5180_vm3 = vmmov 0   ;;  %vm3489_vm4 = vcmask 261120   ;;  %vm1410_vm9 = vcmask 72704  }
  0x1f   : > { %v4228_v11 = vld [vmem:[%s8315_s4 + $0x28] sm:$0xff]  ;;  %s8391_s2 = sld [smem:[#allocation60_spill]]  ;;  %s6923_s19 = sand.u32 1, %s5169_s22  }
  0x20   : > { %s4281_s17 = sshll.u32 %s5316_s16, 8  ;;  %s4283_s15 = sshll.u32 %s5316_s16, 4 }
  0x21   : > { %s4518_s29 = smul.u32 192, %s6923_s19 }
  0x22   : > { %v765_v0 = vld [vmem:[%s8388_s3] sm:$0xff]  ;;  %v4024_v1 = vld [vmem:[%s8388_s3 + $0x8] sm:$0xff]  ;;  %v4107_v2 = vld [vmem:[%s8388_s3 + $0x10] sm:$0xff] }
  0x23   : > { %v766_v3 = vpack.c.bf16 %v765_v0, %v765_v0  ;;  %v1477_v4 = vpack.c.bf16 %v4024_v1, %v4024_v1  ;;  %v2135_v5 = vpack.c.bf16 %v4107_v2, %v4107_v2  ;;  %s5326_s20 = scalar_lea.vmem %s8389_s0, %s4281_s17  ;;  %s4282_s17 = sshll.u32 %s5316_s16, 6 }
  0x24   : > { %v488_v13 = vld [vmem:[%s5326_s20] sm:$0xff]  ;;  %v489_v14 = vld [vmem:[%s5326_s20 + $0x8] sm:$0xff]  ;;  %v490_v15 = vld [vmem:[%s5326_s20 + $0x10] sm:$0xff]  ;;  %s5456_s26 = scalar_lea.vmem %s8390_s1, %s4282_s17  ;;  %s5182_s1 = smov [#allocation2]  }
  0x25   : > { %4515 = vmatprep.subr.msk.bf16.mxu0 %vm823_vm0, %v766_v3  ;;  %v825_v9 = vsel %vm823_vm0, %v766_v3, 0  ;;  %4516 = vmatprep.subr.msk.bf16.mxu1 %vm823_vm0, %v1477_v4  ;;  %v1487_v10 = vsel %vm823_vm0, %v1477_v4, 0  ;;  %v5338_v16 = vpack.c.bf16 %v489_v14, %v488_v13  ;;  %v491_v17 = vld [vmem:[%s5326_s20 + $0x18] sm:$0xff]  ;;  %v492_v18 = vld [vmem:[%s5326_s20 + $0x20] sm:$0xff]  ;;  %v493_v19 = vld [vmem:[%s5326_s20 + $0x28] sm:$0xff]  ;;  %v2145_v21 = vsel %vm823_vm0, %v2135_v5, 0  ;;  %s476_s17 = scalar_lea.vmem %s8391_s2, %s4283_s15 }
  0x26   : > { %4360 = vmatpush3.bf16.msra.mxu0 %v825_v9  ;;  %4394 = vmatpush3.bf16.msra.mxu1 %v1487_v10  ;;  %v5343_v20 = vpack.c.bf16 %v491_v17, %v490_v15  ;;  %v5346_v22 = vpack.c.bf16 %v493_v19, %v492_v18  ;;  %v494_v24 = vld [vmem:[%s5326_s20 + $0x30] sm:$0xff]  ;;  %v495_v25 = vld [vmem:[%s5326_s20 + $0x38] sm:$0xff]  ;;  %v496_v26 = vld [vmem:[%s5326_s20 + $0x40] sm:$0xff] }
  0x27   : > { %4517 = vmatprep.subr.msk.bf16.mxu0 %vm823_vm0, %v2135_v5  ;;  %4461 = vmatprep.subr.bf16.mxu1 %v2853_v8  ;;  %v497_v27 = vld [vmem:[%s5326_s20 + $0x48] sm:$0xff]  ;;  %v5368_v29 = vpack.c.bf16 %v495_v25, %v494_v24  ;;  %v498_v31 = vld [vmem:[%s5326_s20 + $0x50] sm:$0xff]  ;;  %v499_v32 = vld [vmem:[%s5326_s20 + $0x58] sm:$0xff] }
  0x28   : > { %4361 = vmatprep.mubr.msk.bf16.mxu0 %vm774_vm1, %v5338_v16  ;;  %4395 = vmatprep.mubr.msk.bf16.mxu1 %vm774_vm1, %v5338_v16  ;;  %v5370_v30 = vpack.c.bf16 %v497_v27, %v496_v26  ;;  %v500_v33 = vld [vmem:[%s5326_s20 + $0x60] sm:$0xff]  ;;  %v501_v34 = vld [vmem:[%s5326_s20 + $0x68] sm:$0xff]  ;;  %v5384_v35 = vpack.c.bf16 %v499_v32, %v498_v31  ;;  %v502_v37 = vld [vmem:[%s5326_s20 + $0x70] sm:$0xff] }
  0x29   : > { %4362 = vmatmul.mubr.msk.bf16.vlgmr.msra.gmra.mrb[0].mxu0 %vm774_vm1, %v5343_v20  ;;  %4396 = vmatmul.mubr.msk.bf16.vlgmr.msra.gmra.mrb[0].mxu1 %vm774_vm1, %v5343_v20  ;;  %v5386_v36 = vpack.c.bf16 %v501_v34, %v500_v33  ;;  %v503_v38 = vld [vmem:[%s5326_s20 + $0x78] sm:$0xff]  ;;  %v504_v39 = vld [vmem:[%s5326_s20 + $0x80] sm:$0xff]  ;;  %v505_v40 = vld [vmem:[%s5326_s20 + $0x88] sm:$0xff] }
  0x2a   : > { %4428 = vmatpush3.bf16.msra.mxu0 %v2145_v21  ;;  %4365 = vmatprep.mubr.msk.bf16.mxu0 %vm774_vm1, %v5346_v22  ;;  %v5400_v41 = vpack.c.bf16 %v503_v38, %v502_v37  ;;  %v5402_v42 = vpack.c.bf16 %v505_v40, %v504_v39  ;;  %v506_v43 = vld [vmem:[%s5326_s20 + $0x90] sm:$0xff]  ;;  %v507_v44 = vld [vmem:[%s5326_s20 + $0x98] sm:$0xff]  ;;  %v508_v45 = vld [vmem:[%s5326_s20 + $0xa0] sm:$0xff]  ;;  %v536_v37 = vlaneseq }
  0x2b   : > { %4399 = vmatprep.mubr.msk.bf16.mxu1 %vm774_vm1, %v5346_v22  ;;  %4462 = vmatpush3.bf16.msra.mxu1 %v2853_v8  ;;  %v509_v46 = vld [vmem:[%s5326_s20 + $0xa8] sm:$0xff]  ;;  %v5416_v47 = vpack.c.bf16 %v507_v44, %v506_v43  ;;  %v510_v49 = vld [vmem:[%s5326_s20 + $0xb0] sm:$0xff]  ;;  %v511_v50 = vld [vmem:[%s5326_s20 + $0xb8] sm:$0xff] }
  0x2c   : > { %4507 = vmatprep.subr.bf16.mxu0 %v5179_v28  ;;  %4471 = vmatprep.subr.bf16.mxu1 %v5352_v23  ;;  %v5418_v48 = vpack.c.bf16 %v509_v46, %v508_v45  ;;  %v512_v51 = vld [vmem:[%s5326_s20 + $0xc0] sm:$0xff]  ;;  %v513_v52 = vld [vmem:[%s5326_s20 + $0xc8] sm:$0xff]  ;;  %v5432_v53 = vpack.c.bf16 %v511_v50, %v510_v49  ;;  %v514_v55 = vld [vmem:[%s5326_s20 + $0xd0] sm:$0xff]  ;;  %v5584_v38 = vshrl.u32 %v536_v37, 7 }
  0x2d   : > { %v5434_v54 = vpack.c.bf16 %v513_v52, %v512_v51  ;;  %v515_v56 = vld [vmem:[%s5326_s20 + $0xd8] sm:$0xff]  ;;  %v516_v57 = vld [vmem:[%s5326_s20 + $0xe0] sm:$0xff]  ;;  %v517_v58 = vld [vmem:[%s5326_s20 + $0xe8] sm:$0xff] }
  0x2e   : > { %v5448_v59 = vpack.c.bf16 %v515_v56, %v514_v55  ;;  %v5451_v60 = vpack.c.bf16 %v517_v58, %v516_v57  ;;  %v518_v61 = vld [vmem:[%s5326_s20 + $0xf0] sm:$0xff]  ;;  %v519_v62 = vld [vmem:[%s5326_s20 + $0xf8] sm:$0xff]  ;;  %v2791_v63 = vld [vmem:[%s5456_s26] sm:$0xff]  ;;  %8392 = vst [vmem:[#allocation8_spill] sm:$0xff] %v5584_v38  ;;  %v5587_v39 = vadd.s32 16, %v5584_v38  ;;  %v5596_v43 = vadd.s32 8, %v5584_v38 }
  0x2f   : > { %v2792_v0 = vld [vmem:[%s5456_s26 + $0x8] sm:$0xff]  ;;  %v5470_v1 = vpack.c.bf16 %v519_v62, %v518_v61  ;;  %v2793_v3 = vld [vmem:[%s5456_s26 + $0x10] sm:$0xff]  ;;  %v2794_v4 = vld [vmem:[%s5456_s26 + $0x18] sm:$0xff]  ;;  %v635_v45 = vshra.s32 %v5584_v38, 4  ;;  %v5606_v49 = vadd.s32 48, %v5584_v38  ;;  %v571_v51 = vand.u32 15, %v5584_v38 }
  0x30   : > { %v2799_v2 = vpack.c.bf16 %v2792_v0, %v2791_v63  ;;  %v4266_v5 = vld [vmem:[%s8316_s5 + $0x40] sm:$0xff]  ;;  %v2796_v8 = vld [vmem:[%s5456_s26 + $0x28] sm:$0xff]  ;;  %v2800_v9 = vpack.c.bf16 %v2794_v4, %v2793_v3  ;;  %v4268_v14 = vld [vmem:[%s8316_s5 + $0x50] sm:$0xff]  ;;  %8393 = vst [vmem:[#allocation9_spill] sm:$0xff] %v5587_v39  ;;  %v637_v40 = vshra.s32 %v5587_v39, 4  ;;  %v573_v44 = vand.u32 15, %v5587_v39 }
  0x31   : > { %4366 = vmatmul.mubr.msk.bf16.gmra.mrb[4].mxu0 %vm774_vm1, %v5368_v29  ;;  %4400 = vmatmul.mubr.msk.bf16.gmra.mrb[4].mxu1 %vm774_vm1, %v5368_v29  ;;  %v2795_v7 = vld [vmem:[%s5456_s26 + $0x20] sm:$0xff]  ;;  %v3660_v12 = vpack.c.bf16 %v4267_v6, %v4266_v5  ;;  %v4269_v15 = vld [vmem:[%s8316_s5 + $0x58] sm:$0xff]  ;;  %v2797_v17 = vld [vmem:[%s5456_s26 + $0x30] sm:$0xff]  ;;  %8395 = vst [vmem:[#allocation11_spill] sm:$0xff] %v5596_v43  ;;  %v5613_v52 = vadd.s32 32, %v5584_v38  ;;  %v667_v55 = vcvt.s32.f32 %v635_v45  ;;  %v572_v58 = vand.u32 15, %v5596_v43 }
  0x32   : > { %4369 = vmatprep.mubr.msk.bf16.mxu0 %vm774_vm1, %v5370_v30  ;;  %4403 = vmatprep.mubr.msk.bf16.mxu1 %vm774_vm1, %v5370_v30  ;;  %v4227_v10 = vld [vmem:[%s8315_s4 + $0x20] sm:$0xff]  ;;  %v2801_v13 = vpack.c.bf16 %v2796_v8, %v2795_v7  ;;  %v2798_v18 = vld [vmem:[%s5456_s26 + $0x38] sm:$0xff]  ;;  %v3661_v19 = vpack.c.bf16 %v4269_v15, %v4268_v14  ;;  %v3478_v24 = vld [vmem:[%s8316_s5 + $0x10] sm:$0xff]  ;;  %8396 = vst [vmem:[#allocation12_spill] sm:$0xff] %v5606_v49  ;;  %v641_v61 = vshra.s32 %v5606_v49, 4  ;;  %v603_v63 = vcvt.s32.f32 %v571_v51  ;;  %s4521_s26 = smul.u32 1008, %s5316_s16 }
  0x33   : > { %v2802_v21 = vpack.c.bf16 %v2798_v18, %v2797_v17  ;;  %v3479_v25 = vld [vmem:[%s8316_s5 + $0x18] sm:$0xff]  ;;  %v3461_v27 = vld [vmem:[%s476_s17] sm:$0xff]  ;;  %v4256_v31 = vld [vmem:[%s8316_s5 + $0x28] sm:$0xff]  ;;  %8397 = vst [vmem:[#allocation13_spill] sm:$0xff] %v5613_v52  ;;  %v639_v0 = vshra.s32 %v5613_v52, 4  ;;  %v604_v6 = vcvt.s32.f32 %v572_v58  ;;  %v5643_v8 = vadd.s32 40, %v5584_v38 }
  0x34   : > { %v3481_v26 = vpack.c.bf16 %v3479_v25, %v3478_v24  ;;  %v4257_v34 = vld [vmem:[%s8316_s5 + $0x30] sm:$0xff]  ;;  %v575_v15 = vand.u32 15, %v5613_v52  ;;  %s5935_s18 = scalar_lea.vmem %s8323_s12, %s4521_s26 }
  0x35   : > { %8400 = vst [vmem:[#allocation16_spill] sm:$0xff] %v5643_v8  ;;  %v640_v24 = vshra.s32 %v5643_v8, 4 }
  0x39   : > { %4370 = vmatmul.mubr.msk.bf16.gmra.mrb[8].mxu0 %vm774_vm1, %v5384_v35  ;;  %4404 = vmatmul.mubr.msk.bf16.gmra.mrb[8].mxu1 %vm774_vm1, %v5384_v35 }
  0x3a   : > { %4373 = vmatprep.mubr.msk.bf16.mxu0 %vm774_vm1, %v5386_v36  ;;  %4407 = vmatprep.mubr.msk.bf16.mxu1 %vm774_vm1, %v5386_v36 }
  0x41   : > { %4374 = vmatmul.mubr.msk.bf16.gmra.mrb[12].mxu0 %vm774_vm1, %v5400_v41  ;;  %4408 = vmatmul.mubr.msk.bf16.gmra.mrb[12].mxu1 %vm774_vm1, %v5400_v41 }
  0x42   : > { %4377 = vmatprep.mubr.msk.bf16.mxu0 %vm774_vm1, %v5402_v42  ;;  %4411 = vmatprep.mubr.msk.bf16.mxu1 %vm774_vm1, %v5402_v42 }
  0x49   : > { %4378 = vmatmul.mubr.msk.bf16.gmra.mrb[16].mxu0 %vm774_vm1, %v5416_v47  ;;  %4412 = vmatmul.mubr.msk.bf16.gmra.mrb[16].mxu1 %vm774_vm1, %v5416_v47 }
  0x4a   : > { %4381 = vmatprep.mubr.msk.bf16.mxu0 %vm774_vm1, %v5418_v48  ;;  %4415 = vmatprep.mubr.msk.bf16.mxu1 %vm774_vm1, %v5418_v48 }
  0x51   : > { %4382 = vmatmul.mubr.msk.bf16.gmra.mrb[20].mxu0 %vm774_vm1, %v5432_v53  ;;  %4416 = vmatmul.mubr.msk.bf16.gmra.mrb[20].mxu1 %vm774_vm1, %v5432_v53 }
  0x52   : > { %4385 = vmatprep.mubr.msk.bf16.mxu0 %vm774_vm1, %v5434_v54  ;;  %4419 = vmatprep.mubr.msk.bf16.mxu1 %vm774_vm1, %v5434_v54 }
  0x59   : > { %4386 = vmatmul.mubr.msk.bf16.gmra.mrb[24].mxu0 %vm774_vm1, %v5448_v59  ;;  %4420 = vmatmul.mubr.msk.bf16.gmra.mrb[24].mxu1 %vm774_vm1, %v5448_v59 }
  0x5a   : > { %4389 = vmatprep.mubr.msk.bf16.mxu0 %vm774_vm1, %v5451_v60  ;;  %4423 = vmatprep.mubr.msk.bf16.mxu1 %vm774_vm1, %v5451_v60 }
  0x61   : > { %4390 = vmatmul.mubr.msk.bf16.gmra.mrb[28].mxu0 %vm774_vm1, %v5470_v1  ;;  %4424 = vmatmul.mubr.msk.bf16.gmra.mrb[28].mxu1 %vm774_vm1, %v5470_v1 }
  0x62   : > { %4429 = vmatprep.mubr.msk.bf16.mxu0 %vm774_vm1, %v5338_v16  ;;  %4463 = vmatprep.mubr.msk.bf16.mxu1 %vm2861_vm2, %v2799_v2  ;;  %v3264_v16 = vpack.c.bf16 %v4228_v11, %v4227_v10  ;;  %v577_v10 = vand.u32 15, %v5606_v49  ;;  %v673_v11 = vcvt.s32.f32 %v641_v61 }
  0x69   : > { %4430 = vmatmul.mubr.msk.bf16.vlgmr.msra.gmra.mrb[32].mxu0 %vm774_vm1, %v5343_v20  ;;  %4464 = vmatmul.mubr.msk.bf16.vlgmr.msra.gmra.mrb[32].mxu1 %vm2861_vm2, %v2800_v9  ;;  %v3476_v20 = vld [vmem:[%s8316_s5] sm:$0xff] }
  0x6a   : > { %4508 = vmatpush3.bf16.msra.mxu0 %v3660_v12  ;;  %4433 = vmatprep.mubr.msk.bf16.mxu0 %vm774_vm1, %v5346_v22  ;;  %v3477_v22 = vld [vmem:[%s8316_s5 + $0x8] sm:$0xff]  ;;  %v547_v12 = vadd.s32 64, %v5584_v38 }
  0x6b   : > { %4467 = vmatprep.mubr.msk.bf16.mxu1 %vm2861_vm2, %v2801_v13  ;;  %4472 = vmatpush3.bf16.msra.mxu1 %v5352_v23  ;;  %v3480_v23 = vpack.c.bf16 %v3477_v22, %v3476_v20  ;;  %v553_v20 = vadd.s32 112, %v5584_v38 }
  0x6c   : > { %4481 = vmatprep.subr.bf16.mxu1 %v3264_v16  ;;  %4509 = vmatprep.subr.bf16.mxu0 %v5179_v28 }
  0x6e   : > { %4510 = vmatpush3.bf16.msra.mxu0 %v3661_v19 }
  0x71   : > { %4434 = vmatmul.mubr.msk.bf16.gmra.mrb[36].mxu0 %vm774_vm1, %v5368_v29  ;;  %4468 = vmatmul.mubr.msk.bf16.gmra.mrb[36].mxu1 %vm2861_vm2, %v2802_v21  ;;  %v3462_v29 = vld [vmem:[%s476_s17 + $0x8] sm:$0xff]  ;;  %s4520_s17 = smul.u32 768, %s5316_s16  ;;  %s7002_s16 = scalar_lea.vmem [#allocation2], %s4518_s29 }
  0x72   : > { %4437 = vmatprep.mubr.msk.bf16.mxu0 %vm774_vm1, %v5370_v30  ;;  %4473 = vmatprep.mubr.msk.bf16.mxu1 %vm2861_vm2, %v2799_v2  ;;  %v4255_v30 = vld [vmem:[%s8316_s5 + $0x20] sm:$0xff]  ;;  %v3463_v32 = vpack.c.bf16 %v3462_v29, %v3461_v27  ;;  %v643_v29 = vshra.s32 %v547_v12, 4  ;;  %s3776_s20 = sshll.u32 %s7002_s16, 4  ;;  %s7785_s20 = int_to_ptr.vmem [resolvable:$true] %s3776_s20 }
  0x73   : > { %v3571_v33 = vpack.c.bf16 %v4256_v31, %v4255_v30  ;;  %v607_v31 = vcvt.s32.f32 %v575_v15  ;;  %s5738_s0 = scalar_lea.vmem %s8320_s9, %s4520_s17  ;;  %s4522_s17 = smul.u32 3072, %s5272_s25 }
  0x74   : > { %s5083_s28 = scalar_lea.vmem %s7785_s20, 3072 }
  0x75   : > { %s7783_s26 = scalar_lea.hbm %s8321_s10, %s4522_s17  ;;  %p5084_p11 = scmp.ne.s32.totalorder %s7785_s20, %s5083_s28 }
  0x77   : > { %p5085_p12 = pnand %p5084_p11, %p5289_p5 }
  0x79   : > { %4438 = vmatmul.mubr.msk.bf16.gmra.mrb[40].mxu0 %vm774_vm1, %v5384_v35  ;;  %4474 = vmatmul.mubr.msk.bf16.vlgmr.msra.gmra.mrb[40].mxu1 %vm2861_vm2, %v2800_v9  ;;  %v4258_v35 = vld [vmem:[%s8316_s5 + $0x38] sm:$0xff]  ;;  %p5086_p13 = pneg %p5085_p12 }
  0x7a   : > { %4441 = vmatprep.mubr.msk.bf16.mxu0 %vm774_vm1, %v5386_v36  ;;  %4477 = vmatprep.mubr.msk.bf16.mxu1 %vm2861_vm2, %v2801_v13  ;;  %v3572_v36 = vpack.c.bf16 %v4258_v35, %v4257_v34  ;;  %v551_v34 = vadd.s32 96, %v5584_v38  ;;  %v576_v35 = vand.u32 15, %v5643_v8 }
  0x7b   : > { %4482 = vmatpush3.bf16.msra.mxu1 %v3264_v16  ;;  %v671_v16 = vcvt.s32.f32 %v639_v0 }
  0x7c   : > { %4491 = vmatprep.subr.bf16.mxu1 %v5179_v28  ;;  %v608_v58 = vcvt.s32.f32 %v576_v35 }
  0x81   : > { %4442 = vmatmul.mubr.msk.bf16.gmra.mrb[44].mxu0 %vm774_vm1, %v5400_v41  ;;  %4478 = vmatmul.mubr.msk.bf16.gmra.mrb[44].mxu1 %vm2861_vm2, %v2802_v21  ;;  %v5590_v41 = vand.u32 127, %v536_v37  ;;  %v649_v37 = vshra.s32 %v553_v20, 4 }
  0x82   : > { %4445 = vmatprep.mubr.msk.bf16.mxu0 %vm774_vm1, %v5402_v42  ;;  %4483 = vmatprep.mubr.msk.bf16.mxu1 %vm2861_vm2, %v2799_v2  ;;  %v5593_v42 = vadd.s32 24, %v5584_v38 }
  0x83   : > { %vm700_vm5 = vcmp.eq.s32.totalorder %v5590_v41, 1  ;;  %vm1149_vm6 = vcmp.eq.s32.totalorder %v5590_v41, 3  ;;  %vm699_vm7 = vcmp.eq.s32.totalorder %v5590_v41, 0  ;;  %vm1148_vm8 = vcmp.eq.s32.totalorder %v5590_v41, 2 }
  0x84   : > { %8394 = vst [vmem:[#allocation10_spill] sm:$0xff] %v5593_v42  ;;  %v638_v46 = vshra.s32 %v5593_v42, 4  ;;  %v574_v56 = vand.u32 15, %v5593_v42  ;;  %v701_v3 = vsel %vm700_vm5, %v667_v55, 0.0  ;;  %v707_v27 = vsel %vm700_vm5, %v673_v11, 0.0 }
  0x85   : > { %v5651_v14 = vsel %vm699_vm7, %v603_v63, %v701_v3  ;;  %v681_v61 = vcvt.s32.f32 %v649_v37  ;;  %vm1345_vm10 = vcmp.lt.s32.totalorder %v5590_v41, 4  ;;  %vm1344_vm11 = vcmp.lt.s32.totalorder %v5590_v41, 2 }
  0x86   : > { %v670_v57 = vcvt.s32.f32 %v638_v46  ;;  %v606_v4 = vcvt.s32.f32 %v574_v56  ;;  %8401 = vst [vmem:[#allocation17_spill] sm:$0xff] %v5651_v14  ;;  %v585_v56 = vand.u32 15, %v553_v20  ;;  %v5699_v20 = vld [vmem:[%s8317_s6] ss:$0 sm:$0xff] }
  0x88   : > { %v704_v5 = vsel %vm700_vm5, %v670_v57, 0.0  ;;  %v647_v57 = vshra.s32 %v551_v34, 4  ;;  %v617_v11 = vcvt.s32.f32 %v585_v56 }
  0x89   : > { %4446 = vmatmul.mubr.msk.bf16.gmra.mrb[48].mxu0 %vm774_vm1, %v5416_v47  ;;  %4484 = vmatmul.mubr.msk.bf16.vlgmr.msra.gmra.mrb[48].mxu1 %vm2861_vm2, %v2800_v9  ;;  %v636_v47 = vshra.s32 %v5596_v43, 4  ;;  %v549_v9 = vadd.s32 80, %v5584_v38  ;;  %v5661_v19 = vsel %vm699_vm7, %v606_v4, %v704_v5  ;;  %v5685_v4 = vadd.s32 104, %v5584_v38 }
  0x8a   : > { %4449 = vmatprep.mubr.msk.bf16.mxu0 %vm774_vm1, %v5418_v48  ;;  %4487 = vmatprep.mubr.msk.bf16.mxu1 %vm2861_vm2, %v2801_v13  ;;  %v605_v48 = vcvt.s32.f32 %v573_v44  ;;  %v550_v13 = vadd.s32 88, %v5584_v38  ;;  %8402 = vst [vmem:[#allocation18_spill] sm:$0xff] %v5661_v19 }
  0x8b   : > { %4492 = vmatpush3.bf16.msra.mxu1 %v3480_v23  ;;  %v645_v25 = vshra.s32 %v549_v9, 4  ;;  %v581_v45 = vand.u32 15, %v549_v9  ;;  %v584_v56 = vand.u32 15, %v5685_v4 }
  0x8c   : > { %4493 = vmatprep.subr.bf16.mxu1 %v5179_v28  ;;  %v646_v30 = vshra.s32 %v550_v13, 4 }
  0x8d   : > { %v677_v46 = vcvt.s32.f32 %v645_v25 }
  0x8e   : > { %v678_v51 = vcvt.s32.f32 %v646_v30  ;;  %v648_v30 = vshra.s32 %v5685_v4, 4 }
  0x8f   : > { %4494 = vmatpush3.bf16.msra.mxu1 %v3481_v26  ;;  %v609_v26 = vcvt.s32.f32 %v577_v10  ;;  %v711_v3 = vsel %vm700_vm5, %v677_v46, 0.0 }
  0x90   : > { %4499 = vmatprep.subr.bf16.mxu1 %v5179_v28  ;;  %v712_v9 = vsel %vm700_vm5, %v678_v51, 0.0 }
  0x91   : > { %4450 = vmatmul.mubr.msk.bf16.gmra.mrb[52].mxu0 %vm774_vm1, %v5432_v53  ;;  %4488 = vmatmul.mubr.msk.bf16.gmra.mrb[52].mxu1 %vm2861_vm2, %v2802_v21  ;;  %v8324_v53 = vmov 1.0   ;;  %v548_v21 = vadd.s32 72, %v5584_v38 }
  0x92   : > { %4453 = vmatprep.mubr.msk.bf16.mxu0 %vm774_vm1, %v5434_v54  ;;  %4495 = vmatprep.mubr.msk.bf16.mxu1 %vm5180_vm3, %v5179_v28  ;;  %v1150_v54 = vsel %vm1149_vm6, 13.0, %v8324_v53  ;;  %v1810_v2 = vsel %vm1149_vm6, 30.0, %v8324_v53 }
  0x93   : > { %v5627_v62 = vsel %vm1148_vm8, 10.0, %v1150_v54  ;;  %v5657_v18 = vsel %vm1148_vm8, 16.0, %v1810_v2  ;;  %v580_v55 = vand.u32 15, %v548_v21  ;;  %v613_v2 = vcvt.s32.f32 %v581_v45 }
  0x95   : > { %v612_v10 = vcvt.s32.f32 %v580_v55 }
  0x99   : > { %4454 = vmatmul.mubr.msk.bf16.gmra.mrb[56].mxu0 %vm774_vm1, %v5448_v59  ;;  %4496 = vmatmul.mubr.msk.bf16.vlgmr.msra.gmra.mrb[56].mxu1 %vm3489_vm4, %v3463_v32  ;;  %v668_v59 = vcvt.s32.f32 %v636_v47  ;;  %v579_v47 = vand.u32 15, %v547_v12  ;;  %v583_v12 = vand.u32 15, %v551_v34  ;;  %v5725_v34 = vsel %vm699_vm7, %v613_v2, %v711_v3 }
  0x9a   : > { %4500 = vmatpush3.bf16.msra.mxu1 %v3571_v33  ;;  %4457 = vmatprep.mubr.msk.bf16.mxu0 %vm774_vm1, %v5451_v60  ;;  %8408 = vst [vmem:[#allocation24_spill] sm:$0xff] %v5725_v34 }
  0x9b   : > { %4501 = vmatprep.subr.bf16.mxu1 %v5179_v28  ;;  %4503 = vmatprep.mubr.msk.bf16.mxu1 %vm5180_vm3, %v5179_v28  ;;  %v702_v7 = vsel %vm700_vm5, %v668_v59, 0.0  ;;  %v611_v5 = vcvt.s32.f32 %v579_v47  ;;  %v615_v37 = vcvt.s32.f32 %v583_v12 }
  0x9c   : > { %v5667_v22 = vsel %vm699_vm7, %v604_v6, %v702_v7 }
  0x9d   : > { %8403 = vst [vmem:[#allocation19_spill] sm:$0xff] %v5667_v22 }
  0x9e   : > { %4502 = vmatpush3.bf16.msra.mxu1 %v3572_v36  ;;  %v644_v36 = vshra.s32 %v548_v21, 4 }
  0xa0   : > { %v676_v59 = vcvt.s32.f32 %v644_v36 }
  0xa1   : > { %4458 = vmatmul.mubr.msk.bf16.gmra.mrb[60].mxu0 %vm774_vm1, %v5470_v1  ;;  %4504 = vmatmul.mubr.msk.bf16.vlgmr.msra.gmra.mrb[60].mxu1 %vm3489_vm4, %v3463_v32  ;;  %v5631_v1 = vadd.s32 56, %v5584_v38 }
  0xa2   : > { %4511 = vmatprep.mubr.msk.bf16.mxu0 %vm5180_vm3, %v5179_v28  ;;  %v669_v28 = vcvt.s32.f32 %v637_v40  ;;  %v554_v40 = vadd.s32 120, %v5584_v38  ;;  %v710_v15 = vsel %vm700_vm5, %v676_v59, 0.0 }
  0xa3   : > { %8399 = vst [vmem:[#allocation15_spill] sm:$0xff] %v5631_v1  ;;  %v642_v17 = vshra.s32 %v5631_v1, 4  ;;  %v578_v23 = vand.u32 15, %v5631_v1  ;;  %v5742_v35 = vsel %vm699_vm7, %v612_v10, %v710_v15 }
  0xa4   : > { %v703_v50 = vsel %vm700_vm5, %v669_v28, 0.0  ;;  %v672_v28 = vcvt.s32.f32 %v640_v24  ;;  %v650_v63 = vshra.s32 %v554_v40, 4  ;;  %v5708_v24 = vsel %vm699_vm7, %v609_v26, %v707_v27  ;;  %8411 = vst [vmem:[#allocation27_spill] sm:$0xff] %v5742_v35 }
  0xa5   : > { %v5622_v60 = vsel %vm699_vm7, %v605_v48, %v703_v50  ;;  %v674_v33 = vcvt.s32.f32 %v642_v17  ;;  %v610_v44 = vcvt.s32.f32 %v578_v23  ;;  %v675_v48 = vcvt.s32.f32 %v643_v29  ;;  %v5704_v23 = vld [vmem:[%s8317_s6 + $0x1] ss:$0 sm:$0xff]  ;;  %8404 = vst [vmem:[#allocation20_spill] sm:$0xff] %v5708_v24 }
  0xa6   : > { %8398 = vst [vmem:[#allocation14_spill] sm:$0xff] %v5622_v60  ;;  %v582_v50 = vand.u32 15, %v550_v13  ;;  %v706_v0 = vsel %vm700_vm5, %v672_v28, 0.0  ;;  %v679_v13 = vcvt.s32.f32 %v647_v57  ;;  %v586_v17 = vand.u32 15, %v554_v40 }
  0xa7   : > { %v708_v54 = vsel %vm700_vm5, %v674_v33, 0.0  ;;  %v709_v6 = vsel %vm700_vm5, %v675_v48, 0.0  ;;  %v682_v21 = vcvt.s32.f32 %v650_v63  ;;  %v5721_v33 = vsel %vm699_vm7, %v608_v58, %v706_v0 }
  0xa8   : > { %v614_v7 = vcvt.s32.f32 %v582_v50  ;;  %v5716_v29 = vsel %vm699_vm7, %v610_v44, %v708_v54  ;;  %8407 = vst [vmem:[#allocation23_spill] sm:$0xff] %v5721_v33  ;;  %v5729_v26 = vsel %vm699_vm7, %v611_v5, %v709_v6  ;;  %v713_v40 = vsel %vm700_vm5, %v679_v13, 0.0 }
  0xa9   : > { %4512 = vmatmul.mubr.msk.bf16.vlgmr.msra.gmra.mrb[64].mxu0 %vm3489_vm4, %v3463_v32  ;;  %v705_v32 = vsel %vm700_vm5, %v671_v16, 0.0  ;;  %v715_v16 = vsel %vm700_vm5, %v681_v61, 0.0  ;;  %8406 = vst [vmem:[#allocation22_spill] sm:$0xff] %v5716_v29  ;;  %8409 = vst [vmem:[#allocation25_spill] sm:$0xff] %v5729_v26  ;;  %v618_v47 = vcvt.s32.f32 %v586_v17  ;;  %v716_v48 = vsel %vm700_vm5, %v682_v21, 0.0 }
  0xaa   : > { %v5712_v25 = vsel %vm699_vm7, %v607_v31, %v705_v32  ;;  %v5733_v27 = vsel %vm699_vm7, %v614_v7, %v712_v9  ;;  %v5746_v36 = vsel %vm699_vm7, %v617_v11, %v715_v16  ;;  %v680_v57 = vcvt.s32.f32 %v648_v30 }
  0xab   : > { %8405 = vst [vmem:[#allocation21_spill] sm:$0xff] %v5712_v25  ;;  %8410 = vst [vmem:[#allocation26_spill] sm:$0xff] %v5733_v27  ;;  %v5779_v21 = vsel %vm699_vm7, %v615_v37, %v713_v40  ;;  %v5783_v30 = vsel %vm699_vm7, %v618_v47, %v716_v48 }
  0xac   : > { %8412 = vst [vmem:[#allocation28_spill] sm:$0xff] %v5746_v36  ;;  %8413 = vst [vmem:[#allocation29_spill] sm:$0xff] %v5779_v21 }
  0xad   : > { %8414 = vst [vmem:[#allocation30_spill] sm:$0xff] %v5783_v30 }
  0xfc   : > { %v4363_v31 = vpop.f32.mrb[0].mxu0  ;;  %v4397_v32 = vpop.f32.mrb[0].mxu1 }
  0xfd   : > { %v870_v44 = vadd.f32 %v4363_v31, %v5699_v20  ;;  %v1532_v28 = vadd.f32 %v4397_v32, %v5704_v23  ;;  %v861_v45 = vpop.f32.mrb[1].mxu0  ;;  %v1523_v46 = vpop.f32.mrb[1].mxu1 }
  0xfe   : > { %v862_v50 = vadd.f32 %v5699_v20, %v861_v45  ;;  %v1524_v51 = vadd.f32 %v5704_v23, %v1523_v46  ;;  %v4364_v54 = vpop.f32.mrb[2].mxu0  ;;  %v4398_v55 = vpop.f32.mrb[2].mxu1  ;;  %v714_v45 = vsel %vm700_vm5, %v680_v57, 0.0 }
  0xff   : > { %v990_v58 = vsub.f32 0.0, %v870_v44  ;;  %1413 = vst.msk [vmem:[%s5738_s0 + $0x10] sm:$0xff] %vm1410_vm9, %v870_v44  ;;  %v1652_v59 = vsub.f32 0.0, %v1532_v28  ;;  %4077 = vst.msk [vmem:[%s5738_s0 + $0x110] sm:$0xff] %vm1410_vm9, %v1532_v28  ;;  %v873_v61 = vadd.f32 %v4364_v54, %v5699_v20  ;;  %v1535_v63 = vadd.f32 %v4398_v55, %v5704_v23  ;;  %v864_v0 = vpop.f32.mrb[3].mxu0  ;;  %v1526_v2 = vpop.f32.mrb[3].mxu1 }
 0x100   : > { %v988_v3 = vsub.f32 0.0, %v862_v50  ;;  %1411 = vst.msk [vmem:[%s5738_s0] sm:$0xff] %vm1410_vm9, %v862_v50  ;;  %v1650_v4 = vsub.f32 0.0, %v1524_v51  ;;  %4075 = vst.msk [vmem:[%s5738_s0 + $0x100] sm:$0xff] %vm1410_vm9, %v1524_v51  ;;  %v865_v5 = vadd.f32 %v5699_v20, %v864_v0  ;;  %v1527_v6 = vadd.f32 %v5704_v23, %v1526_v2 }
 0x101   : > { %v1024_v7 = vmul.f32 1.442695, %v990_v58  ;;  %v1686_v9 = vmul.f32 1.442695, %v1652_v59  ;;  %v991_v10 = vsub.f32 0.0, %v873_v61  ;;  %1414 = vst.msk [vmem:[%s5738_s0 + $0x18] sm:$0xff] %vm1410_vm9, %v873_v61  ;;  %v616_v28 = vcvt.s32.f32 %v584_v56 }
 0x102   : > { %v1653_v11 = vsub.f32 0.0, %v1535_v63  ;;  %4078 = vst.msk [vmem:[%s5738_s0 + $0x118] sm:$0xff] %vm1410_vm9, %v1535_v63  ;;  %v1020_v12 = vmul.f32 1.442695, %v988_v3  ;;  %v1682_v13 = vmul.f32 1.442695, %v1650_v4 }
 0x103   : > { %v989_v15 = vsub.f32 0.0, %v865_v5  ;;  %1412 = vst.msk [vmem:[%s5738_s0 + $0x8] sm:$0xff] %vm1410_vm9, %v865_v5  ;;  %v1651_v16 = vsub.f32 0.0, %v1527_v6  ;;  %4076 = vst.msk [vmem:[%s5738_s0 + $0x108] sm:$0xff] %vm1410_vm9, %v1527_v6  ;;  %4573 = vpow2.f32 %v1024_v7  ;;  %v1026_v17 = vmul.f32 1.442695, %v991_v10 }
 0x104   : > { %4575 = vpow2.f32 %v1686_v9  ;;  %v1688_v31 = vmul.f32 1.442695, %v1653_v11  ;;  %v4367_v32 = vpop.f32.mrb[4].mxu0  ;;  %v4401_v44 = vpop.f32.mrb[4].mxu1 }
 0x105   : > { %4577 = vpow2.f32 %v1020_v12  ;;  %v1022_v46 = vmul.f32 1.442695, %v989_v15  ;;  %v886_v50 = vadd.f32 %v4367_v32, %v5699_v20  ;;  %v1548_v37 = vadd.f32 %v4401_v44, %v5704_v23  ;;  %v877_v40 = vpop.f32.mrb[5].mxu0  ;;  %v1539_v51 = vpop.f32.mrb[5].mxu1 }
 0x106   : > { %4579 = vpow2.f32 %v1682_v13  ;;  %v1684_v47 = vmul.f32 1.442695, %v1651_v16  ;;  %v878_v48 = vadd.f32 %v5699_v20, %v877_v40  ;;  %v1540_v54 = vadd.f32 %v5704_v23, %v1539_v51  ;;  %v4368_v55 = vpop.f32.mrb[6].mxu0  ;;  %v4402_v56 = vpop.f32.mrb[6].mxu1 }
 0x107   : > { %4581 = vpow2.f32 %v1026_v17  ;;  %v994_v57 = vsub.f32 0.0, %v886_v50  ;;  %1417 = vst.msk [vmem:[%s5738_s0 + $0x30] sm:$0xff] %vm1410_vm9, %v886_v50  ;;  %v1656_v58 = vsub.f32 0.0, %v1548_v37  ;;  %4081 = vst.msk [vmem:[%s5738_s0 + $0x130] sm:$0xff] %vm1410_vm9, %v1548_v37  ;;  %v889_v59 = vadd.f32 %v4368_v55, %v5699_v20  ;;  %v880_v61 = vpop.f32.mrb[7].mxu0  ;;  %v1542_v63 = vpop.f32.mrb[7].mxu1 }
 0x108   : > { %4583 = vpow2.f32 %v1688_v31  ;;  %v992_v0 = vsub.f32 0.0, %v878_v48  ;;  %1415 = vst.msk [vmem:[%s5738_s0 + $0x20] sm:$0xff] %vm1410_vm9, %v878_v48  ;;  %v1654_v2 = vsub.f32 0.0, %v1540_v54  ;;  %4079 = vst.msk [vmem:[%s5738_s0 + $0x120] sm:$0xff] %vm1410_vm9, %v1540_v54  ;;  %v1551_v3 = vadd.f32 %v4402_v56, %v5704_v23 }
 0x109   : > { %4585 = vpow2.f32 %v1022_v46  ;;  %v1032_v4 = vmul.f32 1.442695, %v994_v57  ;;  %v1694_v5 = vmul.f32 1.442695, %v1656_v58  ;;  %v995_v6 = vsub.f32 0.0, %v889_v59  ;;  %1418 = vst.msk [vmem:[%s5738_s0 + $0x38] sm:$0xff] %vm1410_vm9, %v889_v59 }
 0x10a   : > { %4587 = vpow2.f32 %v1684_v47  ;;  %v1028_v7 = vmul.f32 1.442695, %v992_v0  ;;  %v1690_v9 = vmul.f32 1.442695, %v1654_v2  ;;  %v1657_v10 = vsub.f32 0.0, %v1551_v3  ;;  %4082 = vst.msk [vmem:[%s5738_s0 + $0x138] sm:$0xff] %vm1410_vm9, %v1551_v3 }
 0x10b   : > { %4589 = vpow2.f32 %v1032_v4  ;;  %v1034_v11 = vmul.f32 1.442695, %v995_v6  ;;  %v881_v12 = vadd.f32 %v5699_v20, %v880_v61  ;;  %v1543_v13 = vadd.f32 %v5704_v23, %v1542_v63 }
 0x10c   : > { %4591 = vpow2.f32 %v1694_v5  ;;  %v5807_v15 = vmul.f32 1.442695, %v1657_v10  ;;  %v4371_v16 = vpop.f32.mrb[8].mxu0  ;;  %v4405_v17 = vpop.f32.mrb[8].mxu1  ;;  %v5811_v31 = vsel %vm699_vm7, %v616_v28, %v714_v45  ;;  %v5814_v32 = vadd.s32 144, %v5584_v38 }
 0x10d   : > { %8415 = vst [vmem:[#allocation31_spill] sm:$0xff] %v5811_v31  ;;  %v4574_v44 = vpop.eup %4573  ;;  %4593 = vpow2.f32 %v1028_v7  ;;  %v993_v46 = vsub.f32 0.0, %v881_v12  ;;  %1416 = vst.msk [vmem:[%s5738_s0 + $0x28] sm:$0xff] %vm1410_vm9, %v881_v12  ;;  %v1655_v50 = vsub.f32 0.0, %v1543_v13  ;;  %v902_v37 = vadd.f32 %v4371_v16, %v5699_v20  ;;  %v893_v40 = vpop.f32.mrb[9].mxu0 }
 0x10e   : > { %4080 = vst.msk [vmem:[%s5738_s0 + $0x128] sm:$0xff] %vm1410_vm9, %v1543_v13  ;;  %v1555_v51 = vpop.f32.mrb[9].mxu1  ;;  %v4576_v47 = vpop.eup %4575  ;;  %v1086_v48 = vadd.f32 1.0, %v4574_v44  ;;  %4595 = vpow2.f32 %v1690_v9  ;;  %v1564_v28 = vadd.f32 %v4405_v17, %v5704_v23  ;;  %v894_v45 = vadd.f32 %v5699_v20, %v893_v40 }
 0x10f   : > { %v4372_v54 = vpop.f32.mrb[10].mxu0  ;;  %v4406_v55 = vpop.f32.mrb[10].mxu1  ;;  %v1748_v57 = vadd.f32 1.0, %v4576_v47  ;;  %4597 = vpow2.f32 %v1034_v11  ;;  %v5823_v58 = vmul.f32 1.442695, %v993_v46  ;;  %1421 = vst.msk [vmem:[%s5738_s0 + $0x50] sm:$0xff] %vm1410_vm9, %v902_v37  ;;  %v1556_v9 = vadd.f32 %v5704_v23, %v1555_v51 }
 0x110   : > { %v4578_v56 = vpop.eup %4577  ;;  %v896_v59 = vpop.f32.mrb[11].mxu0  ;;  %v5828_v61 = vadd.s32 128, %v5584_v38  ;;  %4599 = vrcp.f32 %v1086_v48  ;;  %v998_v2 = vsub.f32 0.0, %v902_v37  ;;  %v1660_v3 = vsub.f32 0.0, %v1564_v28  ;;  %4085 = vst.msk [vmem:[%s5738_s0 + $0x150] sm:$0xff] %vm1410_vm9, %v1564_v28  ;;  %1419 = vst.msk [vmem:[%s5738_s0 + $0x40] sm:$0xff] %vm1410_vm9, %v894_v45 }
 0x111   : > { %v4580_v63 = vpop.eup %4579  ;;  %v1084_v0 = vadd.f32 1.0, %v4578_v56  ;;  %v1558_v4 = vpop.f32.mrb[11].mxu1  ;;  %4601 = vrcp.f32 %v1748_v57  ;;  %v996_v7 = vsub.f32 0.0, %v894_v45  ;;  %v5835_v12 = vmul.f32 1.442695, %v1655_v50  ;;  %4083 = vst.msk [vmem:[%s5738_s0 + $0x140] sm:$0xff] %vm1410_vm9, %v1556_v9 }
 0x112   : > { %v4582_v5 = vpop.eup %4581  ;;  %v1746_v6 = vadd.f32 1.0, %v4580_v63  ;;  %v5837_v13 = vmul.f32 1.442695, %v998_v2  ;;  %v5839_v44 = vmul.f32 1.442695, %v1660_v3  ;;  %v1658_v46 = vsub.f32 0.0, %v1556_v9 }
 0x113   : > { %v4584_v10 = vpop.eup %4583  ;;  %4603 = vrcp.f32 %v1084_v0  ;;  %v1087_v11 = vadd.f32 1.0, %v4582_v5  ;;  %v905_v51 = vadd.f32 %v4372_v54, %v5699_v20  ;;  %v1567_v47 = vadd.f32 %v4406_v55, %v5704_v23 }
 0x114   : > { %v4586_v16 = vpop.eup %4585  ;;  %4605 = vrcp.f32 %v1746_v6  ;;  %v1749_v17 = vadd.f32 1.0, %v4584_v10  ;;  %v4375_v50 = vpop.f32.mrb[12].mxu0  ;;  %v5845_v56 = vmul.f32 1.442695, %v996_v7  ;;  %v897_v57 = vadd.f32 %v5699_v20, %v896_v59 }
 0x115   : > { %v4588_v37 = vpop.eup %4587  ;;  %4607 = vrcp.f32 %v1087_v11  ;;  %v1085_v40 = vadd.f32 1.0, %v4586_v16  ;;  %v4409_v48 = vpop.f32.mrb[12].mxu1  ;;  %v999_v55 = vsub.f32 0.0, %v905_v51  ;;  %1422 = vst.msk [vmem:[%s5738_s0 + $0x58] sm:$0xff] %vm1410_vm9, %v905_v51  ;;  %v1661_v3 = vsub.f32 0.0, %v1567_v47  ;;  %4086 = vst.msk [vmem:[%s5738_s0 + $0x158] sm:$0xff] %vm1410_vm9, %v1567_v47 }
 0x116   : > { %v4590_v28 = vpop.eup %4589  ;;  %4609 = vrcp.f32 %v1749_v17  ;;  %v1747_v45 = vadd.f32 1.0, %v4588_v37  ;;  %v909_v63 = vpop.f32.mrb[13].mxu0  ;;  %v997_v9 = vsub.f32 0.0, %v897_v57  ;;  %1420 = vst.msk [vmem:[%s5738_s0 + $0x48] sm:$0xff] %vm1410_vm9, %v897_v57  ;;  %v5862_v10 = vadd.f32 %v5704_v23, %v1558_v4 }
 0x117   : > { %v5848_v0 = vpop.f32.mrb[13].mxu1  ;;  %v4592_v2 = vpop.eup %4591  ;;  %4611 = vrcp.f32 %v1085_v40  ;;  %v1090_v54 = vadd.f32 1.0, %v4590_v28  ;;  %v5869_v40 = vmul.f32 1.442695, %v1658_v46  ;;  %v5871_v51 = vmul.f32 1.442695, %v999_v55 }
 0x118   : > { %v5855_v5 = vpop.f32.mrb[14].mxu0  ;;  %v5857_v6 = vpop.f32.mrb[14].mxu1  ;;  %4613 = vrcp.f32 %v1747_v45  ;;  %v1752_v7 = vadd.f32 1.0, %v4592_v2  ;;  %v5873_v45 = vmul.f32 1.442695, %v1661_v3  ;;  %4084 = vst.msk [vmem:[%s5738_s0 + $0x148] sm:$0xff] %vm1410_vm9, %v5862_v10  ;;  %v5881_v46 = vadd.f32 %v4375_v50, %v5699_v20 }
 0x119   : > { %v4594_v59 = vpop.eup %4593  ;;  %v5864_v11 = vpop.f32.mrb[15].mxu0  ;;  %4615 = vrcp.f32 %v1090_v54  ;;  %v5875_v4 = vmul.f32 1.442695, %v997_v9  ;;  %v5884_v54 = vadd.f32 %v4409_v48, %v5704_v23 }
 0x11a   : > { %v5866_v16 = vpop.f32.mrb[15].mxu1  ;;  %v4596_v17 = vpop.eup %4595  ;;  %v1088_v37 = vadd.f32 1.0, %v4594_v59  ;;  %4617 = vrcp.f32 %v1752_v7  ;;  %v5888_v7 = vadd.f32 %v5699_v20, %v909_v63  ;;  %1425 = vst.msk [vmem:[%s5738_s0 + $0x70] sm:$0xff] %vm1410_vm9, %v5881_v46 }
 0x11b   : > { %v4598_v47 = vpop.eup %4597  ;;  %v1750_v28 = vadd.f32 1.0, %v4596_v17  ;;  %4089 = vst.msk [vmem:[%s5738_s0 + $0x170] sm:$0xff] %vm1410_vm9, %v5884_v54 }
 0x11c   : > { %v4600_v57 = vpop.eup %4599  ;;  %4619 = vrcp.f32 %v1088_v37  ;;  %v1091_v2 = vadd.f32 1.0, %v4598_v47  ;;  %v5898_v48 = vpop.f32.mrb[16].mxu0  ;;  %1423 = vst.msk [vmem:[%s5738_s0 + $0x60] sm:$0xff] %vm1410_vm9, %v5888_v7 }
 0x11d   : > { %v4602_v55 = vpop.eup %4601  ;;  %v1154_v3 = vmul.f32 2.0, %v4600_v57  ;;  %4621 = vrcp.f32 %v1750_v28  ;;  %v5900_v47 = vpop.f32.mrb[16].mxu1 }
 0x11e   : > { %v4604_v9 = vpop.eup %4603  ;;  %v1814_v17 = vmul.f32 2.0, %v4602_v55  ;;  %4623 = vrcp.f32 %v1091_v2  ;;  %v5907_v2 = vpop.f32.mrb[17].mxu0 }
 0x11f   : > { %v4606_v63 = vpop.eup %4605  ;;  %v3994_v28 = vadd.f32 -0.5, %v1154_v3  ;;  %v1282_v53 = vmul.f32 %v1154_v3, %v1154_v3  ;;  %v1152_v59 = vmul.f32 2.0, %v4604_v9  ;;  %4625 = vpow2.f32 %v5807_v15  ;;  %v5909_v50 = vpop.f32.mrb[17].mxu1 }
 0x120   : > { %v5911_v37 = vpop.eup %4607  ;;  %v4045_v8 = vadd.f32 -0.5, %v1814_v17  ;;  %v1942_v1 = vmul.f32 %v1814_v17, %v1814_v17  ;;  %v1812_v52 = vmul.f32 2.0, %v4606_v63  ;;  %4627 = vpow2.f32 %v5823_v58  ;;  %v5914_v49 = vpop.f32.mrb[18].mxu0 }
 0x121   : > { %8416 = vst [vmem:[#allocation32_spill] sm:$0xff] %v5914_v49  ;;  %v5916_v3 = vpop.f32.mrb[18].mxu1  ;;  %v5918_v43 = vpop.eup %4609  ;;  %v1218_v15 = vadd.f32 %v3994_v28, %v5622_v60  ;;  %v1314_v42 = vmul.f32 %v1282_v53, %v5627_v62  ;;  %v3992_v39 = vadd.f32 -0.5, %v1152_v59  ;;  %v1280_v31 = vmul.f32 %v1152_v59, %v1152_v59 }
 0x122   : > { %8417 = vst [vmem:[#allocation33_spill] sm:$0xff] %v5916_v3  ;;  %v5922_v30 = vpop.f32.mrb[19].mxu0  ;;  %v5924_v21 = vpop.f32.mrb[19].mxu1  ;;  %v1878_v58 = vadd.f32 %v4045_v8, %v5622_v60  ;;  %v1974_v49 = vmul.f32 %v1942_v1, %v5657_v18  ;;  %v4043_v36 = vadd.f32 -0.5, %v1812_v52  ;;  %v1940_v3 = vmul.f32 %v1812_v52, %v1812_v52 }
 0x123   : > { %8418 = vst [vmem:[#allocation34_spill] sm:$0xff] %v5922_v30  ;;  %8419 = vst [vmem:[#allocation35_spill] sm:$0xff] %v5924_v21  ;;  %v5926_v17 = vpop.eup %4611  ;;  %v1250_v53 = vmul.f32 2.0, %v1218_v15  ;;  %v1348_v59 = vsel %vm1345_vm10, %v1314_v42, %v4600_v57  ;;  %v1216_v28 = vadd.f32 %v3992_v39, %v5651_v14  ;;  %v1312_v8 = vmul.f32 %v1280_v31, %v5627_v62 }
 0x124   : > { %v5930_v35 = vpop.eup %4613  ;;  %v1910_v1 = vmul.f32 2.0, %v1878_v58  ;;  %v2006_v52 = vsel %vm1345_vm10, %v1974_v49, %v4602_v55  ;;  %v1876_v21 = vadd.f32 %v4043_v36, %v5651_v14  ;;  %v1972_v30 = vmul.f32 %v1940_v3, %v5657_v18  ;;  %v5963_v58 = vpop.f32.mrb[20].mxu0 }
 0x125   : > { %v5941_v60 = vpop.eup %4615  ;;  %v1380_v42 = vsel %vm1344_vm11, %v1250_v53, %v1348_v59  ;;  %v1248_v57 = vmul.f32 2.0, %v1216_v28  ;;  %v1346_v39 = vsel %vm1345_vm10, %v1312_v8, %v4604_v9  ;;  %v1155_v31 = vmul.f32 2.0, %v5911_v37  ;;  %8420 = vst [vmem:[#allocation36_spill] sm:$0xff] %v5963_v58  ;;  %v5965_v53 = vpop.f32.mrb[20].mxu1 }
 0x126   : > { %v5947_v27 = vpop.eup %4617  ;;  %1445 = vst.msk [vmem:[%s5935_s18 + $0x10] sm:$0xff] %vm1410_vm9, %v1380_v42  ;;  %v2038_v49 = vsel %vm1344_vm11, %v1910_v1, %v2006_v52  ;;  %v1908_v36 = vmul.f32 2.0, %v1876_v21  ;;  %v2004_v55 = vsel %vm1345_vm10, %v1972_v30, %v4606_v63  ;;  %v1815_v3 = vmul.f32 2.0, %v5918_v43  ;;  %8421 = vst [vmem:[#allocation37_spill] sm:$0xff] %v5965_v53  ;;  %v5974_v1 = vpop.f32.mrb[21].mxu0 }
 0x127   : > { %v5954_v15 = vpop.eup %4619  ;;  %2103 = vst.msk [vmem:[%s5935_s18 + $0x110] sm:$0xff] %vm1410_vm9, %v2038_v49  ;;  %v1378_v59 = vsel %vm1344_vm11, %v1248_v57, %v1346_v39  ;;  %v3995_v28 = vadd.f32 -0.5, %v1155_v31  ;;  %v1283_v8 = vmul.f32 %v1155_v31, %v1155_v31  ;;  %v1153_v21 = vmul.f32 2.0, %v5926_v17  ;;  %8422 = vst [vmem:[#allocation38_spill] sm:$0xff] %v5974_v1  ;;  %v5976_v30 = vpop.f32.mrb[21].mxu1 }
 0x128   : > { %v5967_v9 = vpop.eup %4621  ;;  %8423 = vst [vmem:[#allocation39_spill] sm:$0xff] %v5976_v30  ;;  %1443 = vst.msk [vmem:[%s5935_s18] sm:$0xff] %vm1410_vm9, %v1378_v59  ;;  %v2036_v52 = vsel %vm1344_vm11, %v1908_v36, %v2004_v55  ;;  %v4046_v42 = vadd.f32 -0.5, %v1815_v3  ;;  %v1943_v49 = vmul.f32 %v1815_v3, %v1815_v3  ;;  %v1813_v14 = vmul.f32 2.0, %v5930_v35  ;;  %v5985_v57 = vpop.f32.mrb[22].mxu0 }
 0x129   : > { %v5978_v63 = vpop.eup %4623  ;;  %8424 = vst [vmem:[#allocation40_spill] sm:$0xff] %v5985_v57  ;;  %v5987_v39 = vpop.f32.mrb[22].mxu1  ;;  %2101 = vst.msk [vmem:[%s5935_s18 + $0x100] sm:$0xff] %vm1410_vm9, %v2036_v52  ;;  %v1219_v30 = vadd.f32 %v3995_v28, %v5661_v19  ;;  %v1315_v1 = vmul.f32 %v1283_v8, %v5627_v62  ;;  %v3993_v59 = vadd.f32 -0.5, %v1153_v21  ;;  %v1281_v53 = vmul.f32 %v1153_v21, %v1153_v21 }
 0x12a   : > { %8425 = vst [vmem:[#allocation41_spill] sm:$0xff] %v5987_v39  ;;  %v5989_v31 = vpop.eup %4625  ;;  %v5995_v58 = vpop.f32.mrb[23].mxu0  ;;  %v1879_v3 = vadd.f32 %v4046_v42, %v5661_v19  ;;  %v1975_v39 = vmul.f32 %v1943_v49, %v5657_v18  ;;  %v4044_v57 = vadd.f32 -0.5, %v1813_v14  ;;  %v1941_v26 = vmul.f32 %v1813_v14, %v1813_v14 }
 0x12b   : > { %v5997_v36 = vpop.f32.mrb[23].mxu1  ;;  %v5999_v55 = vpop.eup %4627  ;;  %v1251_v52 = vmul.f32 2.0, %v1219_v30  ;;  %v1349_v28 = vsel %vm1345_vm10, %v1315_v1, %v5911_v37  ;;  %v1217_v8 = vadd.f32 %v3993_v59, %v5667_v22  ;;  %v1313_v21 = vmul.f32 %v1281_v53, %v5627_v62 }
 0x12c   : > { %8426 = vst [vmem:[#allocation42_spill] sm:$0xff] %v5997_v36  ;;  %v1911_v36 = vmul.f32 2.0, %v1879_v3  ;;  %v2007_v42 = vsel %vm1345_vm10, %v1975_v39, %v5918_v43  ;;  %v1877_v19 = vadd.f32 %v4044_v57, %v5667_v22  ;;  %v1973_v49 = vmul.f32 %v1941_v26, %v5657_v18  ;;  %v6027_v39 = vpop.f32.mrb[24].mxu0  ;;  %v6029_v59 = vpop.f32.mrb[24].mxu1 }
 0x12d   : > { %v1381_v14 = vsel %vm1344_vm11, %v1251_v52, %v1349_v28  ;;  %v1249_v30 = vmul.f32 2.0, %v1217_v8  ;;  %v1347_v37 = vsel %vm1345_vm10, %v1313_v21, %v5926_v17  ;;  %v1158_v53 = vmul.f32 2.0, %v5941_v60 }
 0x12e   : > { %1446 = vst.msk [vmem:[%s5935_s18 + $0x18] sm:$0xff] %vm1410_vm9, %v1381_v14  ;;  %v2039_v43 = vsel %vm1344_vm11, %v1911_v36, %v2007_v42  ;;  %v1909_v1 = vmul.f32 2.0, %v1877_v19  ;;  %v2005_v26 = vsel %vm1345_vm10, %v1973_v49, %v5930_v35  ;;  %v1818_v57 = vmul.f32 2.0, %v5947_v27 }
 0x12f   : > { %2104 = vst.msk [vmem:[%s5935_s18 + $0x118] sm:$0xff] %vm1410_vm9, %v2039_v43  ;;  %v1379_v17 = vsel %vm1344_vm11, %v1249_v30, %v1347_v37  ;;  %v3998_v3 = vadd.f32 -0.5, %v1158_v53  ;;  %v1286_v52 = vmul.f32 %v1158_v53, %v1158_v53  ;;  %v1156_v36 = vmul.f32 2.0, %v5954_v15 }
 0x130   : > { %1444 = vst.msk [vmem:[%s5935_s18 + $0x8] sm:$0xff] %vm1410_vm9, %v1379_v17  ;;  %v2037_v19 = vsel %vm1344_vm11, %v1909_v1, %v2005_v26  ;;  %v4049_v35 = vadd.f32 -0.5, %v1818_v57  ;;  %v1946_v28 = vmul.f32 %v1818_v57, %v1818_v57  ;;  %v1816_v8 = vmul.f32 2.0, %v5967_v9  ;;  %v6047_v17 = vpop.f32.mrb[25].mxu0 }
 0x131   : > { %2102 = vst.msk [vmem:[%s5935_s18 + $0x108] sm:$0xff] %vm1410_vm9, %v2037_v19  ;;  %v1222_v21 = vadd.f32 %v3998_v3, %v5708_v24  ;;  %v1318_v42 = vmul.f32 %v1286_v52, %v5627_v62  ;;  %v3996_v49 = vadd.f32 -0.5, %v1156_v36  ;;  %v1284_v14 = vmul.f32 %v1156_v36, %v1156_v36  ;;  %v6054_v52 = vpop.f32.mrb[25].mxu1 }
 0x132   : > { %v1882_v30 = vadd.f32 %v4049_v35, %v5708_v24  ;;  %v1978_v37 = vmul.f32 %v1946_v28, %v5657_v18  ;;  %v4047_v53 = vadd.f32 -0.5, %v1816_v8  ;;  %v1944_v43 = vmul.f32 %v1816_v8, %v1816_v8 }
 0x133   : > { %v1254_v1 = vmul.f32 2.0, %v1222_v21  ;;  %v1352_v26 = vsel %vm1345_vm10, %v1318_v42, %v5941_v60  ;;  %v1220_v57 = vadd.f32 %v3996_v49, %v5712_v25  ;;  %v1316_v3 = vmul.f32 %v1284_v14, %v5627_v62  ;;  %v6067_v49 = vpop.f32.mrb[26].mxu0  ;;  %v6069_v14 = vpop.f32.mrb[26].mxu1 }
 0x134   : > { %v1914_v36 = vmul.f32 2.0, %v1882_v30  ;;  %v2010_v19 = vsel %vm1345_vm10, %v1978_v37, %v5947_v27  ;;  %v1880_v35 = vadd.f32 %v4047_v53, %v5712_v25  ;;  %v1976_v28 = vmul.f32 %v1944_v43, %v5657_v18 }
 0x135   : > { %v1384_v8 = vsel %vm1344_vm11, %v1254_v1, %v1352_v26  ;;  %v1252_v60 = vmul.f32 2.0, %v1220_v57  ;;  %v1350_v21 = vsel %vm1345_vm10, %v1316_v3, %v5954_v15  ;;  %v1159_v42 = vmul.f32 2.0, %v5978_v63 }
 0x136   : > { %1449 = vst.msk [vmem:[%s5935_s18 + $0x30] sm:$0xff] %vm1410_vm9, %v1384_v8  ;;  %v2042_v27 = vsel %vm1344_vm11, %v1914_v36, %v2010_v19  ;;  %v1912_v30 = vmul.f32 2.0, %v1880_v35  ;;  %v2008_v37 = vsel %vm1345_vm10, %v1976_v28, %v5967_v9  ;;  %v1753_v53 = vadd.f32 1.0, %v5989_v31 }
 0x137   : > { %2107 = vst.msk [vmem:[%s5935_s18 + $0x130] sm:$0xff] %vm1410_vm9, %v2042_v27  ;;  %v1382_v15 = vsel %vm1344_vm11, %v1252_v60, %v1350_v21  ;;  %v3999_v43 = vadd.f32 -0.5, %v1159_v42  ;;  %v1287_v1 = vmul.f32 %v1159_v42, %v1159_v42  ;;  %v1089_v26 = vadd.f32 1.0, %v5999_v55  ;;  %v6110_v21 = vpop.f32.mrb[27].mxu0 }
 0x138   : > { %1447 = vst.msk [vmem:[%s5935_s18 + $0x20] sm:$0xff] %vm1410_vm9, %v1382_v15  ;;  %v2040_v57 = vsel %vm1344_vm11, %v1912_v30, %v2008_v37  ;;  %4629 = vrcp.f32 %v1753_v53  ;;  %v8427_v3 = vsub.f32 0.0, %v5862_v10  ;;  %v8428_v31 = vsub.f32 0.0, %v5881_v46 }
 0x139   : > { %2105 = vst.msk [vmem:[%s5935_s18 + $0x120] sm:$0xff] %vm1410_vm9, %v2040_v57  ;;  %v1223_v19 = vadd.f32 %v3999_v43, %v5716_v29  ;;  %v1319_v35 = vmul.f32 %v1287_v1, %v5627_v62  ;;  %4631 = vrcp.f32 %v1089_v26  ;;  %v1000_v55 = vsub.f32 0.0, %v5888_v7 }
 0x13a   : > { %v1700_v9 = vmul.f32 1.442695, %v8427_v3  ;;  %v1048_v36 = vmul.f32 1.442695, %v8428_v31  ;;  %4633 = vpow2.f32 %v5835_v12  ;;  %v1572_v10 = vadd.f32 %v5704_v23, %v5848_v0 }
 0x13b   : > { %v921_v46 = vadd.f32 %v5855_v5, %v5699_v20  ;;  %v1583_v28 = vadd.f32 %v5857_v6, %v5704_v23  ;;  %v1255_v8 = vmul.f32 2.0, %v1223_v19  ;;  %v1353_v60 = vsel %vm1345_vm10, %v1319_v35, %v5978_v63 }
 0x13c   : > { %4635 = vpow2.f32 %v5837_v13  ;;  %v8429_v7 = vsub.f32 0.0, %v5884_v54  ;;  %v1662_v0 = vsub.f32 0.0, %v1572_v10  ;;  %4087 = vst.msk [vmem:[%s5738_s0 + $0x160] sm:$0xff] %vm1410_vm9, %v1572_v10  ;;  %v913_v54 = vadd.f32 %v5699_v20, %v5864_v11 }
 0x13d   : > { %4637 = vpow2.f32 %v5839_v44  ;;  %v1003_v5 = vsub.f32 0.0, %v921_v46  ;;  %1426 = vst.msk [vmem:[%s5738_s0 + $0x78] sm:$0xff] %vm1410_vm9, %v921_v46  ;;  %v1665_v6 = vsub.f32 0.0, %v1583_v28  ;;  %4090 = vst.msk [vmem:[%s5738_s0 + $0x178] sm:$0xff] %vm1410_vm9, %v1583_v28  ;;  %v1385_v13 = vsel %vm1344_vm11, %v1255_v8, %v1353_v60 }
 0x13e   : > { %v1710_v12 = vmul.f32 1.442695, %v8429_v7  ;;  %4639 = vpow2.f32 %v5845_v56  ;;  %v1575_v44 = vadd.f32 %v5704_v23, %v5866_v16  ;;  %1450 = vst.msk [vmem:[%s5935_s18 + $0x38] sm:$0xff] %vm1410_vm9, %v1385_v13  ;;  %v1044_v63 = vmul.f32 1.442695, %v1000_v55  ;;  %1424 = vst.msk [vmem:[%s5738_s0 + $0x68] sm:$0xff] %vm1410_vm9, %v913_v54 }
 0x13f   : > { %4641 = vpow2.f32 %v5869_v40  ;;  %v1706_v42 = vmul.f32 1.442695, %v1662_v0  ;;  %v6129_v27 = vmul.f32 1.442695, %v1003_v5  ;;  %v1001_v30 = vsub.f32 0.0, %v913_v54  ;;  %v6166_v54 = vpop.f32.mrb[27].mxu1 }
 0x140   : > { %4643 = vpow2.f32 %v5871_v51  ;;  %v1663_v56 = vsub.f32 0.0, %v1575_v44  ;;  %4088 = vst.msk [vmem:[%s5738_s0 + $0x168] sm:$0xff] %vm1410_vm9, %v1575_v44  ;;  %v589_v11 = vand.u32 15, %v5814_v32  ;;  %v653_v16 = vshra.s32 %v5814_v32, 4 }
 0x141   : > { %4645 = vpow2.f32 %v5873_v45  ;;  %v934_v40 = vadd.f32 %v5898_v48, %v5699_v20  ;;  %v6143_v51 = vadd.f32 %v5900_v47, %v5704_v23  ;;  %v6146_v37 = vmul.f32 1.442695, %v1665_v6 }
 0x142   : > { %4647 = vpow2.f32 %v5875_v4  ;;  %v6148_v53 = vmul.f32 1.442695, %v1001_v30  ;;  %v6150_v15 = vmul.f32 1.442695, %v1663_v56  ;;  %v4630_v43 = vpop.eup %4629  ;;  %v621_v45 = vcvt.s32.f32 %v589_v11 }
 0x143   : > { %4649 = vpow2.f32 %v1700_v9  ;;  %v685_v1 = vcvt.s32.f32 %v653_v16  ;;  %v1006_v32 = vsub.f32 0.0, %v934_v40  ;;  %1429 = vst.msk [vmem:[%s5738_s0 + $0x90] sm:$0xff] %vm1410_vm9, %v934_v40  ;;  %4093 = vst.msk [vmem:[%s5738_s0 + $0x190] sm:$0xff] %vm1410_vm9, %v6143_v51  ;;  %v4632_v48 = vpop.eup %4631  ;;  %v1819_v47 = vmul.f32 2.0, %v4630_v43 }
 0x144   : > { %4651 = vpow2.f32 %v1048_v36  ;;  %v1668_v4 = vsub.f32 0.0, %v6143_v51  ;;  %v587_v26 = vand.u32 15, %v5828_v61  ;;  %v4634_v57 = vpop.eup %4633  ;;  %v1157_v3 = vmul.f32 2.0, %v4632_v48 }
 0x145   : > { %4653 = vpow2.f32 %v1710_v12  ;;  %v719_v9 = vsel %vm700_vm5, %v685_v1, 0.0  ;;  %v651_v31 = vshra.s32 %v5828_v61, 4  ;;  %v4050_v35 = vadd.f32 -0.5, %v1819_v47 }
 0x146   : > { %v4636_v19 = vpop.eup %4635  ;;  %v1947_v55 = vmul.f32 %v1819_v47, %v1819_v47  ;;  %v1751_v10 = vadd.f32 1.0, %v4634_v57  ;;  %4655 = vpow2.f32 %v1044_v63  ;;  %v3997_v28 = vadd.f32 -0.5, %v1157_v3 }
 0x147   : > { %v4638_v46 = vpop.eup %4637  ;;  %v1285_v36 = vmul.f32 %v1157_v3, %v1157_v3  ;;  %v1094_v8 = vadd.f32 1.0, %v4636_v19  ;;  %4657 = vpow2.f32 %v1706_v42  ;;  %v1883_v7 = vadd.f32 %v4050_v35, %v5716_v29 }
 0x148   : > { %v4640_v60 = vpop.eup %4639  ;;  %v1979_v12 = vmul.f32 %v1947_v55, %v5657_v18  ;;  %4659 = vrcp.f32 %v1751_v10  ;;  %v1756_v0 = vadd.f32 1.0, %v4638_v46  ;;  %v1221_v61 = vadd.f32 %v3997_v28, %v5721_v33 }
 0x149   : > { %v4642_v5 = vpop.eup %4641  ;;  %v1317_v6 = vmul.f32 %v1285_v36, %v5627_v62  ;;  %4661 = vrcp.f32 %v1094_v8  ;;  %v1092_v13 = vadd.f32 1.0, %v4640_v60  ;;  %v1915_v63 = vmul.f32 2.0, %v1883_v7 }
 0x14a   : > { %v4644_v44 = vpop.eup %4643  ;;  %v2011_v42 = vsel %vm1345_vm10, %v1979_v12, %v4630_v43  ;;  %4663 = vrcp.f32 %v1756_v0  ;;  %v1754_v30 = vadd.f32 1.0, %v4642_v5  ;;  %v1253_v11 = vmul.f32 2.0, %v1221_v61 }
 0x14b   : > { %v4646_v56 = vpop.eup %4645  ;;  %v1351_v16 = vsel %vm1345_vm10, %v1317_v6, %v4632_v48  ;;  %4665 = vrcp.f32 %v1092_v13  ;;  %v1095_v40 = vadd.f32 1.0, %v4644_v44  ;;  %v2043_v47 = vsel %vm1344_vm11, %v1915_v63, %v2011_v42 }
 0x14c   : > { %v4648_v1 = vpop.eup %4647  ;;  %4667 = vrcp.f32 %v1754_v30  ;;  %v1757_v57 = vadd.f32 1.0, %v4646_v56  ;;  %v6174_v3 = vmul.f32 1.442695, %v1006_v32  ;;  %2108 = vst.msk [vmem:[%s5935_s18 + $0x138] sm:$0xff] %vm1410_vm9, %v2043_v47  ;;  %v1383_v43 = vsel %vm1344_vm11, %v1253_v11, %v1351_v16 }
 0x14d   : > { %v4650_v19 = vpop.eup %4649  ;;  %4669 = vrcp.f32 %v1095_v40  ;;  %v1093_v35 = vadd.f32 1.0, %v4648_v1  ;;  %v6182_v48 = vsel %vm699_vm7, %v621_v45, %v719_v9  ;;  %1448 = vst.msk [vmem:[%s5935_s18 + $0x28] sm:$0xff] %vm1410_vm9, %v1383_v43  ;;  %v619_v46 = vcvt.s32.f32 %v587_v26  ;;  %v6190_v45 = vpop.f32.mrb[28].mxu0 }
 0x14e   : > { %8430 = vst [vmem:[#allocation43_spill] sm:$0xff] %v6182_v48  ;;  %v4652_v55 = vpop.eup %4651  ;;  %4671 = vrcp.f32 %v1757_v57  ;;  %v1755_v10 = vadd.f32 1.0, %v4650_v19  ;;  %v683_v32 = vcvt.s32.f32 %v651_v31  ;;  %v926_v8 = vadd.f32 %v5699_v20, %v5907_v2  ;;  %v6192_v9 = vpop.f32.mrb[28].mxu1 }
 0x14f   : > { %v4654_v28 = vpop.eup %4653  ;;  %4673 = vrcp.f32 %v1093_v35  ;;  %v1098_v36 = vadd.f32 1.0, %v4652_v55  ;;  %v1588_v60 = vadd.f32 %v5704_v23, %v5909_v50  ;;  %v6197_v31 = vadd.s32 152, %v5584_v38  ;;  %v6199_v0 = vpop.f32.mrb[29].mxu0 }
 0x150   : > { %v4656_v7 = vpop.eup %4655  ;;  %4675 = vrcp.f32 %v1755_v10  ;;  %v1760_v12 = vadd.f32 1.0, %v4654_v28  ;;  %v717_v26 = vsel %vm700_vm5, %v683_v32, 0.0  ;;  %v6203_v23 = vmul.f32 1.442695, %v1668_v4  ;;  %1427 = vst.msk [vmem:[%s5738_s0 + $0x80] sm:$0xff] %vm1410_vm9, %v926_v8 }
 0x151   : > { %v4658_v20 = vpop.eup %4657  ;;  %4677 = vrcp.f32 %v1098_v36  ;;  %v1096_v2 = vadd.f32 1.0, %v4656_v7  ;;  %v1004_v50 = vsub.f32 0.0, %v926_v8  ;;  %4091 = vst.msk [vmem:[%s5738_s0 + $0x180] sm:$0xff] %vm1410_vm9, %v1588_v60  ;;  %v6211_v6 = vsel %vm699_vm7, %v619_v46, %v717_v26 }
 0x152   : > { %v4660_v5 = vpop.eup %4659  ;;  %4679 = vrcp.f32 %v1760_v12  ;;  %v1758_v61 = vadd.f32 1.0, %v4658_v20  ;;  %8431 = vst [vmem:[#allocation44_spill] sm:$0xff] %v6211_v6  ;;  %v1666_v13 = vsub.f32 0.0, %v1588_v60 }
 0x153   : > { %v4662_v44 = vpop.eup %4661  ;;  %v1817_v63 = vmul.f32 2.0, %v4660_v5  ;;  %4681 = vrcp.f32 %v1096_v2  ;;  %v6213_v42 = vmul.f32 1.442695, %v1004_v50 }
 0x154   : > { %v4664_v4 = vpop.eup %4663  ;;  %v1162_v30 = vmul.f32 2.0, %v4662_v44  ;;  %4683 = vrcp.f32 %v1758_v61  ;;  %v6216_v56 = vmul.f32 1.442695, %v1666_v13 }
 0x155   : > { %v4666_v16 = vpop.eup %4665  ;;  %v4048_v40 = vadd.f32 -0.5, %v1817_v63  ;;  %v1945_v1 = vmul.f32 %v1817_v63, %v1817_v63  ;;  %v1822_v47 = vmul.f32 2.0, %v4664_v4  ;;  %4685 = vpow2.f32 %v6129_v27  ;;  %v8432_v63 = vld [vmem:[#allocation25_spill] sm:$0xff] }
 0x156   : > { %v6220_v57 = vpop.eup %4667  ;;  %v4002_v19 = vadd.f32 -0.5, %v1162_v30  ;;  %v1290_v43 = vmul.f32 %v1162_v30, %v1162_v30  ;;  %v1160_v35 = vmul.f32 2.0, %v4666_v16  ;;  %4687 = vpow2.f32 %v6146_v37 }
 0x157   : > { %v6223_v55 = vpop.eup %4669  ;;  %v1881_v10 = vadd.f32 %v4048_v40, %v5721_v33  ;;  %v1977_v46 = vmul.f32 %v1945_v1, %v5657_v18  ;;  %v4053_v32 = vadd.f32 -0.5, %v1822_v47  ;;  %v1950_v28 = vmul.f32 %v1822_v47, %v1822_v47 }
 0x158   : > { %v6227_v36 = vpop.eup %4671  ;;  %v1226_v8 = vadd.f32 %v4002_v19, %v5725_v34  ;;  %v1322_v27 = vmul.f32 %v1290_v43, %v5627_v62  ;;  %v4000_v60 = vadd.f32 -0.5, %v1160_v35  ;;  %v1288_v7 = vmul.f32 %v1160_v35, %v1160_v35 }
 0x159   : > { %v6231_v12 = vpop.eup %4673  ;;  %v1913_v37 = vmul.f32 2.0, %v1881_v10  ;;  %v2009_v26 = vsel %vm1345_vm10, %v1977_v46, %v4660_v5  ;;  %v1886_v20 = vadd.f32 %v4053_v32, %v5725_v34  ;;  %v1982_v2 = vmul.f32 %v1950_v28, %v5657_v18 }
 0x15a   : > { %v6237_v50 = vpop.eup %4675  ;;  %v1258_v61 = vmul.f32 2.0, %v1226_v8  ;;  %v1356_v13 = vsel %vm1345_vm10, %v1322_v27, %v4662_v44  ;;  %v1224_v30 = vadd.f32 %v4000_v60, %v8432_v63  ;;  %v1320_v40 = vmul.f32 %v1288_v7, %v5627_v62 }
 0x15b   : > { %v6243_v1 = vpop.eup %4677  ;;  %v2041_v5 = vsel %vm1344_vm11, %v1913_v37, %v2009_v26  ;;  %v1918_v47 = vmul.f32 2.0, %v1886_v20  ;;  %v2014_v19 = vsel %vm1345_vm10, %v1982_v2, %v4664_v4  ;;  %v1820_v43 = vmul.f32 2.0, %v6220_v57  ;;  %v6273_v2 = vpop.f32.mrb[29].mxu1 }
 0x15c   : > { %v6250_v35 = vpop.eup %4679  ;;  %2106 = vst.msk [vmem:[%s5935_s18 + $0x128] sm:$0xff] %vm1410_vm9, %v2041_v5  ;;  %v1388_v44 = vsel %vm1344_vm11, %v1258_v61, %v1356_v13  ;;  %v1256_v10 = vmul.f32 2.0, %v1224_v30  ;;  %v1354_v46 = vsel %vm1345_vm10, %v1320_v40, %v4666_v16  ;;  %v1163_v32 = vmul.f32 2.0, %v6223_v55 }
 0x15d   : > { %v6259_v28 = vpop.eup %4681  ;;  %1453 = vst.msk [vmem:[%s5935_s18 + $0x50] sm:$0xff] %vm1410_vm9, %v1388_v44  ;;  %v2046_v4 = vsel %vm1344_vm11, %v1918_v47, %v2014_v19  ;;  %v4051_v8 = vadd.f32 -0.5, %v1820_v43  ;;  %v1948_v27 = vmul.f32 %v1820_v43, %v1820_v43  ;;  %v1823_v60 = vmul.f32 2.0, %v6227_v36  ;;  %v8433_v19 = vld [vmem:[#allocation26_spill] sm:$0xff] }
 0x15e   : > { %v6266_v7 = vpop.eup %4683  ;;  %2111 = vst.msk [vmem:[%s5935_s18 + $0x150] sm:$0xff] %vm1410_vm9, %v2046_v4  ;;  %v1386_v16 = vsel %vm1344_vm11, %v1256_v10, %v1354_v46  ;;  %v4003_v37 = vadd.f32 -0.5, %v1163_v32  ;;  %v1291_v26 = vmul.f32 %v1163_v32, %v1163_v32  ;;  %v1161_v20 = vmul.f32 2.0, %v6231_v12  ;;  %v6285_v32 = vpop.f32.mrb[30].mxu0 }
 0x15f   : > { %v6275_v61 = vpop.eup %4685  ;;  %1451 = vst.msk [vmem:[%s5935_s18 + $0x40] sm:$0xff] %vm1410_vm9, %v1386_v16  ;;  %v1884_v13 = vadd.f32 %v4051_v8, %v8432_v63  ;;  %v1980_v30 = vmul.f32 %v1948_v27, %v5657_v18  ;;  %v4054_v40 = vadd.f32 -0.5, %v1823_v60  ;;  %v1951_v5 = vmul.f32 %v1823_v60, %v1823_v60  ;;  %v6287_v4 = vpop.f32.mrb[30].mxu1 }
 0x160   : > { %v6281_v47 = vpop.eup %4687  ;;  %v1227_v43 = vadd.f32 %v4003_v37, %v8433_v19  ;;  %v1323_v44 = vmul.f32 %v1291_v26, %v5627_v62  ;;  %v4001_v10 = vadd.f32 -0.5, %v1161_v20  ;;  %v1289_v46 = vmul.f32 %v1161_v20, %v1161_v20  ;;  %v8434_v20 = vld [vmem:[#allocation27_spill] sm:$0xff] }
 0x161   : > { %v1916_v16 = vmul.f32 2.0, %v1884_v13  ;;  %v2012_v8 = vsel %vm1345_vm10, %v1980_v30, %v6220_v57  ;;  %v1887_v27 = vadd.f32 %v4054_v40, %v8433_v19  ;;  %v1983_v60 = vmul.f32 %v1951_v5, %v5657_v18  ;;  %v6299_v13 = vpop.f32.mrb[31].mxu0 }
 0x162   : > { %v1259_v37 = vmul.f32 2.0, %v1227_v43  ;;  %v1357_v26 = vsel %vm1345_vm10, %v1323_v44, %v6223_v55  ;;  %v1225_v51 = vadd.f32 %v4001_v10, %v8434_v20  ;;  %v1321_v11 = vmul.f32 %v1289_v46, %v5627_v62 }
 0x163   : > { %v2044_v57 = vsel %vm1344_vm11, %v1916_v16, %v2012_v8  ;;  %v1919_v30 = vmul.f32 2.0, %v1887_v27  ;;  %v2015_v40 = vsel %vm1345_vm10, %v1983_v60, %v6227_v36  ;;  %v1821_v5 = vmul.f32 2.0, %v6237_v50 }
 0x164   : > { %2109 = vst.msk [vmem:[%s5935_s18 + $0x140] sm:$0xff] %vm1410_vm9, %v2044_v57  ;;  %v1389_v55 = vsel %vm1344_vm11, %v1259_v37, %v1357_v26  ;;  %v1257_v43 = vmul.f32 2.0, %v1225_v51  ;;  %v1355_v44 = vsel %vm1345_vm10, %v1321_v11, %v6231_v12  ;;  %v1166_v10 = vmul.f32 2.0, %v6243_v1  ;;  %v6325_v12 = vpop.f32.mrb[31].mxu1 }
 0x165   : > { %1454 = vst.msk [vmem:[%s5935_s18 + $0x58] sm:$0xff] %vm1410_vm9, %v1389_v55  ;;  %v2047_v36 = vsel %vm1344_vm11, %v1919_v30, %v2015_v40  ;;  %v4052_v46 = vadd.f32 -0.5, %v1821_v5  ;;  %v1949_v16 = vmul.f32 %v1821_v5, %v1821_v5  ;;  %v1826_v8 = vmul.f32 2.0, %v6250_v35  ;;  %v8435_v40 = vld [vmem:[#allocation28_spill] sm:$0xff] }
 0x166   : > { %2112 = vst.msk [vmem:[%s5935_s18 + $0x158] sm:$0xff] %vm1410_vm9, %v2047_v36  ;;  %v1387_v51 = vsel %vm1344_vm11, %v1257_v43, %v1355_v44  ;;  %v4006_v27 = vadd.f32 -0.5, %v1166_v10  ;;  %v1294_v60 = vmul.f32 %v1166_v10, %v1166_v10  ;;  %v1164_v11 = vmul.f32 2.0, %v6259_v28 }
 0x167   : > { %1452 = vst.msk [vmem:[%s5935_s18 + $0x48] sm:$0xff] %vm1410_vm9, %v1387_v51  ;;  %v1885_v37 = vadd.f32 %v4052_v46, %v8434_v20  ;;  %v1981_v26 = vmul.f32 %v1949_v16, %v5657_v18  ;;  %v4057_v57 = vadd.f32 -0.5, %v1826_v8  ;;  %v1954_v30 = vmul.f32 %v1826_v8, %v1826_v8 }
 0x168   : > { %v1230_v5 = vadd.f32 %v4006_v27, %v8435_v40  ;;  %v1326_v55 = vmul.f32 %v1294_v60, %v5627_v62  ;;  %v4004_v43 = vadd.f32 -0.5, %v1164_v11  ;;  %v1292_v44 = vmul.f32 %v1164_v11, %v1164_v11  ;;  %v8436_v27 = vld [vmem:[#allocation29_spill] sm:$0xff] }
 0x169   : > { %v1917_v10 = vmul.f32 2.0, %v1885_v37  ;;  %v2013_v36 = vsel %vm1345_vm10, %v1981_v26, %v6237_v50  ;;  %v1890_v51 = vadd.f32 %v4057_v57, %v8435_v40  ;;  %v1986_v46 = vmul.f32 %v1954_v30, %v5657_v18 }
 0x16a   : > { %v1262_v16 = vmul.f32 2.0, %v1230_v5  ;;  %v1360_v8 = vsel %vm1345_vm10, %v1326_v55, %v6243_v1  ;;  %v1228_v20 = vadd.f32 %v4004_v43, %v8436_v27  ;;  %v1324_v60 = vmul.f32 %v1292_v44, %v5627_v62  ;;  %v6357_v55 = vpop.f32.mrb[32].mxu0  ;;  %v6359_v43 = vpop.f32.mrb[32].mxu1 }
 0x16b   : > { %v2045_v11 = vsel %vm1344_vm11, %v1917_v10, %v2013_v36  ;;  %v1922_v37 = vmul.f32 2.0, %v1890_v51  ;;  %v2018_v50 = vsel %vm1345_vm10, %v1986_v46, %v6250_v35  ;;  %v1824_v26 = vmul.f32 2.0, %v6266_v7  ;;  %v6375_v51 = vld [vmem:[%s8317_s6] ss:$0 sm:$0xff] }
 0x16c   : > { %2110 = vst.msk [vmem:[%s5935_s18 + $0x148] sm:$0xff] %vm1410_vm9, %v2045_v11  ;;  %v1392_v1 = vsel %vm1344_vm11, %v1262_v16, %v1360_v8  ;;  %v1260_v57 = vmul.f32 2.0, %v1228_v20  ;;  %v1358_v30 = vsel %vm1345_vm10, %v1324_v60, %v6259_v28  ;;  %v1099_v5 = vadd.f32 1.0, %v6275_v61  ;;  %v8438_v46 = vld [vmem:[#allocation32_spill] sm:$0xff]  ;;  %v8439_v11 = vld [vmem:[#allocation33_spill] sm:$0xff] }
 0x16d   : > { %1457 = vst.msk [vmem:[%s5935_s18 + $0x70] sm:$0xff] %vm1410_vm9, %v1392_v1  ;;  %v2050_v35 = vsel %vm1344_vm11, %v1922_v37, %v2018_v50  ;;  %v4055_v44 = vadd.f32 -0.5, %v1824_v26  ;;  %v1952_v10 = vmul.f32 %v1824_v26, %v1824_v26  ;;  %v1761_v20 = vadd.f32 1.0, %v6281_v47  ;;  %v6386_v60 = vld [vmem:[%s8317_s6 + $0x1] ss:$0 sm:$0xff] }
 0x16e   : > { %2115 = vst.msk [vmem:[%s5935_s18 + $0x170] sm:$0xff] %vm1410_vm9, %v2050_v35  ;;  %v1390_v28 = vsel %vm1344_vm11, %v1260_v57, %v1358_v30  ;;  %4689 = vrcp.f32 %v1099_v5  ;;  %v8437_v61 = vshra.s32 %v6197_v31, 4  ;;  %v937_v16 = vadd.f32 %v6375_v51, %v8438_v46 }
 0x16f   : > { %1455 = vst.msk [vmem:[%s5935_s18 + $0x60] sm:$0xff] %vm1410_vm9, %v1390_v28  ;;  %v1888_v47 = vadd.f32 %v4055_v44, %v8436_v27  ;;  %v1984_v8 = vmul.f32 %v1952_v10, %v5657_v18  ;;  %4691 = vrcp.f32 %v1761_v20  ;;  %v1599_v37 = vadd.f32 %v6386_v60, %v8439_v11  ;;  %v8441_v20 = vld [vmem:[#allocation34_spill] sm:$0xff]  ;;  %v8444_v11 = vld [vmem:[#allocation37_spill] sm:$0xff] }
 0x170   : > { %v686_v36 = vcvt.s32.f32 %v8437_v61  ;;  %4693 = vpow2.f32 %v6148_v53  ;;  %v8440_v50 = vand.u32 15, %v6197_v31  ;;  %v1007_v1 = vsub.f32 0.0, %v937_v16  ;;  %1430 = vst.msk [vmem:[%s5738_s0 + $0x98] sm:$0xff] %vm1410_vm9, %v937_v16  ;;  %v8442_v61 = vld [vmem:[#allocation35_spill] sm:$0xff] }
 0x171   : > { %v556_v57 = vadd.s32 136, %v5584_v38  ;;  %v1920_v30 = vmul.f32 2.0, %v1888_v47  ;;  %v2016_v5 = vsel %vm1345_vm10, %v1984_v8, %v6266_v7  ;;  %4695 = vpow2.f32 %v6150_v15  ;;  %4094 = vst.msk [vmem:[%s5738_s0 + $0x198] sm:$0xff] %vm1410_vm9, %v1599_v37 }
 0x172   : > { %v622_v26 = vcvt.s32.f32 %v8440_v50  ;;  %v720_v35 = vsel %vm700_vm5, %v686_v36, 0.0  ;;  %4697 = vpow2.f32 %v6174_v3  ;;  %v1058_v53 = vmul.f32 1.442695, %v1007_v1  ;;  %v6425_v50 = vpop.f32.mrb[33].mxu0 }
 0x173   : > { %v1669_v31 = vsub.f32 0.0, %v1599_v37  ;;  %v588_v44 = vand.u32 15, %v556_v57  ;;  %v2048_v10 = vsel %vm1344_vm11, %v1920_v30, %v2016_v5  ;;  %4699 = vpow2.f32 %v6203_v23 }
 0x174   : > { %v652_v7 = vshra.s32 %v556_v57, 4  ;;  %v929_v15 = vadd.f32 %v6375_v51, %v8441_v20  ;;  %2113 = vst.msk [vmem:[%s5935_s18 + $0x160] sm:$0xff] %vm1410_vm9, %v2048_v10  ;;  %4701 = vpow2.f32 %v6213_v42  ;;  %v1591_v36 = vadd.f32 %v6386_v60, %v8442_v61  ;;  %v8443_v42 = vld [vmem:[#allocation36_spill] sm:$0xff]  ;;  %v6437_v10 = vpop.f32.mrb[33].mxu1 }
 0x175   : > { %v1720_v28 = vmul.f32 1.442695, %v1669_v31  ;;  %v620_v3 = vcvt.s32.f32 %v588_v44  ;;  %4703 = vpow2.f32 %v6216_v56  ;;  %v561_v23 = vadd.s32 176, %v5584_v38 }
 0x176   : > { %v684_v46 = vcvt.s32.f32 %v652_v7  ;;  %v1005_v16 = vsub.f32 0.0, %v929_v15  ;;  %1428 = vst.msk [vmem:[%s5738_s0 + $0x88] sm:$0xff] %vm1410_vm9, %v929_v15  ;;  %4705 = vpow2.f32 %v1058_v53  ;;  %v1667_v47 = vsub.f32 0.0, %v1591_v36  ;;  %4092 = vst.msk [vmem:[%s5738_s0 + $0x188] sm:$0xff] %vm1410_vm9, %v1591_v36 }
 0x177   : > { %v950_v8 = vadd.f32 %v6375_v51, %v8443_v42  ;;  %v1612_v37 = vadd.f32 %v6386_v60, %v8444_v11  ;;  %4707 = vpow2.f32 %v1720_v28  ;;  %v593_v57 = vand.u32 15, %v561_v23 }
 0x178   : > { %v718_v56 = vsel %vm700_vm5, %v684_v46, 0.0  ;;  %v1054_v1 = vmul.f32 1.442695, %v1005_v16  ;;  %v4690_v30 = vpop.eup %4689  ;;  %v6431_v5 = vsel %vm699_vm7, %v622_v26, %v720_v35  ;;  %v1716_v53 = vmul.f32 1.442695, %v1667_v47 }
 0x179   : > { %8445 = vst [vmem:[#allocation32_spill] sm:$0xff] %v6431_v5  ;;  %v657_v31 = vshra.s32 %v561_v23, 4  ;;  %v1010_v44 = vsub.f32 0.0, %v950_v8  ;;  %1433 = vst.msk [vmem:[%s5738_s0 + $0xb0] sm:$0xff] %vm1410_vm9, %v950_v8  ;;  %v4692_v7 = vpop.eup %4691  ;;  %v1167_v20 = vmul.f32 2.0, %v4690_v30  ;;  %v6441_v15 = vsel %vm699_vm7, %v620_v3, %v718_v56  ;;  %v6447_v3 = vpop.f32.mrb[34].mxu0 }
 0x17a   : > { %4097 = vst.msk [vmem:[%s5738_s0 + $0x1b0] sm:$0xff] %vm1410_vm9, %v1612_v37  ;;  %8446 = vst [vmem:[#allocation33_spill] sm:$0xff] %v6441_v15  ;;  %4709 = vpow2.f32 %v1054_v1  ;;  %v1672_v28 = vsub.f32 0.0, %v1612_v37  ;;  %v4694_v61 = vpop.eup %4693  ;;  %v1827_v26 = vmul.f32 2.0, %v4692_v7  ;;  %v6443_v35 = vcvt.s32.f32 %v593_v57  ;;  %v6449_v37 = vpop.f32.mrb[34].mxu1  ;;  %v8447_v1 = vld [vmem:[#allocation30_spill] sm:$0xff] }
 0x17b   : > { %4711 = vpow2.f32 %v1716_v53  ;;  %v689_v36 = vcvt.s32.f32 %v657_v31  ;;  %v4696_v46 = vpop.eup %4695  ;;  %v4007_v16 = vadd.f32 -0.5, %v1167_v20  ;;  %v1295_v23 = vmul.f32 %v1167_v20, %v1167_v20  ;;  %v6507_v24 = vpop.f32.mrb[35].mxu1 }
 0x17c   : > { %v1097_v47 = vadd.f32 1.0, %v4694_v61  ;;  %v1064_v42 = vmul.f32 1.442695, %v1010_v44  ;;  %v4698_v8 = vpop.eup %4697  ;;  %v4058_v11 = vadd.f32 -0.5, %v1827_v26  ;;  %v1955_v27 = vmul.f32 %v1827_v26, %v1827_v26  ;;  %8454 = vst [vmem:[#allocation37_spill] sm:$0xff] %v6507_v24 }
 0x17d   : > { %v1759_v40 = vadd.f32 1.0, %v4696_v46  ;;  %v6445_v19 = vmul.f32 1.442695, %v1672_v28  ;;  %v4700_v56 = vpop.eup %4699  ;;  %v1231_v57 = vadd.f32 %v4007_v16, %v8447_v1  ;;  %v1327_v53 = vmul.f32 %v1295_v23, %v5627_v62  ;;  %v6457_v16 = vpop.f32.mrb[35].mxu0 }
 0x17e   : > { %4713 = vrcp.f32 %v1097_v47  ;;  %v1102_v31 = vadd.f32 1.0, %v4698_v8  ;;  %v4702_v20 = vpop.eup %4701  ;;  %v1891_v44 = vadd.f32 %v4058_v11, %v8447_v1  ;;  %v1987_v61 = vmul.f32 %v1955_v27, %v5657_v18  ;;  %8448 = vst [vmem:[#allocation34_spill] sm:$0xff] %v6457_v16  ;;  %v8453_v1 = vld [vmem:[#allocation31_spill] sm:$0xff] }
 0x17f   : > { %4715 = vrcp.f32 %v1759_v40  ;;  %v1764_v26 = vadd.f32 1.0, %v4700_v56  ;;  %v4704_v28 = vpop.eup %4703  ;;  %v1263_v46 = vmul.f32 2.0, %v1231_v57  ;;  %v1361_v63 = vsel %vm1345_vm10, %v1327_v53, %v4690_v30 }
 0x180   : > { %4717 = vrcp.f32 %v1102_v31  ;;  %v1100_v34 = vadd.f32 1.0, %v4702_v20  ;;  %v4706_v23 = vpop.eup %4705  ;;  %v1923_v47 = vmul.f32 2.0, %v1891_v44  ;;  %v2019_v8 = vsel %vm1345_vm10, %v1987_v61, %v4692_v7  ;;  %v8450_v20 = vld [vmem:[#allocation39_spill] sm:$0xff] }
 0x181   : > { %4719 = vrcp.f32 %v1764_v26  ;;  %v1762_v27 = vadd.f32 1.0, %v4704_v28  ;;  %v4708_v40 = vpop.eup %4707  ;;  %v1393_v11 = vsel %vm1344_vm11, %v1263_v46, %v1361_v63  ;;  %v1103_v56 = vadd.f32 1.0, %v4706_v23 }
 0x182   : > { %4721 = vrcp.f32 %v1100_v34  ;;  %v723_v30 = vsel %vm700_vm5, %v689_v36, 0.0  ;;  %1458 = vst.msk [vmem:[%s5935_s18 + $0x78] sm:$0xff] %vm1410_vm9, %v1393_v11  ;;  %v2051_v57 = vsel %vm1344_vm11, %v1923_v47, %v2019_v8  ;;  %v1765_v53 = vadd.f32 1.0, %v4708_v40  ;;  %v8449_v34 = vld [vmem:[#allocation38_spill] sm:$0xff] }
 0x183   : > { %4723 = vrcp.f32 %v1762_v27  ;;  %v559_v7 = vadd.s32 160, %v5584_v38  ;;  %2116 = vst.msk [vmem:[%s5935_s18 + $0x178] sm:$0xff] %vm1410_vm9, %v2051_v57  ;;  %v942_v63 = vadd.f32 %v6375_v51, %v8449_v34  ;;  %v1604_v36 = vadd.f32 %v6386_v60, %v8450_v20 }
 0x184   : > { %v4710_v31 = vpop.eup %4709  ;;  %4725 = vrcp.f32 %v1103_v56  ;;  %v562_v44 = vadd.s32 184, %v5584_v38 }
 0x185   : > { %v4712_v61 = vpop.eup %4711  ;;  %4727 = vrcp.f32 %v1765_v53  ;;  %v1101_v26 = vadd.f32 1.0, %v4710_v31  ;;  %v591_v28 = vand.u32 15, %v559_v7  ;;  %v655_v46 = vshra.s32 %v559_v7, 4  ;;  %1431 = vst.msk [vmem:[%s5738_s0 + $0xa0] sm:$0xff] %vm1410_vm9, %v942_v63  ;;  %4095 = vst.msk [vmem:[%s5738_s0 + $0x1a0] sm:$0xff] %vm1410_vm9, %v1604_v36 }
 0x186   : > { %v1763_v23 = vadd.f32 1.0, %v4712_v61  ;;  %4729 = vpow2.f32 %v1064_v42  ;;  %v1008_v47 = vsub.f32 0.0, %v942_v63  ;;  %v1670_v8 = vsub.f32 0.0, %v1604_v36 }
 0x187   : > { %4731 = vrcp.f32 %v1101_v26  ;;  %v623_v27 = vcvt.s32.f32 %v591_v28  ;;  %v687_v40 = vcvt.s32.f32 %v655_v46  ;;  %v594_v11 = vand.u32 15, %v562_v44 }
 0x188   : > { %v4714_v56 = vpop.eup %4713  ;;  %4733 = vrcp.f32 %v1763_v23  ;;  %v1060_v57 = vmul.f32 1.442695, %v1008_v47  ;;  %v1722_v34 = vmul.f32 1.442695, %v1670_v8  ;;  %v658_v53 = vshra.s32 %v562_v44, 4 }
 0x189   : > { %v4716_v31 = vpop.eup %4715  ;;  %v1165_v20 = vmul.f32 2.0, %v4714_v56  ;;  %v6484_v42 = vsel %vm699_vm7, %v6443_v35, %v723_v30  ;;  %4735 = vpow2.f32 %v6445_v19  ;;  %v721_v7 = vsel %vm700_vm5, %v687_v40, 0.0 }
 0x18a   : > { %8451 = vst [vmem:[#allocation35_spill] sm:$0xff] %v6484_v42  ;;  %v4718_v63 = vpop.eup %4717  ;;  %v1825_v36 = vmul.f32 2.0, %v4716_v31  ;;  %v6491_v61 = vsel %vm699_vm7, %v623_v27, %v721_v7  ;;  %4737 = vpow2.f32 %v1060_v57  ;;  %v6493_v44 = vcvt.s32.f32 %v594_v11 }
 0x18b   : > { %8452 = vst [vmem:[#allocation36_spill] sm:$0xff] %v6491_v61  ;;  %v4720_v26 = vpop.eup %4719  ;;  %v4005_v28 = vadd.f32 -0.5, %v1165_v20  ;;  %v1293_v46 = vmul.f32 %v1165_v20, %v1165_v20  ;;  %v1170_v23 = vmul.f32 2.0, %v4718_v63  ;;  %v6495_v35 = vcvt.s32.f32 %v658_v53 }
 0x18c   : > { %v6497_v30 = vpop.eup %4721  ;;  %v4056_v19 = vadd.f32 -0.5, %v1825_v36  ;;  %v1953_v47 = vmul.f32 %v1825_v36, %v1825_v36  ;;  %v1830_v8 = vmul.f32 2.0, %v4720_v26  ;;  %4739 = vpow2.f32 %v1722_v34 }
 0x18d   : > { %v6499_v40 = vpop.eup %4723  ;;  %v1229_v27 = vadd.f32 %v4005_v28, %v8453_v1  ;;  %v1325_v57 = vmul.f32 %v1293_v46, %v5627_v62  ;;  %v4010_v11 = vadd.f32 -0.5, %v1170_v23  ;;  %v1298_v7 = vmul.f32 %v1170_v23, %v1170_v23 }
 0x18e   : > { %v6503_v33 = vpop.eup %4725  ;;  %v1889_v20 = vadd.f32 %v4056_v19, %v8453_v1  ;;  %v1985_v53 = vmul.f32 %v1953_v47, %v5657_v18  ;;  %v4061_v29 = vadd.f32 -0.5, %v1830_v8  ;;  %v1958_v25 = vmul.f32 %v1830_v8, %v1830_v8 }
 0x18f   : > { %v6509_v36 = vpop.eup %4727  ;;  %v1261_v34 = vmul.f32 2.0, %v1229_v27  ;;  %v1359_v28 = vsel %vm1345_vm10, %v1325_v57, %v4714_v56  ;;  %v1234_v46 = vadd.f32 %v4010_v11, %v6182_v48  ;;  %v1330_v23 = vmul.f32 %v1298_v7, %v5627_v62 }
 0x190   : > { %v6515_v22 = vpop.eup %4729  ;;  %v1921_v19 = vmul.f32 2.0, %v1889_v20  ;;  %v2017_v47 = vsel %vm1345_vm10, %v1985_v53, %v4716_v31  ;;  %v1894_v8 = vadd.f32 %v4061_v29, %v6182_v48  ;;  %v1990_v1 = vmul.f32 %v1958_v25, %v5657_v18 }
 0x191   : > { %v6521_v24 = vpop.eup %4731  ;;  %v1391_v56 = vsel %vm1344_vm11, %v1261_v34, %v1359_v28  ;;  %v1266_v27 = vmul.f32 2.0, %v1234_v46  ;;  %v1364_v57 = vsel %vm1345_vm10, %v1330_v23, %v4718_v63  ;;  %v1168_v11 = vmul.f32 2.0, %v6497_v30 }
 0x192   : > { %v6528_v7 = vpop.eup %4733  ;;  %1456 = vst.msk [vmem:[%s5935_s18 + $0x68] sm:$0xff] %vm1410_vm9, %v1391_v56  ;;  %v2049_v29 = vsel %vm1344_vm11, %v1921_v19, %v2017_v47  ;;  %v1926_v25 = vmul.f32 2.0, %v1894_v8  ;;  %v2022_v31 = vsel %vm1345_vm10, %v1990_v1, %v4720_v26  ;;  %v1828_v20 = vmul.f32 2.0, %v6499_v40 }
 0x193   : > { %v4736_v53 = vpop.eup %4735  ;;  %2114 = vst.msk [vmem:[%s5935_s18 + $0x168] sm:$0xff] %vm1410_vm9, %v2049_v29  ;;  %v1396_v63 = vsel %vm1344_vm11, %v1266_v27, %v1364_v57  ;;  %v4008_v34 = vadd.f32 -0.5, %v1168_v11  ;;  %v1296_v28 = vmul.f32 %v1168_v11, %v1168_v11  ;;  %v1171_v46 = vmul.f32 2.0, %v6503_v33  ;;  %v6551_v11 = vpop.f32.mrb[36].mxu0 }
 0x194   : > { %v4738_v23 = vpop.eup %4737  ;;  %1461 = vst.msk [vmem:[%s5935_s18 + $0x90] sm:$0xff] %vm1410_vm9, %v1396_v63  ;;  %v2054_v19 = vsel %vm1344_vm11, %v1926_v25, %v2022_v31  ;;  %v4059_v47 = vadd.f32 -0.5, %v1828_v20  ;;  %v1956_v1 = vmul.f32 %v1828_v20, %v1828_v20  ;;  %v1831_v26 = vmul.f32 2.0, %v6509_v36  ;;  %v6553_v29 = vpop.f32.mrb[36].mxu1 }
 0x195   : > { %2119 = vst.msk [vmem:[%s5935_s18 + $0x190] sm:$0xff] %vm1410_vm9, %v2054_v19  ;;  %v1232_v8 = vadd.f32 %v4008_v34, %v6211_v6  ;;  %v1328_v56 = vmul.f32 %v1296_v28, %v5627_v62  ;;  %v4011_v27 = vadd.f32 -0.5, %v1171_v46  ;;  %v1299_v57 = vmul.f32 %v1171_v46, %v1171_v46  ;;  %8455 = vst [vmem:[#allocation38_spill] sm:$0xff] %v6553_v29  ;;  %v6557_v16 = vpop.f32.mrb[37].mxu0  ;;  %v6559_v19 = vpop.f32.mrb[37].mxu1 }
 0x196   : > { %v4740_v63 = vpop.eup %4739  ;;  %v1892_v48 = vadd.f32 %v4059_v47, %v6211_v6  ;;  %v1988_v25 = vmul.f32 %v1956_v1, %v5657_v18  ;;  %v4062_v31 = vadd.f32 -0.5, %v1831_v26  ;;  %v1959_v20 = vmul.f32 %v1831_v26, %v1831_v26  ;;  %8456 = vst [vmem:[#allocation39_spill] sm:$0xff] %v6559_v19 }
 0x197   : > { %v1264_v34 = vmul.f32 2.0, %v1232_v8  ;;  %v1362_v28 = vsel %vm1345_vm10, %v1328_v56, %v6497_v30  ;;  %v1235_v46 = vadd.f32 %v4011_v27, %v6431_v5  ;;  %v1331_v29 = vmul.f32 %v1299_v57, %v5627_v62 }
 0x198   : > { %v1924_v47 = vmul.f32 2.0, %v1892_v48  ;;  %v2020_v1 = vsel %vm1345_vm10, %v1988_v25, %v6499_v40  ;;  %v1895_v26 = vadd.f32 %v4062_v31, %v6431_v5  ;;  %v1991_v6 = vmul.f32 %v1959_v20, %v5657_v18 }
 0x199   : > { %v1394_v8 = vsel %vm1344_vm11, %v1264_v34, %v1362_v28  ;;  %v1267_v19 = vmul.f32 2.0, %v1235_v46  ;;  %v1365_v30 = vsel %vm1345_vm10, %v1331_v29, %v6503_v33  ;;  %v1169_v56 = vmul.f32 2.0, %v6521_v24 }
 0x19a   : > { %1459 = vst.msk [vmem:[%s5935_s18 + $0x80] sm:$0xff] %vm1410_vm9, %v1394_v8  ;;  %v2052_v48 = vsel %vm1344_vm11, %v1924_v47, %v2020_v1  ;;  %v1927_v40 = vmul.f32 2.0, %v1895_v26  ;;  %v2023_v27 = vsel %vm1345_vm10, %v1991_v6, %v6509_v36  ;;  %v1829_v57 = vmul.f32 2.0, %v6528_v7 }
 0x19b   : > { %2117 = vst.msk [vmem:[%s5935_s18 + $0x180] sm:$0xff] %vm1410_vm9, %v2052_v48  ;;  %v1397_v33 = vsel %vm1344_vm11, %v1267_v19, %v1365_v30  ;;  %v4009_v29 = vadd.f32 -0.5, %v1169_v56  ;;  %v1297_v25 = vmul.f32 %v1169_v56, %v1169_v56  ;;  %v1106_v31 = vadd.f32 1.0, %v6515_v22 }
 0x19c   : > { %1462 = vst.msk [vmem:[%s5935_s18 + $0x98] sm:$0xff] %vm1410_vm9, %v1397_v33  ;;  %v2055_v20 = vsel %vm1344_vm11, %v1927_v40, %v2023_v27  ;;  %v4060_v34 = vadd.f32 -0.5, %v1829_v57  ;;  %v1957_v28 = vmul.f32 %v1829_v57, %v1829_v57  ;;  %v1768_v46 = vadd.f32 1.0, %v4736_v53  ;;  %v8459_v33 = vld [vmem:[#allocation42_spill] sm:$0xff] }
 0x19d   : > { %2120 = vst.msk [vmem:[%s5935_s18 + $0x198] sm:$0xff] %vm1410_vm9, %v2055_v20  ;;  %v1233_v6 = vadd.f32 %v4009_v29, %v6441_v15  ;;  %v1329_v36 = vmul.f32 %v1297_v25, %v5627_v62  ;;  %4741 = vrcp.f32 %v1106_v31  ;;  %v1104_v19 = vadd.f32 1.0, %v4738_v23 }
 0x19e   : > { %v1893_v47 = vadd.f32 %v4060_v34, %v6441_v15  ;;  %v1989_v22 = vmul.f32 %v1957_v28, %v5657_v18  ;;  %4743 = vrcp.f32 %v1768_v46  ;;  %v1766_v1 = vadd.f32 1.0, %v4740_v63  ;;  %v8457_v63 = vld [vmem:[#allocation40_spill] sm:$0xff] }
 0x19f   : > { %v1265_v26 = vmul.f32 2.0, %v1233_v6  ;;  %v1363_v53 = vsel %vm1345_vm10, %v1329_v36, %v6521_v24  ;;  %4745 = vrcp.f32 %v1104_v19  ;;  %v724_v8 = vsel %vm700_vm5, %v6495_v35, 0.0  ;;  %v8458_v24 = vld [vmem:[#allocation41_spill] sm:$0xff] }
 0x1a0   : > { %v1925_v23 = vmul.f32 2.0, %v1893_v47  ;;  %v2021_v30 = vsel %vm1345_vm10, %v1989_v22, %v6528_v7  ;;  %4747 = vrcp.f32 %v1766_v1  ;;  %v953_v56 = vadd.f32 %v6375_v51, %v8457_v63  ;;  %v6642_v63 = vpop.f32.mrb[38].mxu1 }
 0x1a1   : > { %v1395_v48 = vsel %vm1344_vm11, %v1265_v26, %v1363_v53  ;;  %v1615_v40 = vadd.f32 %v6386_v60, %v8458_v24  ;;  %v560_v27 = vadd.s32 168, %v5584_v38  ;;  %v945_v35 = vadd.f32 %v6375_v51, %v5995_v58 }
 0x1a2   : > { %1460 = vst.msk [vmem:[%s5935_s18 + $0x88] sm:$0xff] %vm1410_vm9, %v1395_v48  ;;  %v2053_v7 = vsel %vm1344_vm11, %v1925_v23, %v2021_v30  ;;  %v1011_v57 = vsub.f32 0.0, %v953_v56  ;;  %1434 = vst.msk [vmem:[%s5738_s0 + $0xb8] sm:$0xff] %vm1410_vm9, %v953_v56  ;;  %v1607_v29 = vadd.f32 %v6386_v60, %v8459_v33  ;;  %v565_v25 = vadd.s32 208, %v5584_v38  ;;  %v6640_v30 = vpop.f32.mrb[38].mxu0 }
 0x1a3   : > { %2118 = vst.msk [vmem:[%s5935_s18 + $0x188] sm:$0xff] %vm1410_vm9, %v2053_v7  ;;  %v1673_v31 = vsub.f32 0.0, %v1615_v40  ;;  %4098 = vst.msk [vmem:[%s5738_s0 + $0x1b8] sm:$0xff] %vm1410_vm9, %v1615_v40  ;;  %v592_v58 = vand.u32 15, %v560_v27  ;;  %v656_v20 = vshra.s32 %v560_v27, 4  ;;  %v1009_v34 = vsub.f32 0.0, %v945_v35 }
 0x1a4   : > { %1432 = vst.msk [vmem:[%s5738_s0 + $0xa8] sm:$0xff] %vm1410_vm9, %v945_v35  ;;  %v1066_v28 = vmul.f32 1.442695, %v1011_v57  ;;  %v1671_v46 = vsub.f32 0.0, %v1607_v29  ;;  %4096 = vst.msk [vmem:[%s5738_s0 + $0x1a8] sm:$0xff] %vm1410_vm9, %v1607_v29  ;;  %v597_v6 = vand.u32 15, %v565_v25  ;;  %v6638_v26 = vsel %vm699_vm7, %v6493_v44, %v724_v8 }
 0x1a5   : > { %v661_v36 = vshra.s32 %v565_v25, 4  ;;  %v1728_v19 = vmul.f32 1.442695, %v1673_v31  ;;  %v624_v47 = vcvt.s32.f32 %v592_v58  ;;  %v688_v22 = vcvt.s32.f32 %v656_v20  ;;  %8460 = vst [vmem:[#allocation40_spill] sm:$0xff] %v6638_v26  ;;  %v6656_v7 = vpop.f32.mrb[39].mxu0  ;;  %v6658_v57 = vpop.f32.mrb[39].mxu1 }
 0x1a6   : > { %v1062_v1 = vmul.f32 1.442695, %v1009_v34  ;;  %4749 = vpow2.f32 %v1066_v28  ;;  %v1724_v53 = vmul.f32 1.442695, %v1671_v46  ;;  %v966_v24 = vadd.f32 %v6375_v51, %v6027_v39 }
 0x1a7   : > { %v693_v23 = vcvt.s32.f32 %v661_v36  ;;  %v4742_v56 = vpop.eup %4741  ;;  %4751 = vpow2.f32 %v1728_v19  ;;  %v722_v48 = vsel %vm700_vm5, %v688_v22, 0.0  ;;  %v1628_v44 = vadd.f32 %v6386_v60, %v6029_v59 }
 0x1a8   : > { %v4744_v8 = vpop.eup %4743  ;;  %v1174_v40 = vmul.f32 2.0, %v4742_v56  ;;  %v6652_v27 = vsel %vm699_vm7, %v624_v47, %v722_v48  ;;  %4753 = vpow2.f32 %v1062_v1  ;;  %v6654_v35 = vcvt.s32.f32 %v597_v6  ;;  %1437 = vst.msk [vmem:[%s5738_s0 + $0xd0] sm:$0xff] %vm1410_vm9, %v966_v24 }
 0x1a9   : > { %8461 = vst [vmem:[#allocation41_spill] sm:$0xff] %v6652_v27  ;;  %v4746_v33 = vpop.eup %4745  ;;  %v1834_v29 = vmul.f32 2.0, %v4744_v8  ;;  %4755 = vpow2.f32 %v1724_v53  ;;  %v6662_v39 = vsel %vm700_vm5, %v693_v23, 0.0  ;;  %v1014_v59 = vsub.f32 0.0, %v966_v24  ;;  %4101 = vst.msk [vmem:[%s5738_s0 + $0x1d0] sm:$0xff] %vm1410_vm9, %v1628_v44 }
 0x1aa   : > { %v4748_v25 = vpop.eup %4747  ;;  %v4014_v31 = vadd.f32 -0.5, %v1174_v40  ;;  %v1302_v58 = vmul.f32 %v1174_v40, %v1174_v40  ;;  %v1172_v20 = vmul.f32 2.0, %v4746_v33  ;;  %v1676_v34 = vsub.f32 0.0, %v1628_v44 }
 0x1ab   : > { %v4065_v28 = vadd.f32 -0.5, %v1834_v29  ;;  %v1962_v46 = vmul.f32 %v1834_v29, %v1834_v29  ;;  %v1832_v6 = vmul.f32 2.0, %v4748_v25  ;;  %v1072_v36 = vmul.f32 1.442695, %v1014_v59 }
 0x1ac   : > { %v1238_v19 = vadd.f32 %v4014_v31, %v6484_v42  ;;  %v1334_v47 = vmul.f32 %v1302_v58, %v5627_v62  ;;  %v4012_v22 = vadd.f32 -0.5, %v1172_v20  ;;  %v1300_v1 = vmul.f32 %v1172_v20, %v1172_v20 }
 0x1ad   : > { %v1898_v53 = vadd.f32 %v4065_v28, %v6484_v42  ;;  %v1994_v23 = vmul.f32 %v1962_v46, %v5657_v18  ;;  %v4063_v48 = vadd.f32 -0.5, %v1832_v6  ;;  %v1960_v24 = vmul.f32 %v1832_v6, %v1832_v6 }
 0x1ae   : > { %v1270_v40 = vmul.f32 2.0, %v1238_v19  ;;  %v1368_v44 = vsel %vm1345_vm10, %v1334_v47, %v4742_v56  ;;  %v1236_v29 = vadd.f32 %v4012_v22, %v6491_v61  ;;  %v1332_v59 = vmul.f32 %v1300_v1, %v5627_v62 }
 0x1af   : > { %v1930_v31 = vmul.f32 2.0, %v1898_v53  ;;  %v2026_v58 = vsel %vm1345_vm10, %v1994_v23, %v4744_v8  ;;  %v1896_v20 = vadd.f32 %v4063_v48, %v6491_v61  ;;  %v1992_v28 = vmul.f32 %v1960_v24, %v5657_v18 }
 0x1b0   : > { %v4750_v46 = vpop.eup %4749  ;;  %v1400_v6 = vsel %vm1344_vm11, %v1270_v40, %v1368_v44  ;;  %v1268_v19 = vmul.f32 2.0, %v1236_v29  ;;  %v1366_v56 = vsel %vm1345_vm10, %v1332_v59, %v4746_v33  ;;  %4757 = vpow2.f32 %v1072_v36  ;;  %v6695_v40 = vpop.f32.mrb[40].mxu0 }
 0x1b1   : > { %v4752_v47 = vpop.eup %4751  ;;  %1465 = vst.msk [vmem:[%s5935_s18 + $0xb0] sm:$0xff] %vm1410_vm9, %v1400_v6  ;;  %v2058_v8 = vsel %vm1344_vm11, %v1930_v31, %v2026_v58  ;;  %v1928_v22 = vmul.f32 2.0, %v1896_v20  ;;  %v2024_v1 = vsel %vm1345_vm10, %v1992_v28, %v4748_v25  ;;  %v1107_v53 = vadd.f32 1.0, %v4750_v46  ;;  %v6697_v44 = vpop.f32.mrb[40].mxu1 }
 0x1b2   : > { %v4754_v23 = vpop.eup %4753  ;;  %2123 = vst.msk [vmem:[%s5935_s18 + $0x1b0] sm:$0xff] %vm1410_vm9, %v2058_v8  ;;  %v1398_v33 = vsel %vm1344_vm11, %v1268_v19, %v1366_v56  ;;  %v1769_v36 = vadd.f32 1.0, %v4752_v47  ;;  %v1734_v48 = vmul.f32 1.442695, %v1676_v34  ;;  %v563_v24 = vadd.s32 192, %v5584_v38 }
 0x1b3   : > { %v4756_v29 = vpop.eup %4755  ;;  %1463 = vst.msk [vmem:[%s5935_s18 + $0xa0] sm:$0xff] %vm1410_vm9, %v1398_v33  ;;  %v2056_v25 = vsel %vm1344_vm11, %v1928_v22, %v2024_v1  ;;  %4759 = vrcp.f32 %v1107_v53  ;;  %v1105_v59 = vadd.f32 1.0, %v4754_v23  ;;  %v958_v31 = vadd.f32 %v6375_v51, %v6047_v17 }
 0x1b4   : > { %2121 = vst.msk [vmem:[%s5935_s18 + $0x1a0] sm:$0xff] %vm1410_vm9, %v2056_v25  ;;  %4761 = vrcp.f32 %v1769_v36  ;;  %v1767_v34 = vadd.f32 1.0, %v4756_v29  ;;  %v595_v58 = vand.u32 15, %v563_v24  ;;  %v659_v20 = vshra.s32 %v563_v24, 4 }
 0x1b5   : > { %4763 = vrcp.f32 %v1105_v59  ;;  %v1012_v28 = vsub.f32 0.0, %v958_v31  ;;  %1435 = vst.msk [vmem:[%s5738_s0 + $0xc0] sm:$0xff] %vm1410_vm9, %v958_v31  ;;  %v1620_v46 = vadd.f32 %v6386_v60, %v6054_v52  ;;  %v566_v6 = vadd.s32 216, %v5584_v38 }
 0x1b6   : > { %4765 = vrcp.f32 %v1767_v34  ;;  %v6716_v17 = vsel %vm699_vm7, %v6654_v35, %v6662_v39  ;;  %v691_v19 = vcvt.s32.f32 %v659_v20  ;;  %v969_v56 = vadd.f32 %v6375_v51, %v6067_v49  ;;  %v6737_v20 = vpop.f32.mrb[41].mxu0 }
 0x1b7   : > { %8462 = vst [vmem:[#allocation42_spill] sm:$0xff] %v6716_v17  ;;  %v627_v47 = vcvt.s32.f32 %v595_v58  ;;  %v1068_v8 = vmul.f32 1.442695, %v1012_v28  ;;  %v1674_v22 = vsub.f32 0.0, %v1620_v46  ;;  %4099 = vst.msk [vmem:[%s5738_s0 + $0x1c0] sm:$0xff] %vm1410_vm9, %v1620_v46  ;;  %v598_v52 = vand.u32 15, %v566_v6 }
 0x1b8   : > { %4767 = vpow2.f32 %v1734_v48  ;;  %v662_v1 = vshra.s32 %v566_v6, 4  ;;  %v1015_v53 = vsub.f32 0.0, %v969_v56  ;;  %1438 = vst.msk [vmem:[%s5738_s0 + $0xd8] sm:$0xff] %vm1410_vm9, %v969_v56  ;;  %v1631_v35 = vadd.f32 %v6386_v60, %v6069_v14 }
 0x1b9   : > { %v725_v39 = vsel %vm700_vm5, %v691_v19, 0.0  ;;  %4769 = vpow2.f32 %v1068_v8  ;;  %v1730_v49 = vmul.f32 1.442695, %v1674_v22  ;;  %v630_v23 = vcvt.s32.f32 %v598_v52 }
 0x1ba   : > { %v4758_v33 = vpop.eup %4757  ;;  %v694_v36 = vcvt.s32.f32 %v662_v1  ;;  %v1074_v24 = vmul.f32 1.442695, %v1015_v53  ;;  %v1677_v29 = vsub.f32 0.0, %v1631_v35  ;;  %4102 = vst.msk [vmem:[%s5738_s0 + $0x1d8] sm:$0xff] %vm1410_vm9, %v1631_v35  ;;  %v564_v48 = vadd.s32 200, %v5584_v38 }
 0x1bb   : > { %v1110_v25 = vadd.f32 1.0, %v4758_v33  ;;  %4771 = vpow2.f32 %v1730_v49  ;;  %v961_v14 = vadd.f32 %v6375_v51, %v6110_v21  ;;  %v1623_v59 = vadd.f32 %v6386_v60, %v6166_v54  ;;  %v6747_v21 = vpop.f32.mrb[41].mxu1 }
 0x1bc   : > { %v728_v31 = vsel %vm700_vm5, %v694_v36, 0.0  ;;  %4773 = vpow2.f32 %v1074_v24  ;;  %v1736_v34 = vmul.f32 1.442695, %v1677_v29  ;;  %v596_v58 = vand.u32 15, %v564_v48  ;;  %v6759_v49 = vpop.f32.mrb[42].mxu1 }
 0x1bd   : > { %v4760_v28 = vpop.eup %4759  ;;  %4775 = vrcp.f32 %v1110_v25  ;;  %v6741_v46 = vsel %vm699_vm7, %v627_v47, %v725_v39  ;;  %v660_v6 = vshra.s32 %v564_v48, 4  ;;  %v1013_v19 = vsub.f32 0.0, %v961_v14  ;;  %1436 = vst.msk [vmem:[%s5738_s0 + $0xc8] sm:$0xff] %vm1410_vm9, %v961_v14  ;;  %4100 = vst.msk [vmem:[%s5738_s0 + $0x1c8] sm:$0xff] %vm1410_vm9, %v1623_v59  ;;  %v6757_v39 = vpop.f32.mrb[42].mxu0 }
 0x1be   : > { %8463 = vst [vmem:[#allocation45_spill] sm:$0xff] %v6741_v46  ;;  %v4762_v54 = vpop.eup %4761  ;;  %v1175_v56 = vmul.f32 2.0, %v4760_v28  ;;  %v6751_v8 = vsel %vm699_vm7, %v630_v23, %v728_v31  ;;  %4777 = vpow2.f32 %v1736_v34  ;;  %v1675_v22 = vsub.f32 0.0, %v1623_v59  ;;  %8465 = vst [vmem:[#allocation47_spill] sm:$0xff] %v6757_v39 }
 0x1bf   : > { %8464 = vst [vmem:[#allocation46_spill] sm:$0xff] %v6751_v8  ;;  %v4764_v52 = vpop.eup %4763  ;;  %v1835_v1 = vmul.f32 2.0, %v4762_v54  ;;  %v6753_v47 = vcvt.s32.f32 %v596_v58  ;;  %v692_v53 = vcvt.s32.f32 %v660_v6  ;;  %v6755_v35 = vmul.f32 1.442695, %v1013_v19  ;;  %8466 = vst [vmem:[#allocation48_spill] sm:$0xff] %v6759_v49 }
 0x1c0   : > { %v4766_v33 = vpop.eup %4765  ;;  %v4015_v36 = vadd.f32 -0.5, %v1175_v56  ;;  %v1303_v24 = vmul.f32 %v1175_v56, %v1175_v56  ;;  %v1173_v29 = vmul.f32 2.0, %v4764_v52  ;;  %v6762_v23 = vadd.s32 240, %v5584_v38 }
 0x1c1   : > { %v4066_v48 = vadd.f32 -0.5, %v1835_v1  ;;  %v1963_v25 = vmul.f32 %v1835_v1, %v1835_v1  ;;  %v1833_v14 = vmul.f32 2.0, %v4766_v33  ;;  %v6764_v59 = vmul.f32 1.442695, %v1675_v22 }
 0x1c2   : > { %v4768_v31 = vpop.eup %4767  ;;  %v1239_v34 = vadd.f32 %v4015_v36, %v6638_v26  ;;  %v1335_v58 = vmul.f32 %v1303_v24, %v5627_v62  ;;  %v4013_v6 = vadd.f32 -0.5, %v1173_v29  ;;  %v1301_v19 = vmul.f32 %v1173_v29, %v1173_v29 }
 0x1c3   : > { %v4770_v61 = vpop.eup %4769  ;;  %v1899_v42 = vadd.f32 %v4066_v48, %v6638_v26  ;;  %v1995_v56 = vmul.f32 %v1963_v25, %v5657_v18  ;;  %v4064_v15 = vadd.f32 -0.5, %v1833_v14  ;;  %v1961_v5 = vmul.f32 %v1833_v14, %v1833_v14  ;;  %v6778_v14 = vpop.f32.mrb[43].mxu0 }
 0x1c4   : > { %v1271_v49 = vmul.f32 2.0, %v1239_v34  ;;  %v1369_v1 = vsel %vm1345_vm10, %v1335_v58, %v4760_v28  ;;  %v1237_v22 = vadd.f32 %v4013_v6, %v6652_v27  ;;  %v1333_v36 = vmul.f32 %v1301_v19, %v5627_v62  ;;  %v6780_v34 = vpop.f32.mrb[43].mxu1 }
 0x1c5   : > { %v4772_v39 = vpop.eup %4771  ;;  %v1931_v24 = vmul.f32 2.0, %v1899_v42  ;;  %v2027_v29 = vsel %vm1345_vm10, %v1995_v56, %v4762_v54  ;;  %v1897_v48 = vadd.f32 %v4064_v15, %v6652_v27  ;;  %v1993_v25 = vmul.f32 %v1961_v5, %v5657_v18 }
 0x1c6   : > { %v4774_v28 = vpop.eup %4773  ;;  %v1401_v58 = vsel %vm1344_vm11, %v1271_v49, %v1369_v1  ;;  %v1269_v6 = vmul.f32 2.0, %v1237_v22  ;;  %v1367_v42 = vsel %vm1345_vm10, %v1333_v36, %v4764_v52  ;;  %v1772_v19 = vadd.f32 1.0, %v4768_v31 }
 0x1c7   : > { %v4776_v54 = vpop.eup %4775  ;;  %1466 = vst.msk [vmem:[%s5935_s18 + $0xb8] sm:$0xff] %vm1410_vm9, %v1401_v58  ;;  %v2059_v5 = vsel %vm1344_vm11, %v1931_v24, %v2027_v29  ;;  %v1929_v15 = vmul.f32 2.0, %v1897_v48  ;;  %v2025_v56 = vsel %vm1345_vm10, %v1993_v25, %v4766_v33  ;;  %v1108_v27 = vadd.f32 1.0, %v4770_v61 }
 0x1c8   : > { %v4778_v26 = vpop.eup %4777  ;;  %2124 = vst.msk [vmem:[%s5935_s18 + $0x1b8] sm:$0xff] %vm1410_vm9, %v2059_v5  ;;  %v1399_v49 = vsel %vm1344_vm11, %v1269_v6, %v1367_v42  ;;  %v1178_v52 = vmul.f32 2.0, %v4776_v54  ;;  %4779 = vrcp.f32 %v1772_v19  ;;  %v1770_v31 = vadd.f32 1.0, %v4772_v39 }
 0x1c9   : > { %1464 = vst.msk [vmem:[%s5935_s18 + $0xa8] sm:$0xff] %vm1410_vm9, %v1399_v49  ;;  %v2057_v1 = vsel %vm1344_vm11, %v1929_v15, %v2025_v56  ;;  %4781 = vrcp.f32 %v1108_v27  ;;  %v1111_v22 = vadd.f32 1.0, %v4774_v28  ;;  %v1773_v36 = vadd.f32 1.0, %v4778_v26  ;;  %v6808_v27 = vpop.f32.mrb[44].mxu0  ;;  %v6810_v26 = vpop.f32.mrb[44].mxu1 }
 0x1ca   : > { %2122 = vst.msk [vmem:[%s5935_s18 + $0x1a8] sm:$0xff] %vm1410_vm9, %v2057_v1  ;;  %v4018_v61 = vadd.f32 -0.5, %v1178_v52  ;;  %v1306_v33 = vmul.f32 %v1178_v52, %v1178_v52  ;;  %4783 = vrcp.f32 %v1770_v31  ;;  %v726_v24 = vsel %vm700_vm5, %v692_v53, 0.0 }
 0x1cb   : > { %4785 = vrcp.f32 %v1111_v22  ;;  %v601_v39 = vand.u32 15, %v6762_v23  ;;  %v665_v29 = vshra.s32 %v6762_v23, 4  ;;  %v982_v48 = vadd.f32 %v6375_v51, %v6190_v45 }
 0x1cc   : > { %v1242_v25 = vadd.f32 %v4018_v61, %v6716_v17  ;;  %v1338_v28 = vmul.f32 %v1306_v33, %v5627_v62  ;;  %4787 = vrcp.f32 %v1773_v36  ;;  %v1644_v53 = vadd.f32 %v6386_v60, %v6192_v9 }
 0x1cd   : > { %v6819_v23 = vsel %vm699_vm7, %v6753_v47, %v726_v24  ;;  %4789 = vpow2.f32 %v6755_v35  ;;  %v697_v45 = vcvt.s32.f32 %v665_v29  ;;  %v1018_v58 = vsub.f32 0.0, %v982_v48  ;;  %1441 = vst.msk [vmem:[%s5738_s0 + $0xf0] sm:$0xff] %vm1410_vm9, %v982_v48 }
 0x1ce   : > { %8467 = vst [vmem:[#allocation49_spill] sm:$0xff] %v6819_v23  ;;  %v1274_v6 = vmul.f32 2.0, %v1242_v25  ;;  %v1372_v42 = vsel %vm1345_vm10, %v1338_v28, %v4776_v54  ;;  %v633_v19 = vcvt.s32.f32 %v601_v39  ;;  %v1680_v5 = vsub.f32 0.0, %v1644_v53  ;;  %4105 = vst.msk [vmem:[%s5738_s0 + $0x1f0] sm:$0xff] %vm1410_vm9, %v1644_v53 }
 0x1cf   : > { %4791 = vpow2.f32 %v6764_v59  ;;  %v1080_v9 = vmul.f32 1.442695, %v1018_v58  ;;  %v567_v47 = vadd.s32 224, %v5584_v38  ;;  %v974_v35 = vadd.f32 %v6375_v51, %v6199_v0 }
 0x1d0   : > { %v1404_v15 = vsel %vm1344_vm11, %v1274_v6, %v1372_v42  ;;  %v731_v54 = vsel %vm700_vm5, %v697_v45, 0.0  ;;  %v1742_v56 = vmul.f32 1.442695, %v1680_v5  ;;  %v1636_v49 = vadd.f32 %v6386_v60, %v6273_v2  ;;  %v6850_v2 = vld [vmem:[%s8317_s6] ss:$0 sm:$0xff] }
 0x1d1   : > { %1469 = vst.msk [vmem:[%s5935_s18 + $0xd0] sm:$0xff] %vm1410_vm9, %v1404_v15  ;;  %4793 = vpow2.f32 %v1080_v9  ;;  %v599_v59 = vand.u32 15, %v567_v47  ;;  %v663_v52 = vshra.s32 %v567_v47, 4  ;;  %v1016_v31 = vsub.f32 0.0, %v974_v35  ;;  %1439 = vst.msk [vmem:[%s5738_s0 + $0xe0] sm:$0xff] %vm1410_vm9, %v974_v35 }
 0x1d2   : > { %v4780_v1 = vpop.eup %4779  ;;  %4795 = vpow2.f32 %v1742_v56  ;;  %v1678_v0 = vsub.f32 0.0, %v1636_v49  ;;  %4103 = vst.msk [vmem:[%s5738_s0 + $0x1e0] sm:$0xff] %vm1410_vm9, %v1636_v49  ;;  %v6845_v51 = vadd.s32 248, %v5584_v38  ;;  %v6854_v60 = vadd.f32 %v6850_v2, %v6285_v32 }
 0x1d3   : > { %v4782_v22 = vpop.eup %4781  ;;  %v1838_v36 = vmul.f32 2.0, %v4780_v1  ;;  %v6858_v61 = vsel %vm699_vm7, %v633_v19, %v731_v54  ;;  %v6860_v33 = vcvt.s32.f32 %v599_v59  ;;  %v695_v24 = vcvt.s32.f32 %v663_v52 }
 0x1d4   : > { %8468 = vst [vmem:[#allocation50_spill] sm:$0xff] %v6858_v61  ;;  %v4784_v39 = vpop.eup %4783  ;;  %v1176_v29 = vmul.f32 2.0, %v4782_v22  ;;  %v6862_v48 = vmul.f32 1.442695, %v1016_v31  ;;  %v6864_v25 = vmul.f32 1.442695, %v1678_v0 }
 0x1d5   : > { %v602_v28 = vand.u32 15, %v6845_v51  ;;  %1442 = vst.msk [vmem:[%s5738_s0 + $0xf8] sm:$0xff] %vm1410_vm9, %v6854_v60  ;;  %v4786_v32 = vpop.eup %4785  ;;  %v4069_v53 = vadd.f32 -0.5, %v1838_v36  ;;  %v1966_v45 = vmul.f32 %v1838_v36, %v1838_v36  ;;  %v1836_v58 = vmul.f32 2.0, %v4784_v39 }
 0x1d6   : > { %v666_v6 = vshra.s32 %v6845_v51, 4  ;;  %v4788_v42 = vpop.eup %4787  ;;  %v4016_v19 = vadd.f32 -0.5, %v1176_v29  ;;  %v1304_v5 = vmul.f32 %v1176_v29, %v1176_v29  ;;  %v1179_v9 = vmul.f32 2.0, %v4786_v32 }
 0x1d7   : > { %v6873_v47 = vsel %vm700_vm5, %v695_v24, 0.0  ;;  %v4790_v35 = vpop.eup %4789  ;;  %v1902_v15 = vadd.f32 %v4069_v53, %v6716_v17  ;;  %v1998_v54 = vmul.f32 %v1966_v45, %v5657_v18  ;;  %v4067_v56 = vadd.f32 -0.5, %v1836_v58  ;;  %v6883_v17 = vpop.f32.mrb[45].mxu0 }
 0x1d8   : > { %v1964_v49 = vmul.f32 %v1836_v58, %v1836_v58  ;;  %v1240_v59 = vadd.f32 %v4016_v19, %v6741_v46  ;;  %v1336_v52 = vmul.f32 %v1304_v5, %v5627_v62  ;;  %v4019_v31 = vadd.f32 -0.5, %v1179_v9 }
 0x1d9   : > { %v1307_v0 = vmul.f32 %v1179_v9, %v1179_v9  ;;  %v4792_v51 = vpop.eup %4791  ;;  %v1934_v36 = vmul.f32 2.0, %v1902_v15  ;;  %v2030_v24 = vsel %vm1345_vm10, %v1998_v54, %v4780_v1  ;;  %v1900_v29 = vadd.f32 %v4067_v56, %v6741_v46  ;;  %v6889_v9 = vpop.f32.mrb[45].mxu1 }
 0x1da   : > { %v1996_v53 = vmul.f32 %v1964_v49, %v5657_v18  ;;  %v1272_v45 = vmul.f32 2.0, %v1240_v59  ;;  %v1370_v58 = vsel %vm1345_vm10, %v1336_v52, %v4782_v22  ;;  %v1243_v19 = vadd.f32 %v4019_v31, %v6751_v8  ;;  %v6901_v46 = vpop.f32.mrb[46].mxu0 }
 0x1db   : > { %v1339_v5 = vmul.f32 %v1307_v0, %v5627_v62  ;;  %v4794_v15 = vpop.eup %4793  ;;  %v2062_v1 = vsel %vm1344_vm11, %v1934_v36, %v2030_v24  ;;  %v1932_v54 = vmul.f32 2.0, %v1900_v29  ;;  %v1839_v49 = vmul.f32 2.0, %v4788_v42  ;;  %v6903_v36 = vpop.f32.mrb[46].mxu1 }
 0x1dc   : > { %v2028_v56 = vsel %vm1345_vm10, %v1996_v53, %v4784_v39  ;;  %v4796_v59 = vpop.eup %4795  ;;  %2127 = vst.msk [vmem:[%s5935_s18 + $0x1d0] sm:$0xff] %vm1410_vm9, %v2062_v1  ;;  %v1402_v22 = vsel %vm1344_vm11, %v1272_v45, %v1370_v58  ;;  %v1275_v52 = vmul.f32 2.0, %v1243_v19  ;;  %v1109_v0 = vadd.f32 1.0, %v4790_v35  ;;  %8469 = vst [vmem:[#allocation51_spill] sm:$0xff] %v6903_v36 }
 0x1dd   : > { %v1373_v31 = vsel %vm1345_vm10, %v1339_v5, %v4786_v32  ;;  %1467 = vst.msk [vmem:[%s5935_s18 + $0xc0] sm:$0xff] %vm1410_vm9, %v1402_v22  ;;  %v2060_v39 = vsel %vm1344_vm11, %v1932_v54, %v2028_v56  ;;  %v4070_v24 = vadd.f32 -0.5, %v1839_v49  ;;  %v1967_v29 = vmul.f32 %v1839_v49, %v1839_v49  ;;  %v5080_v54 = vld [vmem:[%s8317_s6 + $0x1] ss:$0 sm:$0xff]  ;;  %v6938_v22 = vpop.f32.mrb[47].mxu0 }
 0x1de   : > { %v1771_v53 = vadd.f32 1.0, %v4792_v51  ;;  %2125 = vst.msk [vmem:[%s5935_s18 + $0x1c0] sm:$0xff] %vm1410_vm9, %v2060_v39  ;;  %v1405_v45 = vsel %vm1344_vm11, %v1275_v52, %v1373_v31  ;;  %4797 = vrcp.f32 %v1109_v0  ;;  %v1114_v32 = vadd.f32 1.0, %v4794_v15  ;;  %8470 = vst [vmem:[#allocation52_spill] sm:$0xff] %v6938_v22 }
 0x1df   : > { %v1776_v35 = vadd.f32 1.0, %v4796_v59  ;;  %1470 = vst.msk [vmem:[%s5935_s18 + $0xd8] sm:$0xff] %vm1410_vm9, %v1405_v45  ;;  %v1903_v58 = vadd.f32 %v4070_v24, %v6751_v8  ;;  %v1999_v19 = vmul.f32 %v1967_v29, %v5657_v18  ;;  %v634_v5 = vcvt.s32.f32 %v602_v28  ;;  %v6969_v45 = vld [vmem:[%s8318_s7] ss:$0 sm:$0xff] }
 0x1e0   : > { %4799 = vrcp.f32 %v1771_v53  ;;  %v698_v51 = vcvt.s32.f32 %v666_v6  ;;  %v1019_v1 = vsub.f32 0.0, %v6854_v60  ;;  %v1647_v15 = vadd.f32 %v5080_v54, %v6287_v4  ;;  %v6931_v60 = vld [vmem:[%s8317_s6 + $0x2] ss:$0 sm:$0xff] }
 0x1e1   : > { %4801 = vrcp.f32 %v1114_v32  ;;  %v1935_v56 = vmul.f32 2.0, %v1903_v58  ;;  %v2031_v49 = vsel %vm1345_vm10, %v1999_v19, %v4788_v42  ;;  %v568_v28 = vadd.s32 232, %v5584_v38  ;;  %v6940_v42 = vpop.f32.mrb[47].mxu1 }
 0x1e2   : > { %4803 = vrcp.f32 %v1776_v35  ;;  %v732_v4 = vsel %vm700_vm5, %v698_v51, 0.0  ;;  %v1082_v6 = vmul.f32 1.442695, %v1019_v1  ;;  %v1681_v59 = vsub.f32 0.0, %v1647_v15  ;;  %4106 = vst.msk [vmem:[%s5738_s0 + $0x1f8] sm:$0xff] %vm1410_vm9, %v1647_v15  ;;  %8471 = vst [vmem:[#allocation53_spill] sm:$0xff] %v6940_v42 }
 0x1e3   : > { %4805 = vpow2.f32 %v6862_v48  ;;  %v2063_v52 = vsel %vm1344_vm11, %v1935_v56, %v2031_v49  ;;  %v6948_v31 = vsel %vm699_vm7, %v6860_v33, %v6873_v47  ;;  %v600_v48 = vand.u32 15, %v568_v28  ;;  %v6993_v56 = vpop.f32.mrb[48].mxu0 }
 0x1e4   : > { %8472 = vst [vmem:[#allocation54_spill] sm:$0xff] %v6948_v31  ;;  %4807 = vpow2.f32 %v6864_v25  ;;  %2128 = vst.msk [vmem:[%s5935_s18 + $0x1d8] sm:$0xff] %vm1410_vm9, %v2063_v52  ;;  %v6956_v0 = vsel %vm699_vm7, %v634_v5, %v732_v4  ;;  %v1744_v39 = vmul.f32 1.442695, %v1681_v59  ;;  %v664_v24 = vshra.s32 %v568_v28, 4 }
 0x1e5   : > { %8473 = vst [vmem:[#allocation55_spill] sm:$0xff] %v6956_v0  ;;  %v977_v29 = vadd.f32 %v6850_v2, %v6299_v13  ;;  %4809 = vpow2.f32 %v1082_v6  ;;  %v1639_v33 = vadd.f32 %v5080_v54, %v6325_v12  ;;  %v2190_v25 = vadd.f32 %v6357_v55, %v6931_v60  ;;  %v8475_v2 = vld [vmem:[#allocation9_spill] sm:$0xff] }
 0x1e6   : > { %v8474_v47 = vmov 1.0   ;;  %4811 = vpow2.f32 %v1744_v39  ;;  %v6971_v32 = vcvt.s32.f32 %v600_v48  ;;  %v696_v35 = vcvt.s32.f32 %v664_v24  ;;  %8476 = vst [vmem:[#allocation9_spill] sm:$0xff] %v6993_v56 }
 0x1e7   : > { %v2468_v53 = vsel %vm1149_vm6, 23.0, %v8474_v47  ;;  %v1017_v13 = vsub.f32 0.0, %v977_v29  ;;  %1440 = vst.msk [vmem:[%s5738_s0 + $0xe8] sm:$0xff] %vm1410_vm9, %v977_v29  ;;  %v1679_v12 = vsub.f32 0.0, %v1639_v33  ;;  %4104 = vst.msk [vmem:[%s5738_s0 + $0x1e8] sm:$0xff] %vm1410_vm9, %v1639_v33  ;;  %v2310_v55 = vsub.f32 0.0, %v2190_v25 }
 0x1e8   : > { %4160 = vst.msk [vmem:[%s5738_s0 + $0x210] sm:$0xff] %vm1410_vm9, %v2190_v25  ;;  %v2805_v58 = vand.u32 7, %v8475_v2  ;;  %v2821_v19 = vshra.s32 %v8475_v2, 3  ;;  %v4798_v5 = vpop.eup %4797  ;;  %v6983_v51 = vsel %vm700_vm5, %v696_v35, 0.0  ;;  %v6987_v54 = vsel %vm1148_vm8, 33.0, %v2468_v53 }
 0x1e9   : > { %v1078_v1 = vmul.f32 1.442695, %v1017_v13  ;;  %v6991_v15 = vadd.f32 %v6359_v43, %v6969_v45  ;;  %v1177_v28 = vmul.f32 2.0, %v4798_v5  ;;  %v1740_v4 = vmul.f32 1.442695, %v1679_v12 }
 0x1ea   : > { %v4800_v49 = vpop.eup %4799  ;;  %v2344_v6 = vmul.f32 1.442695, %v2310_v55  ;;  %v6998_v59 = vsel %vm1149_vm6, 61.0, %v8474_v47  ;;  %v2813_v39 = vcvt.s32.f32 %v2805_v58  ;;  %v2829_v24 = vcvt.s32.f32 %v2821_v19 }
 0x1eb   : > { %v4802_v52 = vpop.eup %4801  ;;  %v1837_v48 = vmul.f32 2.0, %v4800_v49  ;;  %4813 = vpow2.f32 %v1078_v1  ;;  %3047 = vst.msk [vmem:[%s7002_s16 + $0x10] sm:$0xff] %vm1410_vm9, %v6991_v15  ;;  %v4017_v29 = vadd.f32 -0.5, %v1177_v28  ;;  %v1305_v33 = vmul.f32 %v1177_v28, %v1177_v28 }
 0x1ec   : > { %v4804_v43 = vpop.eup %4803  ;;  %v1182_v25 = vmul.f32 2.0, %v4802_v52  ;;  %4815 = vpow2.f32 %v1740_v4 }
 0x1ed   : > { %v4806_v53 = vpop.eup %4805  ;;  %v4068_v35 = vadd.f32 -0.5, %v1837_v48  ;;  %v1965_v13 = vmul.f32 %v1837_v48, %v1837_v48  ;;  %v1842_v12 = vmul.f32 2.0, %v4804_v43  ;;  %4817 = vpow2.f32 %v2344_v6 }
 0x1ee   : > { %v4808_v55 = vpop.eup %4807  ;;  %v1241_v2 = vadd.f32 %v4017_v29, %v6819_v23  ;;  %v1337_v58 = vmul.f32 %v1305_v33, %v5627_v62  ;;  %v4022_v19 = vadd.f32 -0.5, %v1182_v25  ;;  %v1310_v1 = vmul.f32 %v1182_v25, %v1182_v25 }
 0x1ef   : > { %v1901_v8 = vadd.f32 %v4068_v35, %v6819_v23  ;;  %v1997_v56 = vmul.f32 %v1965_v13, %v5657_v18  ;;  %v4073_v42 = vadd.f32 -0.5, %v1842_v12  ;;  %v1970_v28 = vmul.f32 %v1842_v12, %v1842_v12  ;;  %v4810_v4 = vpop.eup %4809 }
 0x1f0   : > { %v1273_v22 = vmul.f32 2.0, %v1241_v2  ;;  %v1371_v48 = vsel %vm1345_vm10, %v1337_v58, %v4798_v5  ;;  %v1246_v6 = vadd.f32 %v4022_v19, %v6858_v61  ;;  %v1342_v29 = vmul.f32 %v1310_v1, %v5627_v62  ;;  %v4812_v33 = vpop.eup %4811  ;;  %v7023_v19 = vpop.f32.mrb[48].mxu1 }
 0x1f1   : > { %v1933_v36 = vmul.f32 2.0, %v1901_v8  ;;  %v2029_v25 = vsel %vm1345_vm10, %v1997_v56, %v4800_v49  ;;  %v1906_v35 = vadd.f32 %v4073_v42, %v6858_v61  ;;  %v2002_v13 = vmul.f32 %v1970_v28, %v5657_v18  ;;  %v7035_v1 = vpop.f32.mrb[49].mxu0 }
 0x1f2   : > { %v1403_v12 = vsel %vm1344_vm11, %v1273_v22, %v1371_v48  ;;  %v1278_v2 = vmul.f32 2.0, %v1246_v6  ;;  %v1376_v5 = vsel %vm1345_vm10, %v1342_v29, %v4802_v52  ;;  %v1112_v58 = vadd.f32 1.0, %v4806_v53 }
 0x1f3   : > { %1468 = vst.msk [vmem:[%s5935_s18 + $0xc8] sm:$0xff] %vm1410_vm9, %v1403_v12  ;;  %v2061_v8 = vsel %vm1344_vm11, %v1933_v36, %v2029_v25  ;;  %v1938_v56 = vmul.f32 2.0, %v1906_v35  ;;  %v2034_v42 = vsel %vm1345_vm10, %v2002_v13, %v4804_v43  ;;  %v1774_v49 = vadd.f32 1.0, %v4808_v55  ;;  %v7063_v35 = vpop.f32.mrb[49].mxu1  ;;  %v7067_v12 = vpop.f32.mrb[50].mxu0 }
 0x1f4   : > { %2126 = vst.msk [vmem:[%s5935_s18 + $0x1c8] sm:$0xff] %vm1410_vm9, %v2061_v8  ;;  %v1408_v22 = vsel %vm1344_vm11, %v1278_v2, %v1376_v5  ;;  %4819 = vrcp.f32 %v1112_v58  ;;  %v1115_v52 = vadd.f32 1.0, %v4810_v4  ;;  %v1777_v53 = vadd.f32 1.0, %v4812_v33  ;;  %v8478_v8 = vld [vmem:[#allocation10_spill] sm:$0xff] }
 0x1f5   : > { %v4814_v28 = vpop.eup %4813  ;;  %1473 = vst.msk [vmem:[%s5935_s18 + $0xf0] sm:$0xff] %vm1410_vm9, %v1408_v22  ;;  %v2066_v36 = vsel %vm1344_vm11, %v1938_v56, %v2034_v42  ;;  %4821 = vrcp.f32 %v1774_v49  ;;  %v2837_v43 = vsel %vm700_vm5, %v2829_v24, 0.0  ;;  %v2941_v55 = vsub.f32 0.0, %v6991_v15  ;;  %v7076_v42 = vpop.f32.mrb[50].mxu1 }
 0x1f6   : > { %v4816_v48 = vpop.eup %4815  ;;  %2131 = vst.msk [vmem:[%s5935_s18 + $0x1f0] sm:$0xff] %vm1410_vm9, %v2066_v36  ;;  %4823 = vrcp.f32 %v1115_v52  ;;  %v7050_v4 = vsel %vm699_vm7, %v6971_v32, %v6983_v51  ;;  %v1113_v6 = vadd.f32 1.0, %v4814_v28  ;;  %v7054_v29 = vsel %vm699_vm7, %v2813_v39, %v2837_v43  ;;  %8479 = vst [vmem:[#allocation10_spill] sm:$0xff] %v7076_v42 }
 0x1f7   : > { %8477 = vst [vmem:[#allocation56_spill] sm:$0xff] %v7050_v4  ;;  %v4818_v33 = vpop.eup %4817  ;;  %4825 = vrcp.f32 %v1777_v53  ;;  %v1775_v24 = vadd.f32 1.0, %v4816_v48  ;;  %v7059_v15 = vsel %vm1148_vm8, 30.0, %v6998_v59  ;;  %v2182_v25 = vadd.f32 %v6931_v60, %v6425_v50 }
 0x1f8   : > { %v2406_v32 = vadd.f32 1.0, %v4818_v33  ;;  %v2951_v51 = vmul.f32 1.442695, %v2941_v55  ;;  %v2803_v13 = vand.u32 7, %v5584_v38  ;;  %v2819_v39 = vshra.s32 %v5584_v38, 3  ;;  %v7089_v55 = vpop.f32.mrb[51].mxu0 }
 0x1f9   : > { %4827 = vrcp.f32 %v1113_v6  ;;  %v2308_v2 = vsub.f32 0.0, %v2182_v25  ;;  %4158 = vst.msk [vmem:[%s5738_s0 + $0x200] sm:$0xff] %vm1410_vm9, %v2182_v25  ;;  %v2909_v59 = vadd.f32 %v6969_v45, %v6437_v10  ;;  %v2193_v50 = vadd.f32 %v6447_v3, %v6931_v60  ;;  %8480 = vst [vmem:[#allocation57_spill] sm:$0xff] %v7089_v55  ;;  %v8481_v25 = vld [vmem:[#allocation34_spill] sm:$0xff] }
 0x1fa   : > { %4829 = vrcp.f32 %v1775_v24  ;;  %v2811_v5 = vcvt.s32.f32 %v2803_v13  ;;  %v2827_v58 = vcvt.s32.f32 %v2819_v39  ;;  %v2806_v56 = vand.u32 7, %v8478_v8  ;;  %v8482_v13 = vld [vmem:[#allocation11_spill] sm:$0xff] }
 0x1fb   : > { %4831 = vrcp.f32 %v2406_v32  ;;  %v2340_v49 = vmul.f32 1.442695, %v2308_v2  ;;  %v2939_v22 = vsub.f32 0.0, %v2909_v59  ;;  %3045 = vst.msk [vmem:[%s7002_s16] sm:$0xff] %vm1410_vm9, %v2909_v59  ;;  %v2311_v52 = vsub.f32 0.0, %v2193_v50  ;;  %4161 = vst.msk [vmem:[%s5738_s0 + $0x218] sm:$0xff] %vm1410_vm9, %v2193_v50 }
 0x1fc   : > { %4833 = vpow2.f32 %v2951_v51  ;;  %v2835_v10 = vsel %vm700_vm5, %v2827_v58, 0.0  ;;  %v2822_v3 = vshra.s32 %v8478_v8, 3  ;;  %v2920_v53 = vadd.f32 %v6449_v37, %v6969_v45  ;;  %v8483_v2 = vld [vmem:[#allocation37_spill] sm:$0xff]  ;;  %v7106_v50 = vpop.f32.mrb[51].mxu1 }
 0x1fd   : > { %4835 = vpow2.f32 %v2340_v49  ;;  %v2947_v28 = vmul.f32 1.442695, %v2939_v22  ;;  %v2346_v36 = vmul.f32 1.442695, %v2311_v52  ;;  %v7087_v43 = vcvt.s32.f32 %v2806_v56  ;;  %8484 = vst [vmem:[#allocation34_spill] sm:$0xff] %v7106_v50  ;;  %v7123_v50 = vpop.f32.mrb[52].mxu0 }
 0x1fe   : > { %v4820_v48 = vpop.eup %4819  ;;  %v7093_v6 = vsel %vm699_vm7, %v2811_v5, %v2835_v10  ;;  %v2830_v33 = vcvt.s32.f32 %v2822_v3  ;;  %v2942_v24 = vsub.f32 0.0, %v2920_v53  ;;  %3048 = vst.msk [vmem:[%s7002_s16 + $0x18] sm:$0xff] %vm1410_vm9, %v2920_v53  ;;  %v7099_v37 = vadd.f32 %v6931_v60, %v8481_v25 }
 0x1ff   : > { %v4822_v32 = vpop.eup %4821  ;;  %v1180_v51 = vmul.f32 2.0, %v4820_v48  ;;  %4837 = vpow2.f32 %v2947_v28  ;;  %v7104_v59 = vadd.f32 %v6969_v45, %v8483_v2 }
 0x200   : > { %v4824_v5 = vpop.eup %4823  ;;  %v1840_v58 = vmul.f32 2.0, %v4822_v32  ;;  %4839 = vpow2.f32 %v2346_v36  ;;  %v2953_v8 = vmul.f32 1.442695, %v2942_v24  ;;  %4159 = vst.msk [vmem:[%s5738_s0 + $0x208] sm:$0xff] %vm1410_vm9, %v7099_v37  ;;  %v7114_v3 = vsel %vm700_vm5, %v2830_v33, 0.0 }
 0x201   : > { %v4826_v49 = vpop.eup %4825  ;;  %v4020_v22 = vadd.f32 -0.5, %v1180_v51  ;;  %v1308_v52 = vmul.f32 %v1180_v51, %v1180_v51  ;;  %v1183_v10 = vmul.f32 2.0, %v4824_v5  ;;  %3046 = vst.msk [vmem:[%s7002_s16 + $0x8] sm:$0xff] %vm1410_vm9, %v7104_v59 }
 0x202   : > { %v4071_v53 = vadd.f32 -0.5, %v1840_v58  ;;  %v1968_v28 = vmul.f32 %v1840_v58, %v1840_v58  ;;  %v1843_v36 = vmul.f32 2.0, %v4826_v49  ;;  %4841 = vpow2.f32 %v2953_v8 }
 0x203   : > { %v4828_v24 = vpop.eup %4827  ;;  %v1244_v25 = vadd.f32 %v4020_v22, %v6948_v31  ;;  %v1340_v2 = vmul.f32 %v1308_v52, %v5627_v62  ;;  %v4023_v39 = vadd.f32 -0.5, %v1183_v10  ;;  %v1311_v56 = vmul.f32 %v1183_v10, %v1183_v10 }
 0x204   : > { %v4830_v51 = vpop.eup %4829  ;;  %v1904_v61 = vadd.f32 %v4071_v53, %v6948_v31  ;;  %v2000_v33 = vmul.f32 %v1968_v28, %v5657_v18  ;;  %v4074_v23 = vadd.f32 -0.5, %v1843_v36  ;;  %v1971_v38 = vmul.f32 %v1843_v36, %v1843_v36 }
 0x205   : > { %v4832_v58 = vpop.eup %4831  ;;  %v1276_v55 = vmul.f32 2.0, %v1244_v25  ;;  %v1374_v8 = vsel %vm1345_vm10, %v1340_v2, %v4820_v48  ;;  %v1247_v22 = vadd.f32 %v4023_v39, %v6956_v0  ;;  %v1343_v52 = vmul.f32 %v1311_v56, %v5627_v62 }
 0x206   : > { %v4834_v10 = vpop.eup %4833  ;;  %v1936_v42 = vmul.f32 2.0, %v1904_v61  ;;  %v2032_v53 = vsel %vm1345_vm10, %v2000_v33, %v4822_v32  ;;  %v1907_v28 = vadd.f32 %v4074_v23, %v6956_v0  ;;  %v2003_v36 = vmul.f32 %v1971_v38, %v5657_v18 }
 0x207   : > { %v4836_v31 = vpop.eup %4835  ;;  %v1406_v25 = vsel %vm1344_vm11, %v1276_v55, %v1374_v8  ;;  %v1279_v48 = vmul.f32 2.0, %v1247_v22  ;;  %v1377_v39 = vsel %vm1345_vm10, %v1343_v52, %v4824_v5  ;;  %v1181_v56 = vmul.f32 2.0, %v4828_v24 }
 0x208   : > { %1471 = vst.msk [vmem:[%s5935_s18 + $0xe0] sm:$0xff] %vm1410_vm9, %v1406_v25  ;;  %v2064_v61 = vsel %vm1344_vm11, %v1936_v42, %v2032_v53  ;;  %v1939_v32 = vmul.f32 2.0, %v1907_v28  ;;  %v2035_v38 = vsel %vm1345_vm10, %v2003_v36, %v4826_v49  ;;  %v1841_v23 = vmul.f32 2.0, %v4830_v51 }
 0x209   : > { %v4838_v2 = vpop.eup %4837  ;;  %2129 = vst.msk [vmem:[%s5935_s18 + $0x1e0] sm:$0xff] %vm1410_vm9, %v2064_v61  ;;  %v1409_v55 = vsel %vm1344_vm11, %v1279_v48, %v1377_v39  ;;  %v4021_v33 = vadd.f32 -0.5, %v1181_v56  ;;  %v1309_v5 = vmul.f32 %v1181_v56, %v1181_v56  ;;  %v2472_v8 = vmul.f32 2.0, %v4832_v58 }
 0x20a   : > { %v4840_v22 = vpop.eup %4839  ;;  %1474 = vst.msk [vmem:[%s5935_s18 + $0xf8] sm:$0xff] %vm1410_vm9, %v1409_v55  ;;  %v2067_v42 = vsel %vm1344_vm11, %v1939_v32, %v2035_v38  ;;  %v4072_v52 = vadd.f32 -0.5, %v1841_v23  ;;  %v1969_v53 = vmul.f32 %v1841_v23, %v1841_v23  ;;  %v2965_v28 = vadd.f32 1.0, %v4834_v10  ;;  %v8485_v38 = vld [vmem:[#allocation14_spill] sm:$0xff] }
 0x20b   : > { %2132 = vst.msk [vmem:[%s5935_s18 + $0x1f8] sm:$0xff] %vm1410_vm9, %v2067_v42  ;;  %v1245_v49 = vadd.f32 %v4021_v33, %v7050_v4  ;;  %v1341_v36 = vmul.f32 %v1309_v5, %v5627_v62  ;;  %v4128_v25 = vadd.f32 -0.5, %v2472_v8  ;;  %v2600_v48 = vmul.f32 %v2472_v8, %v2472_v8 }
 0x20c   : > { %v4842_v39 = vpop.eup %4841  ;;  %v1905_v56 = vadd.f32 %v4072_v52, %v7050_v4  ;;  %v2001_v61 = vmul.f32 %v1969_v53, %v5657_v18  ;;  %4843 = vrcp.f32 %v2965_v28  ;;  %v2404_v55 = vadd.f32 1.0, %v4836_v31  ;;  %v7167_v52 = vpop.f32.mrb[52].mxu1 }
 0x20d   : > { %v1277_v32 = vmul.f32 2.0, %v1245_v49  ;;  %v1375_v10 = vsel %vm1345_vm10, %v1341_v36, %v4828_v24  ;;  %v2536_v23 = vadd.f32 %v4128_v25, %v8485_v38  ;;  %v2632_v33 = vmul.f32 %v2600_v48, %v6987_v54  ;;  %v7186_v36 = vpop.f32.mrb[53].mxu0 }
 0x20e   : > { %v1937_v62 = vmul.f32 2.0, %v1905_v56  ;;  %v2033_v5 = vsel %vm1345_vm10, %v2001_v61, %v4830_v51  ;;  %4845 = vrcp.f32 %v2404_v55  ;;  %v2963_v8 = vadd.f32 1.0, %v4838_v2  ;;  %v8488_v56 = vld [vmem:[#allocation12_spill] sm:$0xff] }
 0x20f   : > { %v1407_v18 = vsel %vm1344_vm11, %v1277_v32, %v1375_v10  ;;  %v2568_v31 = vmul.f32 2.0, %v2536_v23  ;;  %v2664_v42 = vsel %vm1345_vm10, %v2632_v33, %v4832_v58  ;;  %v2407_v24 = vadd.f32 1.0, %v4840_v22  ;;  %v8489_v32 = vld [vmem:[#allocation38_spill] sm:$0xff] }
 0x210   : > { %1472 = vst.msk [vmem:[%s5935_s18 + $0xe8] sm:$0xff] %vm1410_vm9, %v1407_v18  ;;  %v2065_v53 = vsel %vm1344_vm11, %v1937_v62, %v2033_v5  ;;  %4847 = vrcp.f32 %v2963_v8  ;;  %v2966_v51 = vadd.f32 1.0, %v4842_v39  ;;  %v2309_v2 = vsub.f32 0.0, %v7099_v37  ;;  %v7193_v39 = vpop.f32.mrb[53].mxu1  ;;  %v7209_v8 = vpop.f32.mrb[54].mxu0 }
 0x211   : > { %2130 = vst.msk [vmem:[%s5935_s18 + $0x1e8] sm:$0xff] %vm1410_vm9, %v2065_v53  ;;  %v2696_v28 = vsel %vm1344_vm11, %v2568_v31, %v2664_v42  ;;  %4849 = vrcp.f32 %v2407_v24  ;;  %v7182_v58 = vsel %vm699_vm7, %v7087_v43, %v7114_v3  ;;  %v8486_v22 = vshra.s32 %v8482_v13, 3  ;;  %v8490_v42 = vld [vmem:[#allocation13_spill] sm:$0xff] }
 0x212   : > { %2761 = vst.msk [vmem:[%s5935_s18 + $0x210] sm:$0xff] %vm1410_vm9, %v2696_v28  ;;  %4851 = vrcp.f32 %v2966_v51  ;;  %v2342_v37 = vmul.f32 1.442695, %v2309_v2  ;;  %v2940_v25 = vsub.f32 0.0, %v7104_v59  ;;  %v2206_v48 = vadd.f32 %v6551_v11, %v6931_v60 }
 0x213   : > { %v2828_v49 = vcvt.s32.f32 %v8486_v22  ;;  %v8487_v43 = vand.u32 7, %v8482_v13  ;;  %v2809_v61 = vand.u32 7, %v8488_v56  ;;  %v2825_v55 = vshra.s32 %v8488_v56, 3 }
 0x214   : > { %v2933_v10 = vadd.f32 %v8489_v32, %v6969_v45  ;;  %4853 = vpow2.f32 %v2342_v37  ;;  %v2949_v59 = vmul.f32 1.442695, %v2940_v25  ;;  %v2314_v23 = vsub.f32 0.0, %v2206_v48  ;;  %4164 = vst.msk [vmem:[%s5738_s0 + $0x230] sm:$0xff] %vm1410_vm9, %v2206_v48 }
 0x215   : > { %v2812_v3 = vcvt.s32.f32 %v8487_v43  ;;  %v2836_v38 = vsel %vm700_vm5, %v2828_v49, 0.0  ;;  %v2817_v11 = vcvt.s32.f32 %v2809_v61  ;;  %v2833_v33 = vcvt.s32.f32 %v2825_v55  ;;  %v7217_v49 = vpop.f32.mrb[54].mxu1 }
 0x216   : > { %v2945_v62 = vsub.f32 0.0, %v2933_v10  ;;  %3051 = vst.msk [vmem:[%s7002_s16 + $0x30] sm:$0xff] %vm1410_vm9, %v2933_v10  ;;  %v2198_v5 = vadd.f32 %v6931_v60, %v6557_v16  ;;  %v4844_v18 = vpop.eup %4843  ;;  %4855 = vpow2.f32 %v2949_v59  ;;  %v2352_v31 = vmul.f32 1.442695, %v2314_v23  ;;  %v8491_v59 = vld [vmem:[#allocation39_spill] sm:$0xff]  ;;  %v7237_v23 = vpop.f32.mrb[55].mxu0 }
 0x217   : > { %v2807_v24 = vand.u32 7, %v8490_v42  ;;  %v2823_v53 = vshra.s32 %v8490_v42, 3  ;;  %v2983_v51 = vmul.f32 2.0, %v4844_v18  ;;  %v2841_v2 = vsel %vm700_vm5, %v2833_v33, 0.0  ;;  %8492 = vst [vmem:[#allocation37_spill] sm:$0xff] %v7237_v23 }
 0x218   : > { %v2959_v28 = vmul.f32 1.442695, %v2945_v62  ;;  %v2312_v22 = vsub.f32 0.0, %v2198_v5  ;;  %4162 = vst.msk [vmem:[%s5738_s0 + $0x220] sm:$0xff] %vm1410_vm9, %v2198_v5  ;;  %v4846_v16 = vpop.eup %4845  ;;  %v7221_v37 = vsel %vm699_vm7, %v2812_v3, %v2836_v38  ;;  %4857 = vpow2.f32 %v2352_v31 }
 0x219   : > { %v7225_v25 = vsel %vm699_vm7, %v2817_v11, %v2841_v2  ;;  %v2831_v48 = vcvt.s32.f32 %v2823_v53  ;;  %v4197_v43 = vadd.f32 -0.5, %v2983_v51  ;;  %v3015_v56 = vmul.f32 %v2983_v51, %v2983_v51 }
 0x21a   : > { %v2470_v61 = vmul.f32 2.0, %v4846_v16  ;;  %4859 = vpow2.f32 %v2959_v28  ;;  %v4848_v55 = vpop.eup %4847  ;;  %v2348_v32 = vmul.f32 1.442695, %v2312_v22  ;;  %v7227_v10 = vcvt.s32.f32 %v2807_v24  ;;  %v8493_v28 = vld [vmem:[#allocation17_spill] sm:$0xff] }
 0x21b   : > { %v7231_v3 = vadd.f32 %v6969_v45, %v8491_v59  ;;  %v7235_v38 = vadd.f32 %v6640_v30, %v6931_v60  ;;  %v4850_v11 = vpop.eup %4849  ;;  %v2999_v33 = vadd.f32 %v4197_v43, %v7054_v29  ;;  %v3023_v62 = vmul.f32 %v3015_v56, %v7059_v15 }
 0x21c   : > { %v4126_v5 = vadd.f32 -0.5, %v2470_v61  ;;  %v2598_v31 = vmul.f32 %v2470_v61, %v2470_v61  ;;  %v4852_v42 = vpop.eup %4851  ;;  %v2981_v24 = vmul.f32 2.0, %v4848_v55  ;;  %v2473_v53 = vmul.f32 2.0, %v4850_v11 }
 0x21d   : > { %4861 = vpow2.f32 %v2348_v32  ;;  %v7243_v51 = vsel %vm700_vm5, %v2831_v48, 0.0  ;;  %3049 = vst.msk [vmem:[%s7002_s16 + $0x20] sm:$0xff] %vm1410_vm9, %v7231_v3  ;;  %4165 = vst.msk [vmem:[%s5738_s0 + $0x238] sm:$0xff] %vm1410_vm9, %v7235_v38  ;;  %v3007_v30 = vmul.f32 4.0, %v2999_v33  ;;  %v3031_v2 = vsel %vm1345_vm10, %v3023_v62, %v4844_v18 }
 0x21e   : > { %v2534_v22 = vadd.f32 %v4126_v5, %v8493_v28  ;;  %v2630_v43 = vmul.f32 %v2598_v31, %v6987_v54  ;;  %v4854_v56 = vpop.eup %4853  ;;  %v4195_v61 = vadd.f32 -0.5, %v2981_v24  ;;  %v3013_v32 = vmul.f32 %v2981_v24, %v2981_v24  ;;  %v8494_v5 = vld [vmem:[#allocation18_spill] sm:$0xff] }
 0x21f   : > { %v4129_v48 = vadd.f32 -0.5, %v2473_v53  ;;  %v2601_v59 = vmul.f32 %v2473_v53, %v2473_v53  ;;  %v3039_v4 = vsel %vm1344_vm11, %v3007_v30, %v3031_v2  ;;  %v2984_v13 = vmul.f32 2.0, %v4852_v42 }
 0x220   : > { %v2566_v0 = vmul.f32 2.0, %v2534_v22  ;;  %v2662_v33 = vsel %vm1345_vm10, %v2630_v43, %v4846_v16  ;;  %v4856_v23 = vpop.eup %4855  ;;  %3055 = vst.msk [vmem:[%s5935_s18 + $0x310] sm:$0xff] %vm1410_vm9, %v3039_v4  ;;  %v2997_v18 = vadd.f32 %v4195_v61, %v7093_v6  ;;  %v3021_v62 = vmul.f32 %v3013_v32, %v7059_v15 }
 0x221   : > { %v2537_v31 = vadd.f32 %v4129_v48, %v8494_v5  ;;  %v2633_v24 = vmul.f32 %v2601_v59, %v6987_v54  ;;  %v4198_v30 = vadd.f32 -0.5, %v2984_v13  ;;  %v3016_v2 = vmul.f32 %v2984_v13, %v2984_v13 }
 0x222   : > { %v2694_v53 = vsel %vm1344_vm11, %v2566_v0, %v2662_v33  ;;  %v2405_v28 = vadd.f32 1.0, %v4854_v56  ;;  %v4858_v16 = vpop.eup %4857  ;;  %v3005_v4 = vmul.f32 4.0, %v2997_v18  ;;  %v3029_v22 = vsel %vm1345_vm10, %v3021_v62, %v4848_v55 }
 0x223   : > { %2759 = vst.msk [vmem:[%s5935_s18 + $0x200] sm:$0xff] %vm1410_vm9, %v2694_v53  ;;  %v2569_v43 = vmul.f32 2.0, %v2537_v31  ;;  %v2665_v61 = vsel %vm1345_vm10, %v2633_v24, %v4850_v11  ;;  %v3000_v48 = vadd.f32 %v4198_v30, %v7182_v58  ;;  %v3024_v0 = vmul.f32 %v3016_v2, %v7059_v15  ;;  %v8495_v31 = vld [vmem:[#allocation15_spill] sm:$0xff] }
 0x224   : > { %v4860_v32 = vpop.eup %4859  ;;  %4863 = vrcp.f32 %v2405_v28  ;;  %v2964_v13 = vadd.f32 1.0, %v4856_v23  ;;  %v3037_v56 = vsel %vm1344_vm11, %v3005_v4, %v3029_v22  ;;  %v2410_v33 = vadd.f32 1.0, %v4858_v16  ;;  %v7291_v16 = vpop.f32.mrb[55].mxu1 }
 0x225   : > { %v2697_v59 = vsel %vm1344_vm11, %v2569_v43, %v2665_v61  ;;  %v2969_v18 = vadd.f32 1.0, %v4860_v32  ;;  %3053 = vst.msk [vmem:[%s5935_s18 + $0x300] sm:$0xff] %vm1410_vm9, %v3037_v56  ;;  %v3008_v55 = vmul.f32 4.0, %v3000_v48  ;;  %v3032_v11 = vsel %vm1345_vm10, %v3024_v0, %v4852_v42  ;;  %v8496_v43 = vld [vmem:[#allocation16_spill] sm:$0xff] }
 0x226   : > { %2762 = vst.msk [vmem:[%s5935_s18 + $0x218] sm:$0xff] %vm1410_vm9, %v2697_v59  ;;  %4865 = vrcp.f32 %v2964_v13  ;;  %v2943_v23 = vsub.f32 0.0, %v7231_v3  ;;  %v2315_v5 = vsub.f32 0.0, %v7235_v38  ;;  %v2810_v24 = vand.u32 7, %v8495_v31 }
 0x227   : > { %v4862_v62 = vpop.eup %4861  ;;  %4867 = vrcp.f32 %v2410_v33  ;;  %v2826_v53 = vshra.s32 %v8495_v31, 3  ;;  %v3040_v30 = vsel %vm1344_vm11, %v3008_v55, %v3032_v11  ;;  %v2936_v38 = vadd.f32 %v6642_v63, %v6969_v45  ;;  %v7310_v63 = vld [vmem:[%s8318_s7 + $0x1] ss:$0 sm:$0xff] }
 0x228   : > { %4869 = vrcp.f32 %v2969_v18  ;;  %v2408_v2 = vadd.f32 1.0, %v4862_v62  ;;  %v2955_v28 = vmul.f32 1.442695, %v2943_v23  ;;  %3056 = vst.msk [vmem:[%s5935_s18 + $0x318] sm:$0xff] %vm1410_vm9, %v3040_v30  ;;  %v2354_v3 = vmul.f32 1.442695, %v2315_v5 }
 0x229   : > { %v2818_v42 = vcvt.s32.f32 %v2810_v24  ;;  %v2834_v4 = vcvt.s32.f32 %v2826_v53  ;;  %v2201_v22 = vadd.f32 %v6931_v60, %v6656_v7  ;;  %v2808_v61 = vand.u32 7, %v8496_v43  ;;  %3052 = vst.msk [vmem:[%s7002_s16 + $0x38] sm:$0xff] %vm1410_vm9, %v2936_v38  ;;  %v7340_v24 = vpop.f32.mrb[56].mxu1 }
 0x22a   : > { %4871 = vrcp.f32 %v2408_v2  ;;  %v2824_v32 = vshra.s32 %v8496_v43, 3  ;;  %v2946_v0 = vsub.f32 0.0, %v2936_v38  ;;  %v2928_v13 = vadd.f32 %v6969_v45, %v6658_v57 }
 0x22b   : > { %4873 = vpow2.f32 %v2955_v28  ;;  %v2842_v48 = vsel %vm700_vm5, %v2834_v4, 0.0  ;;  %v7316_v7 = vsel %vm699_vm7, %v7227_v10, %v7243_v51  ;;  %v2313_v59 = vsub.f32 0.0, %v2201_v22  ;;  %4163 = vst.msk [vmem:[%s5738_s0 + $0x228] sm:$0xff] %vm1410_vm9, %v2201_v22  ;;  %v4497_v28 = vpop.f32.mrb[57].mxu1 }
 0x22c   : > { %4875 = vpow2.f32 %v2354_v3  ;;  %v7320_v56 = vsel %vm699_vm7, %v2818_v42, %v2842_v48  ;;  %v2961_v57 = vmul.f32 1.442695, %v2946_v0  ;;  %v2832_v45 = vcvt.s32.f32 %v2824_v32  ;;  %3050 = vst.msk [vmem:[%s7002_s16 + $0x28] sm:$0xff] %vm1410_vm9, %v2928_v13 }
 0x22d   : > { %v2944_v33 = vsub.f32 0.0, %v2928_v13  ;;  %v2222_v18 = vadd.f32 %v6695_v40, %v6931_v60  ;;  %v2350_v10 = vmul.f32 1.442695, %v2313_v59  ;;  %v2816_v51 = vcvt.s32.f32 %v2808_v61  ;;  %v7338_v40 = vpop.f32.mrb[56].mxu0  ;;  %v8498_v13 = vld [vmem:[#allocation19_spill] sm:$0xff] }
 0x22e   : > { %v4864_v55 = vpop.eup %4863  ;;  %v3116_v11 = vadd.f32 %v6697_v44, %v7310_v63  ;;  %v7332_v23 = vadd.f32 %v6931_v60, %v6737_v20  ;;  %4877 = vpow2.f32 %v2961_v57  ;;  %v2840_v5 = vsel %vm700_vm5, %v2832_v45, 0.0  ;;  %v7352_v2 = vpop.f32.mrb[57].mxu0 }
 0x22f   : > { %v2471_v62 = vmul.f32 2.0, %v4864_v55  ;;  %v2957_v31 = vmul.f32 1.442695, %v2944_v33  ;;  %4168 = vst.msk [vmem:[%s5738_s0 + $0x250] sm:$0xff] %vm1410_vm9, %v2222_v18  ;;  %4879 = vpow2.f32 %v2350_v10  ;;  %v2318_v30 = vsub.f32 0.0, %v2222_v18  ;;  %v7354_v22 = vpop.f32.mrb[58].mxu0 }
 0x230   : > { %v4866_v53 = vpop.eup %4865  ;;  %v3140_v44 = vsub.f32 0.0, %v3116_v11  ;;  %v7345_v20 = vsel %vm1149_vm6, 45.0, %v8474_v47  ;;  %4221 = vst.msk [vmem:[%s7002_s16 + $0x50] sm:$0xff] %vm1410_vm9, %v3116_v11  ;;  %4166 = vst.msk [vmem:[%s5738_s0 + $0x240] sm:$0xff] %vm1410_vm9, %v7332_v23  ;;  %v7358_v32 = vsel %vm699_vm7, %v2816_v51, %v2840_v5  ;;  %v7364_v18 = vpop.f32.mrb[58].mxu1 }
 0x231   : > { %v4868_v3 = vpop.eup %4867  ;;  %v4127_v42 = vadd.f32 -0.5, %v2471_v62  ;;  %v2599_v4 = vmul.f32 %v2471_v62, %v2471_v62  ;;  %v2982_v38 = vmul.f32 2.0, %v4866_v53  ;;  %4881 = vpow2.f32 %v2957_v31  ;;  %8497 = vst [vmem:[#allocation14_spill] sm:$0xff] %v7354_v22  ;;  %8499 = vst [vmem:[#allocation12_spill] sm:$0xff] %v7364_v18  ;;  %v7366_v28 = vpop.f32.mrb[59].mxu0 }
 0x232   : > { %v4870_v43 = vpop.eup %4869  ;;  %v2476_v61 = vmul.f32 2.0, %v4868_v3  ;;  %v2360_v48 = vmul.f32 1.442695, %v2318_v30  ;;  %v7360_v0 = vmul.f32 1.442695, %v3140_v44  ;;  %8500 = vst [vmem:[#allocation38_spill] sm:$0xff] %v7366_v28 }
 0x233   : > { %v2535_v59 = vadd.f32 %v4127_v42, %v8498_v13  ;;  %v2631_v57 = vmul.f32 %v2599_v4, %v6987_v54  ;;  %v4196_v45 = vadd.f32 -0.5, %v2982_v38  ;;  %v3014_v33 = vmul.f32 %v2982_v38, %v2982_v38  ;;  %v4498_v51 = vpop.f32.mrb[59].mxu1  ;;  %v8501_v13 = vld [vmem:[#allocation20_spill] sm:$0xff] }
 0x234   : > { %v4872_v10 = vpop.eup %4871  ;;  %v4132_v11 = vadd.f32 -0.5, %v2476_v61  ;;  %v2604_v62 = vmul.f32 %v2476_v61, %v2476_v61  ;;  %v2987_v31 = vmul.f32 2.0, %v4870_v43  ;;  %4883 = vpow2.f32 %v2360_v48 }
 0x235   : > { %v4874_v5 = vpop.eup %4873  ;;  %v2567_v30 = vmul.f32 2.0, %v2535_v59  ;;  %v2663_v44 = vsel %vm1345_vm10, %v2631_v57, %v4864_v55  ;;  %v2998_v42 = vadd.f32 %v4196_v45, %v7221_v37  ;;  %v3022_v4 = vmul.f32 %v3014_v33, %v7059_v15 }
 0x236   : > { %v4876_v38 = vpop.eup %4875  ;;  %v2540_v18 = vadd.f32 %v4132_v11, %v8501_v13  ;;  %v2636_v61 = vmul.f32 %v2604_v62, %v6987_v54  ;;  %v4201_v22 = vadd.f32 -0.5, %v2987_v31  ;;  %v3019_v48 = vmul.f32 %v2987_v31, %v2987_v31 }
 0x237   : > { %v2695_v51 = vsel %vm1344_vm11, %v2567_v30, %v2663_v44  ;;  %v3006_v28 = vmul.f32 4.0, %v2998_v42  ;;  %v3030_v59 = vsel %vm1345_vm10, %v3022_v4, %v4866_v53  ;;  %v2474_v55 = vmul.f32 2.0, %v4872_v10 }
 0x238   : > { %2760 = vst.msk [vmem:[%s5935_s18 + $0x208] sm:$0xff] %vm1410_vm9, %v2695_v51  ;;  %v2572_v57 = vmul.f32 2.0, %v2540_v18  ;;  %v2668_v45 = vsel %vm1345_vm10, %v2636_v61, %v4868_v3  ;;  %v3003_v33 = vadd.f32 %v4201_v22, %v7225_v25  ;;  %v3027_v11 = vmul.f32 %v3019_v48, %v7059_v15  ;;  %v4878_v62 = vpop.eup %4877  ;;  %v8502_v61 = vld [vmem:[#allocation21_spill] sm:$0xff]  ;;  %v7396_v51 = vpop.f32.mrb[60].mxu0 }
 0x239   : > { %v3038_v31 = vsel %vm1344_vm11, %v3006_v28, %v3030_v59  ;;  %v4130_v30 = vadd.f32 -0.5, %v2474_v55  ;;  %v2602_v44 = vmul.f32 %v2474_v55, %v2474_v55  ;;  %v2967_v42 = vadd.f32 1.0, %v4874_v5  ;;  %v4880_v53 = vpop.eup %4879 }
 0x23a   : > { %3054 = vst.msk [vmem:[%s5935_s18 + $0x308] sm:$0xff] %vm1410_vm9, %v3038_v31  ;;  %v2700_v18 = vsel %vm1344_vm11, %v2572_v57, %v2668_v45  ;;  %v3011_v4 = vmul.f32 4.0, %v3003_v33  ;;  %v3035_v3 = vsel %vm1345_vm10, %v3027_v11, %v4870_v43  ;;  %v2411_v22 = vadd.f32 1.0, %v4876_v38 }
 0x23b   : > { %v4882_v13 = vpop.eup %4881  ;;  %2765 = vst.msk [vmem:[%s5935_s18 + $0x230] sm:$0xff] %vm1410_vm9, %v2700_v18  ;;  %v2538_v28 = vadd.f32 %v4130_v30, %v8502_v61  ;;  %v2634_v48 = vmul.f32 %v2602_v44, %v6987_v54  ;;  %4885 = vrcp.f32 %v2967_v42  ;;  %v2970_v5 = vadd.f32 1.0, %v4878_v62  ;;  %v8503_v62 = vld [vmem:[#allocation47_spill] sm:$0xff]  ;;  %v8504_v30 = vld [vmem:[#allocation48_spill] sm:$0xff] }
 0x23c   : > { %v3043_v59 = vsel %vm1344_vm11, %v3011_v4, %v3035_v3  ;;  %4887 = vrcp.f32 %v2411_v22  ;;  %v2409_v55 = vadd.f32 1.0, %v4880_v53  ;;  %v2968_v57 = vadd.f32 1.0, %v4882_v13 }
 0x23d   : > { %3059 = vst.msk [vmem:[%s5935_s18 + $0x330] sm:$0xff] %vm1410_vm9, %v3043_v59  ;;  %v2570_v43 = vmul.f32 2.0, %v2538_v28  ;;  %v2666_v38 = vsel %vm1345_vm10, %v2634_v48, %v4872_v10  ;;  %4889 = vrcp.f32 %v2970_v5  ;;  %v2316_v45 = vsub.f32 0.0, %v7332_v23 }
 0x23e   : > { %v4884_v33 = vpop.eup %4883  ;;  %4891 = vrcp.f32 %v2409_v55  ;;  %v3108_v11 = vadd.f32 %v7310_v63, %v6747_v21  ;;  %v2225_v31 = vadd.f32 %v8503_v62, %v6931_v60  ;;  %v3119_v44 = vadd.f32 %v8504_v30, %v7310_v63 }
 0x23f   : > { %v2698_v42 = vsel %vm1344_vm11, %v2570_v43, %v2666_v38  ;;  %4893 = vrcp.f32 %v2968_v57  ;;  %v2414_v10 = vadd.f32 1.0, %v4884_v33  ;;  %v2356_v53 = vmul.f32 1.442695, %v2316_v45 }
 0x240   : > { %2763 = vst.msk [vmem:[%s5935_s18 + $0x220] sm:$0xff] %vm1410_vm9, %v2698_v42  ;;  %4895 = vpow2.f32 %v7360_v0  ;;  %v3138_v23 = vsub.f32 0.0, %v3108_v11  ;;  %4219 = vst.msk [vmem:[%s7002_s16 + $0x40] sm:$0xff] %vm1410_vm9, %v3108_v11  ;;  %v2319_v21 = vsub.f32 0.0, %v2225_v31  ;;  %v3141_v18 = vsub.f32 0.0, %v3119_v44 }
 0x241   : > { %4169 = vst.msk [vmem:[%s5738_s0 + $0x258] sm:$0xff] %vm1410_vm9, %v2225_v31  ;;  %4222 = vst.msk [vmem:[%s7002_s16 + $0x58] sm:$0xff] %vm1410_vm9, %v3119_v44  ;;  %4897 = vrcp.f32 %v2414_v10  ;;  %v2217_v4 = vadd.f32 %v6931_v60, %v6778_v14  ;;  %v3111_v3 = vadd.f32 %v7310_v63, %v6780_v34  ;;  %v2238_v0 = vadd.f32 %v6808_v27, %v6931_v60  ;;  %v7438_v34 = vpop.f32.mrb[60].mxu1  ;;  %v7443_v27 = vld [vmem:[%s8317_s6 + $0x2] ss:$0 sm:$0xff] }
 0x242   : > { %4899 = vpow2.f32 %v2356_v53  ;;  %v3146_v22 = vmul.f32 1.442695, %v3138_v23  ;;  %v2362_v13 = vmul.f32 1.442695, %v2319_v21  ;;  %v3152_v61 = vmul.f32 1.442695, %v3141_v18 }
 0x243   : > { %v2317_v28 = vsub.f32 0.0, %v2217_v4  ;;  %4167 = vst.msk [vmem:[%s5738_s0 + $0x248] sm:$0xff] %vm1410_vm9, %v2217_v4  ;;  %v3139_v48 = vsub.f32 0.0, %v3111_v3  ;;  %4220 = vst.msk [vmem:[%s7002_s16 + $0x48] sm:$0xff] %vm1410_vm9, %v3111_v3  ;;  %v2322_v5 = vsub.f32 0.0, %v2238_v0  ;;  %v7436_v14 = vadd.f32 %v6810_v26, %v7310_v63  ;;  %v4505_v55 = vpop.f32.mrb[61].mxu1 }
 0x244   : > { %4172 = vst.msk [vmem:[%s5738_s0 + $0x270] sm:$0xff] %vm1410_vm9, %v2238_v0  ;;  %4901 = vpow2.f32 %v3146_v22  ;;  %v7447_v60 = vadd.f32 %v7443_v27, %v6883_v17  ;;  %v7451_v59 = vadd.f32 %v7310_v63, %v6889_v9  ;;  %v7455_v26 = vadd.f32 %v7443_v27, %v6901_v46  ;;  %v7471_v46 = vpop.f32.mrb[61].mxu0  ;;  %v7477_v18 = vpop.f32.mrb[62].mxu1 }
 0x245   : > { %v4886_v57 = vpop.eup %4885  ;;  %4903 = vpow2.f32 %v2362_v13  ;;  %v2358_v43 = vmul.f32 1.442695, %v2317_v28  ;;  %v3148_v38 = vmul.f32 1.442695, %v3139_v48  ;;  %v2368_v45 = vmul.f32 1.442695, %v2322_v5 }
 0x246   : > { %4225 = vst.msk [vmem:[%s7002_s16 + $0x70] sm:$0xff] %vm1410_vm9, %v7436_v14  ;;  %v4888_v17 = vpop.eup %4887  ;;  %v2985_v33 = vmul.f32 2.0, %v4886_v57  ;;  %4905 = vpow2.f32 %v3152_v61  ;;  %4170 = vst.msk [vmem:[%s5738_s0 + $0x260] sm:$0xff] %vm1410_vm9, %v7447_v60  ;;  %v7475_v21 = vpop.f32.mrb[62].mxu0 }
 0x247   : > { %4223 = vst.msk [vmem:[%s7002_s16 + $0x60] sm:$0xff] %vm1410_vm9, %v7451_v59  ;;  %4173 = vst.msk [vmem:[%s5738_s0 + $0x278] sm:$0xff] %vm1410_vm9, %v7455_v26  ;;  %v4890_v62 = vpop.eup %4889  ;;  %v2477_v31 = vmul.f32 2.0, %v4888_v17  ;;  %4907 = vpow2.f32 %v2358_v43  ;;  %v4506_v13 = vpop.f32.mrb[63].mxu1 }
 0x248   : > { %v4892_v42 = vpop.eup %4891  ;;  %v4199_v10 = vadd.f32 -0.5, %v2985_v33  ;;  %v3017_v53 = vmul.f32 %v2985_v33, %v2985_v33  ;;  %v2988_v23 = vmul.f32 2.0, %v4890_v62  ;;  %4909 = vpow2.f32 %v3148_v38  ;;  %8505 = vst [vmem:[#allocation13_spill] sm:$0xff] %v7477_v18  ;;  %v8506_v38 = vld [vmem:[#allocation22_spill] sm:$0xff] }
 0x249   : > { %v7479_v4 = vpop.eup %4893  ;;  %v4133_v3 = vadd.f32 -0.5, %v2477_v31  ;;  %v2605_v0 = vmul.f32 %v2477_v31, %v2477_v31  ;;  %v2475_v22 = vmul.f32 2.0, %v4892_v42  ;;  %4911 = vpow2.f32 %v2368_v45 }
 0x24a   : > { %v4896_v61 = vpop.eup %4895  ;;  %v3001_v28 = vadd.f32 %v4199_v10, %v7316_v7  ;;  %v3025_v48 = vmul.f32 %v3017_v53, %v7059_v15  ;;  %v4202_v5 = vadd.f32 -0.5, %v2988_v23  ;;  %v3020_v55 = vmul.f32 %v2988_v23, %v2988_v23  ;;  %v7489_v53 = vpop.f32.mrb[63].mxu0 }
 0x24b   : > { %v4898_v43 = vpop.eup %4897  ;;  %v2541_v33 = vadd.f32 %v4133_v3, %v8506_v38  ;;  %v2637_v44 = vmul.f32 %v2605_v0, %v6987_v54  ;;  %v4131_v30 = vadd.f32 -0.5, %v2475_v22  ;;  %v2603_v11 = vmul.f32 %v2475_v22, %v2475_v22  ;;  %v8507_v0 = vld [vmem:[#allocation23_spill] sm:$0xff] }
 0x24c   : > { %v4900_v9 = vpop.eup %4899  ;;  %v3009_v31 = vmul.f32 4.0, %v3001_v28  ;;  %v3033_v45 = vsel %vm1345_vm10, %v3025_v48, %v4886_v57  ;;  %v3004_v13 = vadd.f32 %v4202_v5, %v7320_v56  ;;  %v3028_v10 = vmul.f32 %v3020_v55, %v7059_v15 }
 0x24d   : > { %v2573_v23 = vmul.f32 2.0, %v2541_v33  ;;  %v2669_v3 = vsel %vm1345_vm10, %v2637_v44, %v4888_v17  ;;  %v2539_v38 = vadd.f32 %v4131_v30, %v8507_v0  ;;  %v2635_v22 = vmul.f32 %v2603_v11, %v6987_v54 }
 0x24e   : > { %v4902_v18 = vpop.eup %4901  ;;  %v3041_v28 = vsel %vm1344_vm11, %v3009_v31, %v3033_v45  ;;  %v3012_v57 = vmul.f32 4.0, %v3004_v13  ;;  %v3036_v48 = vsel %vm1345_vm10, %v3028_v10, %v4890_v62  ;;  %v2986_v5 = vmul.f32 2.0, %v7479_v4 }
 0x24f   : > { %v4904_v55 = vpop.eup %4903  ;;  %3057 = vst.msk [vmem:[%s5935_s18 + $0x320] sm:$0xff] %vm1410_vm9, %v3041_v28  ;;  %v2701_v17 = vsel %vm1344_vm11, %v2573_v23, %v2669_v3  ;;  %v2571_v30 = vmul.f32 2.0, %v2539_v38  ;;  %v2667_v11 = vsel %vm1345_vm10, %v2635_v22, %v4892_v42  ;;  %v2480_v44 = vmul.f32 2.0, %v4898_v43 }
 0x250   : > { %v4906_v33 = vpop.eup %4905  ;;  %2766 = vst.msk [vmem:[%s5935_s18 + $0x238] sm:$0xff] %vm1410_vm9, %v2701_v17  ;;  %v3044_v62 = vsel %vm1344_vm11, %v3012_v57, %v3036_v48  ;;  %v4200_v31 = vadd.f32 -0.5, %v2986_v5  ;;  %v3018_v45 = vmul.f32 %v2986_v5, %v2986_v5  ;;  %v3164_v13 = vadd.f32 1.0, %v4896_v61  ;;  %v8508_v61 = vld [vmem:[#allocation24_spill] sm:$0xff] }
 0x251   : > { %v4908_v10 = vpop.eup %4907  ;;  %3060 = vst.msk [vmem:[%s5935_s18 + $0x338] sm:$0xff] %vm1410_vm9, %v3044_v62  ;;  %v2699_v23 = vsel %vm1344_vm11, %v2571_v30, %v2667_v11  ;;  %v4136_v3 = vadd.f32 -0.5, %v2480_v44  ;;  %v2608_v0 = vmul.f32 %v2480_v44, %v2480_v44  ;;  %v2412_v38 = vadd.f32 1.0, %v4900_v9  ;;  %v7520_v11 = vpop.f32.mrb[64].mxu0 }
 0x252   : > { %v4910_v42 = vpop.eup %4909  ;;  %2764 = vst.msk [vmem:[%s5935_s18 + $0x228] sm:$0xff] %vm1410_vm9, %v2699_v23  ;;  %v3002_v22 = vadd.f32 %v4200_v31, %v7358_v32  ;;  %v3026_v28 = vmul.f32 %v3018_v45, %v7059_v15  ;;  %4913 = vrcp.f32 %v3164_v13  ;;  %v3162_v57 = vadd.f32 1.0, %v4902_v18  ;;  %8509 = vst [vmem:[#allocation39_spill] sm:$0xff] %v7520_v11  ;;  %v4513_v15 = vpop.f32.mrb[65].mxu0  ;;  %v8522_v11 = vld [vmem:[#allocation28_spill] sm:$0xff] }
 0x253   : > { %v4912_v48 = vpop.eup %4911  ;;  %v2544_v5 = vadd.f32 %v4136_v3, %v8508_v61  ;;  %v2640_v17 = vmul.f32 %v2608_v0, %v6987_v54  ;;  %4915 = vrcp.f32 %v2412_v38  ;;  %v2415_v30 = vadd.f32 1.0, %v4904_v55  ;;  %v8516_v61 = vld [vmem:[#allocation53_spill] sm:$0xff] }
 0x254   : > { %v3010_v9 = vmul.f32 4.0, %v3002_v22  ;;  %v3034_v44 = vsel %vm1345_vm10, %v3026_v28, %v7479_v4  ;;  %4917 = vrcp.f32 %v3162_v57  ;;  %v3165_v62 = vadd.f32 1.0, %v4906_v33  ;;  %v8514_v28 = vld [vmem:[#allocation51_spill] sm:$0xff]  ;;  %v8515_v57 = vld [vmem:[#allocation52_spill] sm:$0xff] }
 0x255   : > { %v2576_v18 = vmul.f32 2.0, %v2544_v5  ;;  %v2672_v31 = vsel %vm1345_vm10, %v2640_v17, %v4898_v43  ;;  %4919 = vrcp.f32 %v2415_v30  ;;  %v2413_v45 = vadd.f32 1.0, %v4908_v10  ;;  %v7540_v10 = vld [vmem:[%s8318_s7 + $0x2] ss:$0 sm:$0xff]  ;;  %v8517_v17 = vld [vmem:[#allocation9_spill] sm:$0xff] }
 0x256   : > { %v3042_v55 = vsel %vm1344_vm11, %v3010_v9, %v3034_v44  ;;  %4921 = vrcp.f32 %v3165_v62  ;;  %v3163_v13 = vadd.f32 1.0, %v4910_v42  ;;  %v2418_v23 = vadd.f32 1.0, %v4912_v48 }
 0x257   : > { %3058 = vst.msk [vmem:[%s5935_s18 + $0x328] sm:$0xff] %vm1410_vm9, %v3042_v55  ;;  %v2704_v4 = vsel %vm1344_vm11, %v2576_v18, %v2672_v31  ;;  %4923 = vrcp.f32 %v2413_v45  ;;  %v8510_v33 = vsub.f32 0.0, %v7436_v14  ;;  %v8511_v43 = vsub.f32 0.0, %v7447_v60 }
 0x258   : > { %2769 = vst.msk [vmem:[%s5935_s18 + $0x250] sm:$0xff] %vm1410_vm9, %v2704_v4  ;;  %4925 = vrcp.f32 %v3163_v13  ;;  %v8512_v38 = vsub.f32 0.0, %v7451_v59  ;;  %v8513_v22 = vsub.f32 0.0, %v7455_v26  ;;  %v3135_v60 = vadd.f32 %v8514_v28, %v7310_v63 }
 0x259   : > { %v3158_v3 = vmul.f32 1.442695, %v8510_v33  ;;  %v2364_v0 = vmul.f32 1.442695, %v8511_v43  ;;  %4927 = vrcp.f32 %v2418_v23  ;;  %v2233_v48 = vadd.f32 %v7443_v27, %v8515_v57  ;;  %v7577_v43 = vpop.f32.mrb[66].mxu0 }
 0x25a   : > { %v3154_v42 = vmul.f32 1.442695, %v8512_v38  ;;  %v2370_v14 = vmul.f32 1.442695, %v8513_v22  ;;  %v3127_v5 = vadd.f32 %v7310_v63, %v8516_v61  ;;  %v2254_v30 = vadd.f32 %v7443_v27, %v8517_v17  ;;  %4226 = vst.msk [vmem:[%s7002_s16 + $0x78] sm:$0xff] %vm1410_vm9, %v3135_v60  ;;  %8518 = vst [vmem:[#allocation17_spill] sm:$0xff] %v7577_v43 }
 0x25b   : > { %4929 = vpow2.f32 %v3158_v3  ;;  %v3145_v59 = vsub.f32 0.0, %v3135_v60  ;;  %v3316_v26 = vadd.f32 %v7023_v19, %v7540_v10  ;;  %v2321_v9 = vsub.f32 0.0, %v2233_v48  ;;  %4171 = vst.msk [vmem:[%s5738_s0 + $0x268] sm:$0xff] %vm1410_vm9, %v2233_v48  ;;  %v4514_v22 = vpop.f32.mrb[67].mxu0 }
 0x25c   : > { %4931 = vpow2.f32 %v2364_v0  ;;  %v3143_v44 = vsub.f32 0.0, %v3127_v5  ;;  %4224 = vst.msk [vmem:[%s7002_s16 + $0x68] sm:$0xff] %vm1410_vm9, %v3127_v5  ;;  %v2326_v62 = vsub.f32 0.0, %v2254_v30  ;;  %4176 = vst.msk [vmem:[%s5738_s0 + $0x290] sm:$0xff] %vm1410_vm9, %v2254_v30  ;;  %v4914_v63 = vpop.eup %4913  ;;  %v7569_v15 = vsel %vm1148_vm8, 62.0, %v7345_v20  ;;  %v8520_v22 = vld [vmem:[#allocation26_spill] sm:$0xff] }
 0x25d   : > { %4933 = vpow2.f32 %v3154_v42  ;;  %v3160_v18 = vmul.f32 1.442695, %v3145_v59  ;;  %v3340_v31 = vsub.f32 0.0, %v3316_v26  ;;  %4245 = vst.msk [vmem:[%s7002_s16 + $0x90] sm:$0xff] %vm1410_vm9, %v3316_v26  ;;  %v4916_v19 = vpop.eup %4915  ;;  %v3182_v45 = vmul.f32 2.0, %v4914_v63  ;;  %v8519_v26 = vld [vmem:[#allocation25_spill] sm:$0xff] }
 0x25e   : > { %4935 = vpow2.f32 %v2370_v14  ;;  %v2366_v55 = vmul.f32 1.442695, %v2321_v9  ;;  %v3156_v13 = vmul.f32 1.442695, %v3143_v44  ;;  %v4918_v23 = vpop.eup %4917  ;;  %v2478_v4 = vmul.f32 2.0, %v4916_v19 }
 0x25f   : > { %4937 = vpow2.f32 %v3160_v18  ;;  %v7573_v33 = vmul.f32 1.442695, %v2326_v62  ;;  %v7575_v3 = vmul.f32 1.442695, %v3340_v31  ;;  %v4920_v20 = vpop.eup %4919  ;;  %v4213_v0 = vadd.f32 -0.5, %v3182_v45 }
 0x260   : > { %v3214_v38 = vmul.f32 %v3182_v45, %v3182_v45  ;;  %v3180_v42 = vmul.f32 2.0, %v4918_v23  ;;  %4939 = vpow2.f32 %v2366_v55  ;;  %v4922_v28 = vpop.eup %4921  ;;  %v4134_v60 = vadd.f32 -0.5, %v2478_v4 }
 0x261   : > { %v2606_v14 = vmul.f32 %v2478_v4, %v2478_v4  ;;  %v2481_v57 = vmul.f32 2.0, %v4920_v20  ;;  %4941 = vpow2.f32 %v3156_v13  ;;  %v4924_v48 = vpop.eup %4923  ;;  %v3198_v61 = vadd.f32 %v4213_v0, %v7054_v29 }
 0x262   : > { %v3222_v5 = vmul.f32 %v3214_v38, %v7569_v15  ;;  %v4211_v17 = vadd.f32 -0.5, %v3180_v42  ;;  %v3212_v30 = vmul.f32 %v3180_v42, %v3180_v42  ;;  %v4926_v59 = vpop.eup %4925  ;;  %v2542_v9 = vadd.f32 %v4134_v60, %v8519_v26 }
 0x263   : > { %v2638_v44 = vmul.f32 %v2606_v14, %v6987_v54  ;;  %v4137_v62 = vadd.f32 -0.5, %v2481_v57  ;;  %v2609_v18 = vmul.f32 %v2481_v57, %v2481_v57  ;;  %v4928_v31 = vpop.eup %4927  ;;  %v3206_v45 = vmul.f32 4.0, %v3198_v61 }
 0x264   : > { %v3230_v55 = vsel %vm1345_vm10, %v3222_v5, %v4914_v63  ;;  %v3196_v13 = vadd.f32 %v4211_v17, %v7093_v6  ;;  %v3220_v4 = vmul.f32 %v3212_v30, %v7569_v15  ;;  %v2574_v38 = vmul.f32 2.0, %v2542_v9 }
 0x265   : > { %v4930_v0 = vpop.eup %4929  ;;  %v2670_v42 = vsel %vm1345_vm10, %v2638_v44, %v4916_v19  ;;  %v2545_v60 = vadd.f32 %v4137_v62, %v8520_v22  ;;  %v2641_v14 = vmul.f32 %v2609_v18, %v6987_v54  ;;  %v3238_v61 = vsel %vm1344_vm11, %v3206_v45, %v3230_v55 }
 0x266   : > { %v4932_v57 = vpop.eup %4931  ;;  %v3204_v26 = vmul.f32 4.0, %v3196_v13  ;;  %v3228_v63 = vsel %vm1345_vm10, %v3220_v4, %v4918_v23  ;;  %v3183_v5 = vmul.f32 2.0, %v4922_v28  ;;  %3255 = vst.msk [vmem:[%s5935_s18 + $0x350] sm:$0xff] %vm1410_vm9, %v3238_v61  ;;  %v2702_v19 = vsel %vm1344_vm11, %v2574_v38, %v2670_v42 }
 0x267   : > { %v4934_v17 = vpop.eup %4933  ;;  %v2577_v30 = vmul.f32 2.0, %v2545_v60  ;;  %v2673_v9 = vsel %vm1345_vm10, %v2641_v14, %v4920_v20  ;;  %v2479_v44 = vmul.f32 2.0, %v4924_v48  ;;  %2767 = vst.msk [vmem:[%s5935_s18 + $0x240] sm:$0xff] %vm1410_vm9, %v2702_v19  ;;  %v3181_v55 = vmul.f32 2.0, %v4926_v59 }
 0x268   : > { %v4936_v62 = vpop.eup %4935  ;;  %v3236_v18 = vsel %vm1344_vm11, %v3204_v26, %v3228_v63  ;;  %v4214_v23 = vadd.f32 -0.5, %v3183_v5  ;;  %v3215_v45 = vmul.f32 %v3183_v5, %v3183_v5  ;;  %v2484_v22 = vmul.f32 2.0, %v4928_v31  ;;  %v8521_v5 = vld [vmem:[#allocation27_spill] sm:$0xff] }
 0x269   : > { %v4938_v13 = vpop.eup %4937  ;;  %3253 = vst.msk [vmem:[%s5935_s18 + $0x340] sm:$0xff] %vm1410_vm9, %v3236_v18  ;;  %v2705_v4 = vsel %vm1344_vm11, %v2577_v30, %v2673_v9  ;;  %v4135_v38 = vadd.f32 -0.5, %v2479_v44  ;;  %v2607_v42 = vmul.f32 %v2479_v44, %v2479_v44  ;;  %v4212_v61 = vadd.f32 -0.5, %v3181_v55 }
 0x26a   : > { %v4940_v20 = vpop.eup %4939  ;;  %2770 = vst.msk [vmem:[%s5935_s18 + $0x258] sm:$0xff] %vm1410_vm9, %v2705_v4  ;;  %v3199_v60 = vadd.f32 %v4214_v23, %v7182_v58  ;;  %v3223_v14 = vmul.f32 %v3215_v45, %v7569_v15  ;;  %v3213_v26 = vmul.f32 %v3181_v55, %v3181_v55  ;;  %v4140_v43 = vadd.f32 -0.5, %v2484_v22 }
 0x26b   : > { %v4942_v63 = vpop.eup %4941  ;;  %v2543_v19 = vadd.f32 %v4135_v38, %v8521_v5  ;;  %v2639_v18 = vmul.f32 %v2607_v42, %v6987_v54  ;;  %v2612_v30 = vmul.f32 %v2484_v22, %v2484_v22  ;;  %v3197_v4 = vadd.f32 %v4212_v61, %v7221_v37 }
 0x26c   : > { %v3207_v9 = vmul.f32 4.0, %v3199_v60  ;;  %v3231_v44 = vsel %vm1345_vm10, %v3223_v14, %v4922_v28  ;;  %v3221_v23 = vmul.f32 %v3213_v26, %v7569_v15  ;;  %v2548_v38 = vadd.f32 %v4140_v43, %v8522_v11 }
 0x26d   : > { %v2575_v45 = vmul.f32 2.0, %v2543_v19  ;;  %v2671_v55 = vsel %vm1345_vm10, %v2639_v18, %v4924_v48  ;;  %v2644_v42 = vmul.f32 %v2612_v30, %v6987_v54  ;;  %v3205_v60 = vmul.f32 4.0, %v3197_v4  ;;  %v8524_v30 = vld [vmem:[#allocation57_spill] sm:$0xff] }
 0x26e   : > { %v3239_v22 = vsel %vm1344_vm11, %v3207_v9, %v3231_v44  ;;  %v3229_v28 = vsel %vm1345_vm10, %v3221_v23, %v4926_v59  ;;  %v3168_v14 = vadd.f32 1.0, %v4930_v0  ;;  %v2580_v48 = vmul.f32 2.0, %v2548_v38 }
 0x26f   : > { %3256 = vst.msk [vmem:[%s5935_s18 + $0x358] sm:$0xff] %vm1410_vm9, %v3239_v22  ;;  %v2703_v61 = vsel %vm1344_vm11, %v2575_v45, %v2671_v55  ;;  %v2676_v11 = vsel %vm1345_vm10, %v2644_v42, %v4928_v31  ;;  %v2416_v43 = vadd.f32 1.0, %v4932_v57  ;;  %v3237_v26 = vsel %vm1344_vm11, %v3205_v60, %v3229_v28 }
 0x270   : > { %2768 = vst.msk [vmem:[%s5935_s18 + $0x248] sm:$0xff] %vm1410_vm9, %v2703_v61  ;;  %4943 = vrcp.f32 %v3168_v14  ;;  %v3166_v5 = vadd.f32 1.0, %v4934_v17  ;;  %v2419_v59 = vadd.f32 1.0, %v4936_v62  ;;  %3254 = vst.msk [vmem:[%s5935_s18 + $0x348] sm:$0xff] %vm1410_vm9, %v3237_v26  ;;  %v2708_v0 = vsel %vm1344_vm11, %v2580_v48, %v2676_v11 }
 0x271   : > { %4945 = vrcp.f32 %v2416_v43  ;;  %v3169_v19 = vadd.f32 1.0, %v4938_v13  ;;  %v2417_v18 = vadd.f32 1.0, %v4940_v20  ;;  %2773 = vst.msk [vmem:[%s5935_s18 + $0x270] sm:$0xff] %vm1410_vm9, %v2708_v0  ;;  %v3167_v31 = vadd.f32 1.0, %v4942_v63  ;;  %v8523_v13 = vld [vmem:[#allocation10_spill] sm:$0xff] }
 0x272   : > { %4947 = vrcp.f32 %v3166_v5  ;;  %v2246_v57 = vadd.f32 %v7443_v27, %v7035_v1  ;;  %v3308_v17 = vadd.f32 %v7540_v10, %v7063_v35  ;;  %v2257_v62 = vadd.f32 %v7443_v27, %v7067_v12  ;;  %v8525_v35 = vld [vmem:[#allocation34_spill] sm:$0xff] }
 0x273   : > { %4949 = vrcp.f32 %v2419_v59  ;;  %v3319_v20 = vadd.f32 %v8523_v13, %v7540_v10  ;;  %v2249_v9 = vadd.f32 %v7443_v27, %v8524_v30  ;;  %v3311_v44 = vadd.f32 %v7540_v10, %v8525_v35  ;;  %v8526_v35 = vld [vmem:[#allocation29_spill] sm:$0xff] }
 0x274   : > { %4951 = vrcp.f32 %v3169_v19  ;;  %v2324_v63 = vsub.f32 0.0, %v2246_v57  ;;  %4174 = vst.msk [vmem:[%s5738_s0 + $0x280] sm:$0xff] %vm1410_vm9, %v2246_v57  ;;  %v3338_v1 = vsub.f32 0.0, %v3308_v17  ;;  %4243 = vst.msk [vmem:[%s7002_s16 + $0x80] sm:$0xff] %vm1410_vm9, %v3308_v17  ;;  %v2327_v4 = vsub.f32 0.0, %v2257_v62 }
 0x275   : > { %4953 = vrcp.f32 %v2417_v18  ;;  %4177 = vst.msk [vmem:[%s5738_s0 + $0x298] sm:$0xff] %vm1410_vm9, %v2257_v62  ;;  %v3341_v12 = vsub.f32 0.0, %v3319_v20  ;;  %4246 = vst.msk [vmem:[%s7002_s16 + $0x98] sm:$0xff] %vm1410_vm9, %v3319_v20  ;;  %v2325_v23 = vsub.f32 0.0, %v2249_v9  ;;  %v3339_v38 = vsub.f32 0.0, %v3311_v44 }
 0x276   : > { %4175 = vst.msk [vmem:[%s5738_s0 + $0x288] sm:$0xff] %vm1410_vm9, %v2249_v9  ;;  %4955 = vrcp.f32 %v3167_v31  ;;  %v2372_v45 = vmul.f32 1.442695, %v2324_v63  ;;  %v3346_v55 = vmul.f32 1.442695, %v3338_v1  ;;  %4244 = vst.msk [vmem:[%s7002_s16 + $0x88] sm:$0xff] %vm1410_vm9, %v3311_v44  ;;  %v7671_v28 = vadd.f32 %v7443_v27, %v7123_v50 }
 0x277   : > { %4957 = vpow2.f32 %v7573_v33  ;;  %v2378_v42 = vmul.f32 1.442695, %v2327_v4  ;;  %v3352_v22 = vmul.f32 1.442695, %v3341_v12  ;;  %v2374_v60 = vmul.f32 1.442695, %v2325_v23 }
 0x278   : > { %4959 = vpow2.f32 %v7575_v3  ;;  %v7675_v14 = vadd.f32 %v7167_v52, %v7540_v10  ;;  %v7679_v61 = vadd.f32 %v7443_v27, %v7186_v36  ;;  %v7683_v33 = vadd.f32 %v7540_v10, %v7193_v39  ;;  %4180 = vst.msk [vmem:[%s5738_s0 + $0x2b0] sm:$0xff] %vm1410_vm9, %v7671_v28 }
 0x279   : > { %4961 = vpow2.f32 %v2372_v45  ;;  %v7687_v50 = vadd.f32 %v7443_v27, %v7209_v8  ;;  %v3348_v52 = vmul.f32 1.442695, %v3339_v38  ;;  %v7697_v36 = vadd.f32 %v7217_v49, %v7540_v10 }
 0x27a   : > { %v4944_v3 = vpop.eup %4943  ;;  %4963 = vpow2.f32 %v3346_v55  ;;  %4249 = vst.msk [vmem:[%s7002_s16 + $0xb0] sm:$0xff] %vm1410_vm9, %v7675_v14  ;;  %v2330_v8 = vsub.f32 0.0, %v7671_v28  ;;  %v3344_v11 = vsub.f32 0.0, %v7675_v14  ;;  %4178 = vst.msk [vmem:[%s5738_s0 + $0x2a0] sm:$0xff] %vm1410_vm9, %v7679_v61  ;;  %v2328_v49 = vsub.f32 0.0, %v7679_v61 }
 0x27b   : > { %v4946_v39 = vpop.eup %4945  ;;  %v3186_v48 = vmul.f32 2.0, %v4944_v3  ;;  %4965 = vpow2.f32 %v2378_v42  ;;  %4247 = vst.msk [vmem:[%s7002_s16 + $0xa0] sm:$0xff] %vm1410_vm9, %v7683_v33  ;;  %4181 = vst.msk [vmem:[%s5738_s0 + $0x2b8] sm:$0xff] %vm1410_vm9, %v7687_v50  ;;  %v3342_v5 = vsub.f32 0.0, %v7683_v33  ;;  %v3345_v14 = vsub.f32 0.0, %v7697_v36 }
 0x27c   : > { %v4948_v43 = vpop.eup %4947  ;;  %v2482_v26 = vmul.f32 2.0, %v4946_v39  ;;  %4967 = vpow2.f32 %v3352_v22  ;;  %4250 = vst.msk [vmem:[%s7002_s16 + $0xb8] sm:$0xff] %vm1410_vm9, %v7697_v36 }
 0x27d   : > { %v4950_v59 = vpop.eup %4949  ;;  %v4217_v0 = vadd.f32 -0.5, %v3186_v48  ;;  %v3218_v19 = vmul.f32 %v3186_v48, %v3186_v48  ;;  %v3184_v18 = vmul.f32 2.0, %v4948_v43  ;;  %4969 = vpow2.f32 %v2374_v60 }
 0x27e   : > { %v4952_v31 = vpop.eup %4951  ;;  %v4138_v57 = vadd.f32 -0.5, %v2482_v26  ;;  %v2610_v17 = vmul.f32 %v2482_v26, %v2482_v26  ;;  %v2485_v62 = vmul.f32 2.0, %v4950_v59  ;;  %4971 = vpow2.f32 %v3348_v52  ;;  %v8527_v26 = vld [vmem:[#allocation30_spill] sm:$0xff] }
 0x27f   : > { %v4954_v13 = vpop.eup %4953  ;;  %v3202_v20 = vadd.f32 %v4217_v0, %v7225_v25  ;;  %v3226_v30 = vmul.f32 %v3218_v19, %v7569_v15  ;;  %v4215_v9 = vadd.f32 -0.5, %v3184_v18  ;;  %v3216_v63 = vmul.f32 %v3184_v18, %v3184_v18 }
 0x280   : > { %v4956_v1 = vpop.eup %4955  ;;  %v2546_v44 = vadd.f32 %v4138_v57, %v8526_v35  ;;  %v2642_v4 = vmul.f32 %v2610_v17, %v6987_v54  ;;  %v4141_v12 = vadd.f32 -0.5, %v2485_v62  ;;  %v2613_v23 = vmul.f32 %v2485_v62, %v2485_v62 }
 0x281   : > { %v4958_v45 = vpop.eup %4957  ;;  %v3210_v55 = vmul.f32 4.0, %v3202_v20  ;;  %v3234_v38 = vsel %vm1345_vm10, %v3226_v30, %v4944_v3  ;;  %v3200_v42 = vadd.f32 %v4215_v9, %v7316_v7  ;;  %v3224_v22 = vmul.f32 %v3216_v63, %v7569_v15 }
 0x282   : > { %v4960_v60 = vpop.eup %4959  ;;  %v2578_v52 = vmul.f32 2.0, %v2546_v44  ;;  %v2674_v48 = vsel %vm1345_vm10, %v2642_v4, %v4946_v39  ;;  %v2549_v0 = vadd.f32 %v4141_v12, %v8527_v26  ;;  %v2645_v19 = vmul.f32 %v2613_v23, %v6987_v54 }
 0x283   : > { %v4962_v18 = vpop.eup %4961  ;;  %v3242_v57 = vsel %vm1344_vm11, %v3210_v55, %v3234_v38  ;;  %v3208_v17 = vmul.f32 4.0, %v3200_v42  ;;  %v3232_v3 = vsel %vm1345_vm10, %v3224_v22, %v4948_v43  ;;  %v3187_v62 = vmul.f32 2.0, %v4952_v31 }
 0x284   : > { %v4964_v20 = vpop.eup %4963  ;;  %3259 = vst.msk [vmem:[%s5935_s18 + $0x370] sm:$0xff] %vm1410_vm9, %v3242_v57  ;;  %v2706_v39 = vsel %vm1344_vm11, %v2578_v52, %v2674_v48  ;;  %v2581_v30 = vmul.f32 2.0, %v2549_v0  ;;  %v2677_v9 = vsel %vm1345_vm10, %v2645_v19, %v4950_v59  ;;  %v2483_v63 = vmul.f32 2.0, %v4954_v13  ;;  %v8528_v57 = vld [vmem:[#allocation31_spill] sm:$0xff] }
 0x285   : > { %v4966_v35 = vpop.eup %4965  ;;  %2771 = vst.msk [vmem:[%s5935_s18 + $0x260] sm:$0xff] %vm1410_vm9, %v2706_v39  ;;  %v3240_v44 = vsel %vm1344_vm11, %v3208_v17, %v3232_v3  ;;  %v4218_v43 = vadd.f32 -0.5, %v3187_v62  ;;  %v3219_v4 = vmul.f32 %v3187_v62, %v3187_v62  ;;  %v3185_v12 = vmul.f32 2.0, %v4956_v1 }
 0x286   : > { %v4968_v23 = vpop.eup %4967  ;;  %3257 = vst.msk [vmem:[%s5935_s18 + $0x360] sm:$0xff] %vm1410_vm9, %v3240_v44  ;;  %v2709_v55 = vsel %vm1344_vm11, %v2581_v30, %v2677_v9  ;;  %v4139_v38 = vadd.f32 -0.5, %v2483_v63  ;;  %v2611_v42 = vmul.f32 %v2483_v63, %v2483_v63  ;;  %v2422_v22 = vadd.f32 1.0, %v4958_v45 }
 0x287   : > { %v4970_v59 = vpop.eup %4969  ;;  %2774 = vst.msk [vmem:[%s5935_s18 + $0x278] sm:$0xff] %vm1410_vm9, %v2709_v55  ;;  %v3203_v52 = vadd.f32 %v4218_v43, %v7320_v56  ;;  %v3227_v48 = vmul.f32 %v3219_v4, %v7569_v15  ;;  %v4216_v26 = vadd.f32 -0.5, %v3185_v12  ;;  %v3217_v0 = vmul.f32 %v3185_v12, %v3185_v12 }
 0x288   : > { %v4972_v19 = vpop.eup %4971  ;;  %v2547_v17 = vadd.f32 %v4139_v38, %v8528_v57  ;;  %v2643_v3 = vmul.f32 %v2611_v42, %v6987_v54  ;;  %4973 = vrcp.f32 %v2422_v22  ;;  %v3364_v62 = vadd.f32 1.0, %v4960_v60  ;;  %v8529_v22 = vld [vmem:[#allocation37_spill] sm:$0xff] }
 0x289   : > { %v3211_v45 = vmul.f32 4.0, %v3203_v52  ;;  %v3235_v39 = vsel %vm1345_vm10, %v3227_v48, %v4952_v31  ;;  %v3201_v30 = vadd.f32 %v4216_v26, %v7358_v32  ;;  %v3225_v9 = vmul.f32 %v3217_v0, %v7569_v15 }
 0x28a   : > { %v2579_v63 = vmul.f32 2.0, %v2547_v17  ;;  %v2675_v44 = vsel %vm1345_vm10, %v2643_v3, %v4954_v13  ;;  %4975 = vrcp.f32 %v3364_v62  ;;  %v2420_v43 = vadd.f32 1.0, %v4962_v18 }
 0x28b   : > { %v3243_v60 = vsel %vm1344_vm11, %v3211_v45, %v3235_v39  ;;  %v3209_v4 = vmul.f32 4.0, %v3201_v30  ;;  %v3233_v31 = vsel %vm1345_vm10, %v3225_v9, %v4956_v1  ;;  %v3362_v12 = vadd.f32 1.0, %v4964_v20 }
 0x28c   : > { %3260 = vst.msk [vmem:[%s5935_s18 + $0x378] sm:$0xff] %vm1410_vm9, %v3243_v60  ;;  %v2707_v15 = vsel %vm1344_vm11, %v2579_v63, %v2675_v44  ;;  %4977 = vrcp.f32 %v2420_v43  ;;  %v2423_v13 = vadd.f32 1.0, %v4966_v35  ;;  %v3365_v18 = vadd.f32 1.0, %v4968_v23 }
 0x28d   : > { %2772 = vst.msk [vmem:[%s5935_s18 + $0x268] sm:$0xff] %vm1410_vm9, %v2707_v15  ;;  %v3241_v55 = vsel %vm1344_vm11, %v3209_v4, %v3233_v31  ;;  %4979 = vrcp.f32 %v3362_v12  ;;  %v2421_v38 = vadd.f32 1.0, %v4970_v59  ;;  %v3363_v42 = vadd.f32 1.0, %v4972_v19 }
 0x28e   : > { %3258 = vst.msk [vmem:[%s5935_s18 + $0x368] sm:$0xff] %vm1410_vm9, %v3241_v55  ;;  %v3378_v1 = vsel %vm1149_vm6, 119.0, %v8474_v47  ;;  %4981 = vrcp.f32 %v2423_v13  ;;  %v2384_v20 = vmul.f32 1.442695, %v2330_v8  ;;  %v2331_v35 = vsub.f32 0.0, %v7687_v50 }
 0x28f   : > { %4983 = vrcp.f32 %v3365_v18  ;;  %v3358_v23 = vmul.f32 1.442695, %v3344_v11  ;;  %v7791_v28 = vadd.f32 %v7443_v27, %v8529_v22  ;;  %v7795_v50 = vadd.f32 %v7540_v10, %v7291_v16  ;;  %v7815_v16 = vld [vmem:[%s8319_s8] ss:$0 sm:$0xff] }
 0x290   : > { %4985 = vrcp.f32 %v2421_v38  ;;  %v2380_v8 = vmul.f32 1.442695, %v2328_v49  ;;  %v7802_v11 = vadd.f32 %v7443_v27, %v7338_v40  ;;  %v3354_v59 = vmul.f32 1.442695, %v3342_v5 }
 0x291   : > { %4987 = vrcp.f32 %v3363_v42  ;;  %4179 = vst.msk [vmem:[%s5738_s0 + $0x2a8] sm:$0xff] %vm1410_vm9, %v7791_v28  ;;  %4248 = vst.msk [vmem:[%s7002_s16 + $0xa8] sm:$0xff] %vm1410_vm9, %v7795_v50  ;;  %v2386_v40 = vmul.f32 1.442695, %v2331_v35  ;;  %s5087_s16 = sshll.u32 %s5182_s1, 4  ;;  %s5088_s16 = int_to_ptr.vmem [resolvable:$false] %s5087_s16 }
 0x292   : > { %v7817_v10 = vpop.eup %4973  ;;  %4989 = vpow2.f32 %v2384_v20  ;;  %4184 = vst.msk [vmem:[%s5738_s0 + $0x2d0] sm:$0xff] %vm1410_vm9, %v7802_v11  ;;  %s5089_s2 = scalar_lea.vmem %s5088_s16, 6144  ;;  %p5090_p0 = scmp.lt.s32.totalorder %s7785_s20, %s5088_s16 }
 0x293   : > { %p5091_p1 = scmp.lt.s32.totalorder %s5089_s2, %s5083_s28 }
 0x295   : > { %p5092_p2 = por %p5091_p1, %p5090_p0 }
 0x297   : > { %p5093_p3 = pnand %p5092_p2, %p5086_p13 }
 0x299   : > { %5096 = shalt.err (!%p5093_p3)
}
 0x29a   : > { %s5097_s17 = scalar_lea.hbm %s7783_s26, 3072  ;;  %s5101_s1 = scalar_lea.hbm %s8321_s10, 6144 }
 0x29b   : > { %p5098_p4 = scmp.ne.s32.totalorder %s7783_s26, %s5097_s17  ;;  %p5102_p9 = scmp.lt.u32.totalorder %s7783_s26, %s8321_s10 }
 0x29c   : > { %p5103_p10 = scmp.lt.u32.totalorder %s5101_s1, %s5097_s17  ;;  %p5105_p12 = scmp.lt.u32.totalorder %s5097_s17, %s7783_s26 }
 0x29d   : > { %p5099_p7 = pnand %p5098_p4, %p5289_p5 }
 0x29e   : > { %p5104_p11 = por %p5103_p10, %p5102_p9 }
 0x29f   : > { %p5100_p8 = pneg %p5099_p7 }
 0x2a0   : > { %p5106_p13 = por %p5105_p12, %p5104_p11 }
 0x2a2   : > { %p5107_p0 = pnand %p5106_p13, %p5100_p8 }
 0x2a4   : > { %5110 = shalt.err (!%p5107_p0)
}
 0x2a5   : > { %s5183_s2 = smov 128   ;;  %s5184_s28 = smov 8   ;;  %v2488_v27 = vmul.f32 2.0, %v7817_v10  ;;  %v7852_v61 = vsel %vm1148_vm8, 59.0, %v3378_v1  ;;  %4991 = vpow2.f32 %v3358_v23  ;;  %v8531_v33 = vld [vmem:[#allocation8_spill] sm:$0xff]  ;;  %v4976_v49 = vpop.eup %4975  ;;  %v2329_v52 = vsub.f32 0.0, %v7791_v28 }
 0x2a6   : > { %s8530_s15 = scalar_lea.sflag [#allocation3], %s6923_s19  ;;  %v3464_v36 = vand.u32 3, %v8531_v33  ;;  %4993 = vpow2.f32 %v2380_v8  ;;  %v3360_v5 = vmul.f32 1.442695, %v3345_v14  ;;  %v7858_v48 = vadd.f32 %v7815_v16, %v7340_v24  ;;  %v4978_v57 = vpop.eup %4977  ;;  %s8532_s3 = smul.u32 48, %s6923_s19  ;;  %v8533_v45 = vld [vmem:[#allocation43_spill] sm:$0xff] }
 0x2a7   : > { %4524 = dma.vmem_to_hbm [thread:$0]  (%p5289_p5), %s7785_s20, 3072, %s7783_s26, %s8530_s15, %s5183_s2, %s5183_s2, %s5184_s28   ;;  %v4144_v26 = vadd.f32 -0.5, %v2488_v27  ;;  %v2616_v0 = vmul.f32 %v2488_v27, %v2488_v27  ;;  %v3382_v19 = vmul.f32 2.0, %v4976_v49  ;;  %4995 = vpow2.f32 %v3354_v59  ;;  %v4980_v24 = vpop.eup %4979 }
 0x2a8   : > { %4997 = vpow2.f32 %v2386_v40  ;;  %v3343_v17 = vsub.f32 0.0, %v7795_v50  ;;  %v2334_v3 = vsub.f32 0.0, %v7802_v11  ;;  %v3468_v62 = vshra.s32 %v8531_v33, 2  ;;  %s7865_s20 = scalar_lea.vmem [#allocation4], %s8532_s3  ;;  %v4982_v44 = vpop.eup %4981  ;;  %s4523_s3 = smul.u32 768, %s5272_s25 }
 0x2a9   : > { %3562 = vst.msk [vmem:[%s7865_s20] sm:$0xff] %vm1410_vm9, %v7858_v48  ;;  %v2552_v39 = vadd.f32 %v4144_v26, %v8533_v45  ;;  %v2648_v30 = vmul.f32 %v2616_v0, %v6987_v54  ;;  %v4237_v9 = vadd.f32 -0.5, %v3382_v19  ;;  %v3414_v63 = vmul.f32 %v3382_v19, %v3382_v19  ;;  %v4984_v31 = vpop.eup %4983  ;;  %s3792_s26 = sshll.u32 %s7865_s20, 4  ;;  %s8100_s26 = int_to_ptr.vmem [resolvable:$true] %s3792_s26 }
 0x2aa   : > { %v2486_v43 = vmul.f32 2.0, %v4978_v57  ;;  %v3380_v60 = vmul.f32 2.0, %v4980_v24  ;;  %4999 = vpow2.f32 %v3360_v5  ;;  %v3534_v4 = vsub.f32 0.0, %v7858_v48  ;;  %v7878_v55 = vpop.eup %4985  ;;  %v8540_v48 = vld [vmem:[#allocation11_spill] sm:$0xff]  ;;  %s8098_s17 = scalar_lea.hbm %s8322_s11, %s4523_s3  ;;  %s5111_s1 = scalar_lea.vmem %s8100_s26, 768 }
 0x2ab   : > { %v2584_v12 = vmul.f32 2.0, %v2552_v39  ;;  %v2680_v15 = vsel %vm1345_vm10, %v2648_v30, %v7817_v10  ;;  %v3398_v13 = vadd.f32 %v4237_v9, %v7054_v29  ;;  %v3422_v18 = vmul.f32 %v3414_v63, %v7852_v61  ;;  %v4988_v35 = vpop.eup %4987  ;;  %v8534_v29 = vld [vmem:[#allocation44_spill] sm:$0xff]  ;;  %p5112_p1 = scmp.ne.s32.totalorder %s8100_s26, %s5111_s1 }
 0x2ac   : > { %v4142_v38 = vadd.f32 -0.5, %v2486_v43  ;;  %v2614_v42 = vmul.f32 %v2486_v43, %v2486_v43  ;;  %v4235_v1 = vadd.f32 -0.5, %v3380_v60  ;;  %v3412_v20 = vmul.f32 %v3380_v60, %v3380_v60  ;;  %v4990_v59 = vpop.eup %4989  ;;  %v8535_v60 = vld [vmem:[#allocation32_spill] sm:$0xff] }
 0x2ad   : > { %v2712_v23 = vsel %vm1344_vm11, %v2584_v12, %v2680_v15  ;;  %v3406_v22 = vmul.f32 4.0, %v3398_v13  ;;  %v3430_v8 = vsel %vm1345_vm10, %v3422_v18, %v4976_v49  ;;  %v2489_v14 = vmul.f32 2.0, %v4982_v44  ;;  %p5113_p2 = pnand %p5112_p1, %p5289_p5 }
 0x2ae   : > { %2777 = vst.msk [vmem:[%s5935_s18 + $0x290] sm:$0xff] %vm1410_vm9, %v2712_v23  ;;  %v2550_v10 = vadd.f32 %v4142_v38, %v8534_v29  ;;  %v2646_v40 = vmul.f32 %v2614_v42, %v6987_v54  ;;  %v3396_v27 = vadd.f32 %v4235_v1, %v7093_v6  ;;  %v3420_v5 = vmul.f32 %v3412_v20, %v7852_v61 }
 0x2af   : > { %v4992_v26 = vpop.eup %4991  ;;  %v3438_v0 = vsel %vm1344_vm11, %v3406_v22, %v3430_v8  ;;  %v4145_v19 = vadd.f32 -0.5, %v2489_v14  ;;  %v2617_v45 = vmul.f32 %v2489_v14, %v2489_v14  ;;  %v3383_v39 = vmul.f32 2.0, %v4984_v31  ;;  %p5114_p3 = pneg %p5113_p2 }
 0x2b0   : > { %v4994_v49 = vpop.eup %4993  ;;  %3455 = vst.msk [vmem:[%s5935_s18 + $0x390] sm:$0xff] %vm1410_vm9, %v3438_v0  ;;  %v2582_v30 = vmul.f32 2.0, %v2550_v10  ;;  %v2678_v9 = vsel %vm1345_vm10, %v2646_v40, %v4978_v57  ;;  %v3404_v63 = vmul.f32 4.0, %v3396_v27  ;;  %v3428_v6 = vsel %vm1345_vm10, %v3420_v5, %v4980_v24 }
 0x2b1   : > { %v4996_v43 = vpop.eup %4995  ;;  %v2553_v12 = vadd.f32 %v4145_v19, %v8535_v60  ;;  %v2649_v15 = vmul.f32 %v2617_v45, %v6987_v54  ;;  %v4238_v13 = vadd.f32 -0.5, %v3383_v39  ;;  %v3415_v18 = vmul.f32 %v3383_v39, %v3383_v39 }
 0x2b2   : > { %v4998_v38 = vpop.eup %4997  ;;  %v2710_v42 = vsel %vm1344_vm11, %v2582_v30, %v2678_v9  ;;  %v3436_v1 = vsel %vm1344_vm11, %v3404_v63, %v3428_v6  ;;  %v2487_v57 = vmul.f32 2.0, %v7878_v55  ;;  %v3381_v20 = vmul.f32 2.0, %v4988_v35 }
 0x2b3   : > { %2775 = vst.msk [vmem:[%s5935_s18 + $0x280] sm:$0xff] %vm1410_vm9, %v2710_v42  ;;  %3453 = vst.msk [vmem:[%s5935_s18 + $0x380] sm:$0xff] %vm1410_vm9, %v3436_v1  ;;  %v2585_v24 = vmul.f32 2.0, %v2553_v12  ;;  %v2681_v23 = vsel %vm1345_vm10, %v2649_v15, %v4982_v44  ;;  %v3399_v22 = vadd.f32 %v4238_v13, %v7182_v58  ;;  %v3423_v8 = vmul.f32 %v3415_v18, %v7852_v61  ;;  %v8536_v44 = vld [vmem:[#allocation33_spill] sm:$0xff] }
 0x2b4   : > { %v5000_v14 = vpop.eup %4999  ;;  %v4143_v29 = vadd.f32 -0.5, %v2487_v57  ;;  %v2615_v10 = vmul.f32 %v2487_v57, %v2487_v57  ;;  %v4236_v40 = vadd.f32 -0.5, %v3381_v20  ;;  %v3413_v27 = vmul.f32 %v3381_v20, %v3381_v20  ;;  %v8539_v20 = vld [vmem:[#allocation38_spill] sm:$0xff] }
 0x2b5   : > { %v2713_v5 = vsel %vm1344_vm11, %v2585_v24, %v2681_v23  ;;  %v3407_v0 = vmul.f32 4.0, %v3399_v22  ;;  %v3431_v19 = vsel %vm1345_vm10, %v3423_v8, %v4984_v31  ;;  %v2426_v45 = vadd.f32 1.0, %v4990_v59 }
 0x2b6   : > { %2778 = vst.msk [vmem:[%s5935_s18 + $0x298] sm:$0xff] %vm1410_vm9, %v2713_v5  ;;  %v2551_v58 = vadd.f32 %v4143_v29, %v8536_v44  ;;  %v2647_v39 = vmul.f32 %v2615_v10, %v6987_v54  ;;  %v3397_v30 = vadd.f32 %v4236_v40, %v7221_v37  ;;  %v3421_v9 = vmul.f32 %v3413_v27, %v7852_v61 }
 0x2b7   : > { %v3439_v63 = vsel %vm1344_vm11, %v3407_v0, %v3431_v19  ;;  %5001 = vrcp.f32 %v2426_v45  ;;  %v3368_v6 = vadd.f32 1.0, %v4992_v26  ;;  %v2424_v60 = vadd.f32 1.0, %v4994_v49 }
 0x2b8   : > { %3456 = vst.msk [vmem:[%s5935_s18 + $0x398] sm:$0xff] %vm1410_vm9, %v3439_v63  ;;  %v2583_v31 = vmul.f32 2.0, %v2551_v58  ;;  %v2679_v59 = vsel %vm1345_vm10, %v2647_v39, %v7878_v55  ;;  %v3405_v12 = vmul.f32 4.0, %v3397_v30  ;;  %v3429_v37 = vsel %vm1345_vm10, %v3421_v9, %v4988_v35  ;;  %v7947_v35 = vld [vmem:[%s8317_s6 + $0x2] ss:$0 sm:$0xff] }
 0x2b9   : > { %5003 = vrcp.f32 %v3368_v6  ;;  %v3366_v15 = vadd.f32 1.0, %v4996_v43  ;;  %v2427_v13 = vadd.f32 1.0, %v4998_v38  ;;  %v3369_v18 = vadd.f32 1.0, %v5000_v14  ;;  %v8537_v38 = vld [vmem:[#allocation14_spill] sm:$0xff] }
 0x2ba   : > { %v2711_v26 = vsel %vm1344_vm11, %v2583_v31, %v2679_v59  ;;  %v3437_v49 = vsel %vm1344_vm11, %v3405_v12, %v3429_v37  ;;  %5005 = vrcp.f32 %v2424_v60  ;;  %v2382_v42 = vmul.f32 1.442695, %v2329_v52  ;;  %v8541_v31 = vld [vmem:[#allocation35_spill] sm:$0xff] }
 0x2bb   : > { %2776 = vst.msk [vmem:[%s5935_s18 + $0x288] sm:$0xff] %vm1410_vm9, %v2711_v26  ;;  %3454 = vst.msk [vmem:[%s5935_s18 + $0x388] sm:$0xff] %vm1410_vm9, %v3437_v49  ;;  %5007 = vrcp.f32 %v3366_v15  ;;  %v3356_v55 = vmul.f32 1.442695, %v3343_v17  ;;  %v2278_v43 = vadd.f32 %v7947_v35, %v7352_v2  ;;  %v2289_v28 = vadd.f32 %v7947_v35, %v8537_v38  ;;  %v8538_v17 = vld [vmem:[#allocation12_spill] sm:$0xff] }
 0x2bc   : > { %5009 = vrcp.f32 %v2427_v13  ;;  %v2392_v52 = vmul.f32 1.442695, %v2334_v3  ;;  %v3536_v50 = vmul.f32 1.442695, %v3534_v4  ;;  %v3531_v1 = vadd.f32 %v7815_v16, %v8538_v17  ;;  %v7973_v16 = vld [vmem:[%s8319_s8 + $0x1] ss:$0 sm:$0xff] }
 0x2bd   : > { %5011 = vrcp.f32 %v3369_v18  ;;  %v2332_v57 = vsub.f32 0.0, %v2278_v43  ;;  %4182 = vst.msk [vmem:[%s5738_s0 + $0x2c0] sm:$0xff] %vm1410_vm9, %v2278_v43  ;;  %v2335_v2 = vsub.f32 0.0, %v2289_v28  ;;  %4185 = vst.msk [vmem:[%s5738_s0 + $0x2d8] sm:$0xff] %vm1410_vm9, %v2289_v28  ;;  %v2281_v24 = vadd.f32 %v7947_v35, %v8539_v20 }
 0x2be   : > { %5013 = vpow2.f32 %v2382_v42  ;;  %v3470_v11 = vcvt.s32.f32 %v3468_v62  ;;  %v3469_v3 = vshra.s32 %v8540_v48, 2  ;;  %v3535_v4 = vsub.f32 0.0, %v3531_v1  ;;  %3563 = vst.msk [vmem:[%s7865_s20 + $0x8] sm:$0xff] %vm1410_vm9, %v3531_v1 }
 0x2bf   : > { %5015 = vpow2.f32 %v3356_v55  ;;  %v2388_v23 = vmul.f32 1.442695, %v2332_v57  ;;  %v2394_v22 = vmul.f32 1.442695, %v2335_v2  ;;  %v2333_v8 = vsub.f32 0.0, %v2281_v24  ;;  %4183 = vst.msk [vmem:[%s5738_s0 + $0x2c8] sm:$0xff] %vm1410_vm9, %v2281_v24 }
 0x2c0   : > { %5017 = vpow2.f32 %v2392_v52  ;;  %v3538_v14 = vmul.f32 1.442695, %v3535_v4  ;;  %v2302_v62 = vadd.f32 %v7947_v35, %v7396_v51  ;;  %v7981_v10 = vcvt.s32.f32 %v3464_v36 }
 0x2c1   : > { %v5002_v29 = vpop.eup %5001  ;;  %5019 = vpow2.f32 %v3536_v50  ;;  %v2390_v40 = vmul.f32 1.442695, %v2333_v8  ;;  %v7985_v27 = vadd.f32 %v7973_v16, %v7438_v34  ;;  %v7989_v0 = vsel %vm700_vm5, %v3470_v11, 0.0  ;;  %v8542_v50 = vld [vmem:[#allocation36_spill] sm:$0xff] }
 0x2c2   : > { %v2492_v5 = vmul.f32 2.0, %v5002_v29  ;;  %5021 = vpow2.f32 %v2388_v23  ;;  %v2338_v19 = vsub.f32 0.0, %v2302_v62  ;;  %4188 = vst.msk [vmem:[%s5738_s0 + $0x2f0] sm:$0xff] %vm1410_vm9, %v2302_v62  ;;  %v3465_v33 = vand.u32 3, %v8540_v48 }
 0x2c3   : > { %v5004_v51 = vpop.eup %5003  ;;  %5023 = vpow2.f32 %v2394_v22  ;;  %v7994_v36 = vcvt.s32.f32 %v3469_v3  ;;  %4264 = vst.msk [vmem:[%s7865_s20 + $0x10] sm:$0xff] %vm1410_vm9, %v7985_v27  ;;  %v8001_v34 = vadd.f32 %v7947_v35, %v7471_v46  ;;  %v3622_v6 = vsub.f32 0.0, %v7985_v27 }
 0x2c4   : > { %v5006_v45 = vpop.eup %5005  ;;  %v4148_v44 = vadd.f32 -0.5, %v2492_v5  ;;  %v2620_v58 = vmul.f32 %v2492_v5, %v2492_v5  ;;  %v3386_v39 = vmul.f32 2.0, %v5004_v51  ;;  %5025 = vpow2.f32 %v3538_v14 }
 0x2c5   : > { %v5008_v30 = vpop.eup %5007  ;;  %v2490_v9 = vmul.f32 2.0, %v5006_v45  ;;  %5027 = vpow2.f32 %v2390_v40  ;;  %v8003_v63 = vmul.f32 1.442695, %v2338_v19  ;;  %4186 = vst.msk [vmem:[%s5738_s0 + $0x2e0] sm:$0xff] %vm1410_vm9, %v8001_v34  ;;  %v8543_v40 = vld [vmem:[#allocation40_spill] sm:$0xff]  ;;  %v3467_v27 = vcvt.s32.f32 %v3465_v33 }
 0x2c6   : > { %v5010_v60 = vpop.eup %5009  ;;  %v2556_v59 = vadd.f32 %v4148_v44, %v8541_v31  ;;  %v2652_v46 = vmul.f32 %v2620_v58, %v6987_v54  ;;  %v4241_v12 = vadd.f32 -0.5, %v3386_v39  ;;  %v3418_v37 = vmul.f32 %v3386_v39, %v3386_v39 }
 0x2c7   : > { %v5012_v15 = vpop.eup %5011  ;;  %v4146_v13 = vadd.f32 -0.5, %v2490_v9  ;;  %v2618_v18 = vmul.f32 %v2490_v9, %v2490_v9  ;;  %v3384_v26 = vmul.f32 2.0, %v5008_v30  ;;  %v2493_v49 = vmul.f32 2.0, %v5010_v60 }
 0x2c8   : > { %v5014_v42 = vpop.eup %5013  ;;  %v2588_v55 = vmul.f32 2.0, %v2556_v59  ;;  %v2684_v43 = vsel %vm1345_vm10, %v2652_v46, %v5002_v29  ;;  %v3402_v38 = vadd.f32 %v4241_v12, %v7225_v25  ;;  %v3426_v28 = vmul.f32 %v3418_v37, %v7852_v61 }
 0x2c9   : > { %v5016_v52 = vpop.eup %5015  ;;  %v2554_v17 = vadd.f32 %v4146_v13, %v8542_v50  ;;  %v2650_v1 = vmul.f32 %v2618_v18, %v6987_v54  ;;  %v4239_v57 = vadd.f32 -0.5, %v3384_v26  ;;  %v3416_v2 = vmul.f32 %v3384_v26, %v3384_v26  ;;  %v4271_v50 = vld [vmem:[%s8319_s8 + $0x2] ss:$0 sm:$0xff] }
 0x2ca   : > { %v5018_v20 = vpop.eup %5017  ;;  %v2716_v24 = vsel %vm1344_vm11, %v2588_v55, %v2684_v43  ;;  %v3410_v11 = vmul.f32 4.0, %v3402_v38  ;;  %v3434_v3 = vsel %vm1345_vm10, %v3426_v28, %v5004_v51  ;;  %v4149_v4 = vadd.f32 -0.5, %v2493_v49 }
 0x2cb   : > { %v5020_v25 = vpop.eup %5019  ;;  %2781 = vst.msk [vmem:[%s5935_s18 + $0x2b0] sm:$0xff] %vm1410_vm9, %v2716_v24  ;;  %v2586_v23 = vmul.f32 2.0, %v2554_v17  ;;  %v2682_v22 = vsel %vm1345_vm10, %v2650_v1, %v5006_v45  ;;  %v3400_v8 = vadd.f32 %v4239_v57, %v7316_v7  ;;  %v3424_v14 = vmul.f32 %v3416_v2, %v7852_v61 }
 0x2cc   : > { %v5022_v62 = vpop.eup %5021  ;;  %v3442_v29 = vsel %vm1344_vm11, %v3410_v11, %v3434_v3  ;;  %v2557_v5 = vadd.f32 %v4149_v4, %v8543_v40  ;;  %v2621_v19 = vmul.f32 %v2493_v49, %v2493_v49  ;;  %v3387_v51 = vmul.f32 2.0, %v5012_v15  ;;  %v8545_v11 = vld [vmem:[#allocation39_spill] sm:$0xff] }
 0x2cd   : > { %v5024_v44 = vpop.eup %5023  ;;  %3459 = vst.msk [vmem:[%s5935_s18 + $0x3b0] sm:$0xff] %vm1410_vm9, %v3442_v29  ;;  %v2714_v58 = vsel %vm1344_vm11, %v2586_v23, %v2682_v22  ;;  %v3408_v45 = vmul.f32 4.0, %v3400_v8  ;;  %v3432_v7 = vsel %vm1345_vm10, %v3424_v14, %v5008_v30  ;;  %v2425_v39 = vadd.f32 1.0, %v5014_v42  ;;  %v8546_v22 = vld [vmem:[#allocation17_spill] sm:$0xff] }
 0x2ce   : > { %v5026_v9 = vpop.eup %5025  ;;  %2779 = vst.msk [vmem:[%s5935_s18 + $0x2a0] sm:$0xff] %vm1410_vm9, %v2714_v58  ;;  %v2589_v31 = vmul.f32 2.0, %v2557_v5  ;;  %v2653_v59 = vmul.f32 %v2621_v19, %v6987_v54  ;;  %v4242_v46 = vadd.f32 -0.5, %v3387_v51  ;;  %v3419_v12 = vmul.f32 %v3387_v51, %v3387_v51 }
 0x2cf   : > { %v5028_v37 = vpop.eup %5027  ;;  %v3440_v13 = vsel %vm1344_vm11, %v3408_v45, %v3432_v7  ;;  %5029 = vrcp.f32 %v2425_v39  ;;  %v3367_v18 = vadd.f32 1.0, %v5016_v52  ;;  %v2430_v26 = vadd.f32 1.0, %v5018_v20 }
 0x2d0   : > { %3457 = vst.msk [vmem:[%s5935_s18 + $0x3a0] sm:$0xff] %vm1410_vm9, %v3440_v13  ;;  %v2685_v30 = vsel %vm1345_vm10, %v2653_v59, %v5010_v60  ;;  %v3403_v49 = vadd.f32 %v4242_v46, %v7320_v56  ;;  %v3427_v42 = vmul.f32 %v3419_v12, %v7852_v61  ;;  %v3540_v55 = vadd.f32 1.0, %v5020_v25 }
 0x2d1   : > { %v2717_v43 = vsel %vm1344_vm11, %v2589_v31, %v2685_v30  ;;  %5031 = vrcp.f32 %v3367_v18  ;;  %v2428_v38 = vadd.f32 1.0, %v5022_v62  ;;  %v2431_v28 = vadd.f32 1.0, %v5024_v44 }
 0x2d2   : > { %2782 = vst.msk [vmem:[%s5935_s18 + $0x2b8] sm:$0xff] %vm1410_vm9, %v2717_v43  ;;  %v3411_v52 = vmul.f32 4.0, %v3403_v49  ;;  %v3435_v60 = vsel %vm1345_vm10, %v3427_v42, %v5012_v15  ;;  %5033 = vrcp.f32 %v2430_v26  ;;  %v3541_v56 = vadd.f32 1.0, %v5026_v9  ;;  %v8544_v15 = vld [vmem:[#allocation13_spill] sm:$0xff] }
 0x2d3   : > { %5035 = vrcp.f32 %v3540_v55  ;;  %v2429_v17 = vadd.f32 1.0, %v5028_v37  ;;  %v2336_v1 = vsub.f32 0.0, %v8001_v34  ;;  %v2305_v57 = vadd.f32 %v7947_v35, %v7475_v21 }
 0x2d4   : > { %v3443_v2 = vsel %vm1344_vm11, %v3411_v52, %v3435_v60  ;;  %5037 = vrcp.f32 %v2428_v38  ;;  %v3619_v20 = vadd.f32 %v7973_v16, %v8544_v15  ;;  %v2297_v24 = vadd.f32 %v7947_v35, %v7489_v53 }
 0x2d5   : > { %3460 = vst.msk [vmem:[%s5935_s18 + $0x3b8] sm:$0xff] %vm1410_vm9, %v3443_v2  ;;  %5039 = vrcp.f32 %v2431_v28  ;;  %v3624_v21 = vmul.f32 1.442695, %v3622_v6  ;;  %v2339_v34 = vsub.f32 0.0, %v2305_v57  ;;  %4189 = vst.msk [vmem:[%s5738_s0 + $0x2f8] sm:$0xff] %vm1410_vm9, %v2305_v57  ;;  %v8074_v3 = vadd.f32 %v4271_v50, %v8545_v11 }
 0x2d6   : > { %5041 = vrcp.f32 %v3541_v56  ;;  %v2396_v16 = vmul.f32 1.442695, %v2336_v1  ;;  %v3623_v4 = vsub.f32 0.0, %v3619_v20  ;;  %4265 = vst.msk [vmem:[%s7865_s20 + $0x18] sm:$0xff] %vm1410_vm9, %v3619_v20  ;;  %v2337_v53 = vsub.f32 0.0, %v2297_v24  ;;  %4187 = vst.msk [vmem:[%s5738_s0 + $0x2e8] sm:$0xff] %vm1410_vm9, %v2297_v24 }
 0x2d7   : > { %v3544_v35 = vsel %vm1149_vm6, 90.0, %v8474_v47  ;;  %5043 = vrcp.f32 %v2429_v17  ;;  %v2402_v6 = vmul.f32 1.442695, %v2339_v34  ;;  %4275 = vst.msk [vmem:[%s7865_s20 + $0x20] sm:$0xff] %vm1410_vm9, %v8074_v3  ;;  %v3473_v25 = vsel %vm700_vm5, %v7994_v36, 0.0 }
 0x2d8   : > { %5045 = vpow2.f32 %v8003_v63  ;;  %v3626_v23 = vmul.f32 1.442695, %v3623_v4  ;;  %v8093_v8 = vadd.f32 %v4271_v50, %v8546_v22  ;;  %v2398_v33 = vmul.f32 1.442695, %v2337_v53 }
 0x2d9   : > { %v5030_v48 = vpop.eup %5029  ;;  %5047 = vpow2.f32 %v3624_v21  ;;  %v8111_v14 = vsel %vm699_vm7, %v7981_v10, %v7989_v0  ;;  %v8115_v62 = vsel %vm1148_vm8, 116.0, %v3544_v35  ;;  %v8119_v29 = vsel %vm699_vm7, %v3467_v27, %v3473_v25 }
 0x2da   : > { %v2491_v36 = vmul.f32 2.0, %v5030_v48  ;;  %5049 = vpow2.f32 %v2396_v16  ;;  %4276 = vst.msk [vmem:[%s7865_s20 + $0x28] sm:$0xff] %vm1410_vm9, %v8093_v8  ;;  %s5185_s20 = smov [#allocation4]  }
 0x2db   : > { %v8105_v63 = vpop.eup %5031  ;;  %5051 = vpow2.f32 %v2402_v6  ;;  %s5115_s16 = sshll.u32 %s5185_s20, 4  ;;  %s5116_s16 = int_to_ptr.vmem [resolvable:$false] %s5115_s16 }
 0x2dc   : > { %s5117_s15 = scalar_lea.vmem %s5116_s16, 1536  ;;  %p5118_p4 = scmp.lt.s32.totalorder %s8100_s26, %s5116_s16 }
 0x2dd   : > { %p5119_p7 = scmp.lt.s32.totalorder %s5117_s15, %s5111_s1 }
 0x2df   : > { %p5120_p8 = por %p5119_p7, %p5118_p4 }
 0x2e1   : > { %p5121_p9 = pnand %p5120_p8, %p5114_p3 }
 0x2e3   : > { %5124 = shalt.err (!%p5121_p9)
}
 0x2e4   : > { %s5125_s3 = scalar_lea.hbm %s8098_s17, 768  ;;  %s5129_s20 = scalar_lea.hbm %s8322_s11, 1536 }
 0x2e5   : > { %p5126_p10 = scmp.ne.s32.totalorder %s8098_s17, %s5125_s3  ;;  %p5130_p13 = scmp.lt.u32.totalorder %s8098_s17, %s8322_s11 }
 0x2e6   : > { %p5131_p0 = scmp.lt.u32.totalorder %s5129_s20, %s5125_s3  ;;  %p5133_p2 = scmp.lt.u32.totalorder %s5125_s3, %s8098_s17 }
 0x2e7   : > { %p5127_p11 = pnand %p5126_p10, %p5289_p5 }
 0x2e8   : > { %p5132_p1 = por %p5131_p0, %p5130_p13 }
 0x2e9   : > { %p5128_p12 = pneg %p5127_p11 }
 0x2ea   : > { %p5134_p3 = por %p5133_p2, %p5132_p1 }
 0x2ec   : > { %p5135_p4 = pnand %p5134_p3, %p5128_p12 }
 0x2ee   : > { %5138 = shalt.err (!%p5135_p4)
}
 0x2ef   : > { %s8547_s1 = scalar_lea.sflag [#allocation5], %s6923_s19  ;;  %v5034_v10 = vpop.eup %5033  ;;  %v4147_v0 = vadd.f32 -0.5, %v2491_v36  ;;  %v2619_v40 = vmul.f32 %v2491_v36, %v2491_v36  ;;  %v3385_v5 = vmul.f32 2.0, %v8105_v63  ;;  %5053 = vpow2.f32 %v3626_v23  ;;  %v8548_v7 = vld [vmem:[#allocation41_spill] sm:$0xff]  ;;  %v8549_v38 = vld [vmem:[#allocation42_spill] sm:$0xff] }
 0x2f0   : > { %4525 = dma.vmem_to_hbm [thread:$0]  (%p5289_p5), %s8100_s26, 768, %s8098_s17, %s8547_s1, %s5183_s2, %s5183_s2, %s5184_s28   ;;  %v5036_v19 = vpop.eup %5035  ;;  %v2496_v51 = vmul.f32 2.0, %v5034_v10  ;;  %5055 = vpow2.f32 %v2398_v33  ;;  %v3711_v44 = vsub.f32 0.0, %v8074_v3  ;;  %v3712_v58 = vsub.f32 0.0, %v8093_v8  ;;  %v8550_v11 = vld [vmem:[#allocation45_spill] sm:$0xff]  ;;  %v8553_v3 = vld [vmem:[#allocation50_spill] sm:$0xff] }
 0x2f1   : > { %v5038_v45 = vpop.eup %5037  ;;  %v2555_v39 = vadd.f32 %v4147_v0, %v8548_v7  ;;  %v2651_v9 = vmul.f32 %v2619_v40, %v6987_v54  ;;  %v4240_v31 = vadd.f32 -0.5, %v3385_v5  ;;  %v3417_v59 = vmul.f32 %v3385_v5, %v3385_v5  ;;  %v8551_v7 = vld [vmem:[#allocation46_spill] sm:$0xff] }
 0x2f2   : > { %v5040_v46 = vpop.eup %5039  ;;  %v4152_v12 = vadd.f32 -0.5, %v2496_v51  ;;  %v2624_v37 = vmul.f32 %v2496_v51, %v2496_v51  ;;  %v3546_v13 = vmul.f32 2.0, %v5036_v19  ;;  %v2494_v18 = vmul.f32 2.0, %v5038_v45 }
 0x2f3   : > { %v5042_v26 = vpop.eup %5041  ;;  %v2587_v30 = vmul.f32 2.0, %v2555_v39  ;;  %v2683_v49 = vsel %vm1345_vm10, %v2651_v9, %v5030_v48  ;;  %v3401_v42 = vadd.f32 %v4240_v31, %v7358_v32  ;;  %v3425_v55 = vmul.f32 %v3417_v59, %v7852_v61 }
 0x2f4   : > { %v8157_v43 = vpop.eup %5043  ;;  %v2560_v28 = vadd.f32 %v4152_v12, %v8549_v38  ;;  %v2656_v52 = vmul.f32 %v2624_v37, %v6987_v54  ;;  %v4253_v60 = vadd.f32 -0.5, %v3546_v13  ;;  %v3554_v56 = vmul.f32 %v3546_v13, %v3546_v13 }
 0x2f5   : > { %v5046_v50 = vpop.eup %5045  ;;  %v2715_v17 = vsel %vm1344_vm11, %v2587_v30, %v2683_v49  ;;  %v3409_v1 = vmul.f32 4.0, %v3401_v42  ;;  %v3433_v32 = vsel %vm1345_vm10, %v3425_v55, %v8105_v63  ;;  %v4150_v57 = vadd.f32 -0.5, %v2494_v18  ;;  %v8552_v55 = vld [vmem:[#allocation49_spill] sm:$0xff] }
 0x2f6   : > { %v5048_v61 = vpop.eup %5047  ;;  %2780 = vst.msk [vmem:[%s5935_s18 + $0x2a8] sm:$0xff] %vm1410_vm9, %v2715_v17  ;;  %v2592_v2 = vmul.f32 2.0, %v2560_v28  ;;  %v2688_v15 = vsel %vm1345_vm10, %v2656_v52, %v5034_v10  ;;  %v3550_v20 = vadd.f32 %v4253_v60, %v8111_v14  ;;  %v3556_v24 = vmul.f32 %v3554_v56, %v8115_v62 }
 0x2f7   : > { %v5050_v21 = vpop.eup %5049  ;;  %v3441_v34 = vsel %vm1344_vm11, %v3409_v1, %v3433_v32  ;;  %v2558_v16 = vadd.f32 %v4150_v57, %v8550_v11  ;;  %v2622_v4 = vmul.f32 %v2494_v18, %v2494_v18  ;;  %v2497_v53 = vmul.f32 2.0, %v5040_v46 }
 0x2f8   : > { %v5052_v35 = vpop.eup %5051  ;;  %3458 = vst.msk [vmem:[%s5935_s18 + $0x3a8] sm:$0xff] %vm1410_vm9, %v3441_v34  ;;  %v2720_v27 = vsel %vm1344_vm11, %v2592_v2, %v2688_v15  ;;  %v3552_v6 = vmul.f32 8.0, %v3550_v20  ;;  %v3558_v25 = vsel %vm1345_vm10, %v3556_v24, %v5036_v19  ;;  %v3547_v23 = vmul.f32 2.0, %v5042_v26 }
 0x2f9   : > { %v5054_v22 = vpop.eup %5053  ;;  %2785 = vst.msk [vmem:[%s5935_s18 + $0x2d0] sm:$0xff] %vm1410_vm9, %v2720_v27  ;;  %v2590_v48 = vmul.f32 2.0, %v2558_v16  ;;  %v2654_v33 = vmul.f32 %v2622_v4, %v6987_v54  ;;  %v4153_v36 = vadd.f32 -0.5, %v2497_v53  ;;  %v2625_v63 = vmul.f32 %v2497_v53, %v2497_v53 }
 0x2fa   : > { %v5056_v10 = vpop.eup %5055  ;;  %v3560_v0 = vsel %vm1344_vm11, %v3552_v6, %v3558_v25  ;;  %v4254_v40 = vadd.f32 -0.5, %v3547_v23  ;;  %v3555_v5 = vmul.f32 %v3547_v23, %v3547_v23  ;;  %v2495_v51 = vmul.f32 2.0, %v8157_v43 }
 0x2fb   : > { %3564 = vst.msk [vmem:[%s5935_s18 + $0x3c0] sm:$0xff] %vm1410_vm9, %v3560_v0  ;;  %v2686_v19 = vsel %vm1345_vm10, %v2654_v33, %v5038_v45  ;;  %v2561_v39 = vadd.f32 %v4153_v36, %v8551_v7  ;;  %v2657_v9 = vmul.f32 %v2625_v63, %v6987_v54  ;;  %v2434_v31 = vadd.f32 1.0, %v5046_v50 }
 0x2fc   : > { %v2718_v59 = vsel %vm1344_vm11, %v2590_v48, %v2686_v19  ;;  %v3551_v12 = vadd.f32 %v4254_v40, %v8119_v29  ;;  %v3557_v37 = vmul.f32 %v3555_v5, %v8115_v62  ;;  %v4151_v13 = vadd.f32 -0.5, %v2495_v51  ;;  %v8554_v5 = vld [vmem:[#allocation54_spill] sm:$0xff] }
 0x2fd   : > { %2783 = vst.msk [vmem:[%s5935_s18 + $0x2c0] sm:$0xff] %vm1410_vm9, %v2718_v59  ;;  %v2593_v18 = vmul.f32 2.0, %v2561_v39  ;;  %v2689_v45 = vsel %vm1345_vm10, %v2657_v9, %v5040_v46  ;;  %v2623_v30 = vmul.f32 %v2495_v51, %v2495_v51  ;;  %5057 = vrcp.f32 %v2434_v31  ;;  %v8555_v59 = vld [vmem:[#allocation55_spill] sm:$0xff] }
 0x2fe   : > { %v3553_v49 = vmul.f32 8.0, %v3551_v12  ;;  %v3559_v42 = vsel %vm1345_vm10, %v3557_v37, %v5042_v26  ;;  %v2559_v38 = vadd.f32 %v4151_v13, %v8552_v55  ;;  %v3628_v28 = vadd.f32 1.0, %v5048_v61 }
 0x2ff   : > { %v2721_v62 = vsel %vm1344_vm11, %v2593_v18, %v2689_v45  ;;  %v2655_v52 = vmul.f32 %v2623_v30, %v6987_v54  ;;  %v2432_v60 = vadd.f32 1.0, %v5050_v21  ;;  %v2435_v56 = vadd.f32 1.0, %v5052_v35 }
 0x300   : > { %2786 = vst.msk [vmem:[%s5935_s18 + $0x2d8] sm:$0xff] %vm1410_vm9, %v2721_v62  ;;  %v3561_v46 = vsel %vm1344_vm11, %v3553_v49, %v3559_v42  ;;  %v2591_v50 = vmul.f32 2.0, %v2559_v38  ;;  %5059 = vrcp.f32 %v3628_v28  ;;  %v3629_v17 = vadd.f32 1.0, %v5054_v22 }
 0x301   : > { %3565 = vst.msk [vmem:[%s5935_s18 + $0x3c8] sm:$0xff] %vm1410_vm9, %v3561_v46  ;;  %v2687_v26 = vsel %vm1345_vm10, %v2655_v52, %v8157_v43  ;;  %5061 = vrcp.f32 %v2432_v60  ;;  %v2433_v32 = vadd.f32 1.0, %v5056_v10  ;;  %v3713_v57 = vmul.f32 1.442695, %v3711_v44 }
 0x302   : > { %v2719_v1 = vsel %vm1344_vm11, %v2591_v50, %v2687_v26  ;;  %5063 = vrcp.f32 %v2435_v56  ;;  %v3715_v61 = vmul.f32 1.442695, %v3712_v58  ;;  %v3632_v43 = vsel %vm1149_vm6, 198.0, %v8474_v47 }
 0x303   : > { %2784 = vst.msk [vmem:[%s5935_s18 + $0x2c8] sm:$0xff] %vm1410_vm9, %v2719_v1  ;;  %5065 = vrcp.f32 %v3629_v17  ;;  %v3633_v58 = vsel %vm1148_vm8, 156.0, %v3632_v43 }
 0x304   : > { %5067 = vrcp.f32 %v2433_v32 }
 0x305   : > { %5069 = vpow2.f32 %v3713_v57  ;;  %v8556_v57 = vld [vmem:[#allocation56_spill] sm:$0xff] }
 0x306   : > { %5071 = vpow2.f32 %v3715_v61 }
 0x307   : > { %v5058_v2 = vpop.eup %5057 }
 0x308   : > { %v2500_v15 = vmul.f32 2.0, %v5058_v2 }
 0x30a   : > { %v5060_v20 = vpop.eup %5059  ;;  %v4156_v24 = vadd.f32 -0.5, %v2500_v15  ;;  %v2628_v21 = vmul.f32 %v2500_v15, %v2500_v15 }
 0x30b   : > { %v5062_v34 = vpop.eup %5061  ;;  %v3634_v11 = vmul.f32 2.0, %v5060_v20 }
 0x30c   : > { %v5064_v16 = vpop.eup %5063  ;;  %v2564_v44 = vadd.f32 %v4156_v24, %v8553_v3  ;;  %v2660_v8 = vmul.f32 %v2628_v21, %v6987_v54  ;;  %v2498_v4 = vmul.f32 2.0, %v5062_v34  ;;  %v3721_v21 = vsel %vm1149_vm6, 326.0, %v8474_v47 }
 0x30d   : > { %v5066_v53 = vpop.eup %5065  ;;  %v4262_v35 = vadd.f32 -0.5, %v3634_v11  ;;  %v3642_v27 = vmul.f32 %v3634_v11, %v3634_v11  ;;  %v2501_v6 = vmul.f32 2.0, %v5064_v16 }
 0x30e   : > { %v2596_v25 = vmul.f32 2.0, %v2564_v44  ;;  %v2692_v23 = vsel %vm1345_vm10, %v2660_v8, %v5058_v2  ;;  %v4154_v22 = vadd.f32 -0.5, %v2498_v4  ;;  %v2626_v48 = vmul.f32 %v2498_v4, %v2498_v4  ;;  %v5068_v0 = vpop.eup %5067 }
 0x30f   : > { %v3638_v33 = vadd.f32 %v4262_v35, %v8111_v14  ;;  %v3644_v36 = vmul.f32 %v3642_v27, %v3633_v58  ;;  %v4157_v63 = vadd.f32 -0.5, %v2501_v6  ;;  %v2629_v10 = vmul.f32 %v2501_v6, %v2501_v6  ;;  %v5070_v39 = vpop.eup %5069 }
 0x310   : > { %v2724_v40 = vsel %vm1344_vm11, %v2596_v25, %v2692_v23  ;;  %v2562_v51 = vadd.f32 %v4154_v22, %v8554_v5  ;;  %v2658_v19 = vmul.f32 %v2626_v48, %v6987_v54  ;;  %v3635_v7 = vmul.f32 2.0, %v5066_v53  ;;  %v5072_v13 = vpop.eup %5071 }
 0x311   : > { %2789 = vst.msk [vmem:[%s5935_s18 + $0x2f0] sm:$0xff] %vm1410_vm9, %v2724_v40  ;;  %v3640_v9 = vmul.f32 8.0, %v3638_v33  ;;  %v3646_v31 = vsel %vm1345_vm10, %v3644_v36, %v5060_v20  ;;  %v2565_v12 = vadd.f32 %v4157_v63, %v8555_v59  ;;  %v2661_v37 = vmul.f32 %v2629_v10, %v6987_v54 }
 0x312   : > { %v2594_v18 = vmul.f32 2.0, %v2562_v51  ;;  %v2690_v45 = vsel %vm1345_vm10, %v2658_v19, %v5062_v34  ;;  %v4263_v30 = vadd.f32 -0.5, %v3635_v7  ;;  %v3643_v49 = vmul.f32 %v3635_v7, %v3635_v7 }
 0x313   : > { %v3648_v42 = vsel %vm1344_vm11, %v3640_v9, %v3646_v31  ;;  %v2597_v55 = vmul.f32 2.0, %v2565_v12  ;;  %v2693_v38 = vsel %vm1345_vm10, %v2661_v37, %v5064_v16  ;;  %v2499_v28 = vmul.f32 2.0, %v5068_v0 }
 0x314   : > { %3653 = vst.msk [vmem:[%s5935_s18 + $0x3d0] sm:$0xff] %vm1410_vm9, %v3648_v42  ;;  %v2722_v62 = vsel %vm1344_vm11, %v2594_v18, %v2690_v45  ;;  %v3639_v52 = vadd.f32 %v4263_v30, %v8119_v29  ;;  %v3645_v60 = vmul.f32 %v3643_v49, %v3633_v58  ;;  %v3717_v56 = vadd.f32 1.0, %v5070_v39 }
 0x315   : > { %2787 = vst.msk [vmem:[%s5935_s18 + $0x2e0] sm:$0xff] %vm1410_vm9, %v2722_v62  ;;  %v2725_v46 = vsel %vm1344_vm11, %v2597_v55, %v2693_v38  ;;  %v4155_v50 = vadd.f32 -0.5, %v2499_v28  ;;  %v2627_v17 = vmul.f32 %v2499_v28, %v2499_v28  ;;  %v3718_v26 = vadd.f32 1.0, %v5072_v13 }
 0x316   : > { %2790 = vst.msk [vmem:[%s5935_s18 + $0x2f8] sm:$0xff] %vm1410_vm9, %v2725_v46  ;;  %v3641_v1 = vmul.f32 8.0, %v3639_v52  ;;  %v3647_v32 = vsel %vm1345_vm10, %v3645_v60, %v5066_v53  ;;  %5073 = vrcp.f32 %v3717_v56  ;;  %v3722_v16 = vsel %vm1148_vm8, 373.0, %v3721_v21 }
 0x317   : > { %v2563_v61 = vadd.f32 %v4155_v50, %v8556_v57  ;;  %v2659_v2 = vmul.f32 %v2627_v17, %v6987_v54  ;;  %5075 = vrcp.f32 %v3718_v26 }
 0x318   : > { %v3649_v15 = vsel %vm1344_vm11, %v3641_v1, %v3647_v32 }
 0x319   : > { %3654 = vst.msk [vmem:[%s5935_s18 + $0x3d8] sm:$0xff] %vm1410_vm9, %v3649_v15  ;;  %v2595_v43 = vmul.f32 2.0, %v2563_v61  ;;  %v2691_v20 = vsel %vm1345_vm10, %v2659_v2, %v5068_v0 }
 0x31b   : > { %v2723_v24 = vsel %vm1344_vm11, %v2595_v43, %v2691_v20 }
 0x31c   : > { %2788 = vst.msk [vmem:[%s5935_s18 + $0x2e8] sm:$0xff] %vm1410_vm9, %v2723_v24 }
 0x320   : > { %v5074_v54 = vpop.eup %5073 }
 0x321   : > { %v5076_v34 = vpop.eup %5075  ;;  %v3723_v11 = vmul.f32 2.0, %v5074_v54 }
 0x322   : > { %v3724_v3 = vmul.f32 2.0, %v5076_v34 }
 0x323   : > { %v4273_v44 = vadd.f32 -0.5, %v3723_v11  ;;  %v3731_v8 = vmul.f32 %v3723_v11, %v3723_v11 }
 0x324   : > { %v4274_v58 = vadd.f32 -0.5, %v3724_v3  ;;  %v3732_v4 = vmul.f32 %v3724_v3, %v3724_v3 }
 0x325   : > { %v3727_v53 = vadd.f32 %v4273_v44, %v8111_v14  ;;  %v3733_v35 = vmul.f32 %v3731_v8, %v3722_v16 }
 0x326   : > { %v3728_v27 = vadd.f32 %v4274_v58, %v8119_v29  ;;  %v3734_v6 = vmul.f32 %v3732_v4, %v3722_v16 }
 0x327   : > { %v3729_v47 = vmul.f32 8.0, %v3727_v53  ;;  %v3735_v25 = vsel %vm1345_vm10, %v3733_v35, %v5074_v54 }
 0x328   : > { %v3730_v23 = vmul.f32 8.0, %v3728_v27  ;;  %v3736_v22 = vsel %vm1345_vm10, %v3734_v6, %v5076_v34 }
 0x329   : > { %v3737_v48 = vsel %vm1344_vm11, %v3729_v47, %v3735_v25 }
 0x32a   : > { %3742 = vst.msk [vmem:[%s5935_s18 + $0x3e0] sm:$0xff] %vm1410_vm9, %v3737_v48  ;;  %v3738_v14 = vsel %vm1344_vm11, %v3730_v23, %v3736_v22 }
 0x32b   : > { %3743 = vst.msk [vmem:[%s5935_s18 + $0x3e8] sm:$0xff] %vm1410_vm9, %v3738_v14 }
 0x32c PF: > { %p4535_p5 = scmp.ge.s32.totalorder %s5177_s24, 2  ;;  %s3818_s13 = sand.u32 1, %s5165_s21  }
 0x32d   : > { %s3819_s19 = scalar_lea.sflag [#allocation3], %s3818_s13 }
 0x32e   : > { %p4529_p7 = pnand %p4535_p5, %p5293_p6 }
 0x330   : > { %5156 = dma.done.wait (!%p4529_p7), %s3819_s19, 3072  }
 0x331   : > { %5158 = vsyncadd (!%p4529_p7), %s3819_s19, 4294964224  ;;  %s3828_s2 = scalar_lea.sflag [#allocation5], %s3818_s13 }
 0x332   : > { %5160 = dma.done.wait (!%p4529_p7), %s3828_s2, 768  }
 0x333   : > { %5162 = vsyncadd (!%p4529_p7), %s3828_s2, 4294966528  ;;  %p26_p8 = scmp.ge.s32.totalorder %s5276_s27, 4   ;;  %s8557_s21 = smov %s5169_s22 }
 0x334   : > { %s8558_s22 = smov %s5173_s23  ;;  %s8559_s23 = smov %s5287_s30 }
 0x335   : > { %s8560_s24 = smov %s5276_s27  ;;  %28 = sbr.rel (!%p26_p8) target bundleno = 10 (0xa), region = 156 }
 0x33c   :  { %3841 = vsyncpa [#allocation3], 1 }
 0x33d   :  { %3843 = vsyncpa [#allocation3 + $0x1], 1 }
 0x33e   :  { %3844 = vsyncpa [#allocation5], 1 }
 0x33f   :  { %3846 = vsyncpa [#allocation5 + $0x1], 1 }

</bundles_post_ra>
